<compile_context>
chip_gen: v5e
topology: v5e:2x2
jax: 0.10.0
libtpu: 0.0.40
codegen_flags: <defaults>
</compile_context>

<pallas_src>
import functools

import jax
import jax.numpy as jnp
from jax import lax
from jax.experimental import pallas as pl
from jax.experimental.pallas import tpu as pltpu


# 3x3 taps in (ky, kx) row-major order, expressed as offsets from the output pixel.
_TAPS = tuple((dy, dx) for dy in (-1, 0, 1) for dx in (-1, 0, 1))


def _refinenet_block_kernel(
    x_ref,                                   # (1, C, HW)          f32
    rcu1_w1_ref, rcu1_w2_ref,                # (c_hr, 9C), (9C, c_hr)    bf16
    rcu2_w1_ref, rcu2_w2_ref,                # (c_hr, 9C), (9C, c_hr)    bf16
    crp_w1_ref, crp_w2_ref,                  # (C, 9C), (C, 9C)          bf16
    out_w1_ref, out_w2_ref,                  # (c_out, 9C), (9C, c_out)  bf16
    o_ref,                                   # (1, C, HW)          f32
    pcol_ref,                                # (9C, HW)            bf16  scratch
    hbf_ref,                                 # (max(c_hr,c_out), HW) bf16 scratch
    shpad_ref,                               # (9C, HW + 2*pad)    f32   scratch
    *, H, W, C, c_hr, c_out, pad,
):
    HW = H * W
    f32 = jnp.float32

    # ---- hoisted lane-index helpers for the shift masks (iota + compares only) ----
    pix = lax.broadcasted_iota(jnp.int32, (C, HW), 1)        # flattened pixel index
    if W & (W - 1) == 0:
        px = jnp.bitwise_and(pix, W - 1)                     # x = p % W (W power of 2)
    else:
        # TODO(synk): non-power-of-two W relies on vector remainder lowering.
        px = pix % W

    def shift_mask(dy, dx):
        # Validity of the source pixel (y+dy, x+dx) seen from output pixel p.
        # y-conditions are expressed directly on the flat index (no division).
        conds = []
        if dy > 0:
            conds.append(pix < (H - dy) * W)
        if dy < 0:
            conds.append(pix >= (-dy) * W)
        if dx > 0:
            conds.append(px < (W - dx))
        if dx < 0:
            conds.append(px >= (-dx))
        if not conds:
            return None
        m = conds[0]
        for c in conds[1:]:
            m = jnp.logical_and(m, c)
        return m

    def stage(rows, a):
        # Put `a` ((rows, HW) f32) into the interior lanes of the shift scratch.
        # The pad columns are never initialised: every read of them is masked.
        shpad_ref[0:rows, pad:pad + HW] = a

    def shifted(row0, dy, dx, fill):
        # (C, HW) window of the staged data shifted by (dy, dx); invalid source
        # pixels (image border / lane padding) are replaced by `fill`.
        s = dy * W + dx
        win = shpad_ref[row0:row0 + C, pad + s:pad + s + HW]
        m = shift_mask(dy, dx)
        return win if m is None else jnp.where(m, win, fill)

    def build_pcol(a):
        # im2col in (9*C, HW) layout: taps along sublanes, pixels lane-dense.
        stage(C, a)
        for t, (dy, dx) in enumerate(_TAPS):
            v = a if (dy == 0 and dx == 0) else shifted(0, dy, dx, 0.0)
            pcol_ref[t * C:(t + 1) * C, :] = v.astype(jnp.bfloat16)

    def conv_small_cin(wp_ref):
        # (Cout, 9C) @ (9C, HW) -> (Cout, HW) f32 : one MXU matmul, K = 9*C.
        return jnp.dot(wp_ref[...], pcol_ref[...], preferred_element_type=f32)

    def maxpool5(a):
        # Separable 5x5 / stride 1 / pad 2 max pool on (C, HW), -inf padding.
        stage(C, a)
        r = a
        for dx in (-2, -1, 1, 2):
            r = jnp.maximum(r, shifted(0, 0, dx, -jnp.inf))
        stage(C, r)
        c = r
        for dy in (-2, -1, 1, 2):
            c = jnp.maximum(c, shifted(0, dy, 0, -jnp.inf))
        return c

    def rcu(a, w1_ref, w2_ref, c_mid):
        # a + Conv3x3(ReLU(Conv3x3(ReLU(a)))),  channels C -> c_mid -> C.
        build_pcol(jnp.maximum(a, 0.0))

        # conv1 (Cin=C, Cout=c_mid): chunked over output channels so the
        # ReLU + bf16 epilogue is fused right behind the matmul (no full
        # (c_mid, HW) f32 round trip), written straight into conv2's operand.
        step = min(c_mid, 128)
        for c0 in range(0, c_mid, step):
            cs = min(step, c_mid - c0)
            part = jnp.dot(w1_ref[c0:c0 + cs, :], pcol_ref[...],
                           preferred_element_type=f32)           # (cs, HW) f32
            hbf_ref[c0:c0 + cs, :] = jnp.maximum(part, 0.0).astype(jnp.bfloat16)

        # conv2 (Cin=c_mid, Cout=C): ONE (9C, c_mid) @ (c_mid, HW) matmul, then
        # the 9 per-tap (C, HW) slices are lane-shifted + masked + accumulated
        # into a lane-dense 2-vreg f32 accumulator.
        # NOTE: hbf_ref rows [c_mid:] may hold stale data from a previous RCU;
        # only rows [:c_mid] are read here.
        y = jnp.dot(w2_ref[...], hbf_ref[0:c_mid, :],
                    preferred_element_type=f32)                  # (9C, HW) f32
        stage(9 * C, y)
        d = jnp.zeros((C, HW), f32)
        for t, (dy, dx) in enumerate(_TAPS):
            d = d + shifted(t * C, dy, dx, 0.0)
        return a + d

    # ------------------------------ forward pass ------------------------------ #
    x = x_ref[0]                                                  # (C, HW) f32

    # hr_2RCU (conv_channels = 512 since idx == 4)
    x = rcu(x, rcu1_w1_ref, rcu1_w2_ref, c_hr)
    x = rcu(x, rcu2_w1_ref, rcu2_w2_ref, c_hr)

    # layer_CRP (N = 2 chained MaxPool5x5 -> Conv3x3 stages, accumulated)
    r = jnp.maximum(x, 0.0)
    build_pcol(maxpool5(r))
    f = conv_small_cin(crp_w1_ref)
    r = r + f
    build_pcol(maxpool5(f))
    f = conv_small_cin(crp_w2_ref)
    r = r + f

    # conv_out: single RCU with conv_channels = 256 (idx != 1)
    r = rcu(r, out_w1_ref, out_w2_ref, c_out)

    # lane-dense store, no transpose
    o_ref[0] = r.astype(o_ref.dtype)


# ------------------------------ weight packing ------------------------------ #

def _pack_w_in(w):
    # HWIO (3,3,cin,cout) -> (cout, 9*cin) bf16 ; column index = (3*ky+kx)*cin + ci.
    kh, kw, cin, cout = w.shape
    return jnp.transpose(w, (3, 0, 1, 2)).reshape(cout, kh * kw * cin).astype(jnp.bfloat16)


def _pack_w_out(w):
    # HWIO (3,3,cin,cout) -> (9*cout, cin) bf16 ; row index = (3*ky+kx)*cout + co.
    kh, kw, cin, cout = w.shape
    return jnp.transpose(w, (0, 1, 3, 2)).reshape(kh * kw * cout, cin).astype(jnp.bfloat16)


# --------------------------------- wrapper ---------------------------------- #

def refinenet_block_idx4(hr_nchw, params):
    N, C, H, W = hr_nchw.shape
    HW = H * W
    x2d = hr_nchw.reshape(N, C, HW)                    # lane-dense (C, H*W) per image

    w = {
        "rcu1_w1": _pack_w_in(params["rcu1_w1"]),
        "rcu1_w2": _pack_w_out(params["rcu1_w2"]),
        "rcu2_w1": _pack_w_in(params["rcu2_w1"]),
        "rcu2_w2": _pack_w_out(params["rcu2_w2"]),
        "crp_w1": _pack_w_in(params["crp_w1"]),
        "crp_w2": _pack_w_in(params["crp_w2"]),
        "out_w1": _pack_w_in(params["out_w1"]),
        "out_w2": _pack_w_out(params["out_w2"]),
    }
    c_hr = w["rcu1_w1"].shape[0]
    c_out = w["out_w1"].shape[0]
    # lane padding of the shift-staging buffer: >= 2*W (pool dy=+-2), 128-aligned
    # so the interior store is a full unmasked lane window.
    pad = ((2 * W + 127) // 128) * 128

    kernel = functools.partial(_refinenet_block_kernel,
                               H=H, W=W, C=C, c_hr=c_hr, c_out=c_out, pad=pad)

    def wspec(shape):
        return pl.BlockSpec(shape, lambda n: (0, 0))

    out2d = pl.pallas_call(
        kernel,
        out_shape=jax.ShapeDtypeStruct((N, C, HW), hr_nchw.dtype),
        grid_spec=pltpu.PrefetchScalarGridSpec(
            num_scalar_prefetch=0,
            grid=(N,),
            in_specs=[
                pl.BlockSpec((1, C, HW), lambda n: (n, 0, 0)),
                wspec(w["rcu1_w1"].shape), wspec(w["rcu1_w2"].shape),
                wspec(w["rcu2_w1"].shape), wspec(w["rcu2_w2"].shape),
                wspec(w["crp_w1"].shape), wspec(w["crp_w2"].shape),
                wspec(w["out_w1"].shape), wspec(w["out_w2"].shape),
            ],
            out_specs=pl.BlockSpec((1, C, HW), lambda n: (n, 0, 0)),
            scratch_shapes=[
                pltpu.VMEM((9 * C, HW), jnp.bfloat16),               # im2col (taps x pixels)
                pltpu.VMEM((max(c_hr, c_out), HW), jnp.bfloat16),    # relu(conv1) bf16 operand
                pltpu.VMEM((9 * C, HW + 2 * pad), jnp.float32),      # lane-shift staging buffer
            ],
        ),
        compiler_params=pltpu.CompilerParams(
            dimension_semantics=("parallel",),
        ),
    )(x2d, w["rcu1_w1"], w["rcu1_w2"], w["rcu2_w1"], w["rcu2_w2"],
      w["crp_w1"], w["crp_w2"], w["out_w1"], w["out_w2"])

    return out2d.reshape(N, C, H, W)


# ---------------------------- pure-JAX reference ---------------------------- #

def _reference_forward(x_nchw, params):
    dn = ("NCHW", "HWIO", "NCHW")

    def conv(a, w):
        return lax.conv_general_dilated(a, w, (1, 1), "SAME", dimension_numbers=dn)

    def relu(a):
        return jnp.maximum(a, 0.0)

    def rcu(a, w1, w2):
        return a + conv(relu(conv(relu(a), w1)), w2)

    def pool5(a):
        return lax.reduce_window(a, -jnp.inf, lax.max, (1, 1, 5, 5), (1, 1, 1, 1),
                                 ((0, 0), (0, 0), (2, 2), (2, 2)))

    x = rcu(x_nchw, params["rcu1_w1"], params["rcu1_w2"])
    x = rcu(x, params["rcu2_w1"], params["rcu2_w2"])
    r = relu(x)
    f = conv(pool5(r), params["crp_w1"])
    r = r + f
    f = conv(pool5(f), params["crp_w2"])
    r = r + f
    return rcu(r, params["out_w1"], params["out_w2"])


if __name__ == "__main__":
    key = jax.random.PRNGKey(0)
    N, C, H, W = 2, 8, 16, 16          # hr_in_channels = 8
    CONV_HR = 512                      # 512 because idx == 4
    CONV_OUT = 256

    keys = jax.random.split(key, 9)

    def make_w(k, cin, cout):
        # deterministic, kaiming-ish scaled weights, HWIO layout
        scale = 1.0 / (3 * 3 * cin) ** 0.5
        return jax.random.normal(k, (3, 3, cin, cout), jnp.float32) * scale

    params = {
        "rcu1_w1": make_w(keys[0], C, CONV_HR),
        "rcu1_w2": make_w(keys[1], CONV_HR, C),
        "rcu2_w1": make_w(keys[2], C, CONV_HR),
        "rcu2_w2": make_w(keys[3], CONV_HR, C),
        "crp_w1": make_w(keys[4], C, C),
        "crp_w2": make_w(keys[5], C, C),
        "out_w1": make_w(keys[6], C, CONV_OUT),
        "out_w2": make_w(keys[7], CONV_OUT, C),
    }

    hr_feature = jax.random.normal(keys[8], (N, C, H, W), jnp.float32)

    out = jax.jit(refinenet_block_idx4)(hr_feature, params)
    jax.block_until_ready(out)
    assert out.shape == (N, C, H, W) and out.dtype == jnp.float32
    assert bool(jnp.all(jnp.isfinite(out)))

    # Loose correctness check vs. a pure-JAX f32 reference (kernel uses bf16 MXU
    # operands with f32 accumulation, so expect ~1% relative difference).
    ref = jax.jit(_reference_forward)(hr_feature, params)
    jax.block_until_ready(ref)
    rel_err = jnp.sqrt(jnp.sum((out - ref) ** 2)) / jnp.sqrt(jnp.sum(ref ** 2))
    assert float(rel_err) < 0.05, f"relative error too large: {float(rel_err)}"

    print("KERNEL_OK")
</pallas_src>

<mosaic_0001>
module attributes {stable_mosaic.version = 11 : i64} {
  func.func @_refinenet_block_kernel(%arg0: i32, %arg1: memref<1x8x256xf32, #tpu.memory_space<vmem>>, %arg2: memref<512x72xbf16, #tpu.memory_space<vmem>>, %arg3: memref<72x512xbf16, #tpu.memory_space<vmem>>, %arg4: memref<512x72xbf16, #tpu.memory_space<vmem>>, %arg5: memref<72x512xbf16, #tpu.memory_space<vmem>>, %arg6: memref<8x72xbf16, #tpu.memory_space<vmem>>, %arg7: memref<8x72xbf16, #tpu.memory_space<vmem>>, %arg8: memref<256x72xbf16, #tpu.memory_space<vmem>>, %arg9: memref<72x256xbf16, #tpu.memory_space<vmem>>, %arg10: memref<1x8x256xf32, #tpu.memory_space<vmem>>, %arg11: memref<72x256xbf16, #tpu.memory_space<vmem>>, %arg12: memref<512x256xbf16, #tpu.memory_space<vmem>>, %arg13: memref<72x512xf32, #tpu.memory_space<vmem>>) attributes {dimension_semantics = [#tpu.dimension_semantics<parallel>], iteration_bounds = array<i64: 2>, scalar_prefetch = 0 : i64, scratch_operands = 3 : i64, tpu.core_type = #tpu.core_type<tc>, window_params = [{transform_indices = @transform_0, window_bounds = array<i64: 1, 8, 256>}, {pipeline_mode = #tpu.pipeline_mode<synchronous>, transform_indices = @transform_1, window_bounds = array<i64: 512, 72>}, {pipeline_mode = #tpu.pipeline_mode<synchronous>, transform_indices = @transform_2, window_bounds = array<i64: 72, 512>}, {pipeline_mode = #tpu.pipeline_mode<synchronous>, transform_indices = @transform_3, window_bounds = array<i64: 512, 72>}, {pipeline_mode = #tpu.pipeline_mode<synchronous>, transform_indices = @transform_4, window_bounds = array<i64: 72, 512>}, {pipeline_mode = #tpu.pipeline_mode<synchronous>, transform_indices = @transform_5, window_bounds = array<i64: 8, 72>}, {pipeline_mode = #tpu.pipeline_mode<synchronous>, transform_indices = @transform_6, window_bounds = array<i64: 8, 72>}, {pipeline_mode = #tpu.pipeline_mode<synchronous>, transform_indices = @transform_7, window_bounds = array<i64: 256, 72>}, {pipeline_mode = #tpu.pipeline_mode<synchronous>, transform_indices = @transform_8, window_bounds = array<i64: 72, 256>}, {transform_indices = @transform_9, window_bounds = array<i64: 1, 8, 256>}]} {
    %0 = tpu.iota {dimensions = array<i32: 1>} : vector<8x256xi32>
    %c15_i32 = arith.constant 15 : i32
    %1 = vector.broadcast %c15_i32 : i32 to vector<8x256xi32>
    %2 = arith.andi %0, %1 : vector<8x256xi32>
    %c0 = arith.constant 0 : index
    %c0_0 = arith.constant 0 : index
    %c0_1 = arith.constant 0 : index
    %3 = vector.load %arg1[%c0, %c0_0, %c0_1] : memref<1x8x256xf32, #tpu.memory_space<vmem>>, vector<1x8x256xf32>
    %4 = vector.shape_cast %3 : vector<1x8x256xf32> to vector<8x256xf32>
    %cst = arith.constant 0.000000e+00 : f32
    %5 = vector.broadcast %cst : f32 to vector<8x256xf32>
    %6 = arith.maximumf %4, %5 : vector<8x256xf32>
    %c0_2 = arith.constant 0 : index
    %c128 = arith.constant 128 : index
    %7 = vector.load %arg13[%c0_2, %c128] : memref<72x512xf32, #tpu.memory_space<vmem>>, vector<8x256xf32>
    tpu.vector_store %arg13[%c0_2, %c128], %6 {strides = array<i32>} : memref<72x512xf32, #tpu.memory_space<vmem>>, vector<8x256xf32>,
    %c0_3 = arith.constant 0 : index
    %c111 = arith.constant 111 : index
    %8 = vector.load %arg13[%c0_3, %c111] : memref<72x512xf32, #tpu.memory_space<vmem>>, vector<8x256xf32>
    %c16_i32 = arith.constant 16 : i32
    %9 = vector.broadcast %c16_i32 : i32 to vector<8x256xi32>
    %10 = arith.cmpi sge, %0, %9 : vector<8x256xi32>
    %c1_i32 = arith.constant 1 : i32
    %11 = vector.broadcast %c1_i32 : i32 to vector<8x256xi32>
    %12 = arith.cmpi sge, %2, %11 : vector<8x256xi32>
    %13 = arith.andi %10, %12 : vector<8x256xi1>
    %cst_4 = arith.constant 0.000000e+00 : f32
    %14 = vector.broadcast %cst_4 : f32 to vector<8x256xf32>
    %15 = arith.select %13, %8, %14 : vector<8x256xi1>, vector<8x256xf32>
    %16 = arith.truncf %15 : vector<8x256xf32> to vector<8x256xbf16>
    %c0_5 = arith.constant 0 : index
    %c0_6 = arith.constant 0 : index
    %17 = vector.load %arg11[%c0_5, %c0_6] : memref<72x256xbf16, #tpu.memory_space<vmem>>, vector<8x256xbf16>
    tpu.vector_store %arg11[%c0_5, %c0_6], %16 {strides = array<i32>} : memref<72x256xbf16, #tpu.memory_space<vmem>>, vector<8x256xbf16>,
    %c0_7 = arith.constant 0 : index
    %c112 = arith.constant 112 : index
    %18 = vector.load %arg13[%c0_7, %c112] : memref<72x512xf32, #tpu.memory_space<vmem>>, vector<8x256xf32>
    %c16_i32_8 = arith.constant 16 : i32
    %19 = vector.broadcast %c16_i32_8 : i32 to vector<8x256xi32>
    %20 = arith.cmpi sge, %0, %19 : vector<8x256xi32>
    %cst_9 = arith.constant 0.000000e+00 : f32
    %21 = vector.broadcast %cst_9 : f32 to vector<8x256xf32>
    %22 = arith.select %20, %18, %21 : vector<8x256xi1>, vector<8x256xf32>
    %23 = arith.truncf %22 : vector<8x256xf32> to vector<8x256xbf16>
    %c8 = arith.constant 8 : index
    %c0_10 = arith.constant 0 : index
    %24 = vector.load %arg11[%c8, %c0_10] : memref<72x256xbf16, #tpu.memory_space<vmem>>, vector<8x256xbf16>
    tpu.vector_store %arg11[%c8, %c0_10], %23 {strides = array<i32>} : memref<72x256xbf16, #tpu.memory_space<vmem>>, vector<8x256xbf16>,
    %c0_11 = arith.constant 0 : index
    %c113 = arith.constant 113 : index
    %25 = vector.load %arg13[%c0_11, %c113] : memref<72x512xf32, #tpu.memory_space<vmem>>, vector<8x256xf32>
    %c16_i32_12 = arith.constant 16 : i32
    %26 = vector.broadcast %c16_i32_12 : i32 to vector<8x256xi32>
    %27 = arith.cmpi sge, %0, %26 : vector<8x256xi32>
    %c15_i32_13 = arith.constant 15 : i32
    %28 = vector.broadcast %c15_i32_13 : i32 to vector<8x256xi32>
    %29 = arith.cmpi slt, %2, %28 : vector<8x256xi32>
    %30 = arith.andi %27, %29 : vector<8x256xi1>
    %cst_14 = arith.constant 0.000000e+00 : f32
    %31 = vector.broadcast %cst_14 : f32 to vector<8x256xf32>
    %32 = arith.select %30, %25, %31 : vector<8x256xi1>, vector<8x256xf32>
    %33 = arith.truncf %32 : vector<8x256xf32> to vector<8x256xbf16>
    %c16 = arith.constant 16 : index
    %c0_15 = arith.constant 0 : index
    %34 = vector.load %arg11[%c16, %c0_15] : memref<72x256xbf16, #tpu.memory_space<vmem>>, vector<8x256xbf16>
    tpu.vector_store %arg11[%c16, %c0_15], %33 {strides = array<i32>} : memref<72x256xbf16, #tpu.memory_space<vmem>>, vector<8x256xbf16>,
    %c0_16 = arith.constant 0 : index
    %c127 = arith.constant 127 : index
    %35 = vector.load %arg13[%c0_16, %c127] : memref<72x512xf32, #tpu.memory_space<vmem>>, vector<8x256xf32>
    %c1_i32_17 = arith.constant 1 : i32
    %36 = vector.broadcast %c1_i32_17 : i32 to vector<8x256xi32>
    %37 = arith.cmpi sge, %2, %36 : vector<8x256xi32>
    %cst_18 = arith.constant 0.000000e+00 : f32
    %38 = vector.broadcast %cst_18 : f32 to vector<8x256xf32>
    %39 = arith.select %37, %35, %38 : vector<8x256xi1>, vector<8x256xf32>
    %40 = arith.truncf %39 : vector<8x256xf32> to vector<8x256xbf16>
    %c24 = arith.constant 24 : index
    %c0_19 = arith.constant 0 : index
    %41 = vector.load %arg11[%c24, %c0_19] : memref<72x256xbf16, #tpu.memory_space<vmem>>, vector<8x256xbf16>
    tpu.vector_store %arg11[%c24, %c0_19], %40 {strides = array<i32>} : memref<72x256xbf16, #tpu.memory_space<vmem>>, vector<8x256xbf16>,
    %42 = arith.truncf %6 : vector<8x256xf32> to vector<8x256xbf16>
    %c32 = arith.constant 32 : index
    %c0_20 = arith.constant 0 : index
    %43 = vector.load %arg11[%c32, %c0_20] : memref<72x256xbf16, #tpu.memory_space<vmem>>, vector<8x256xbf16>
    tpu.vector_store %arg11[%c32, %c0_20], %42 {strides = array<i32>} : memref<72x256xbf16, #tpu.memory_space<vmem>>, vector<8x256xbf16>,
    %c0_21 = arith.constant 0 : index
    %c129 = arith.constant 129 : index
    %44 = vector.load %arg13[%c0_21, %c129] : memref<72x512xf32, #tpu.memory_space<vmem>>, vector<8x256xf32>
    %c15_i32_22 = arith.constant 15 : i32
    %45 = vector.broadcast %c15_i32_22 : i32 to vector<8x256xi32>
    %46 = arith.cmpi slt, %2, %45 : vector<8x256xi32>
    %cst_23 = arith.constant 0.000000e+00 : f32
    %47 = vector.broadcast %cst_23 : f32 to vector<8x256xf32>
    %48 = arith.select %46, %44, %47 : vector<8x256xi1>, vector<8x256xf32>
    %49 = arith.truncf %48 : vector<8x256xf32> to vector<8x256xbf16>
    %c40 = arith.constant 40 : index
    %c0_24 = arith.constant 0 : index
    %50 = vector.load %arg11[%c40, %c0_24] : memref<72x256xbf16, #tpu.memory_space<vmem>>, vector<8x256xbf16>
    tpu.vector_store %arg11[%c40, %c0_24], %49 {strides = array<i32>} : memref<72x256xbf16, #tpu.memory_space<vmem>>, vector<8x256xbf16>,
    %c0_25 = arith.constant 0 : index
    %c143 = arith.constant 143 : index
    %51 = vector.load %arg13[%c0_25, %c143] : memref<72x512xf32, #tpu.memory_space<vmem>>, vector<8x256xf32>
    %c240_i32 = arith.constant 240 : i32
    %52 = vector.broadcast %c240_i32 : i32 to vector<8x256xi32>
    %53 = arith.cmpi slt, %0, %52 : vector<8x256xi32>
    %c1_i32_26 = arith.constant 1 : i32
    %54 = vector.broadcast %c1_i32_26 : i32 to vector<8x256xi32>
    %55 = arith.cmpi sge, %2, %54 : vector<8x256xi32>
    %56 = arith.andi %53, %55 : vector<8x256xi1>
    %cst_27 = arith.constant 0.000000e+00 : f32
    %57 = vector.broadcast %cst_27 : f32 to vector<8x256xf32>
    %58 = arith.select %56, %51, %57 : vector<8x256xi1>, vector<8x256xf32>
    %59 = arith.truncf %58 : vector<8x256xf32> to vector<8x256xbf16>
    %c48 = arith.constant 48 : index
    %c0_28 = arith.constant 0 : index
    %60 = vector.load %arg11[%c48, %c0_28] : memref<72x256xbf16, #tpu.memory_space<vmem>>, vector<8x256xbf16>
    tpu.vector_store %arg11[%c48, %c0_28], %59 {strides = array<i32>} : memref<72x256xbf16, #tpu.memory_space<vmem>>, vector<8x256xbf16>,
    %c0_29 = arith.constant 0 : index
    %c144 = arith.constant 144 : index
    %61 = vector.load %arg13[%c0_29, %c144] : memref<72x512xf32, #tpu.memory_space<vmem>>, vector<8x256xf32>
    %c240_i32_30 = arith.constant 240 : i32
    %62 = vector.broadcast %c240_i32_30 : i32 to vector<8x256xi32>
    %63 = arith.cmpi slt, %0, %62 : vector<8x256xi32>
    %cst_31 = arith.constant 0.000000e+00 : f32
    %64 = vector.broadcast %cst_31 : f32 to vector<8x256xf32>
    %65 = arith.select %63, %61, %64 : vector<8x256xi1>, vector<8x256xf32>
    %66 = arith.truncf %65 : vector<8x256xf32> to vector<8x256xbf16>
    %c56 = arith.constant 56 : index
    %c0_32 = arith.constant 0 : index
    %67 = vector.load %arg11[%c56, %c0_32] : memref<72x256xbf16, #tpu.memory_space<vmem>>, vector<8x256xbf16>
    tpu.vector_store %arg11[%c56, %c0_32], %66 {strides = array<i32>} : memref<72x256xbf16, #tpu.memory_space<vmem>>, vector<8x256xbf16>,
    %c0_33 = arith.constant 0 : index
    %c145 = arith.constant 145 : index
    %68 = vector.load %arg13[%c0_33, %c145] : memref<72x512xf32, #tpu.memory_space<vmem>>, vector<8x256xf32>
    %c240_i32_34 = arith.constant 240 : i32
    %69 = vector.broadcast %c240_i32_34 : i32 to vector<8x256xi32>
    %70 = arith.cmpi slt, %0, %69 : vector<8x256xi32>
    %c15_i32_35 = arith.constant 15 : i32
    %71 = vector.broadcast %c15_i32_35 : i32 to vector<8x256xi32>
    %72 = arith.cmpi slt, %2, %71 : vector<8x256xi32>
    %73 = arith.andi %70, %72 : vector<8x256xi1>
    %cst_36 = arith.constant 0.000000e+00 : f32
    %74 = vector.broadcast %cst_36 : f32 to vector<8x256xf32>
    %75 = arith.select %73, %68, %74 : vector<8x256xi1>, vector<8x256xf32>
    %76 = arith.truncf %75 : vector<8x256xf32> to vector<8x256xbf16>
    %c64 = arith.constant 64 : index
    %c0_37 = arith.constant 0 : index
    %77 = vector.load %arg11[%c64, %c0_37] : memref<72x256xbf16, #tpu.memory_space<vmem>>, vector<8x256xbf16>
    tpu.vector_store %arg11[%c64, %c0_37], %76 {strides = array<i32>} : memref<72x256xbf16, #tpu.memory_space<vmem>>, vector<8x256xbf16>,
    %c0_38 = arith.constant 0 : index
    %c0_39 = arith.constant 0 : index
    %78 = vector.load %arg2[%c0_38, %c0_39] : memref<512x72xbf16, #tpu.memory_space<vmem>>, vector<128x72xbf16>
    %c0_40 = arith.constant 0 : index
    %c0_41 = arith.constant 0 : index
    %79 = vector.load %arg11[%c0_40, %c0_41] : memref<72x256xbf16, #tpu.memory_space<vmem>>, vector<72x256xbf16>
    %cst_42 = arith.constant dense<0.000000e+00> : vector<128x256xf32>
    %80 = tpu.matmul %78, %79, %cst_42 {dimension_numbers = #tpu.dot_dimension_numbers<[1], [0], [0], [1], [0, 0, 1, 1], [], []>} : vector<128x72xbf16>, vector<72x256xbf16>, vector<128x256xf32> -> vector<128x256xf32>
    %cst_43 = arith.constant 0.000000e+00 : f32
    %81 = vector.broadcast %cst_43 : f32 to vector<128x256xf32>
    %82 = arith.maximumf %80, %81 : vector<128x256xf32>
    %83 = arith.truncf %82 : vector<128x256xf32> to vector<128x256xbf16>
    %c0_44 = arith.constant 0 : index
    %c0_45 = arith.constant 0 : index
    %84 = vector.load %arg12[%c0_44, %c0_45] : memref<512x256xbf16, #tpu.memory_space<vmem>>, vector<128x256xbf16>
    tpu.vector_store %arg12[%c0_44, %c0_45], %83 {strides = array<i32>} : memref<512x256xbf16, #tpu.memory_space<vmem>>, vector<128x256xbf16>,
    %c128_46 = arith.constant 128 : index
    %c0_47 = arith.constant 0 : index
    %85 = vector.load %arg2[%c128_46, %c0_47] : memref<512x72xbf16, #tpu.memory_space<vmem>>, vector<128x72xbf16>
    %c0_48 = arith.constant 0 : index
    %c0_49 = arith.constant 0 : index
    %86 = vector.load %arg11[%c0_48, %c0_49] : memref<72x256xbf16, #tpu.memory_space<vmem>>, vector<72x256xbf16>
    %cst_50 = arith.constant dense<0.000000e+00> : vector<128x256xf32>
    %87 = tpu.matmul %85, %86, %cst_50 {dimension_numbers = #tpu.dot_dimension_numbers<[1], [0], [0], [1], [0, 0, 1, 1], [], []>} : vector<128x72xbf16>, vector<72x256xbf16>, vector<128x256xf32> -> vector<128x256xf32>
    %cst_51 = arith.constant 0.000000e+00 : f32
    %88 = vector.broadcast %cst_51 : f32 to vector<128x256xf32>
    %89 = arith.maximumf %87, %88 : vector<128x256xf32>
    %90 = arith.truncf %89 : vector<128x256xf32> to vector<128x256xbf16>
    %c128_52 = arith.constant 128 : index
    %c0_53 = arith.constant 0 : index
    %91 = vector.load %arg12[%c128_52, %c0_53] : memref<512x256xbf16, #tpu.memory_space<vmem>>, vector<128x256xbf16>
    tpu.vector_store %arg12[%c128_52, %c0_53], %90 {strides = array<i32>} : memref<512x256xbf16, #tpu.memory_space<vmem>>, vector<128x256xbf16>,
    %c256 = arith.constant 256 : index
    %c0_54 = arith.constant 0 : index
    %92 = vector.load %arg2[%c256, %c0_54] : memref<512x72xbf16, #tpu.memory_space<vmem>>, vector<128x72xbf16>
    %c0_55 = arith.constant 0 : index
    %c0_56 = arith.constant 0 : index
    %93 = vector.load %arg11[%c0_55, %c0_56] : memref<72x256xbf16, #tpu.memory_space<vmem>>, vector<72x256xbf16>
    %cst_57 = arith.constant dense<0.000000e+00> : vector<128x256xf32>
    %94 = tpu.matmul %92, %93, %cst_57 {dimension_numbers = #tpu.dot_dimension_numbers<[1], [0], [0], [1], [0, 0, 1, 1], [], []>} : vector<128x72xbf16>, vector<72x256xbf16>, vector<128x256xf32> -> vector<128x256xf32>
    %cst_58 = arith.constant 0.000000e+00 : f32
    %95 = vector.broadcast %cst_58 : f32 to vector<128x256xf32>
    %96 = arith.maximumf %94, %95 : vector<128x256xf32>
    %97 = arith.truncf %96 : vector<128x256xf32> to vector<128x256xbf16>
    %c256_59 = arith.constant 256 : index
    %c0_60 = arith.constant 0 : index
    %98 = vector.load %arg12[%c256_59, %c0_60] : memref<512x256xbf16, #tpu.memory_space<vmem>>, vector<128x256xbf16>
    tpu.vector_store %arg12[%c256_59, %c0_60], %97 {strides = array<i32>} : memref<512x256xbf16, #tpu.memory_space<vmem>>, vector<128x256xbf16>,
    %c384 = arith.constant 384 : index
    %c0_61 = arith.constant 0 : index
    %99 = vector.load %arg2[%c384, %c0_61] : memref<512x72xbf16, #tpu.memory_space<vmem>>, vector<128x72xbf16>
    %c0_62 = arith.constant 0 : index
    %c0_63 = arith.constant 0 : index
    %100 = vector.load %arg11[%c0_62, %c0_63] : memref<72x256xbf16, #tpu.memory_space<vmem>>, vector<72x256xbf16>
    %cst_64 = arith.constant dense<0.000000e+00> : vector<128x256xf32>
    %101 = tpu.matmul %99, %100, %cst_64 {dimension_numbers = #tpu.dot_dimension_numbers<[1], [0], [0], [1], [0, 0, 1, 1], [], []>} : vector<128x72xbf16>, vector<72x256xbf16>, vector<128x256xf32> -> vector<128x256xf32>
    %cst_65 = arith.constant 0.000000e+00 : f32
    %102 = vector.broadcast %cst_65 : f32 to vector<128x256xf32>
    %103 = arith.maximumf %101, %102 : vector<128x256xf32>
    %104 = arith.truncf %103 : vector<128x256xf32> to vector<128x256xbf16>
    %c384_66 = arith.constant 384 : index
    %c0_67 = arith.constant 0 : index
    %105 = vector.load %arg12[%c384_66, %c0_67] : memref<512x256xbf16, #tpu.memory_space<vmem>>, vector<128x256xbf16>
    tpu.vector_store %arg12[%c384_66, %c0_67], %104 {strides = array<i32>} : memref<512x256xbf16, #tpu.memory_space<vmem>>, vector<128x256xbf16>,
    %c0_68 = arith.constant 0 : index
    %c0_69 = arith.constant 0 : index
    %106 = vector.load %arg3[%c0_68, %c0_69] : memref<72x512xbf16, #tpu.memory_space<vmem>>, vector<72x512xbf16>
    %c0_70 = arith.constant 0 : index
    %c0_71 = arith.constant 0 : index
    %107 = vector.load %arg12[%c0_70, %c0_71] : memref<512x256xbf16, #tpu.memory_space<vmem>>, vector<512x256xbf16>
    %cst_72 = arith.constant dense<0.000000e+00> : vector<72x256xf32>
    %108 = tpu.matmul %106, %107, %cst_72 {dimension_numbers = #tpu.dot_dimension_numbers<[1], [0], [0], [1], [0, 0, 1, 1], [], []>} : vector<72x512xbf16>, vector<512x256xbf16>, vector<72x256xf32> -> vector<72x256xf32>
    %c0_73 = arith.constant 0 : index
    %c128_74 = arith.constant 128 : index
    %109 = vector.load %arg13[%c0_73, %c128_74] : memref<72x512xf32, #tpu.memory_space<vmem>>, vector<72x256xf32>
    tpu.vector_store %arg13[%c0_73, %c128_74], %108 {strides = array<i32>} : memref<72x512xf32, #tpu.memory_space<vmem>>, vector<72x256xf32>,
    %cst_75 = arith.constant 0.000000e+00 : f32
    %110 = vector.broadcast %cst_75 : f32 to vector<8x256xf32>
    %c0_76 = arith.constant 0 : index
    %c111_77 = arith.constant 111 : index
    %111 = vector.load %arg13[%c0_76, %c111_77] : memref<72x512xf32, #tpu.memory_space<vmem>>, vector<8x256xf32>
    %c16_i32_78 = arith.constant 16 : i32
    %112 = vector.broadcast %c16_i32_78 : i32 to vector<8x256xi32>
    %113 = arith.cmpi sge, %0, %112 : vector<8x256xi32>
    %c1_i32_79 = arith.constant 1 : i32
    %114 = vector.broadcast %c1_i32_79 : i32 to vector<8x256xi32>
    %115 = arith.cmpi sge, %2, %114 : vector<8x256xi32>
    %116 = arith.andi %113, %115 : vector<8x256xi1>
    %cst_80 = arith.constant 0.000000e+00 : f32
    %117 = vector.broadcast %cst_80 : f32 to vector<8x256xf32>
    %118 = arith.select %116, %111, %117 : vector<8x256xi1>, vector<8x256xf32>
    %119 = arith.addf %110, %118 : vector<8x256xf32>
    %c8_81 = arith.constant 8 : index
    %c112_82 = arith.constant 112 : index
    %120 = vector.load %arg13[%c8_81, %c112_82] : memref<72x512xf32, #tpu.memory_space<vmem>>, vector<8x256xf32>
    %c16_i32_83 = arith.constant 16 : i32
    %121 = vector.broadcast %c16_i32_83 : i32 to vector<8x256xi32>
    %122 = arith.cmpi sge, %0, %121 : vector<8x256xi32>
    %cst_84 = arith.constant 0.000000e+00 : f32
    %123 = vector.broadcast %cst_84 : f32 to vector<8x256xf32>
    %124 = arith.select %122, %120, %123 : vector<8x256xi1>, vector<8x256xf32>
    %125 = arith.addf %119, %124 : vector<8x256xf32>
    %c16_85 = arith.constant 16 : index
    %c113_86 = arith.constant 113 : index
    %126 = vector.load %arg13[%c16_85, %c113_86] : memref<72x512xf32, #tpu.memory_space<vmem>>, vector<8x256xf32>
    %c16_i32_87 = arith.constant 16 : i32
    %127 = vector.broadcast %c16_i32_87 : i32 to vector<8x256xi32>
    %128 = arith.cmpi sge, %0, %127 : vector<8x256xi32>
    %c15_i32_88 = arith.constant 15 : i32
    %129 = vector.broadcast %c15_i32_88 : i32 to vector<8x256xi32>
    %130 = arith.cmpi slt, %2, %129 : vector<8x256xi32>
    %131 = arith.andi %128, %130 : vector<8x256xi1>
    %cst_89 = arith.constant 0.000000e+00 : f32
    %132 = vector.broadcast %cst_89 : f32 to vector<8x256xf32>
    %133 = arith.select %131, %126, %132 : vector<8x256xi1>, vector<8x256xf32>
    %134 = arith.addf %125, %133 : vector<8x256xf32>
    %c24_90 = arith.constant 24 : index
    %c127_91 = arith.constant 127 : index
    %135 = vector.load %arg13[%c24_90, %c127_91] : memref<72x512xf32, #tpu.memory_space<vmem>>, vector<8x256xf32>
    %c1_i32_92 = arith.constant 1 : i32
    %136 = vector.broadcast %c1_i32_92 : i32 to vector<8x256xi32>
    %137 = arith.cmpi sge, %2, %136 : vector<8x256xi32>
    %cst_93 = arith.constant 0.000000e+00 : f32
    %138 = vector.broadcast %cst_93 : f32 to vector<8x256xf32>
    %139 = arith.select %137, %135, %138 : vector<8x256xi1>, vector<8x256xf32>
    %140 = arith.addf %134, %139 : vector<8x256xf32>
    %c32_94 = arith.constant 32 : index
    %c128_95 = arith.constant 128 : index
    %141 = vector.load %arg13[%c32_94, %c128_95] : memref<72x512xf32, #tpu.memory_space<vmem>>, vector<8x256xf32>
    %142 = arith.addf %140, %141 : vector<8x256xf32>
    %c40_96 = arith.constant 40 : index
    %c129_97 = arith.constant 129 : index
    %143 = vector.load %arg13[%c40_96, %c129_97] : memref<72x512xf32, #tpu.memory_space<vmem>>, vector<8x256xf32>
    %c15_i32_98 = arith.constant 15 : i32
    %144 = vector.broadcast %c15_i32_98 : i32 to vector<8x256xi32>
    %145 = arith.cmpi slt, %2, %144 : vector<8x256xi32>
    %cst_99 = arith.constant 0.000000e+00 : f32
    %146 = vector.broadcast %cst_99 : f32 to vector<8x256xf32>
    %147 = arith.select %145, %143, %146 : vector<8x256xi1>, vector<8x256xf32>
    %148 = arith.addf %142, %147 : vector<8x256xf32>
    %c48_100 = arith.constant 48 : index
    %c143_101 = arith.constant 143 : index
    %149 = vector.load %arg13[%c48_100, %c143_101] : memref<72x512xf32, #tpu.memory_space<vmem>>, vector<8x256xf32>
    %c240_i32_102 = arith.constant 240 : i32
    %150 = vector.broadcast %c240_i32_102 : i32 to vector<8x256xi32>
    %151 = arith.cmpi slt, %0, %150 : vector<8x256xi32>
    %c1_i32_103 = arith.constant 1 : i32
    %152 = vector.broadcast %c1_i32_103 : i32 to vector<8x256xi32>
    %153 = arith.cmpi sge, %2, %152 : vector<8x256xi32>
    %154 = arith.andi %151, %153 : vector<8x256xi1>
    %cst_104 = arith.constant 0.000000e+00 : f32
    %155 = vector.broadcast %cst_104 : f32 to vector<8x256xf32>
    %156 = arith.select %154, %149, %155 : vector<8x256xi1>, vector<8x256xf32>
    %157 = arith.addf %148, %156 : vector<8x256xf32>
    %c56_105 = arith.constant 56 : index
    %c144_106 = arith.constant 144 : index
    %158 = vector.load %arg13[%c56_105, %c144_106] : memref<72x512xf32, #tpu.memory_space<vmem>>, vector<8x256xf32>
    %c240_i32_107 = arith.constant 240 : i32
    %159 = vector.broadcast %c240_i32_107 : i32 to vector<8x256xi32>
    %160 = arith.cmpi slt, %0, %159 : vector<8x256xi32>
    %cst_108 = arith.constant 0.000000e+00 : f32
    %161 = vector.broadcast %cst_108 : f32 to vector<8x256xf32>
    %162 = arith.select %160, %158, %161 : vector<8x256xi1>, vector<8x256xf32>
    %163 = arith.addf %157, %162 : vector<8x256xf32>
    %c64_109 = arith.constant 64 : index
    %c145_110 = arith.constant 145 : index
    %164 = vector.load %arg13[%c64_109, %c145_110] : memref<72x512xf32, #tpu.memory_space<vmem>>, vector<8x256xf32>
    %c240_i32_111 = arith.constant 240 : i32
    %165 = vector.broadcast %c240_i32_111 : i32 to vector<8x256xi32>
    %166 = arith.cmpi slt, %0, %165 : vector<8x256xi32>
    %c15_i32_112 = arith.constant 15 : i32
    %167 = vector.broadcast %c15_i32_112 : i32 to vector<8x256xi32>
    %168 = arith.cmpi slt, %2, %167 : vector<8x256xi32>
    %169 = arith.andi %166, %168 : vector<8x256xi1>
    %cst_113 = arith.constant 0.000000e+00 : f32
    %170 = vector.broadcast %cst_113 : f32 to vector<8x256xf32>
    %171 = arith.select %169, %164, %170 : vector<8x256xi1>, vector<8x256xf32>
    %172 = arith.addf %163, %171 : vector<8x256xf32>
    %173 = arith.addf %4, %172 : vector<8x256xf32>
    %cst_114 = arith.constant 0.000000e+00 : f32
    %174 = vector.broadcast %cst_114 : f32 to vector<8x256xf32>
    %175 = arith.maximumf %173, %174 : vector<8x256xf32>
    %c0_115 = arith.constant 0 : index
    %c128_116 = arith.constant 128 : index
    %176 = vector.load %arg13[%c0_115, %c128_116] : memref<72x512xf32, #tpu.memory_space<vmem>>, vector<8x256xf32>
    tpu.vector_store %arg13[%c0_115, %c128_116], %175 {strides = array<i32>} : memref<72x512xf32, #tpu.memory_space<vmem>>, vector<8x256xf32>,
    %c0_117 = arith.constant 0 : index
    %c111_118 = arith.constant 111 : index
    %177 = vector.load %arg13[%c0_117, %c111_118] : memref<72x512xf32, #tpu.memory_space<vmem>>, vector<8x256xf32>
    %c16_i32_119 = arith.constant 16 : i32
    %178 = vector.broadcast %c16_i32_119 : i32 to vector<8x256xi32>
    %179 = arith.cmpi sge, %0, %178 : vector<8x256xi32>
    %c1_i32_120 = arith.constant 1 : i32
    %180 = vector.broadcast %c1_i32_120 : i32 to vector<8x256xi32>
    %181 = arith.cmpi sge, %2, %180 : vector<8x256xi32>
    %182 = arith.andi %179, %181 : vector<8x256xi1>
    %cst_121 = arith.constant 0.000000e+00 : f32
    %183 = vector.broadcast %cst_121 : f32 to vector<8x256xf32>
    %184 = arith.select %182, %177, %183 : vector<8x256xi1>, vector<8x256xf32>
    %185 = arith.truncf %184 : vector<8x256xf32> to vector<8x256xbf16>
    %c0_122 = arith.constant 0 : index
    %c0_123 = arith.constant 0 : index
    %186 = vector.load %arg11[%c0_122, %c0_123] : memref<72x256xbf16, #tpu.memory_space<vmem>>, vector<8x256xbf16>
    tpu.vector_store %arg11[%c0_122, %c0_123], %185 {strides = array<i32>} : memref<72x256xbf16, #tpu.memory_space<vmem>>, vector<8x256xbf16>,
    %c0_124 = arith.constant 0 : index
    %c112_125 = arith.constant 112 : index
    %187 = vector.load %arg13[%c0_124, %c112_125] : memref<72x512xf32, #tpu.memory_space<vmem>>, vector<8x256xf32>
    %c16_i32_126 = arith.constant 16 : i32
    %188 = vector.broadcast %c16_i32_126 : i32 to vector<8x256xi32>
    %189 = arith.cmpi sge, %0, %188 : vector<8x256xi32>
    %cst_127 = arith.constant 0.000000e+00 : f32
    %190 = vector.broadcast %cst_127 : f32 to vector<8x256xf32>
    %191 = arith.select %189, %187, %190 : vector<8x256xi1>, vector<8x256xf32>
    %192 = arith.truncf %191 : vector<8x256xf32> to vector<8x256xbf16>
    %c8_128 = arith.constant 8 : index
    %c0_129 = arith.constant 0 : index
    %193 = vector.load %arg11[%c8_128, %c0_129] : memref<72x256xbf16, #tpu.memory_space<vmem>>, vector<8x256xbf16>
    tpu.vector_store %arg11[%c8_128, %c0_129], %192 {strides = array<i32>} : memref<72x256xbf16, #tpu.memory_space<vmem>>, vector<8x256xbf16>,
    %c0_130 = arith.constant 0 : index
    %c113_131 = arith.constant 113 : index
    %194 = vector.load %arg13[%c0_130, %c113_131] : memref<72x512xf32, #tpu.memory_space<vmem>>, vector<8x256xf32>
    %c16_i32_132 = arith.constant 16 : i32
    %195 = vector.broadcast %c16_i32_132 : i32 to vector<8x256xi32>
    %196 = arith.cmpi sge, %0, %195 : vector<8x256xi32>
    %c15_i32_133 = arith.constant 15 : i32
    %197 = vector.broadcast %c15_i32_133 : i32 to vector<8x256xi32>
    %198 = arith.cmpi slt, %2, %197 : vector<8x256xi32>
    %199 = arith.andi %196, %198 : vector<8x256xi1>
    %cst_134 = arith.constant 0.000000e+00 : f32
    %200 = vector.broadcast %cst_134 : f32 to vector<8x256xf32>
    %201 = arith.select %199, %194, %200 : vector<8x256xi1>, vector<8x256xf32>
    %202 = arith.truncf %201 : vector<8x256xf32> to vector<8x256xbf16>
    %c16_135 = arith.constant 16 : index
    %c0_136 = arith.constant 0 : index
    %203 = vector.load %arg11[%c16_135, %c0_136] : memref<72x256xbf16, #tpu.memory_space<vmem>>, vector<8x256xbf16>
    tpu.vector_store %arg11[%c16_135, %c0_136], %202 {strides = array<i32>} : memref<72x256xbf16, #tpu.memory_space<vmem>>, vector<8x256xbf16>,
    %c0_137 = arith.constant 0 : index
    %c127_138 = arith.constant 127 : index
    %204 = vector.load %arg13[%c0_137, %c127_138] : memref<72x512xf32, #tpu.memory_space<vmem>>, vector<8x256xf32>
    %c1_i32_139 = arith.constant 1 : i32
    %205 = vector.broadcast %c1_i32_139 : i32 to vector<8x256xi32>
    %206 = arith.cmpi sge, %2, %205 : vector<8x256xi32>
    %cst_140 = arith.constant 0.000000e+00 : f32
    %207 = vector.broadcast %cst_140 : f32 to vector<8x256xf32>
    %208 = arith.select %206, %204, %207 : vector<8x256xi1>, vector<8x256xf32>
    %209 = arith.truncf %208 : vector<8x256xf32> to vector<8x256xbf16>
    %c24_141 = arith.constant 24 : index
    %c0_142 = arith.constant 0 : index
    %210 = vector.load %arg11[%c24_141, %c0_142] : memref<72x256xbf16, #tpu.memory_space<vmem>>, vector<8x256xbf16>
    tpu.vector_store %arg11[%c24_141, %c0_142], %209 {strides = array<i32>} : memref<72x256xbf16, #tpu.memory_space<vmem>>, vector<8x256xbf16>,
    %211 = arith.truncf %175 : vector<8x256xf32> to vector<8x256xbf16>
    %c32_143 = arith.constant 32 : index
    %c0_144 = arith.constant 0 : index
    %212 = vector.load %arg11[%c32_143, %c0_144] : memref<72x256xbf16, #tpu.memory_space<vmem>>, vector<8x256xbf16>
    tpu.vector_store %arg11[%c32_143, %c0_144], %211 {strides = array<i32>} : memref<72x256xbf16, #tpu.memory_space<vmem>>, vector<8x256xbf16>,
    %c0_145 = arith.constant 0 : index
    %c129_146 = arith.constant 129 : index
    %213 = vector.load %arg13[%c0_145, %c129_146] : memref<72x512xf32, #tpu.memory_space<vmem>>, vector<8x256xf32>
    %c15_i32_147 = arith.constant 15 : i32
    %214 = vector.broadcast %c15_i32_147 : i32 to vector<8x256xi32>
    %215 = arith.cmpi slt, %2, %214 : vector<8x256xi32>
    %cst_148 = arith.constant 0.000000e+00 : f32
    %216 = vector.broadcast %cst_148 : f32 to vector<8x256xf32>
    %217 = arith.select %215, %213, %216 : vector<8x256xi1>, vector<8x256xf32>
    %218 = arith.truncf %217 : vector<8x256xf32> to vector<8x256xbf16>
    %c40_149 = arith.constant 40 : index
    %c0_150 = arith.constant 0 : index
    %219 = vector.load %arg11[%c40_149, %c0_150] : memref<72x256xbf16, #tpu.memory_space<vmem>>, vector<8x256xbf16>
    tpu.vector_store %arg11[%c40_149, %c0_150], %218 {strides = array<i32>} : memref<72x256xbf16, #tpu.memory_space<vmem>>, vector<8x256xbf16>,
    %c0_151 = arith.constant 0 : index
    %c143_152 = arith.constant 143 : index
    %220 = vector.load %arg13[%c0_151, %c143_152] : memref<72x512xf32, #tpu.memory_space<vmem>>, vector<8x256xf32>
    %c240_i32_153 = arith.constant 240 : i32
    %221 = vector.broadcast %c240_i32_153 : i32 to vector<8x256xi32>
    %222 = arith.cmpi slt, %0, %221 : vector<8x256xi32>
    %c1_i32_154 = arith.constant 1 : i32
    %223 = vector.broadcast %c1_i32_154 : i32 to vector<8x256xi32>
    %224 = arith.cmpi sge, %2, %223 : vector<8x256xi32>
    %225 = arith.andi %222, %224 : vector<8x256xi1>
    %cst_155 = arith.constant 0.000000e+00 : f32
    %226 = vector.broadcast %cst_155 : f32 to vector<8x256xf32>
    %227 = arith.select %225, %220, %226 : vector<8x256xi1>, vector<8x256xf32>
    %228 = arith.truncf %227 : vector<8x256xf32> to vector<8x256xbf16>
    %c48_156 = arith.constant 48 : index
    %c0_157 = arith.constant 0 : index
    %229 = vector.load %arg11[%c48_156, %c0_157] : memref<72x256xbf16, #tpu.memory_space<vmem>>, vector<8x256xbf16>
    tpu.vector_store %arg11[%c48_156, %c0_157], %228 {strides = array<i32>} : memref<72x256xbf16, #tpu.memory_space<vmem>>, vector<8x256xbf16>,
    %c0_158 = arith.constant 0 : index
    %c144_159 = arith.constant 144 : index
    %230 = vector.load %arg13[%c0_158, %c144_159] : memref<72x512xf32, #tpu.memory_space<vmem>>, vector<8x256xf32>
    %c240_i32_160 = arith.constant 240 : i32
    %231 = vector.broadcast %c240_i32_160 : i32 to vector<8x256xi32>
    %232 = arith.cmpi slt, %0, %231 : vector<8x256xi32>
    %cst_161 = arith.constant 0.000000e+00 : f32
    %233 = vector.broadcast %cst_161 : f32 to vector<8x256xf32>
    %234 = arith.select %232, %230, %233 : vector<8x256xi1>, vector<8x256xf32>
    %235 = arith.truncf %234 : vector<8x256xf32> to vector<8x256xbf16>
    %c56_162 = arith.constant 56 : index
    %c0_163 = arith.constant 0 : index
    %236 = vector.load %arg11[%c56_162, %c0_163] : memref<72x256xbf16, #tpu.memory_space<vmem>>, vector<8x256xbf16>
    tpu.vector_store %arg11[%c56_162, %c0_163], %235 {strides = array<i32>} : memref<72x256xbf16, #tpu.memory_space<vmem>>, vector<8x256xbf16>,
    %c0_164 = arith.constant 0 : index
    %c145_165 = arith.constant 145 : index
    %237 = vector.load %arg13[%c0_164, %c145_165] : memref<72x512xf32, #tpu.memory_space<vmem>>, vector<8x256xf32>
    %c240_i32_166 = arith.constant 240 : i32
    %238 = vector.broadcast %c240_i32_166 : i32 to vector<8x256xi32>
    %239 = arith.cmpi slt, %0, %238 : vector<8x256xi32>
    %c15_i32_167 = arith.constant 15 : i32
    %240 = vector.broadcast %c15_i32_167 : i32 to vector<8x256xi32>
    %241 = arith.cmpi slt, %2, %240 : vector<8x256xi32>
    %242 = arith.andi %239, %241 : vector<8x256xi1>
    %cst_168 = arith.constant 0.000000e+00 : f32
    %243 = vector.broadcast %cst_168 : f32 to vector<8x256xf32>
    %244 = arith.select %242, %237, %243 : vector<8x256xi1>, vector<8x256xf32>
    %245 = arith.truncf %244 : vector<8x256xf32> to vector<8x256xbf16>
    %c64_169 = arith.constant 64 : index
    %c0_170 = arith.constant 0 : index
    %246 = vector.load %arg11[%c64_169, %c0_170] : memref<72x256xbf16, #tpu.memory_space<vmem>>, vector<8x256xbf16>
    tpu.vector_store %arg11[%c64_169, %c0_170], %245 {strides = array<i32>} : memref<72x256xbf16, #tpu.memory_space<vmem>>, vector<8x256xbf16>,
    %c0_171 = arith.constant 0 : index
    %c0_172 = arith.constant 0 : index
    %247 = vector.load %arg4[%c0_171, %c0_172] : memref<512x72xbf16, #tpu.memory_space<vmem>>, vector<128x72xbf16>
    %c0_173 = arith.constant 0 : index
    %c0_174 = arith.constant 0 : index
    %248 = vector.load %arg11[%c0_173, %c0_174] : memref<72x256xbf16, #tpu.memory_space<vmem>>, vector<72x256xbf16>
    %cst_175 = arith.constant dense<0.000000e+00> : vector<128x256xf32>
    %249 = tpu.matmul %247, %248, %cst_175 {dimension_numbers = #tpu.dot_dimension_numbers<[1], [0], [0], [1], [0, 0, 1, 1], [], []>} : vector<128x72xbf16>, vector<72x256xbf16>, vector<128x256xf32> -> vector<128x256xf32>
    %cst_176 = arith.constant 0.000000e+00 : f32
    %250 = vector.broadcast %cst_176 : f32 to vector<128x256xf32>
    %251 = arith.maximumf %249, %250 : vector<128x256xf32>
    %252 = arith.truncf %251 : vector<128x256xf32> to vector<128x256xbf16>
    %c0_177 = arith.constant 0 : index
    %c0_178 = arith.constant 0 : index
    %253 = vector.load %arg12[%c0_177, %c0_178] : memref<512x256xbf16, #tpu.memory_space<vmem>>, vector<128x256xbf16>
    tpu.vector_store %arg12[%c0_177, %c0_178], %252 {strides = array<i32>} : memref<512x256xbf16, #tpu.memory_space<vmem>>, vector<128x256xbf16>,
    %c128_179 = arith.constant 128 : index
    %c0_180 = arith.constant 0 : index
    %254 = vector.load %arg4[%c128_179, %c0_180] : memref<512x72xbf16, #tpu.memory_space<vmem>>, vector<128x72xbf16>
    %c0_181 = arith.constant 0 : index
    %c0_182 = arith.constant 0 : index
    %255 = vector.load %arg11[%c0_181, %c0_182] : memref<72x256xbf16, #tpu.memory_space<vmem>>, vector<72x256xbf16>
    %cst_183 = arith.constant dense<0.000000e+00> : vector<128x256xf32>
    %256 = tpu.matmul %254, %255, %cst_183 {dimension_numbers = #tpu.dot_dimension_numbers<[1], [0], [0], [1], [0, 0, 1, 1], [], []>} : vector<128x72xbf16>, vector<72x256xbf16>, vector<128x256xf32> -> vector<128x256xf32>
    %cst_184 = arith.constant 0.000000e+00 : f32
    %257 = vector.broadcast %cst_184 : f32 to vector<128x256xf32>
    %258 = arith.maximumf %256, %257 : vector<128x256xf32>
    %259 = arith.truncf %258 : vector<128x256xf32> to vector<128x256xbf16>
    %c128_185 = arith.constant 128 : index
    %c0_186 = arith.constant 0 : index
    %260 = vector.load %arg12[%c128_185, %c0_186] : memref<512x256xbf16, #tpu.memory_space<vmem>>, vector<128x256xbf16>
    tpu.vector_store %arg12[%c128_185, %c0_186], %259 {strides = array<i32>} : memref<512x256xbf16, #tpu.memory_space<vmem>>, vector<128x256xbf16>,
    %c256_187 = arith.constant 256 : index
    %c0_188 = arith.constant 0 : index
    %261 = vector.load %arg4[%c256_187, %c0_188] : memref<512x72xbf16, #tpu.memory_space<vmem>>, vector<128x72xbf16>
    %c0_189 = arith.constant 0 : index
    %c0_190 = arith.constant 0 : index
    %262 = vector.load %arg11[%c0_189, %c0_190] : memref<72x256xbf16, #tpu.memory_space<vmem>>, vector<72x256xbf16>
    %cst_191 = arith.constant dense<0.000000e+00> : vector<128x256xf32>
    %263 = tpu.matmul %261, %262, %cst_191 {dimension_numbers = #tpu.dot_dimension_numbers<[1], [0], [0], [1], [0, 0, 1, 1], [], []>} : vector<128x72xbf16>, vector<72x256xbf16>, vector<128x256xf32> -> vector<128x256xf32>
    %cst_192 = arith.constant 0.000000e+00 : f32
    %264 = vector.broadcast %cst_192 : f32 to vector<128x256xf32>
    %265 = arith.maximumf %263, %264 : vector<128x256xf32>
    %266 = arith.truncf %265 : vector<128x256xf32> to vector<128x256xbf16>
    %c256_193 = arith.constant 256 : index
    %c0_194 = arith.constant 0 : index
    %267 = vector.load %arg12[%c256_193, %c0_194] : memref<512x256xbf16, #tpu.memory_space<vmem>>, vector<128x256xbf16>
    tpu.vector_store %arg12[%c256_193, %c0_194], %266 {strides = array<i32>} : memref<512x256xbf16, #tpu.memory_space<vmem>>, vector<128x256xbf16>,
    %c384_195 = arith.constant 384 : index
    %c0_196 = arith.constant 0 : index
    %268 = vector.load %arg4[%c384_195, %c0_196] : memref<512x72xbf16, #tpu.memory_space<vmem>>, vector<128x72xbf16>
    %c0_197 = arith.constant 0 : index
    %c0_198 = arith.constant 0 : index
    %269 = vector.load %arg11[%c0_197, %c0_198] : memref<72x256xbf16, #tpu.memory_space<vmem>>, vector<72x256xbf16>
    %cst_199 = arith.constant dense<0.000000e+00> : vector<128x256xf32>
    %270 = tpu.matmul %268, %269, %cst_199 {dimension_numbers = #tpu.dot_dimension_numbers<[1], [0], [0], [1], [0, 0, 1, 1], [], []>} : vector<128x72xbf16>, vector<72x256xbf16>, vector<128x256xf32> -> vector<128x256xf32>
    %cst_200 = arith.constant 0.000000e+00 : f32
    %271 = vector.broadcast %cst_200 : f32 to vector<128x256xf32>
    %272 = arith.maximumf %270, %271 : vector<128x256xf32>
    %273 = arith.truncf %272 : vector<128x256xf32> to vector<128x256xbf16>
    %c384_201 = arith.constant 384 : index
    %c0_202 = arith.constant 0 : index
    %274 = vector.load %arg12[%c384_201, %c0_202] : memref<512x256xbf16, #tpu.memory_space<vmem>>, vector<128x256xbf16>
    tpu.vector_store %arg12[%c384_201, %c0_202], %273 {strides = array<i32>} : memref<512x256xbf16, #tpu.memory_space<vmem>>, vector<128x256xbf16>,
    %c0_203 = arith.constant 0 : index
    %c0_204 = arith.constant 0 : index
    %275 = vector.load %arg5[%c0_203, %c0_204] : memref<72x512xbf16, #tpu.memory_space<vmem>>, vector<72x512xbf16>
    %c0_205 = arith.constant 0 : index
    %c0_206 = arith.constant 0 : index
    %276 = vector.load %arg12[%c0_205, %c0_206] : memref<512x256xbf16, #tpu.memory_space<vmem>>, vector<512x256xbf16>
    %cst_207 = arith.constant dense<0.000000e+00> : vector<72x256xf32>
    %277 = tpu.matmul %275, %276, %cst_207 {dimension_numbers = #tpu.dot_dimension_numbers<[1], [0], [0], [1], [0, 0, 1, 1], [], []>} : vector<72x512xbf16>, vector<512x256xbf16>, vector<72x256xf32> -> vector<72x256xf32>
    %c0_208 = arith.constant 0 : index
    %c128_209 = arith.constant 128 : index
    %278 = vector.load %arg13[%c0_208, %c128_209] : memref<72x512xf32, #tpu.memory_space<vmem>>, vector<72x256xf32>
    tpu.vector_store %arg13[%c0_208, %c128_209], %277 {strides = array<i32>} : memref<72x512xf32, #tpu.memory_space<vmem>>, vector<72x256xf32>,
    %cst_210 = arith.constant 0.000000e+00 : f32
    %279 = vector.broadcast %cst_210 : f32 to vector<8x256xf32>
    %c0_211 = arith.constant 0 : index
    %c111_212 = arith.constant 111 : index
    %280 = vector.load %arg13[%c0_211, %c111_212] : memref<72x512xf32, #tpu.memory_space<vmem>>, vector<8x256xf32>
    %c16_i32_213 = arith.constant 16 : i32
    %281 = vector.broadcast %c16_i32_213 : i32 to vector<8x256xi32>
    %282 = arith.cmpi sge, %0, %281 : vector<8x256xi32>
    %c1_i32_214 = arith.constant 1 : i32
    %283 = vector.broadcast %c1_i32_214 : i32 to vector<8x256xi32>
    %284 = arith.cmpi sge, %2, %283 : vector<8x256xi32>
    %285 = arith.andi %282, %284 : vector<8x256xi1>
    %cst_215 = arith.constant 0.000000e+00 : f32
    %286 = vector.broadcast %cst_215 : f32 to vector<8x256xf32>
    %287 = arith.select %285, %280, %286 : vector<8x256xi1>, vector<8x256xf32>
    %288 = arith.addf %279, %287 : vector<8x256xf32>
    %c8_216 = arith.constant 8 : index
    %c112_217 = arith.constant 112 : index
    %289 = vector.load %arg13[%c8_216, %c112_217] : memref<72x512xf32, #tpu.memory_space<vmem>>, vector<8x256xf32>
    %c16_i32_218 = arith.constant 16 : i32
    %290 = vector.broadcast %c16_i32_218 : i32 to vector<8x256xi32>
    %291 = arith.cmpi sge, %0, %290 : vector<8x256xi32>
    %cst_219 = arith.constant 0.000000e+00 : f32
    %292 = vector.broadcast %cst_219 : f32 to vector<8x256xf32>
    %293 = arith.select %291, %289, %292 : vector<8x256xi1>, vector<8x256xf32>
    %294 = arith.addf %288, %293 : vector<8x256xf32>
    %c16_220 = arith.constant 16 : index
    %c113_221 = arith.constant 113 : index
    %295 = vector.load %arg13[%c16_220, %c113_221] : memref<72x512xf32, #tpu.memory_space<vmem>>, vector<8x256xf32>
    %c16_i32_222 = arith.constant 16 : i32
    %296 = vector.broadcast %c16_i32_222 : i32 to vector<8x256xi32>
    %297 = arith.cmpi sge, %0, %296 : vector<8x256xi32>
    %c15_i32_223 = arith.constant 15 : i32
    %298 = vector.broadcast %c15_i32_223 : i32 to vector<8x256xi32>
    %299 = arith.cmpi slt, %2, %298 : vector<8x256xi32>
    %300 = arith.andi %297, %299 : vector<8x256xi1>
    %cst_224 = arith.constant 0.000000e+00 : f32
    %301 = vector.broadcast %cst_224 : f32 to vector<8x256xf32>
    %302 = arith.select %300, %295, %301 : vector<8x256xi1>, vector<8x256xf32>
    %303 = arith.addf %294, %302 : vector<8x256xf32>
    %c24_225 = arith.constant 24 : index
    %c127_226 = arith.constant 127 : index
    %304 = vector.load %arg13[%c24_225, %c127_226] : memref<72x512xf32, #tpu.memory_space<vmem>>, vector<8x256xf32>
    %c1_i32_227 = arith.constant 1 : i32
    %305 = vector.broadcast %c1_i32_227 : i32 to vector<8x256xi32>
    %306 = arith.cmpi sge, %2, %305 : vector<8x256xi32>
    %cst_228 = arith.constant 0.000000e+00 : f32
    %307 = vector.broadcast %cst_228 : f32 to vector<8x256xf32>
    %308 = arith.select %306, %304, %307 : vector<8x256xi1>, vector<8x256xf32>
    %309 = arith.addf %303, %308 : vector<8x256xf32>
    %c32_229 = arith.constant 32 : index
    %c128_230 = arith.constant 128 : index
    %310 = vector.load %arg13[%c32_229, %c128_230] : memref<72x512xf32, #tpu.memory_space<vmem>>, vector<8x256xf32>
    %311 = arith.addf %309, %310 : vector<8x256xf32>
    %c40_231 = arith.constant 40 : index
    %c129_232 = arith.constant 129 : index
    %312 = vector.load %arg13[%c40_231, %c129_232] : memref<72x512xf32, #tpu.memory_space<vmem>>, vector<8x256xf32>
    %c15_i32_233 = arith.constant 15 : i32
    %313 = vector.broadcast %c15_i32_233 : i32 to vector<8x256xi32>
    %314 = arith.cmpi slt, %2, %313 : vector<8x256xi32>
    %cst_234 = arith.constant 0.000000e+00 : f32
    %315 = vector.broadcast %cst_234 : f32 to vector<8x256xf32>
    %316 = arith.select %314, %312, %315 : vector<8x256xi1>, vector<8x256xf32>
    %317 = arith.addf %311, %316 : vector<8x256xf32>
    %c48_235 = arith.constant 48 : index
    %c143_236 = arith.constant 143 : index
    %318 = vector.load %arg13[%c48_235, %c143_236] : memref<72x512xf32, #tpu.memory_space<vmem>>, vector<8x256xf32>
    %c240_i32_237 = arith.constant 240 : i32
    %319 = vector.broadcast %c240_i32_237 : i32 to vector<8x256xi32>
    %320 = arith.cmpi slt, %0, %319 : vector<8x256xi32>
    %c1_i32_238 = arith.constant 1 : i32
    %321 = vector.broadcast %c1_i32_238 : i32 to vector<8x256xi32>
    %322 = arith.cmpi sge, %2, %321 : vector<8x256xi32>
    %323 = arith.andi %320, %322 : vector<8x256xi1>
    %cst_239 = arith.constant 0.000000e+00 : f32
    %324 = vector.broadcast %cst_239 : f32 to vector<8x256xf32>
    %325 = arith.select %323, %318, %324 : vector<8x256xi1>, vector<8x256xf32>
    %326 = arith.addf %317, %325 : vector<8x256xf32>
    %c56_240 = arith.constant 56 : index
    %c144_241 = arith.constant 144 : index
    %327 = vector.load %arg13[%c56_240, %c144_241] : memref<72x512xf32, #tpu.memory_space<vmem>>, vector<8x256xf32>
    %c240_i32_242 = arith.constant 240 : i32
    %328 = vector.broadcast %c240_i32_242 : i32 to vector<8x256xi32>
    %329 = arith.cmpi slt, %0, %328 : vector<8x256xi32>
    %cst_243 = arith.constant 0.000000e+00 : f32
    %330 = vector.broadcast %cst_243 : f32 to vector<8x256xf32>
    %331 = arith.select %329, %327, %330 : vector<8x256xi1>, vector<8x256xf32>
    %332 = arith.addf %326, %331 : vector<8x256xf32>
    %c64_244 = arith.constant 64 : index
    %c145_245 = arith.constant 145 : index
    %333 = vector.load %arg13[%c64_244, %c145_245] : memref<72x512xf32, #tpu.memory_space<vmem>>, vector<8x256xf32>
    %c240_i32_246 = arith.constant 240 : i32
    %334 = vector.broadcast %c240_i32_246 : i32 to vector<8x256xi32>
    %335 = arith.cmpi slt, %0, %334 : vector<8x256xi32>
    %c15_i32_247 = arith.constant 15 : i32
    %336 = vector.broadcast %c15_i32_247 : i32 to vector<8x256xi32>
    %337 = arith.cmpi slt, %2, %336 : vector<8x256xi32>
    %338 = arith.andi %335, %337 : vector<8x256xi1>
    %cst_248 = arith.constant 0.000000e+00 : f32
    %339 = vector.broadcast %cst_248 : f32 to vector<8x256xf32>
    %340 = arith.select %338, %333, %339 : vector<8x256xi1>, vector<8x256xf32>
    %341 = arith.addf %332, %340 : vector<8x256xf32>
    %342 = arith.addf %173, %341 : vector<8x256xf32>
    %cst_249 = arith.constant 0.000000e+00 : f32
    %343 = vector.broadcast %cst_249 : f32 to vector<8x256xf32>
    %344 = arith.maximumf %342, %343 : vector<8x256xf32>
    %c0_250 = arith.constant 0 : index
    %c128_251 = arith.constant 128 : index
    %345 = vector.load %arg13[%c0_250, %c128_251] : memref<72x512xf32, #tpu.memory_space<vmem>>, vector<8x256xf32>
    tpu.vector_store %arg13[%c0_250, %c128_251], %344 {strides = array<i32>} : memref<72x512xf32, #tpu.memory_space<vmem>>, vector<8x256xf32>,
    %c0_252 = arith.constant 0 : index
    %c126 = arith.constant 126 : index
    %346 = vector.load %arg13[%c0_252, %c126] : memref<72x512xf32, #tpu.memory_space<vmem>>, vector<8x256xf32>
    %c2_i32 = arith.constant 2 : i32
    %347 = vector.broadcast %c2_i32 : i32 to vector<8x256xi32>
    %348 = arith.cmpi sge, %2, %347 : vector<8x256xi32>
    %cst_253 = arith.constant 0xFF800000 : f32
    %349 = vector.broadcast %cst_253 : f32 to vector<8x256xf32>
    %350 = arith.select %348, %346, %349 : vector<8x256xi1>, vector<8x256xf32>
    %351 = arith.maximumf %344, %350 : vector<8x256xf32>
    %c0_254 = arith.constant 0 : index
    %c127_255 = arith.constant 127 : index
    %352 = vector.load %arg13[%c0_254, %c127_255] : memref<72x512xf32, #tpu.memory_space<vmem>>, vector<8x256xf32>
    %c1_i32_256 = arith.constant 1 : i32
    %353 = vector.broadcast %c1_i32_256 : i32 to vector<8x256xi32>
    %354 = arith.cmpi sge, %2, %353 : vector<8x256xi32>
    %cst_257 = arith.constant 0xFF800000 : f32
    %355 = vector.broadcast %cst_257 : f32 to vector<8x256xf32>
    %356 = arith.select %354, %352, %355 : vector<8x256xi1>, vector<8x256xf32>
    %357 = arith.maximumf %351, %356 : vector<8x256xf32>
    %c0_258 = arith.constant 0 : index
    %c129_259 = arith.constant 129 : index
    %358 = vector.load %arg13[%c0_258, %c129_259] : memref<72x512xf32, #tpu.memory_space<vmem>>, vector<8x256xf32>
    %c15_i32_260 = arith.constant 15 : i32
    %359 = vector.broadcast %c15_i32_260 : i32 to vector<8x256xi32>
    %360 = arith.cmpi slt, %2, %359 : vector<8x256xi32>
    %cst_261 = arith.constant 0xFF800000 : f32
    %361 = vector.broadcast %cst_261 : f32 to vector<8x256xf32>
    %362 = arith.select %360, %358, %361 : vector<8x256xi1>, vector<8x256xf32>
    %363 = arith.maximumf %357, %362 : vector<8x256xf32>
    %c0_262 = arith.constant 0 : index
    %c130 = arith.constant 130 : index
    %364 = vector.load %arg13[%c0_262, %c130] : memref<72x512xf32, #tpu.memory_space<vmem>>, vector<8x256xf32>
    %c14_i32 = arith.constant 14 : i32
    %365 = vector.broadcast %c14_i32 : i32 to vector<8x256xi32>
    %366 = arith.cmpi slt, %2, %365 : vector<8x256xi32>
    %cst_263 = arith.constant 0xFF800000 : f32
    %367 = vector.broadcast %cst_263 : f32 to vector<8x256xf32>
    %368 = arith.select %366, %364, %367 : vector<8x256xi1>, vector<8x256xf32>
    %369 = arith.maximumf %363, %368 : vector<8x256xf32>
    %c0_264 = arith.constant 0 : index
    %c128_265 = arith.constant 128 : index
    %370 = vector.load %arg13[%c0_264, %c128_265] : memref<72x512xf32, #tpu.memory_space<vmem>>, vector<8x256xf32>
    tpu.vector_store %arg13[%c0_264, %c128_265], %369 {strides = array<i32>} : memref<72x512xf32, #tpu.memory_space<vmem>>, vector<8x256xf32>,
    %c0_266 = arith.constant 0 : index
    %c96 = arith.constant 96 : index
    %371 = vector.load %arg13[%c0_266, %c96] : memref<72x512xf32, #tpu.memory_space<vmem>>, vector<8x256xf32>
    %c32_i32 = arith.constant 32 : i32
    %372 = vector.broadcast %c32_i32 : i32 to vector<8x256xi32>
    %373 = arith.cmpi sge, %0, %372 : vector<8x256xi32>
    %cst_267 = arith.constant 0xFF800000 : f32
    %374 = vector.broadcast %cst_267 : f32 to vector<8x256xf32>
    %375 = arith.select %373, %371, %374 : vector<8x256xi1>, vector<8x256xf32>
    %376 = arith.maximumf %369, %375 : vector<8x256xf32>
    %c0_268 = arith.constant 0 : index
    %c112_269 = arith.constant 112 : index
    %377 = vector.load %arg13[%c0_268, %c112_269] : memref<72x512xf32, #tpu.memory_space<vmem>>, vector<8x256xf32>
    %c16_i32_270 = arith.constant 16 : i32
    %378 = vector.broadcast %c16_i32_270 : i32 to vector<8x256xi32>
    %379 = arith.cmpi sge, %0, %378 : vector<8x256xi32>
    %cst_271 = arith.constant 0xFF800000 : f32
    %380 = vector.broadcast %cst_271 : f32 to vector<8x256xf32>
    %381 = arith.select %379, %377, %380 : vector<8x256xi1>, vector<8x256xf32>
    %382 = arith.maximumf %376, %381 : vector<8x256xf32>
    %c0_272 = arith.constant 0 : index
    %c144_273 = arith.constant 144 : index
    %383 = vector.load %arg13[%c0_272, %c144_273] : memref<72x512xf32, #tpu.memory_space<vmem>>, vector<8x256xf32>
    %c240_i32_274 = arith.constant 240 : i32
    %384 = vector.broadcast %c240_i32_274 : i32 to vector<8x256xi32>
    %385 = arith.cmpi slt, %0, %384 : vector<8x256xi32>
    %cst_275 = arith.constant 0xFF800000 : f32
    %386 = vector.broadcast %cst_275 : f32 to vector<8x256xf32>
    %387 = arith.select %385, %383, %386 : vector<8x256xi1>, vector<8x256xf32>
    %388 = arith.maximumf %382, %387 : vector<8x256xf32>
    %c0_276 = arith.constant 0 : index
    %c160 = arith.constant 160 : index
    %389 = vector.load %arg13[%c0_276, %c160] : memref<72x512xf32, #tpu.memory_space<vmem>>, vector<8x256xf32>
    %c224_i32 = arith.constant 224 : i32
    %390 = vector.broadcast %c224_i32 : i32 to vector<8x256xi32>
    %391 = arith.cmpi slt, %0, %390 : vector<8x256xi32>
    %cst_277 = arith.constant 0xFF800000 : f32
    %392 = vector.broadcast %cst_277 : f32 to vector<8x256xf32>
    %393 = arith.select %391, %389, %392 : vector<8x256xi1>, vector<8x256xf32>
    %394 = arith.maximumf %388, %393 : vector<8x256xf32>
    %c0_278 = arith.constant 0 : index
    %c128_279 = arith.constant 128 : index
    %395 = vector.load %arg13[%c0_278, %c128_279] : memref<72x512xf32, #tpu.memory_space<vmem>>, vector<8x256xf32>
    tpu.vector_store %arg13[%c0_278, %c128_279], %394 {strides = array<i32>} : memref<72x512xf32, #tpu.memory_space<vmem>>, vector<8x256xf32>,
    %c0_280 = arith.constant 0 : index
    %c111_281 = arith.constant 111 : index
    %396 = vector.load %arg13[%c0_280, %c111_281] : memref<72x512xf32, #tpu.memory_space<vmem>>, vector<8x256xf32>
    %c16_i32_282 = arith.constant 16 : i32
    %397 = vector.broadcast %c16_i32_282 : i32 to vector<8x256xi32>
    %398 = arith.cmpi sge, %0, %397 : vector<8x256xi32>
    %c1_i32_283 = arith.constant 1 : i32
    %399 = vector.broadcast %c1_i32_283 : i32 to vector<8x256xi32>
    %400 = arith.cmpi sge, %2, %399 : vector<8x256xi32>
    %401 = arith.andi %398, %400 : vector<8x256xi1>
    %cst_284 = arith.constant 0.000000e+00 : f32
    %402 = vector.broadcast %cst_284 : f32 to vector<8x256xf32>
    %403 = arith.select %401, %396, %402 : vector<8x256xi1>, vector<8x256xf32>
    %404 = arith.truncf %403 : vector<8x256xf32> to vector<8x256xbf16>
    %c0_285 = arith.constant 0 : index
    %c0_286 = arith.constant 0 : index
    %405 = vector.load %arg11[%c0_285, %c0_286] : memref<72x256xbf16, #tpu.memory_space<vmem>>, vector<8x256xbf16>
    tpu.vector_store %arg11[%c0_285, %c0_286], %404 {strides = array<i32>} : memref<72x256xbf16, #tpu.memory_space<vmem>>, vector<8x256xbf16>,
    %c0_287 = arith.constant 0 : index
    %c112_288 = arith.constant 112 : index
    %406 = vector.load %arg13[%c0_287, %c112_288] : memref<72x512xf32, #tpu.memory_space<vmem>>, vector<8x256xf32>
    %c16_i32_289 = arith.constant 16 : i32
    %407 = vector.broadcast %c16_i32_289 : i32 to vector<8x256xi32>
    %408 = arith.cmpi sge, %0, %407 : vector<8x256xi32>
    %cst_290 = arith.constant 0.000000e+00 : f32
    %409 = vector.broadcast %cst_290 : f32 to vector<8x256xf32>
    %410 = arith.select %408, %406, %409 : vector<8x256xi1>, vector<8x256xf32>
    %411 = arith.truncf %410 : vector<8x256xf32> to vector<8x256xbf16>
    %c8_291 = arith.constant 8 : index
    %c0_292 = arith.constant 0 : index
    %412 = vector.load %arg11[%c8_291, %c0_292] : memref<72x256xbf16, #tpu.memory_space<vmem>>, vector<8x256xbf16>
    tpu.vector_store %arg11[%c8_291, %c0_292], %411 {strides = array<i32>} : memref<72x256xbf16, #tpu.memory_space<vmem>>, vector<8x256xbf16>,
    %c0_293 = arith.constant 0 : index
    %c113_294 = arith.constant 113 : index
    %413 = vector.load %arg13[%c0_293, %c113_294] : memref<72x512xf32, #tpu.memory_space<vmem>>, vector<8x256xf32>
    %c16_i32_295 = arith.constant 16 : i32
    %414 = vector.broadcast %c16_i32_295 : i32 to vector<8x256xi32>
    %415 = arith.cmpi sge, %0, %414 : vector<8x256xi32>
    %c15_i32_296 = arith.constant 15 : i32
    %416 = vector.broadcast %c15_i32_296 : i32 to vector<8x256xi32>
    %417 = arith.cmpi slt, %2, %416 : vector<8x256xi32>
    %418 = arith.andi %415, %417 : vector<8x256xi1>
    %cst_297 = arith.constant 0.000000e+00 : f32
    %419 = vector.broadcast %cst_297 : f32 to vector<8x256xf32>
    %420 = arith.select %418, %413, %419 : vector<8x256xi1>, vector<8x256xf32>
    %421 = arith.truncf %420 : vector<8x256xf32> to vector<8x256xbf16>
    %c16_298 = arith.constant 16 : index
    %c0_299 = arith.constant 0 : index
    %422 = vector.load %arg11[%c16_298, %c0_299] : memref<72x256xbf16, #tpu.memory_space<vmem>>, vector<8x256xbf16>
    tpu.vector_store %arg11[%c16_298, %c0_299], %421 {strides = array<i32>} : memref<72x256xbf16, #tpu.memory_space<vmem>>, vector<8x256xbf16>,
    %c0_300 = arith.constant 0 : index
    %c127_301 = arith.constant 127 : index
    %423 = vector.load %arg13[%c0_300, %c127_301] : memref<72x512xf32, #tpu.memory_space<vmem>>, vector<8x256xf32>
    %c1_i32_302 = arith.constant 1 : i32
    %424 = vector.broadcast %c1_i32_302 : i32 to vector<8x256xi32>
    %425 = arith.cmpi sge, %2, %424 : vector<8x256xi32>
    %cst_303 = arith.constant 0.000000e+00 : f32
    %426 = vector.broadcast %cst_303 : f32 to vector<8x256xf32>
    %427 = arith.select %425, %423, %426 : vector<8x256xi1>, vector<8x256xf32>
    %428 = arith.truncf %427 : vector<8x256xf32> to vector<8x256xbf16>
    %c24_304 = arith.constant 24 : index
    %c0_305 = arith.constant 0 : index
    %429 = vector.load %arg11[%c24_304, %c0_305] : memref<72x256xbf16, #tpu.memory_space<vmem>>, vector<8x256xbf16>
    tpu.vector_store %arg11[%c24_304, %c0_305], %428 {strides = array<i32>} : memref<72x256xbf16, #tpu.memory_space<vmem>>, vector<8x256xbf16>,
    %430 = arith.truncf %394 : vector<8x256xf32> to vector<8x256xbf16>
    %c32_306 = arith.constant 32 : index
    %c0_307 = arith.constant 0 : index
    %431 = vector.load %arg11[%c32_306, %c0_307] : memref<72x256xbf16, #tpu.memory_space<vmem>>, vector<8x256xbf16>
    tpu.vector_store %arg11[%c32_306, %c0_307], %430 {strides = array<i32>} : memref<72x256xbf16, #tpu.memory_space<vmem>>, vector<8x256xbf16>,
    %c0_308 = arith.constant 0 : index
    %c129_309 = arith.constant 129 : index
    %432 = vector.load %arg13[%c0_308, %c129_309] : memref<72x512xf32, #tpu.memory_space<vmem>>, vector<8x256xf32>
    %c15_i32_310 = arith.constant 15 : i32
    %433 = vector.broadcast %c15_i32_310 : i32 to vector<8x256xi32>
    %434 = arith.cmpi slt, %2, %433 : vector<8x256xi32>
    %cst_311 = arith.constant 0.000000e+00 : f32
    %435 = vector.broadcast %cst_311 : f32 to vector<8x256xf32>
    %436 = arith.select %434, %432, %435 : vector<8x256xi1>, vector<8x256xf32>
    %437 = arith.truncf %436 : vector<8x256xf32> to vector<8x256xbf16>
    %c40_312 = arith.constant 40 : index
    %c0_313 = arith.constant 0 : index
    %438 = vector.load %arg11[%c40_312, %c0_313] : memref<72x256xbf16, #tpu.memory_space<vmem>>, vector<8x256xbf16>
    tpu.vector_store %arg11[%c40_312, %c0_313], %437 {strides = array<i32>} : memref<72x256xbf16, #tpu.memory_space<vmem>>, vector<8x256xbf16>,
    %c0_314 = arith.constant 0 : index
    %c143_315 = arith.constant 143 : index
    %439 = vector.load %arg13[%c0_314, %c143_315] : memref<72x512xf32, #tpu.memory_space<vmem>>, vector<8x256xf32>
    %c240_i32_316 = arith.constant 240 : i32
    %440 = vector.broadcast %c240_i32_316 : i32 to vector<8x256xi32>
    %441 = arith.cmpi slt, %0, %440 : vector<8x256xi32>
    %c1_i32_317 = arith.constant 1 : i32
    %442 = vector.broadcast %c1_i32_317 : i32 to vector<8x256xi32>
    %443 = arith.cmpi sge, %2, %442 : vector<8x256xi32>
    %444 = arith.andi %441, %443 : vector<8x256xi1>
    %cst_318 = arith.constant 0.000000e+00 : f32
    %445 = vector.broadcast %cst_318 : f32 to vector<8x256xf32>
    %446 = arith.select %444, %439, %445 : vector<8x256xi1>, vector<8x256xf32>
    %447 = arith.truncf %446 : vector<8x256xf32> to vector<8x256xbf16>
    %c48_319 = arith.constant 48 : index
    %c0_320 = arith.constant 0 : index
    %448 = vector.load %arg11[%c48_319, %c0_320] : memref<72x256xbf16, #tpu.memory_space<vmem>>, vector<8x256xbf16>
    tpu.vector_store %arg11[%c48_319, %c0_320], %447 {strides = array<i32>} : memref<72x256xbf16, #tpu.memory_space<vmem>>, vector<8x256xbf16>,
    %c0_321 = arith.constant 0 : index
    %c144_322 = arith.constant 144 : index
    %449 = vector.load %arg13[%c0_321, %c144_322] : memref<72x512xf32, #tpu.memory_space<vmem>>, vector<8x256xf32>
    %c240_i32_323 = arith.constant 240 : i32
    %450 = vector.broadcast %c240_i32_323 : i32 to vector<8x256xi32>
    %451 = arith.cmpi slt, %0, %450 : vector<8x256xi32>
    %cst_324 = arith.constant 0.000000e+00 : f32
    %452 = vector.broadcast %cst_324 : f32 to vector<8x256xf32>
    %453 = arith.select %451, %449, %452 : vector<8x256xi1>, vector<8x256xf32>
    %454 = arith.truncf %453 : vector<8x256xf32> to vector<8x256xbf16>
    %c56_325 = arith.constant 56 : index
    %c0_326 = arith.constant 0 : index
    %455 = vector.load %arg11[%c56_325, %c0_326] : memref<72x256xbf16, #tpu.memory_space<vmem>>, vector<8x256xbf16>
    tpu.vector_store %arg11[%c56_325, %c0_326], %454 {strides = array<i32>} : memref<72x256xbf16, #tpu.memory_space<vmem>>, vector<8x256xbf16>,
    %c0_327 = arith.constant 0 : index
    %c145_328 = arith.constant 145 : index
    %456 = vector.load %arg13[%c0_327, %c145_328] : memref<72x512xf32, #tpu.memory_space<vmem>>, vector<8x256xf32>
    %c240_i32_329 = arith.constant 240 : i32
    %457 = vector.broadcast %c240_i32_329 : i32 to vector<8x256xi32>
    %458 = arith.cmpi slt, %0, %457 : vector<8x256xi32>
    %c15_i32_330 = arith.constant 15 : i32
    %459 = vector.broadcast %c15_i32_330 : i32 to vector<8x256xi32>
    %460 = arith.cmpi slt, %2, %459 : vector<8x256xi32>
    %461 = arith.andi %458, %460 : vector<8x256xi1>
    %cst_331 = arith.constant 0.000000e+00 : f32
    %462 = vector.broadcast %cst_331 : f32 to vector<8x256xf32>
    %463 = arith.select %461, %456, %462 : vector<8x256xi1>, vector<8x256xf32>
    %464 = arith.truncf %463 : vector<8x256xf32> to vector<8x256xbf16>
    %c64_332 = arith.constant 64 : index
    %c0_333 = arith.constant 0 : index
    %465 = vector.load %arg11[%c64_332, %c0_333] : memref<72x256xbf16, #tpu.memory_space<vmem>>, vector<8x256xbf16>
    tpu.vector_store %arg11[%c64_332, %c0_333], %464 {strides = array<i32>} : memref<72x256xbf16, #tpu.memory_space<vmem>>, vector<8x256xbf16>,
    %c0_334 = arith.constant 0 : index
    %c0_335 = arith.constant 0 : index
    %466 = vector.load %arg6[%c0_334, %c0_335] : memref<8x72xbf16, #tpu.memory_space<vmem>>, vector<8x72xbf16>
    %c0_336 = arith.constant 0 : index
    %c0_337 = arith.constant 0 : index
    %467 = vector.load %arg11[%c0_336, %c0_337] : memref<72x256xbf16, #tpu.memory_space<vmem>>, vector<72x256xbf16>
    %cst_338 = arith.constant dense<0.000000e+00> : vector<8x256xf32>
    %468 = tpu.matmul %466, %467, %cst_338 {dimension_numbers = #tpu.dot_dimension_numbers<[1], [0], [0], [1], [0, 0, 1, 1], [], []>} : vector<8x72xbf16>, vector<72x256xbf16>, vector<8x256xf32> -> vector<8x256xf32>
    %469 = arith.addf %344, %468 : vector<8x256xf32>
    %c0_339 = arith.constant 0 : index
    %c128_340 = arith.constant 128 : index
    %470 = vector.load %arg13[%c0_339, %c128_340] : memref<72x512xf32, #tpu.memory_space<vmem>>, vector<8x256xf32>
    tpu.vector_store %arg13[%c0_339, %c128_340], %468 {strides = array<i32>} : memref<72x512xf32, #tpu.memory_space<vmem>>, vector<8x256xf32>,
    %c0_341 = arith.constant 0 : index
    %c126_342 = arith.constant 126 : index
    %471 = vector.load %arg13[%c0_341, %c126_342] : memref<72x512xf32, #tpu.memory_space<vmem>>, vector<8x256xf32>
    %c2_i32_343 = arith.constant 2 : i32
    %472 = vector.broadcast %c2_i32_343 : i32 to vector<8x256xi32>
    %473 = arith.cmpi sge, %2, %472 : vector<8x256xi32>
    %cst_344 = arith.constant 0xFF800000 : f32
    %474 = vector.broadcast %cst_344 : f32 to vector<8x256xf32>
    %475 = arith.select %473, %471, %474 : vector<8x256xi1>, vector<8x256xf32>
    %476 = arith.maximumf %468, %475 : vector<8x256xf32>
    %c0_345 = arith.constant 0 : index
    %c127_346 = arith.constant 127 : index
    %477 = vector.load %arg13[%c0_345, %c127_346] : memref<72x512xf32, #tpu.memory_space<vmem>>, vector<8x256xf32>
    %c1_i32_347 = arith.constant 1 : i32
    %478 = vector.broadcast %c1_i32_347 : i32 to vector<8x256xi32>
    %479 = arith.cmpi sge, %2, %478 : vector<8x256xi32>
    %cst_348 = arith.constant 0xFF800000 : f32
    %480 = vector.broadcast %cst_348 : f32 to vector<8x256xf32>
    %481 = arith.select %479, %477, %480 : vector<8x256xi1>, vector<8x256xf32>
    %482 = arith.maximumf %476, %481 : vector<8x256xf32>
    %c0_349 = arith.constant 0 : index
    %c129_350 = arith.constant 129 : index
    %483 = vector.load %arg13[%c0_349, %c129_350] : memref<72x512xf32, #tpu.memory_space<vmem>>, vector<8x256xf32>
    %c15_i32_351 = arith.constant 15 : i32
    %484 = vector.broadcast %c15_i32_351 : i32 to vector<8x256xi32>
    %485 = arith.cmpi slt, %2, %484 : vector<8x256xi32>
    %cst_352 = arith.constant 0xFF800000 : f32
    %486 = vector.broadcast %cst_352 : f32 to vector<8x256xf32>
    %487 = arith.select %485, %483, %486 : vector<8x256xi1>, vector<8x256xf32>
    %488 = arith.maximumf %482, %487 : vector<8x256xf32>
    %c0_353 = arith.constant 0 : index
    %c130_354 = arith.constant 130 : index
    %489 = vector.load %arg13[%c0_353, %c130_354] : memref<72x512xf32, #tpu.memory_space<vmem>>, vector<8x256xf32>
    %c14_i32_355 = arith.constant 14 : i32
    %490 = vector.broadcast %c14_i32_355 : i32 to vector<8x256xi32>
    %491 = arith.cmpi slt, %2, %490 : vector<8x256xi32>
    %cst_356 = arith.constant 0xFF800000 : f32
    %492 = vector.broadcast %cst_356 : f32 to vector<8x256xf32>
    %493 = arith.select %491, %489, %492 : vector<8x256xi1>, vector<8x256xf32>
    %494 = arith.maximumf %488, %493 : vector<8x256xf32>
    %c0_357 = arith.constant 0 : index
    %c128_358 = arith.constant 128 : index
    %495 = vector.load %arg13[%c0_357, %c128_358] : memref<72x512xf32, #tpu.memory_space<vmem>>, vector<8x256xf32>
    tpu.vector_store %arg13[%c0_357, %c128_358], %494 {strides = array<i32>} : memref<72x512xf32, #tpu.memory_space<vmem>>, vector<8x256xf32>,
    %c0_359 = arith.constant 0 : index
    %c96_360 = arith.constant 96 : index
    %496 = vector.load %arg13[%c0_359, %c96_360] : memref<72x512xf32, #tpu.memory_space<vmem>>, vector<8x256xf32>
    %c32_i32_361 = arith.constant 32 : i32
    %497 = vector.broadcast %c32_i32_361 : i32 to vector<8x256xi32>
    %498 = arith.cmpi sge, %0, %497 : vector<8x256xi32>
    %cst_362 = arith.constant 0xFF800000 : f32
    %499 = vector.broadcast %cst_362 : f32 to vector<8x256xf32>
    %500 = arith.select %498, %496, %499 : vector<8x256xi1>, vector<8x256xf32>
    %501 = arith.maximumf %494, %500 : vector<8x256xf32>
    %c0_363 = arith.constant 0 : index
    %c112_364 = arith.constant 112 : index
    %502 = vector.load %arg13[%c0_363, %c112_364] : memref<72x512xf32, #tpu.memory_space<vmem>>, vector<8x256xf32>
    %c16_i32_365 = arith.constant 16 : i32
    %503 = vector.broadcast %c16_i32_365 : i32 to vector<8x256xi32>
    %504 = arith.cmpi sge, %0, %503 : vector<8x256xi32>
    %cst_366 = arith.constant 0xFF800000 : f32
    %505 = vector.broadcast %cst_366 : f32 to vector<8x256xf32>
    %506 = arith.select %504, %502, %505 : vector<8x256xi1>, vector<8x256xf32>
    %507 = arith.maximumf %501, %506 : vector<8x256xf32>
    %c0_367 = arith.constant 0 : index
    %c144_368 = arith.constant 144 : index
    %508 = vector.load %arg13[%c0_367, %c144_368] : memref<72x512xf32, #tpu.memory_space<vmem>>, vector<8x256xf32>
    %c240_i32_369 = arith.constant 240 : i32
    %509 = vector.broadcast %c240_i32_369 : i32 to vector<8x256xi32>
    %510 = arith.cmpi slt, %0, %509 : vector<8x256xi32>
    %cst_370 = arith.constant 0xFF800000 : f32
    %511 = vector.broadcast %cst_370 : f32 to vector<8x256xf32>
    %512 = arith.select %510, %508, %511 : vector<8x256xi1>, vector<8x256xf32>
    %513 = arith.maximumf %507, %512 : vector<8x256xf32>
    %c0_371 = arith.constant 0 : index
    %c160_372 = arith.constant 160 : index
    %514 = vector.load %arg13[%c0_371, %c160_372] : memref<72x512xf32, #tpu.memory_space<vmem>>, vector<8x256xf32>
    %c224_i32_373 = arith.constant 224 : i32
    %515 = vector.broadcast %c224_i32_373 : i32 to vector<8x256xi32>
    %516 = arith.cmpi slt, %0, %515 : vector<8x256xi32>
    %cst_374 = arith.constant 0xFF800000 : f32
    %517 = vector.broadcast %cst_374 : f32 to vector<8x256xf32>
    %518 = arith.select %516, %514, %517 : vector<8x256xi1>, vector<8x256xf32>
    %519 = arith.maximumf %513, %518 : vector<8x256xf32>
    %c0_375 = arith.constant 0 : index
    %c128_376 = arith.constant 128 : index
    %520 = vector.load %arg13[%c0_375, %c128_376] : memref<72x512xf32, #tpu.memory_space<vmem>>, vector<8x256xf32>
    tpu.vector_store %arg13[%c0_375, %c128_376], %519 {strides = array<i32>} : memref<72x512xf32, #tpu.memory_space<vmem>>, vector<8x256xf32>,
    %c0_377 = arith.constant 0 : index
    %c111_378 = arith.constant 111 : index
    %521 = vector.load %arg13[%c0_377, %c111_378] : memref<72x512xf32, #tpu.memory_space<vmem>>, vector<8x256xf32>
    %c16_i32_379 = arith.constant 16 : i32
    %522 = vector.broadcast %c16_i32_379 : i32 to vector<8x256xi32>
    %523 = arith.cmpi sge, %0, %522 : vector<8x256xi32>
    %c1_i32_380 = arith.constant 1 : i32
    %524 = vector.broadcast %c1_i32_380 : i32 to vector<8x256xi32>
    %525 = arith.cmpi sge, %2, %524 : vector<8x256xi32>
    %526 = arith.andi %523, %525 : vector<8x256xi1>
    %cst_381 = arith.constant 0.000000e+00 : f32
    %527 = vector.broadcast %cst_381 : f32 to vector<8x256xf32>
    %528 = arith.select %526, %521, %527 : vector<8x256xi1>, vector<8x256xf32>
    %529 = arith.truncf %528 : vector<8x256xf32> to vector<8x256xbf16>
    %c0_382 = arith.constant 0 : index
    %c0_383 = arith.constant 0 : index
    %530 = vector.load %arg11[%c0_382, %c0_383] : memref<72x256xbf16, #tpu.memory_space<vmem>>, vector<8x256xbf16>
    tpu.vector_store %arg11[%c0_382, %c0_383], %529 {strides = array<i32>} : memref<72x256xbf16, #tpu.memory_space<vmem>>, vector<8x256xbf16>,
    %c0_384 = arith.constant 0 : index
    %c112_385 = arith.constant 112 : index
    %531 = vector.load %arg13[%c0_384, %c112_385] : memref<72x512xf32, #tpu.memory_space<vmem>>, vector<8x256xf32>
    %c16_i32_386 = arith.constant 16 : i32
    %532 = vector.broadcast %c16_i32_386 : i32 to vector<8x256xi32>
    %533 = arith.cmpi sge, %0, %532 : vector<8x256xi32>
    %cst_387 = arith.constant 0.000000e+00 : f32
    %534 = vector.broadcast %cst_387 : f32 to vector<8x256xf32>
    %535 = arith.select %533, %531, %534 : vector<8x256xi1>, vector<8x256xf32>
    %536 = arith.truncf %535 : vector<8x256xf32> to vector<8x256xbf16>
    %c8_388 = arith.constant 8 : index
    %c0_389 = arith.constant 0 : index
    %537 = vector.load %arg11[%c8_388, %c0_389] : memref<72x256xbf16, #tpu.memory_space<vmem>>, vector<8x256xbf16>
    tpu.vector_store %arg11[%c8_388, %c0_389], %536 {strides = array<i32>} : memref<72x256xbf16, #tpu.memory_space<vmem>>, vector<8x256xbf16>,
    %c0_390 = arith.constant 0 : index
    %c113_391 = arith.constant 113 : index
    %538 = vector.load %arg13[%c0_390, %c113_391] : memref<72x512xf32, #tpu.memory_space<vmem>>, vector<8x256xf32>
    %c16_i32_392 = arith.constant 16 : i32
    %539 = vector.broadcast %c16_i32_392 : i32 to vector<8x256xi32>
    %540 = arith.cmpi sge, %0, %539 : vector<8x256xi32>
    %c15_i32_393 = arith.constant 15 : i32
    %541 = vector.broadcast %c15_i32_393 : i32 to vector<8x256xi32>
    %542 = arith.cmpi slt, %2, %541 : vector<8x256xi32>
    %543 = arith.andi %540, %542 : vector<8x256xi1>
    %cst_394 = arith.constant 0.000000e+00 : f32
    %544 = vector.broadcast %cst_394 : f32 to vector<8x256xf32>
    %545 = arith.select %543, %538, %544 : vector<8x256xi1>, vector<8x256xf32>
    %546 = arith.truncf %545 : vector<8x256xf32> to vector<8x256xbf16>
    %c16_395 = arith.constant 16 : index
    %c0_396 = arith.constant 0 : index
    %547 = vector.load %arg11[%c16_395, %c0_396] : memref<72x256xbf16, #tpu.memory_space<vmem>>, vector<8x256xbf16>
    tpu.vector_store %arg11[%c16_395, %c0_396], %546 {strides = array<i32>} : memref<72x256xbf16, #tpu.memory_space<vmem>>, vector<8x256xbf16>,
    %c0_397 = arith.constant 0 : index
    %c127_398 = arith.constant 127 : index
    %548 = vector.load %arg13[%c0_397, %c127_398] : memref<72x512xf32, #tpu.memory_space<vmem>>, vector<8x256xf32>
    %c1_i32_399 = arith.constant 1 : i32
    %549 = vector.broadcast %c1_i32_399 : i32 to vector<8x256xi32>
    %550 = arith.cmpi sge, %2, %549 : vector<8x256xi32>
    %cst_400 = arith.constant 0.000000e+00 : f32
    %551 = vector.broadcast %cst_400 : f32 to vector<8x256xf32>
    %552 = arith.select %550, %548, %551 : vector<8x256xi1>, vector<8x256xf32>
    %553 = arith.truncf %552 : vector<8x256xf32> to vector<8x256xbf16>
    %c24_401 = arith.constant 24 : index
    %c0_402 = arith.constant 0 : index
    %554 = vector.load %arg11[%c24_401, %c0_402] : memref<72x256xbf16, #tpu.memory_space<vmem>>, vector<8x256xbf16>
    tpu.vector_store %arg11[%c24_401, %c0_402], %553 {strides = array<i32>} : memref<72x256xbf16, #tpu.memory_space<vmem>>, vector<8x256xbf16>,
    %555 = arith.truncf %519 : vector<8x256xf32> to vector<8x256xbf16>
    %c32_403 = arith.constant 32 : index
    %c0_404 = arith.constant 0 : index
    %556 = vector.load %arg11[%c32_403, %c0_404] : memref<72x256xbf16, #tpu.memory_space<vmem>>, vector<8x256xbf16>
    tpu.vector_store %arg11[%c32_403, %c0_404], %555 {strides = array<i32>} : memref<72x256xbf16, #tpu.memory_space<vmem>>, vector<8x256xbf16>,
    %c0_405 = arith.constant 0 : index
    %c129_406 = arith.constant 129 : index
    %557 = vector.load %arg13[%c0_405, %c129_406] : memref<72x512xf32, #tpu.memory_space<vmem>>, vector<8x256xf32>
    %c15_i32_407 = arith.constant 15 : i32
    %558 = vector.broadcast %c15_i32_407 : i32 to vector<8x256xi32>
    %559 = arith.cmpi slt, %2, %558 : vector<8x256xi32>
    %cst_408 = arith.constant 0.000000e+00 : f32
    %560 = vector.broadcast %cst_408 : f32 to vector<8x256xf32>
    %561 = arith.select %559, %557, %560 : vector<8x256xi1>, vector<8x256xf32>
    %562 = arith.truncf %561 : vector<8x256xf32> to vector<8x256xbf16>
    %c40_409 = arith.constant 40 : index
    %c0_410 = arith.constant 0 : index
    %563 = vector.load %arg11[%c40_409, %c0_410] : memref<72x256xbf16, #tpu.memory_space<vmem>>, vector<8x256xbf16>
    tpu.vector_store %arg11[%c40_409, %c0_410], %562 {strides = array<i32>} : memref<72x256xbf16, #tpu.memory_space<vmem>>, vector<8x256xbf16>,
    %c0_411 = arith.constant 0 : index
    %c143_412 = arith.constant 143 : index
    %564 = vector.load %arg13[%c0_411, %c143_412] : memref<72x512xf32, #tpu.memory_space<vmem>>, vector<8x256xf32>
    %c240_i32_413 = arith.constant 240 : i32
    %565 = vector.broadcast %c240_i32_413 : i32 to vector<8x256xi32>
    %566 = arith.cmpi slt, %0, %565 : vector<8x256xi32>
    %c1_i32_414 = arith.constant 1 : i32
    %567 = vector.broadcast %c1_i32_414 : i32 to vector<8x256xi32>
    %568 = arith.cmpi sge, %2, %567 : vector<8x256xi32>
    %569 = arith.andi %566, %568 : vector<8x256xi1>
    %cst_415 = arith.constant 0.000000e+00 : f32
    %570 = vector.broadcast %cst_415 : f32 to vector<8x256xf32>
    %571 = arith.select %569, %564, %570 : vector<8x256xi1>, vector<8x256xf32>
    %572 = arith.truncf %571 : vector<8x256xf32> to vector<8x256xbf16>
    %c48_416 = arith.constant 48 : index
    %c0_417 = arith.constant 0 : index
    %573 = vector.load %arg11[%c48_416, %c0_417] : memref<72x256xbf16, #tpu.memory_space<vmem>>, vector<8x256xbf16>
    tpu.vector_store %arg11[%c48_416, %c0_417], %572 {strides = array<i32>} : memref<72x256xbf16, #tpu.memory_space<vmem>>, vector<8x256xbf16>,
    %c0_418 = arith.constant 0 : index
    %c144_419 = arith.constant 144 : index
    %574 = vector.load %arg13[%c0_418, %c144_419] : memref<72x512xf32, #tpu.memory_space<vmem>>, vector<8x256xf32>
    %c240_i32_420 = arith.constant 240 : i32
    %575 = vector.broadcast %c240_i32_420 : i32 to vector<8x256xi32>
    %576 = arith.cmpi slt, %0, %575 : vector<8x256xi32>
    %cst_421 = arith.constant 0.000000e+00 : f32
    %577 = vector.broadcast %cst_421 : f32 to vector<8x256xf32>
    %578 = arith.select %576, %574, %577 : vector<8x256xi1>, vector<8x256xf32>
    %579 = arith.truncf %578 : vector<8x256xf32> to vector<8x256xbf16>
    %c56_422 = arith.constant 56 : index
    %c0_423 = arith.constant 0 : index
    %580 = vector.load %arg11[%c56_422, %c0_423] : memref<72x256xbf16, #tpu.memory_space<vmem>>, vector<8x256xbf16>
    tpu.vector_store %arg11[%c56_422, %c0_423], %579 {strides = array<i32>} : memref<72x256xbf16, #tpu.memory_space<vmem>>, vector<8x256xbf16>,
    %c0_424 = arith.constant 0 : index
    %c145_425 = arith.constant 145 : index
    %581 = vector.load %arg13[%c0_424, %c145_425] : memref<72x512xf32, #tpu.memory_space<vmem>>, vector<8x256xf32>
    %c240_i32_426 = arith.constant 240 : i32
    %582 = vector.broadcast %c240_i32_426 : i32 to vector<8x256xi32>
    %583 = arith.cmpi slt, %0, %582 : vector<8x256xi32>
    %c15_i32_427 = arith.constant 15 : i32
    %584 = vector.broadcast %c15_i32_427 : i32 to vector<8x256xi32>
    %585 = arith.cmpi slt, %2, %584 : vector<8x256xi32>
    %586 = arith.andi %583, %585 : vector<8x256xi1>
    %cst_428 = arith.constant 0.000000e+00 : f32
    %587 = vector.broadcast %cst_428 : f32 to vector<8x256xf32>
    %588 = arith.select %586, %581, %587 : vector<8x256xi1>, vector<8x256xf32>
    %589 = arith.truncf %588 : vector<8x256xf32> to vector<8x256xbf16>
    %c64_429 = arith.constant 64 : index
    %c0_430 = arith.constant 0 : index
    %590 = vector.load %arg11[%c64_429, %c0_430] : memref<72x256xbf16, #tpu.memory_space<vmem>>, vector<8x256xbf16>
    tpu.vector_store %arg11[%c64_429, %c0_430], %589 {strides = array<i32>} : memref<72x256xbf16, #tpu.memory_space<vmem>>, vector<8x256xbf16>,
    %c0_431 = arith.constant 0 : index
    %c0_432 = arith.constant 0 : index
    %591 = vector.load %arg7[%c0_431, %c0_432] : memref<8x72xbf16, #tpu.memory_space<vmem>>, vector<8x72xbf16>
    %c0_433 = arith.constant 0 : index
    %c0_434 = arith.constant 0 : index
    %592 = vector.load %arg11[%c0_433, %c0_434] : memref<72x256xbf16, #tpu.memory_space<vmem>>, vector<72x256xbf16>
    %cst_435 = arith.constant dense<0.000000e+00> : vector<8x256xf32>
    %593 = tpu.matmul %591, %592, %cst_435 {dimension_numbers = #tpu.dot_dimension_numbers<[1], [0], [0], [1], [0, 0, 1, 1], [], []>} : vector<8x72xbf16>, vector<72x256xbf16>, vector<8x256xf32> -> vector<8x256xf32>
    %594 = arith.addf %469, %593 : vector<8x256xf32>
    %cst_436 = arith.constant 0.000000e+00 : f32
    %595 = vector.broadcast %cst_436 : f32 to vector<8x256xf32>
    %596 = arith.maximumf %594, %595 : vector<8x256xf32>
    %c0_437 = arith.constant 0 : index
    %c128_438 = arith.constant 128 : index
    %597 = vector.load %arg13[%c0_437, %c128_438] : memref<72x512xf32, #tpu.memory_space<vmem>>, vector<8x256xf32>
    tpu.vector_store %arg13[%c0_437, %c128_438], %596 {strides = array<i32>} : memref<72x512xf32, #tpu.memory_space<vmem>>, vector<8x256xf32>,
    %c0_439 = arith.constant 0 : index
    %c111_440 = arith.constant 111 : index
    %598 = vector.load %arg13[%c0_439, %c111_440] : memref<72x512xf32, #tpu.memory_space<vmem>>, vector<8x256xf32>
    %c16_i32_441 = arith.constant 16 : i32
    %599 = vector.broadcast %c16_i32_441 : i32 to vector<8x256xi32>
    %600 = arith.cmpi sge, %0, %599 : vector<8x256xi32>
    %c1_i32_442 = arith.constant 1 : i32
    %601 = vector.broadcast %c1_i32_442 : i32 to vector<8x256xi32>
    %602 = arith.cmpi sge, %2, %601 : vector<8x256xi32>
    %603 = arith.andi %600, %602 : vector<8x256xi1>
    %cst_443 = arith.constant 0.000000e+00 : f32
    %604 = vector.broadcast %cst_443 : f32 to vector<8x256xf32>
    %605 = arith.select %603, %598, %604 : vector<8x256xi1>, vector<8x256xf32>
    %606 = arith.truncf %605 : vector<8x256xf32> to vector<8x256xbf16>
    %c0_444 = arith.constant 0 : index
    %c0_445 = arith.constant 0 : index
    %607 = vector.load %arg11[%c0_444, %c0_445] : memref<72x256xbf16, #tpu.memory_space<vmem>>, vector<8x256xbf16>
    tpu.vector_store %arg11[%c0_444, %c0_445], %606 {strides = array<i32>} : memref<72x256xbf16, #tpu.memory_space<vmem>>, vector<8x256xbf16>,
    %c0_446 = arith.constant 0 : index
    %c112_447 = arith.constant 112 : index
    %608 = vector.load %arg13[%c0_446, %c112_447] : memref<72x512xf32, #tpu.memory_space<vmem>>, vector<8x256xf32>
    %c16_i32_448 = arith.constant 16 : i32
    %609 = vector.broadcast %c16_i32_448 : i32 to vector<8x256xi32>
    %610 = arith.cmpi sge, %0, %609 : vector<8x256xi32>
    %cst_449 = arith.constant 0.000000e+00 : f32
    %611 = vector.broadcast %cst_449 : f32 to vector<8x256xf32>
    %612 = arith.select %610, %608, %611 : vector<8x256xi1>, vector<8x256xf32>
    %613 = arith.truncf %612 : vector<8x256xf32> to vector<8x256xbf16>
    %c8_450 = arith.constant 8 : index
    %c0_451 = arith.constant 0 : index
    %614 = vector.load %arg11[%c8_450, %c0_451] : memref<72x256xbf16, #tpu.memory_space<vmem>>, vector<8x256xbf16>
    tpu.vector_store %arg11[%c8_450, %c0_451], %613 {strides = array<i32>} : memref<72x256xbf16, #tpu.memory_space<vmem>>, vector<8x256xbf16>,
    %c0_452 = arith.constant 0 : index
    %c113_453 = arith.constant 113 : index
    %615 = vector.load %arg13[%c0_452, %c113_453] : memref<72x512xf32, #tpu.memory_space<vmem>>, vector<8x256xf32>
    %c16_i32_454 = arith.constant 16 : i32
    %616 = vector.broadcast %c16_i32_454 : i32 to vector<8x256xi32>
    %617 = arith.cmpi sge, %0, %616 : vector<8x256xi32>
    %c15_i32_455 = arith.constant 15 : i32
    %618 = vector.broadcast %c15_i32_455 : i32 to vector<8x256xi32>
    %619 = arith.cmpi slt, %2, %618 : vector<8x256xi32>
    %620 = arith.andi %617, %619 : vector<8x256xi1>
    %cst_456 = arith.constant 0.000000e+00 : f32
    %621 = vector.broadcast %cst_456 : f32 to vector<8x256xf32>
    %622 = arith.select %620, %615, %621 : vector<8x256xi1>, vector<8x256xf32>
    %623 = arith.truncf %622 : vector<8x256xf32> to vector<8x256xbf16>
    %c16_457 = arith.constant 16 : index
    %c0_458 = arith.constant 0 : index
    %624 = vector.load %arg11[%c16_457, %c0_458] : memref<72x256xbf16, #tpu.memory_space<vmem>>, vector<8x256xbf16>
    tpu.vector_store %arg11[%c16_457, %c0_458], %623 {strides = array<i32>} : memref<72x256xbf16, #tpu.memory_space<vmem>>, vector<8x256xbf16>,
    %c0_459 = arith.constant 0 : index
    %c127_460 = arith.constant 127 : index
    %625 = vector.load %arg13[%c0_459, %c127_460] : memref<72x512xf32, #tpu.memory_space<vmem>>, vector<8x256xf32>
    %c1_i32_461 = arith.constant 1 : i32
    %626 = vector.broadcast %c1_i32_461 : i32 to vector<8x256xi32>
    %627 = arith.cmpi sge, %2, %626 : vector<8x256xi32>
    %cst_462 = arith.constant 0.000000e+00 : f32
    %628 = vector.broadcast %cst_462 : f32 to vector<8x256xf32>
    %629 = arith.select %627, %625, %628 : vector<8x256xi1>, vector<8x256xf32>
    %630 = arith.truncf %629 : vector<8x256xf32> to vector<8x256xbf16>
    %c24_463 = arith.constant 24 : index
    %c0_464 = arith.constant 0 : index
    %631 = vector.load %arg11[%c24_463, %c0_464] : memref<72x256xbf16, #tpu.memory_space<vmem>>, vector<8x256xbf16>
    tpu.vector_store %arg11[%c24_463, %c0_464], %630 {strides = array<i32>} : memref<72x256xbf16, #tpu.memory_space<vmem>>, vector<8x256xbf16>,
    %632 = arith.truncf %596 : vector<8x256xf32> to vector<8x256xbf16>
    %c32_465 = arith.constant 32 : index
    %c0_466 = arith.constant 0 : index
    %633 = vector.load %arg11[%c32_465, %c0_466] : memref<72x256xbf16, #tpu.memory_space<vmem>>, vector<8x256xbf16>
    tpu.vector_store %arg11[%c32_465, %c0_466], %632 {strides = array<i32>} : memref<72x256xbf16, #tpu.memory_space<vmem>>, vector<8x256xbf16>,
    %c0_467 = arith.constant 0 : index
    %c129_468 = arith.constant 129 : index
    %634 = vector.load %arg13[%c0_467, %c129_468] : memref<72x512xf32, #tpu.memory_space<vmem>>, vector<8x256xf32>
    %c15_i32_469 = arith.constant 15 : i32
    %635 = vector.broadcast %c15_i32_469 : i32 to vector<8x256xi32>
    %636 = arith.cmpi slt, %2, %635 : vector<8x256xi32>
    %cst_470 = arith.constant 0.000000e+00 : f32
    %637 = vector.broadcast %cst_470 : f32 to vector<8x256xf32>
    %638 = arith.select %636, %634, %637 : vector<8x256xi1>, vector<8x256xf32>
    %639 = arith.truncf %638 : vector<8x256xf32> to vector<8x256xbf16>
    %c40_471 = arith.constant 40 : index
    %c0_472 = arith.constant 0 : index
    %640 = vector.load %arg11[%c40_471, %c0_472] : memref<72x256xbf16, #tpu.memory_space<vmem>>, vector<8x256xbf16>
    tpu.vector_store %arg11[%c40_471, %c0_472], %639 {strides = array<i32>} : memref<72x256xbf16, #tpu.memory_space<vmem>>, vector<8x256xbf16>,
    %c0_473 = arith.constant 0 : index
    %c143_474 = arith.constant 143 : index
    %641 = vector.load %arg13[%c0_473, %c143_474] : memref<72x512xf32, #tpu.memory_space<vmem>>, vector<8x256xf32>
    %c240_i32_475 = arith.constant 240 : i32
    %642 = vector.broadcast %c240_i32_475 : i32 to vector<8x256xi32>
    %643 = arith.cmpi slt, %0, %642 : vector<8x256xi32>
    %c1_i32_476 = arith.constant 1 : i32
    %644 = vector.broadcast %c1_i32_476 : i32 to vector<8x256xi32>
    %645 = arith.cmpi sge, %2, %644 : vector<8x256xi32>
    %646 = arith.andi %643, %645 : vector<8x256xi1>
    %cst_477 = arith.constant 0.000000e+00 : f32
    %647 = vector.broadcast %cst_477 : f32 to vector<8x256xf32>
    %648 = arith.select %646, %641, %647 : vector<8x256xi1>, vector<8x256xf32>
    %649 = arith.truncf %648 : vector<8x256xf32> to vector<8x256xbf16>
    %c48_478 = arith.constant 48 : index
    %c0_479 = arith.constant 0 : index
    %650 = vector.load %arg11[%c48_478, %c0_479] : memref<72x256xbf16, #tpu.memory_space<vmem>>, vector<8x256xbf16>
    tpu.vector_store %arg11[%c48_478, %c0_479], %649 {strides = array<i32>} : memref<72x256xbf16, #tpu.memory_space<vmem>>, vector<8x256xbf16>,
    %c0_480 = arith.constant 0 : index
    %c144_481 = arith.constant 144 : index
    %651 = vector.load %arg13[%c0_480, %c144_481] : memref<72x512xf32, #tpu.memory_space<vmem>>, vector<8x256xf32>
    %c240_i32_482 = arith.constant 240 : i32
    %652 = vector.broadcast %c240_i32_482 : i32 to vector<8x256xi32>
    %653 = arith.cmpi slt, %0, %652 : vector<8x256xi32>
    %cst_483 = arith.constant 0.000000e+00 : f32
    %654 = vector.broadcast %cst_483 : f32 to vector<8x256xf32>
    %655 = arith.select %653, %651, %654 : vector<8x256xi1>, vector<8x256xf32>
    %656 = arith.truncf %655 : vector<8x256xf32> to vector<8x256xbf16>
    %c56_484 = arith.constant 56 : index
    %c0_485 = arith.constant 0 : index
    %657 = vector.load %arg11[%c56_484, %c0_485] : memref<72x256xbf16, #tpu.memory_space<vmem>>, vector<8x256xbf16>
    tpu.vector_store %arg11[%c56_484, %c0_485], %656 {strides = array<i32>} : memref<72x256xbf16, #tpu.memory_space<vmem>>, vector<8x256xbf16>,
    %c0_486 = arith.constant 0 : index
    %c145_487 = arith.constant 145 : index
    %658 = vector.load %arg13[%c0_486, %c145_487] : memref<72x512xf32, #tpu.memory_space<vmem>>, vector<8x256xf32>
    %c240_i32_488 = arith.constant 240 : i32
    %659 = vector.broadcast %c240_i32_488 : i32 to vector<8x256xi32>
    %660 = arith.cmpi slt, %0, %659 : vector<8x256xi32>
    %c15_i32_489 = arith.constant 15 : i32
    %661 = vector.broadcast %c15_i32_489 : i32 to vector<8x256xi32>
    %662 = arith.cmpi slt, %2, %661 : vector<8x256xi32>
    %663 = arith.andi %660, %662 : vector<8x256xi1>
    %cst_490 = arith.constant 0.000000e+00 : f32
    %664 = vector.broadcast %cst_490 : f32 to vector<8x256xf32>
    %665 = arith.select %663, %658, %664 : vector<8x256xi1>, vector<8x256xf32>
    %666 = arith.truncf %665 : vector<8x256xf32> to vector<8x256xbf16>
    %c64_491 = arith.constant 64 : index
    %c0_492 = arith.constant 0 : index
    %667 = vector.load %arg11[%c64_491, %c0_492] : memref<72x256xbf16, #tpu.memory_space<vmem>>, vector<8x256xbf16>
    tpu.vector_store %arg11[%c64_491, %c0_492], %666 {strides = array<i32>} : memref<72x256xbf16, #tpu.memory_space<vmem>>, vector<8x256xbf16>,
    %c0_493 = arith.constant 0 : index
    %c0_494 = arith.constant 0 : index
    %668 = vector.load %arg8[%c0_493, %c0_494] : memref<256x72xbf16, #tpu.memory_space<vmem>>, vector<128x72xbf16>
    %c0_495 = arith.constant 0 : index
    %c0_496 = arith.constant 0 : index
    %669 = vector.load %arg11[%c0_495, %c0_496] : memref<72x256xbf16, #tpu.memory_space<vmem>>, vector<72x256xbf16>
    %cst_497 = arith.constant dense<0.000000e+00> : vector<128x256xf32>
    %670 = tpu.matmul %668, %669, %cst_497 {dimension_numbers = #tpu.dot_dimension_numbers<[1], [0], [0], [1], [0, 0, 1, 1], [], []>} : vector<128x72xbf16>, vector<72x256xbf16>, vector<128x256xf32> -> vector<128x256xf32>
    %cst_498 = arith.constant 0.000000e+00 : f32
    %671 = vector.broadcast %cst_498 : f32 to vector<128x256xf32>
    %672 = arith.maximumf %670, %671 : vector<128x256xf32>
    %673 = arith.truncf %672 : vector<128x256xf32> to vector<128x256xbf16>
    %c0_499 = arith.constant 0 : index
    %c0_500 = arith.constant 0 : index
    %674 = vector.load %arg12[%c0_499, %c0_500] : memref<512x256xbf16, #tpu.memory_space<vmem>>, vector<128x256xbf16>
    tpu.vector_store %arg12[%c0_499, %c0_500], %673 {strides = array<i32>} : memref<512x256xbf16, #tpu.memory_space<vmem>>, vector<128x256xbf16>,
    %c128_501 = arith.constant 128 : index
    %c0_502 = arith.constant 0 : index
    %675 = vector.load %arg8[%c128_501, %c0_502] : memref<256x72xbf16, #tpu.memory_space<vmem>>, vector<128x72xbf16>
    %c0_503 = arith.constant 0 : index
    %c0_504 = arith.constant 0 : index
    %676 = vector.load %arg11[%c0_503, %c0_504] : memref<72x256xbf16, #tpu.memory_space<vmem>>, vector<72x256xbf16>
    %cst_505 = arith.constant dense<0.000000e+00> : vector<128x256xf32>
    %677 = tpu.matmul %675, %676, %cst_505 {dimension_numbers = #tpu.dot_dimension_numbers<[1], [0], [0], [1], [0, 0, 1, 1], [], []>} : vector<128x72xbf16>, vector<72x256xbf16>, vector<128x256xf32> -> vector<128x256xf32>
    %cst_506 = arith.constant 0.000000e+00 : f32
    %678 = vector.broadcast %cst_506 : f32 to vector<128x256xf32>
    %679 = arith.maximumf %677, %678 : vector<128x256xf32>
    %680 = arith.truncf %679 : vector<128x256xf32> to vector<128x256xbf16>
    %c128_507 = arith.constant 128 : index
    %c0_508 = arith.constant 0 : index
    %681 = vector.load %arg12[%c128_507, %c0_508] : memref<512x256xbf16, #tpu.memory_space<vmem>>, vector<128x256xbf16>
    tpu.vector_store %arg12[%c128_507, %c0_508], %680 {strides = array<i32>} : memref<512x256xbf16, #tpu.memory_space<vmem>>, vector<128x256xbf16>,
    %c0_509 = arith.constant 0 : index
    %c0_510 = arith.constant 0 : index
    %682 = vector.load %arg9[%c0_509, %c0_510] : memref<72x256xbf16, #tpu.memory_space<vmem>>, vector<72x256xbf16>
    %c0_511 = arith.constant 0 : index
    %c0_512 = arith.constant 0 : index
    %683 = vector.load %arg12[%c0_511, %c0_512] : memref<512x256xbf16, #tpu.memory_space<vmem>>, vector<256x256xbf16>
    %cst_513 = arith.constant dense<0.000000e+00> : vector<72x256xf32>
    %684 = tpu.matmul %682, %683, %cst_513 {dimension_numbers = #tpu.dot_dimension_numbers<[1], [0], [0], [1], [0, 0, 1, 1], [], []>} : vector<72x256xbf16>, vector<256x256xbf16>, vector<72x256xf32> -> vector<72x256xf32>
    %c0_514 = arith.constant 0 : index
    %c128_515 = arith.constant 128 : index
    %685 = vector.load %arg13[%c0_514, %c128_515] : memref<72x512xf32, #tpu.memory_space<vmem>>, vector<72x256xf32>
    tpu.vector_store %arg13[%c0_514, %c128_515], %684 {strides = array<i32>} : memref<72x512xf32, #tpu.memory_space<vmem>>, vector<72x256xf32>,
    %cst_516 = arith.constant 0.000000e+00 : f32
    %686 = vector.broadcast %cst_516 : f32 to vector<8x256xf32>
    %c0_517 = arith.constant 0 : index
    %c111_518 = arith.constant 111 : index
    %687 = vector.load %arg13[%c0_517, %c111_518] : memref<72x512xf32, #tpu.memory_space<vmem>>, vector<8x256xf32>
    %c16_i32_519 = arith.constant 16 : i32
    %688 = vector.broadcast %c16_i32_519 : i32 to vector<8x256xi32>
    %689 = arith.cmpi sge, %0, %688 : vector<8x256xi32>
    %c1_i32_520 = arith.constant 1 : i32
    %690 = vector.broadcast %c1_i32_520 : i32 to vector<8x256xi32>
    %691 = arith.cmpi sge, %2, %690 : vector<8x256xi32>
    %692 = arith.andi %689, %691 : vector<8x256xi1>
    %cst_521 = arith.constant 0.000000e+00 : f32
    %693 = vector.broadcast %cst_521 : f32 to vector<8x256xf32>
    %694 = arith.select %692, %687, %693 : vector<8x256xi1>, vector<8x256xf32>
    %695 = arith.addf %686, %694 : vector<8x256xf32>
    %c8_522 = arith.constant 8 : index
    %c112_523 = arith.constant 112 : index
    %696 = vector.load %arg13[%c8_522, %c112_523] : memref<72x512xf32, #tpu.memory_space<vmem>>, vector<8x256xf32>
    %c16_i32_524 = arith.constant 16 : i32
    %697 = vector.broadcast %c16_i32_524 : i32 to vector<8x256xi32>
    %698 = arith.cmpi sge, %0, %697 : vector<8x256xi32>
    %cst_525 = arith.constant 0.000000e+00 : f32
    %699 = vector.broadcast %cst_525 : f32 to vector<8x256xf32>
    %700 = arith.select %698, %696, %699 : vector<8x256xi1>, vector<8x256xf32>
    %701 = arith.addf %695, %700 : vector<8x256xf32>
    %c16_526 = arith.constant 16 : index
    %c113_527 = arith.constant 113 : index
    %702 = vector.load %arg13[%c16_526, %c113_527] : memref<72x512xf32, #tpu.memory_space<vmem>>, vector<8x256xf32>
    %c16_i32_528 = arith.constant 16 : i32
    %703 = vector.broadcast %c16_i32_528 : i32 to vector<8x256xi32>
    %704 = arith.cmpi sge, %0, %703 : vector<8x256xi32>
    %c15_i32_529 = arith.constant 15 : i32
    %705 = vector.broadcast %c15_i32_529 : i32 to vector<8x256xi32>
    %706 = arith.cmpi slt, %2, %705 : vector<8x256xi32>
    %707 = arith.andi %704, %706 : vector<8x256xi1>
    %cst_530 = arith.constant 0.000000e+00 : f32
    %708 = vector.broadcast %cst_530 : f32 to vector<8x256xf32>
    %709 = arith.select %707, %702, %708 : vector<8x256xi1>, vector<8x256xf32>
    %710 = arith.addf %701, %709 : vector<8x256xf32>
    %c24_531 = arith.constant 24 : index
    %c127_532 = arith.constant 127 : index
    %711 = vector.load %arg13[%c24_531, %c127_532] : memref<72x512xf32, #tpu.memory_space<vmem>>, vector<8x256xf32>
    %c1_i32_533 = arith.constant 1 : i32
    %712 = vector.broadcast %c1_i32_533 : i32 to vector<8x256xi32>
    %713 = arith.cmpi sge, %2, %712 : vector<8x256xi32>
    %cst_534 = arith.constant 0.000000e+00 : f32
    %714 = vector.broadcast %cst_534 : f32 to vector<8x256xf32>
    %715 = arith.select %713, %711, %714 : vector<8x256xi1>, vector<8x256xf32>
    %716 = arith.addf %710, %715 : vector<8x256xf32>
    %c32_535 = arith.constant 32 : index
    %c128_536 = arith.constant 128 : index
    %717 = vector.load %arg13[%c32_535, %c128_536] : memref<72x512xf32, #tpu.memory_space<vmem>>, vector<8x256xf32>
    %718 = arith.addf %716, %717 : vector<8x256xf32>
    %c40_537 = arith.constant 40 : index
    %c129_538 = arith.constant 129 : index
    %719 = vector.load %arg13[%c40_537, %c129_538] : memref<72x512xf32, #tpu.memory_space<vmem>>, vector<8x256xf32>
    %c15_i32_539 = arith.constant 15 : i32
    %720 = vector.broadcast %c15_i32_539 : i32 to vector<8x256xi32>
    %721 = arith.cmpi slt, %2, %720 : vector<8x256xi32>
    %cst_540 = arith.constant 0.000000e+00 : f32
    %722 = vector.broadcast %cst_540 : f32 to vector<8x256xf32>
    %723 = arith.select %721, %719, %722 : vector<8x256xi1>, vector<8x256xf32>
    %724 = arith.addf %718, %723 : vector<8x256xf32>
    %c48_541 = arith.constant 48 : index
    %c143_542 = arith.constant 143 : index
    %725 = vector.load %arg13[%c48_541, %c143_542] : memref<72x512xf32, #tpu.memory_space<vmem>>, vector<8x256xf32>
    %c240_i32_543 = arith.constant 240 : i32
    %726 = vector.broadcast %c240_i32_543 : i32 to vector<8x256xi32>
    %727 = arith.cmpi slt, %0, %726 : vector<8x256xi32>
    %c1_i32_544 = arith.constant 1 : i32
    %728 = vector.broadcast %c1_i32_544 : i32 to vector<8x256xi32>
    %729 = arith.cmpi sge, %2, %728 : vector<8x256xi32>
    %730 = arith.andi %727, %729 : vector<8x256xi1>
    %cst_545 = arith.constant 0.000000e+00 : f32
    %731 = vector.broadcast %cst_545 : f32 to vector<8x256xf32>
    %732 = arith.select %730, %725, %731 : vector<8x256xi1>, vector<8x256xf32>
    %733 = arith.addf %724, %732 : vector<8x256xf32>
    %c56_546 = arith.constant 56 : index
    %c144_547 = arith.constant 144 : index
    %734 = vector.load %arg13[%c56_546, %c144_547] : memref<72x512xf32, #tpu.memory_space<vmem>>, vector<8x256xf32>
    %c240_i32_548 = arith.constant 240 : i32
    %735 = vector.broadcast %c240_i32_548 : i32 to vector<8x256xi32>
    %736 = arith.cmpi slt, %0, %735 : vector<8x256xi32>
    %cst_549 = arith.constant 0.000000e+00 : f32
    %737 = vector.broadcast %cst_549 : f32 to vector<8x256xf32>
    %738 = arith.select %736, %734, %737 : vector<8x256xi1>, vector<8x256xf32>
    %739 = arith.addf %733, %738 : vector<8x256xf32>
    %c64_550 = arith.constant 64 : index
    %c145_551 = arith.constant 145 : index
    %740 = vector.load %arg13[%c64_550, %c145_551] : memref<72x512xf32, #tpu.memory_space<vmem>>, vector<8x256xf32>
    %c240_i32_552 = arith.constant 240 : i32
    %741 = vector.broadcast %c240_i32_552 : i32 to vector<8x256xi32>
    %742 = arith.cmpi slt, %0, %741 : vector<8x256xi32>
    %c15_i32_553 = arith.constant 15 : i32
    %743 = vector.broadcast %c15_i32_553 : i32 to vector<8x256xi32>
    %744 = arith.cmpi slt, %2, %743 : vector<8x256xi32>
    %745 = arith.andi %742, %744 : vector<8x256xi1>
    %cst_554 = arith.constant 0.000000e+00 : f32
    %746 = vector.broadcast %cst_554 : f32 to vector<8x256xf32>
    %747 = arith.select %745, %740, %746 : vector<8x256xi1>, vector<8x256xf32>
    %748 = arith.addf %739, %747 : vector<8x256xf32>
    %749 = arith.addf %594, %748 : vector<8x256xf32>
    %c0_555 = arith.constant 0 : index
    %c0_556 = arith.constant 0 : index
    %c0_557 = arith.constant 0 : index
    %750 = vector.load %arg10[%c0_555, %c0_556, %c0_557] : memref<1x8x256xf32, #tpu.memory_space<vmem>>, vector<1x8x256xf32>
    %751 = vector.shape_cast %750 : vector<1x8x256xf32> to vector<8x256xf32>
    %752 = vector.shape_cast %749 : vector<8x256xf32> to vector<1x8x256xf32>
    tpu.vector_store %arg10[%c0_555, %c0_556, %c0_557], %752 {strides = array<i32>} : memref<1x8x256xf32, #tpu.memory_space<vmem>>, vector<1x8x256xf32>,
    return
  }
  func.func @transform_0(%arg0: i32) -> (i32, i32, i32) {
    %c0_i32 = arith.constant 0 : i32
    %c0_i32_0 = arith.constant 0 : i32
    %c0_i32_1 = arith.constant 0 : i32
    return %arg0, %c0_i32, %c0_i32_0 : i32, i32, i32
  }
  func.func @transform_1(%arg0: i32) -> (i32, i32) {
    %c0_i32 = arith.constant 0 : i32
    %c0_i32_0 = arith.constant 0 : i32
    %c0_i32_1 = arith.constant 0 : i32
    return %c0_i32, %c0_i32_0 : i32, i32
  }
  func.func @transform_2(%arg0: i32) -> (i32, i32) {
    %c0_i32 = arith.constant 0 : i32
    %c0_i32_0 = arith.constant 0 : i32
    %c0_i32_1 = arith.constant 0 : i32
    return %c0_i32, %c0_i32_0 : i32, i32
  }
  func.func @transform_3(%arg0: i32) -> (i32, i32) {
    %c0_i32 = arith.constant 0 : i32
    %c0_i32_0 = arith.constant 0 : i32
    %c0_i32_1 = arith.constant 0 : i32
    return %c0_i32, %c0_i32_0 : i32, i32
  }
  func.func @transform_4(%arg0: i32) -> (i32, i32) {
    %c0_i32 = arith.constant 0 : i32
    %c0_i32_0 = arith.constant 0 : i32
    %c0_i32_1 = arith.constant 0 : i32
    return %c0_i32, %c0_i32_0 : i32, i32
  }
  func.func @transform_5(%arg0: i32) -> (i32, i32) {
    %c0_i32 = arith.constant 0 : i32
    %c0_i32_0 = arith.constant 0 : i32
    %c0_i32_1 = arith.constant 0 : i32
    return %c0_i32, %c0_i32_0 : i32, i32
  }
  func.func @transform_6(%arg0: i32) -> (i32, i32) {
    %c0_i32 = arith.constant 0 : i32
    %c0_i32_0 = arith.constant 0 : i32
    %c0_i32_1 = arith.constant 0 : i32
    return %c0_i32, %c0_i32_0 : i32, i32
  }
  func.func @transform_7(%arg0: i32) -> (i32, i32) {
    %c0_i32 = arith.constant 0 : i32
    %c0_i32_0 = arith.constant 0 : i32
    %c0_i32_1 = arith.constant 0 : i32
    return %c0_i32, %c0_i32_0 : i32, i32
  }
  func.func @transform_8(%arg0: i32) -> (i32, i32) {
    %c0_i32 = arith.constant 0 : i32
    %c0_i32_0 = arith.constant 0 : i32
    %c0_i32_1 = arith.constant 0 : i32
    return %c0_i32, %c0_i32_0 : i32, i32
  }
  func.func @transform_9(%arg0: i32) -> (i32, i32, i32) {
    %c0_i32 = arith.constant 0 : i32
    %c0_i32_0 = arith.constant 0 : i32
    %c0_i32_1 = arith.constant 0 : i32
    return %arg0, %c0_i32, %c0_i32_0 : i32, i32, i32
  }
}

</mosaic_0001>

<bundles_post_ra>
// kernel: refinenet_block_idx4.1
= control target key start
LH: loop header
LB: loop body
LE: loop exit
PB: predicated region body
PF: predicated region fallthrough
CT: control target
= control target key end

     0   :  { %s9533_s30 = smov 0   ;;  %s11173_s0 = inlined_call_operand.vmem [shape: f32[2,8,256], index: 0, kind: input, shape index: {}]   ;;  %s11174_s1 = inlined_call_operand.vmem [shape: bf16[512,72], index: 1, kind: input, shape index: {}]   ;;  %s11175_s2 = inlined_call_operand.vmem [shape: bf16[72,512], index: 2, kind: input, shape index: {}]   ;;  %s11176_s3 = inlined_call_operand.vmem [shape: bf16[512,72], index: 3, kind: input, shape index: {}]   ;;  %s11177_s4 = inlined_call_operand.vmem [shape: bf16[72,512], index: 4, kind: input, shape index: {}]   ;;  %s11178_s5 = inlined_call_operand.vmem [shape: bf16[8,72], index: 5, kind: input, shape index: {}]   ;;  %s11179_s6 = inlined_call_operand.vmem [shape: bf16[8,72], index: 6, kind: input, shape index: {}]   ;;  %s11180_s7 = inlined_call_operand.vmem [shape: bf16[256,72], index: 7, kind: input, shape index: {}]   ;;  %s11181_s8 = inlined_call_operand.vmem [shape: bf16[72,256], index: 8, kind: input, shape index: {}]   ;;  %s11182_s9 = inlined_call_operand.vmem [shape: f32[2,8,256], index: 9, kind: output, shape index: {}]  }
   0x1 LB: > { %s7184_s10 = sadd.s32 4294967295, %s9469_s30   ;;  %p7188_p0 = scmp.ge.s32.totalorder %s9469_s30, 1  ;;  %s9469_s30 = sphi %s9533_s30, %s19_s30  }
   0x2   : > { %p287_p1 = scmp.lt.s32.totalorder %s9469_s30, 3 }
   0x4   : > { %p288_p2 = pnand %p7188_p0, %p287_p1 }
   0x5   : > { %s9471_s11 = smov (!%p288_p2), 113   ;;  %s9472_s12 = smov (!%p288_p2), 111  }
   0x6   : > { %291 = sbr.rel (%p288_p2) target bundleno = 3947 (0xf6b), region = 56  ;;  %p323_p3 = scmp.lt.s32.totalorder (!%p288_p2), %s7184_s10, 1 }
   0x7   : > { %s9473_s17 = smov (!%p288_p2), 127   ;;  %s9474_s18 = smov (!%p288_p2), 112  }
   0x8   : > { %s9475_s19 = smov (!%p288_p2), 1   ;;  %s9476_s20 = smov (!%p288_p2), 15  }
   0x9   : > { %s9477_s21 = smov (!%p288_p2), 17   ;;  %s9478_s22 = smov (!%p288_p2), 16  }
   0xa   : > { %s9479_s14 = smov (!%p288_p2), 2   ;;  %s9480_s15 = smov (!%p288_p2), 126  }
   0xb   : > { %v464_v0 = vld [vmem:[#allocation4 + $0x70] sm:$0xff]  ;;  %s11439_s10 = smov (!%p323_p3, %s7184_s10), 1  ;;  %v418_v7 = vld [vmem:[#allocation4] sm:$0xff]  ;;  %v334_v9 = vlaneseq  ;;  %vm11186_vm0 = vcmask 916480   ;;  %vm11191_vm3 = vcmask 908288   ;;  %vm11192_vm7 = vcmask 924672  }
   0xc   : > { %476 = vrot.lane.b32.xlu1 %v464_v0, %s9471_s11  ;;  %520 = vrot.lane.b32.xlu0 %v464_v0, %s9472_s12  ;;  %s8863_s13 = sshll.u32 %s11439_s10, 4  ;;  %vm11193_vm10 = vcmask 1039360   ;;  %vm11183_vm12 = vcmask 1043456   ;;  %vm11200_vm13 = vcmask 121856   ;;  %vm430_vm15 = vcmask 7168   ;;  %s9481_s23 = smov 32  }
   0xd   : > { %s9551_s16 = scalar_lea.vmem %s11173_s0, %s8863_s13  ;;  %v9569_v10 = vand.u32 127, %v334_v9  ;;  %s9482_s24 = smov 96  }
   0xe   : > { %v339_v1 = vld [vmem:[%s9551_s16] sm:$0xff]  ;;  %v340_v2 = vld [vmem:[%s9551_s16 + $0x8] sm:$0xff] }
   0xf   : > { %v341_v3 = vmax.f32 %v339_v1, 0.0  ;;  %v342_v4 = vmax.f32 %v340_v2, 0.0  ;;  %v9572_v12 = vadd.s32 128, %v9569_v10  ;;  %v9583_v25 = vand.u32 15, %v9569_v10 }
  0x10   : > { %vm11188_vm11 = vcmp.ge.s32.totalorder %v9569_v10, 16 }
  0x11   : > { %v9261_v5 = vpack.i.bf16 %v342_v4, %v341_v3  ;;  %v9271_v6 = vpack.i.bf16 %v464_v0, %v342_v4  ;;  %v9286_v8 = vpack.i.bf16 %v341_v3, %v418_v7  ;;  %vm11184_vm1 = vcmp.lt.s32.totalorder %v9572_v12, 240 }
  0x12   : > { %v439_v17 = vpack.c.bf16 %v342_v4, %v341_v3  ;;  %v9580_v23 = vand.u32 15, %v9572_v12  ;;  %vm11185_vm4 = vcmp.lt.s32.totalorder %v9583_v25, 15  ;;  %vm350_vm8 = vcmp.ge.s32.totalorder %v9583_v25, 1 }
  0x13   : > { %9272 = vrot.lane.b32.xlu2 %v9271_v6, %s9474_s18  ;;  %vm9634_vm14 = vmand %vm11188_vm11, %vm11185_vm4 }
  0x14   : > { %451 = vrot.lane.b32.xlu1 %v464_v0, %s9473_s17  ;;  %9262 = vrot.lane.b32.xlu0 %v9261_v5, %s9472_s12  ;;  %440 = vst [vmem:[#allocation2 + $0x20] sm:$0xff] %v439_v17  ;;  %vm397_vm2 = vcmp.lt.s32.totalorder %v9580_v23, 15  ;;  %vm351_vm6 = vcmp.ge.s32.totalorder %v9580_v23, 1 }
  0x15   : > { %vm9591_vm5 = vmand %vm11184_vm1, %vm397_vm2 }
  0x16   : > { %vm9607_vm9 = vmand %vm11184_vm1, %vm351_vm6 }
  0x1b   : > { %493 = vrot.lane.b32.xlu2 %v341_v3, %s9474_s18 }
  0x1c   : > { %9267 = vrot.lane.b32.xlu1 %v9261_v5, %s9471_s11  ;;  %9277 = vrot.lane.b32.xlu0 %v9261_v5, %s9473_s17 }
  0x23   : > { %9282 = vrot.lane.b32.xlu2 %v9286_v8, %s9476_s20 }
  0x24   : > { %9287 = vrot.lane.b32.xlu1 %v9286_v8, %s9475_s19  ;;  %407 = vrot.lane.b32.xlu0 %v342_v4, %s9476_s20 }
  0x2b   : > { %428 = vrot.lane.b32.xlu2 %v342_v4, %s9475_s19 }
  0x2c   : > { %361 = vrot.lane.b32.xlu1 %v342_v4, %s9477_s21  ;;  %9292 = vrot.lane.b32.xlu0 %v9286_v8, %s9477_s21 }
  0x33   : > { %9297 = vrot.lane.b32.xlu2 %v9286_v8, %s9478_s22 }
  0x34   : > { %382 = vrot.lane.b32.xlu0 %v342_v4, %s9478_s22 }
  0x6d   : > { %v9273_v11 = vpop.permute.xlu2 %9272 }
  0x6e   : > { %v9275_v13 = vunpack.i.h.bf16 %v9273_v11  ;;  %v9274_v14 = vunpack.i.l.bf16 %v9273_v11 }
  0x70   : > { %v501_v15 = vsel %vm11186_vm0, %v9274_v14, %v9275_v13 }
  0x71   : > { %v505_v16 = vsel %vm11184_vm1, %v501_v15, 0.0  ;;  %vm11189_vm1 = vcmask 130048  }
  0x75   : > { %v494_v18 = vpop.permute.xlu2 %493 }
  0x76   : > { %v500_v19 = vsel %vm11186_vm0, %v494_v18, %v9274_v14  ;;  %vm11187_vm0 = vcmask 588800  }
  0x77   : > { %v506_v20 = vpack.c.bf16 %v505_v16, %v500_v19 }
  0x79   : > { %507 = vst [vmem:[#allocation2 + $0x38] sm:$0xff] %v506_v20 }
  0x7d   : > { %v9283_v32 = vpop.permute.xlu2 %9282 }
  0x7e   : > { %v477_v21 = vpop.permute.xlu1 %476  ;;  %v521_v22 = vpop.permute.xlu0 %520  ;;  %v9285_v45 = vunpack.i.h.bf16 %v9283_v32  ;;  %v9284_v46 = vunpack.i.l.bf16 %v9283_v32  ;;  %v7323_v32 = vld [vmem:[#allocation2 + $0x20] sm:$0xf] }
  0x80   : > { %v410_v63 = vsel %vm11200_vm13, %v9284_v46, %v9285_v45  ;;  %v8880_v11 = vld [vmem:[#allocation2 + $0x34] sm:$0xf0]  ;;  %v7253_v15 = vld [vmem:[#allocation2 + $0x38] sm:$0xf0] }
  0x81   : > { %v414_v4 = vsel %vm9634_vm14, %v410_v63, 0.0  ;;  %v8896_v16 = vld [vmem:[#allocation2 + $0x34] sm:$0xf0] }
  0x85   : > { %v429_v0 = vpop.permute.xlu2 %428 }
  0x86   : > { %v452_v24 = vpop.permute.xlu1 %451  ;;  %v9263_v26 = vpop.permute.xlu0 %9262 }
  0x87   : > { %v9265_v28 = vunpack.i.h.bf16 %v9263_v26  ;;  %v9264_v29 = vunpack.i.l.bf16 %v9263_v26 }
  0x89   : > { %v524_v30 = vsel %vm11191_vm3, %v9265_v28, %v521_v22  ;;  %v523_v31 = vsel %vm11191_vm3, %v9264_v29, %v9265_v28  ;;  %v8877_v22 = vld [vmem:[#allocation2 + $0x24] sm:$0xf] }
  0x8a   : > { %v528_v33 = vsel %vm9591_vm5, %v524_v30, 0.0  ;;  %v527_v34 = vsel %vm11185_vm4, %v523_v31, 0.0  ;;  %v7333_v30 = vld [vmem:[#allocation2 + $0x38] sm:$0xf0] }
  0x8b   : > { %v529_v35 = vpack.c.bf16 %v528_v33, %v527_v34  ;;  %v8893_v33 = vld [vmem:[#allocation2 + $0x24] sm:$0xf] }
  0x8d   : > { %v621_v40 = vunpack.c.l.b16 %v529_v35  ;;  %v622_v41 = vunpack.c.h.b16 %v529_v35  ;;  %v9298_v34 = vpop.permute.xlu2 %9297 }
  0x8e   : > { %v9268_v36 = vpop.permute.xlu1 %9267  ;;  %v9278_v44 = vpop.permute.xlu0 %9277 }
  0x8f   : > { %v9270_v38 = vunpack.i.h.bf16 %v9268_v36  ;;  %v9269_v39 = vunpack.i.l.bf16 %v9268_v36  ;;  %v9280_v49 = vunpack.i.h.bf16 %v9278_v44  ;;  %v9279_v50 = vunpack.i.l.bf16 %v9278_v44 }
  0x90   : > { %v631_v52 = vpack.c.b16 %v621_v40, %v621_v40  ;;  %v632_v53 = vpack.c.b16 %v622_v41, %v622_v41  ;;  %v9300_v44 = vunpack.i.h.bf16 %v9298_v34 }
  0x91   : > { %v480_v42 = vsel %vm11192_vm7, %v9270_v38, %v477_v21  ;;  %v479_v43 = vsel %vm11192_vm7, %v9269_v39, %v9270_v38  ;;  %v455_v54 = vsel %vm11193_vm10, %v9280_v49, %v452_v24  ;;  %v454_v55 = vsel %vm11193_vm10, %v9279_v50, %v9280_v49  ;;  %v7243_v21 = vld [vmem:[#allocation2 + $0x20] sm:$0xf] }
  0x92   : > { %v484_v47 = vsel %vm9607_vm9, %v480_v42, 0.0  ;;  %v483_v48 = vsel %vm350_vm8, %v479_v43, 0.0  ;;  %v459_v56 = vsel %vm397_vm2, %v455_v54, 0.0  ;;  %v458_v57 = vsel %vm11185_vm4, %v454_v55, 0.0  ;;  %vm9658_vm4 = vmand %vm11188_vm11, %vm350_vm8 }
  0x93   : > { %v485_v51 = vpack.c.bf16 %v484_v47, %v483_v48  ;;  %v9625_v58 = vsel %vm11183_vm12, %v631_v52, 0  ;;  %v9628_v59 = vsel %vm11183_vm12, %v632_v53, 0  ;;  %v460_v60 = vpack.c.bf16 %v459_v56, %v458_v57 }
  0x94   : > { %676 = vmatpush.bf16.msra.mxu0 %v9625_v58  ;;  %725 = vmatpush.bf16.msra.mxu1 %v9628_v59  ;;  %vm11190_vm12 = vcmask 138240  }
  0x95   : > { %486 = vst [vmem:[#allocation2 + $0x30] sm:$0xff] %v485_v51  ;;  %978 = vmatpush.bf16.msra.mxu2 %v9625_v58  ;;  %1027 = vmatpush.bf16.msra.mxu3 %v9628_v59 }
  0x96   : > { %v9288_v61 = vpop.permute.xlu1 %9287  ;;  %461 = vst [vmem:[#allocation2 + $0x28] sm:$0xff] %v460_v60  ;;  %v408_v3 = vpop.permute.xlu0 %407 }
  0x97   : > { %v9290_v1 = vunpack.i.h.bf16 %v9288_v61  ;;  %v9289_v2 = vunpack.i.l.bf16 %v9288_v61  ;;  %v411_v7 = vsel %vm11200_vm13, %v9285_v45, %v408_v3  ;;  %v9299_v45 = vunpack.i.l.bf16 %v9298_v34 }
  0x98   : > { %v415_v13 = vsel %vm397_vm2, %v411_v7, 0.0 }
  0x99   : > { %v431_v5 = vsel %vm430_vm15, %v9289_v2, %v9290_v1  ;;  %v432_v6 = vsel %vm430_vm15, %v9290_v1, %v429_v0  ;;  %v416_v17 = vpack.c.bf16 %v415_v13, %v414_v4  ;;  %v385_v63 = vsel %vm11189_vm1, %v9299_v45, %v9300_v44 }
  0x9a   : > { %v435_v8 = vsel %vm350_vm8, %v431_v5, 0.0  ;;  %v436_v9 = vsel %vm351_vm6, %v432_v6, 0.0 }
  0x9b   : > { %v437_v14 = vpack.c.bf16 %v436_v9, %v435_v8  ;;  %417 = vst [vmem:[#allocation2 + $0x10] sm:$0xff] %v416_v17  ;;  %v389_v8 = vsel %vm11188_vm11, %v385_v63, 0.0 }
  0x9c   : > { %v7251_v18 = vld [vmem:[#allocation2 + $0x30] sm:$0xf]  ;;  %v8879_v19 = vld [vmem:[#allocation2 + $0x34] sm:$0xf] }
  0x9d   : > { %v7331_v20 = vld [vmem:[#allocation2 + $0x30] sm:$0xf]  ;;  %438 = vst [vmem:[#allocation2 + $0x18] sm:$0xff] %v437_v14  ;;  %v7252_v24 = vor.u32 %v8880_v11, %v7251_v18  ;;  %v7256_v26 = vor.u32 %v8879_v19, %v7253_v15  ;;  %v8895_v29 = vld [vmem:[#allocation2 + $0x34] sm:$0xf] }
  0x9e   : > { %v7332_v28 = vor.u32 %v8896_v16, %v7331_v20  ;;  %v7336_v31 = vor.u32 %v8895_v29, %v7333_v30  ;;  %v8878_v35 = vld [vmem:[#allocation2 + $0x24] sm:$0xf0]  ;;  %v7245_v36 = vld [vmem:[#allocation2 + $0x28] sm:$0xf0]  ;;  %v9293_v40 = vpop.permute.xlu0 %9292  ;;  %v362_v41 = vpop.permute.xlu1 %361  ;;  %v8865_v29 = vld [vmem:[%s11174_s1] sm:$0xff] }
  0x9f   : > { %677 = vmatpush.bf16.msra.mxu0 %v7252_v24  ;;  %726 = vmatpush.bf16.msra.mxu1 %v7256_v26  ;;  %v8894_v38 = vld [vmem:[#allocation2 + $0x24] sm:$0xf0]  ;;  %v7325_v39 = vld [vmem:[#allocation2 + $0x28] sm:$0xf0]  ;;  %v7244_v42 = vor.u32 %v8878_v35, %v7243_v21  ;;  %v7248_v43 = vor.u32 %v8877_v22, %v7245_v36  ;;  %v9295_v46 = vunpack.i.h.bf16 %v9293_v40  ;;  %v9294_v47 = vunpack.i.l.bf16 %v9293_v40  ;;  %v8881_v30 = vld [vmem:[%s11174_s1 + $0x40] sm:$0xff] }
  0xa0   : > { %979 = vmatpush.bf16.msra.mxu2 %v7332_v28  ;;  %1028 = vmatpush.bf16.msra.mxu3 %v7336_v31  ;;  %v7324_v49 = vor.u32 %v8894_v38, %v7323_v32  ;;  %v7328_v50 = vor.u32 %v8893_v33, %v7325_v39  ;;  %v7411_v31 = vld [vmem:[#allocation2 + $0x30] sm:$0xf]  ;;  %v8911_v32 = vld [vmem:[#allocation2 + $0x34] sm:$0xf]  ;;  %v8912_v35 = vld [vmem:[#allocation2 + $0x34] sm:$0xf0] }
  0xa1   : > { %v364_v51 = vsel %vm11190_vm12, %v9294_v47, %v9295_v46  ;;  %v365_v52 = vsel %vm11190_vm12, %v9295_v46, %v362_v41  ;;  %v7491_v33 = vld [vmem:[#allocation2 + $0x30] sm:$0xf]  ;;  %v8927_v34 = vld [vmem:[#allocation2 + $0x34] sm:$0xf]  ;;  %v7413_v36 = vld [vmem:[#allocation2 + $0x38] sm:$0xf0]  ;;  %v7412_v39 = vor.u32 %v8912_v35, %v7411_v31 }
  0xa2   : > { %v368_v56 = vsel %vm9658_vm4, %v364_v51, 0.0  ;;  %v369_v57 = vsel %vm351_vm6, %v365_v52, 0.0  ;;  %v7235_v60 = vld [vmem:[#allocation2 + $0x10] sm:$0xf]  ;;  %v8875_v61 = vld [vmem:[#allocation2 + $0x14] sm:$0xf]  ;;  %v7416_v40 = vor.u32 %v8911_v32, %v7413_v36 }
  0xa3   : > { %678 = vmatpush.bf16.msra.mxu0 %v7244_v42  ;;  %727 = vmatpush.bf16.msra.mxu1 %v7248_v43  ;;  %v370_v0 = vpack.c.bf16 %v369_v57, %v368_v56  ;;  %v7315_v3 = vld [vmem:[#allocation2 + $0x10] sm:$0xf]  ;;  %v8891_v4 = vld [vmem:[#allocation2 + $0x14] sm:$0xf]  ;;  %v7403_v38 = vld [vmem:[#allocation2 + $0x20] sm:$0xf] }
  0xa4   : > { %980 = vmatpush.bf16.msra.mxu2 %v7324_v49  ;;  %1029 = vmatpush.bf16.msra.mxu3 %v7328_v50  ;;  %v8876_v53 = vld [vmem:[#allocation2 + $0x14] sm:$0xf0]  ;;  %v7237_v54 = vld [vmem:[#allocation2 + $0x18] sm:$0xf0]  ;;  %v8909_v43 = vld [vmem:[#allocation2 + $0x24] sm:$0xf] }
  0xa5   : > { %v8892_v55 = vld [vmem:[#allocation2 + $0x14] sm:$0xf0]  ;;  %v7236_v1 = vor.u32 %v8876_v53, %v7235_v60  ;;  %v7240_v2 = vor.u32 %v8875_v61, %v7237_v54  ;;  %v7317_v5 = vld [vmem:[#allocation2 + $0x18] sm:$0xf0]  ;;  %371 = vst [vmem:[#allocation2] sm:$0xff] %v370_v0  ;;  %v8870_v31 = vld [vmem:[%s11174_s1 + $0x28] sm:$0xff] }
  0xa6   : > { %v7316_v6 = vor.u32 %v8892_v55, %v7315_v3  ;;  %v7320_v7 = vor.u32 %v8891_v4, %v7317_v5  ;;  %v383_v9 = vpop.permute.xlu0 %382  ;;  %v8928_v41 = vld [vmem:[#allocation2 + $0x34] sm:$0xf0]  ;;  %v7493_v42 = vld [vmem:[#allocation2 + $0x38] sm:$0xf0]  ;;  %v8910_v45 = vld [vmem:[#allocation2 + $0x24] sm:$0xf0] }
  0xa7   : > { %679 = vmatpush.bf16.msra.mxu0 %v7236_v1  ;;  %728 = vmatpush.bf16.msra.mxu1 %v7240_v2  ;;  %v386_v11 = vsel %vm11189_vm1, %v9300_v44, %v383_v9  ;;  %v7492_v44 = vor.u32 %v8928_v41, %v7491_v33  ;;  %v7483_v46 = vld [vmem:[#allocation2 + $0x20] sm:$0xf]  ;;  %v8926_v47 = vld [vmem:[#allocation2 + $0x24] sm:$0xf0]  ;;  %v8925_v49 = vld [vmem:[#allocation2 + $0x24] sm:$0xf]  ;;  %v7404_v51 = vor.u32 %v8910_v45, %v7403_v38 }
  0xa8   : > { %981 = vmatpush.bf16.msra.mxu2 %v7316_v6  ;;  %1030 = vmatpush.bf16.msra.mxu3 %v7320_v7  ;;  %v391_v13 = vpack.c.bf16 %v386_v11, %v389_v8  ;;  %v7485_v50 = vld [vmem:[#allocation2 + $0x28] sm:$0xf0]  ;;  %v7395_v53 = vld [vmem:[#allocation2 + $0x10] sm:$0xf]  ;;  %v8908_v54 = vld [vmem:[#allocation2 + $0x14] sm:$0xf0]  ;;  %v7484_v55 = vor.u32 %v8926_v47, %v7483_v46 }
  0xa9   : > { %v7488_v56 = vor.u32 %v8925_v49, %v7485_v50  ;;  %v8907_v57 = vld [vmem:[#allocation2 + $0x14] sm:$0xf]  ;;  %v7397_v60 = vld [vmem:[#allocation2 + $0x18] sm:$0xf0]  ;;  %v7475_v61 = vld [vmem:[#allocation2 + $0x10] sm:$0xf]  ;;  %v7396_v2 = vor.u32 %v8908_v54, %v7395_v53 }
  0xaa   : > { %392 = vst [vmem:[#allocation2 + $0x8] sm:$0xff] %v391_v13  ;;  %v8924_v63 = vld [vmem:[#allocation2 + $0x14] sm:$0xf0]  ;;  %v8923_v0 = vld [vmem:[#allocation2 + $0x14] sm:$0xf]  ;;  %v7400_v3 = vor.u32 %v8907_v57, %v7397_v60  ;;  %v8886_v32 = vld [vmem:[%s11174_s1 + $0x68] sm:$0xff] }
  0xab   : > { %v7477_v1 = vld [vmem:[#allocation2 + $0x18] sm:$0xf0]  ;;  %v7476_v4 = vor.u32 %v8924_v63, %v7475_v61  ;;  %v8871_v33 = vld [vmem:[%s11174_s1 + $0x30] sm:$0xff]  ;;  %v8897_v38 = vld [vmem:[%s11174_s1 + $0x80] sm:$0xff] }
  0xac   : > { %v7227_v14 = vld [vmem:[#allocation2] sm:$0xf]  ;;  %v8873_v15 = vld [vmem:[#allocation2 + $0x4] sm:$0xf]  ;;  %v7480_v5 = vor.u32 %v8923_v0, %v7477_v1  ;;  %v8872_v35 = vld [vmem:[%s11174_s1 + $0x38] sm:$0xff] }
  0xad   : > { %v7307_v16 = vld [vmem:[#allocation2] sm:$0xf]  ;;  %v8889_v24 = vld [vmem:[#allocation2 + $0x4] sm:$0xf]  ;;  %v8888_v36 = vld [vmem:[%s11174_s1 + $0x78] sm:$0xff] }
  0xae   : > { %v7387_v11 = vld [vmem:[#allocation2] sm:$0xf]  ;;  %v8905_v13 = vld [vmem:[#allocation2 + $0x4] sm:$0xf]  ;;  %v8914_v0 = vld [vmem:[%s11174_s1 + $0xc8] sm:$0xff] }
  0xaf   : > { %v8913_v41 = vld [vmem:[%s11174_s1 + $0xc0] sm:$0xff] }
  0xb1   : > { %v8874_v17 = vld [vmem:[#allocation2 + $0x4] sm:$0xf0]  ;;  %v7229_v18 = vld [vmem:[#allocation2 + $0x8] sm:$0xf0] }
  0xb2   : > { %v8890_v19 = vld [vmem:[#allocation2 + $0x4] sm:$0xf0]  ;;  %v7228_v20 = vor.u32 %v8874_v17, %v7227_v14  ;;  %v7232_v21 = vor.u32 %v8873_v15, %v7229_v18  ;;  %v7309_v26 = vld [vmem:[#allocation2 + $0x8] sm:$0xf0]  ;;  %v8921_v17 = vld [vmem:[#allocation2 + $0x4] sm:$0xf] }
  0xb3   : > { %v7308_v22 = vor.u32 %v8890_v19, %v7307_v16  ;;  %v7312_v28 = vor.u32 %v8889_v24, %v7309_v26  ;;  %v8906_v6 = vld [vmem:[#allocation2 + $0x4] sm:$0xf0]  ;;  %v7389_v7 = vld [vmem:[#allocation2 + $0x8] sm:$0xf0]  ;;  %v7467_v16 = vld [vmem:[#allocation2] sm:$0xf] }
  0xb4   : > { %680 = vmatpush.bf16.msra.mxu0 %v7228_v20  ;;  %729 = vmatpush.bf16.msra.mxu1 %v7232_v21  ;;  %v8922_v8 = vld [vmem:[#allocation2 + $0x4] sm:$0xf0]  ;;  %v7469_v9 = vld [vmem:[#allocation2 + $0x8] sm:$0xf0]  ;;  %v7388_v14 = vor.u32 %v8906_v6, %v7387_v11  ;;  %v7392_v15 = vor.u32 %v8905_v13, %v7389_v7  ;;  %v8883_v24 = vld [vmem:[%s11174_s1 + $0x50] sm:$0xff] }
  0xb5   : > { %982 = vmatpush.bf16.msra.mxu2 %v7308_v22  ;;  %1031 = vmatpush.bf16.msra.mxu3 %v7312_v28  ;;  %v8866_v18 = vld [vmem:[%s11174_s1 + $0x8] sm:$0xff]  ;;  %v7468_v19 = vor.u32 %v8922_v8, %v7467_v16  ;;  %v7472_v20 = vor.u32 %v8921_v17, %v7469_v9  ;;  %v8867_v22 = vld [vmem:[%s11174_s1 + $0x10] sm:$0xff]  ;;  %v8868_v26 = vld [vmem:[%s11174_s1 + $0x18] sm:$0xff] }
  0xb6   : > { %v8882_v21 = vld [vmem:[%s11174_s1 + $0x48] sm:$0xff]  ;;  %v8884_v28 = vld [vmem:[%s11174_s1 + $0x58] sm:$0xff] }
  0xb7   : > { %7257 = vmatmul.msk.bf16.vlgmr.msra.gmra.mxu0 %vm11187_vm0, %v8865_v29  ;;  %7265 = vmatmul.msk.bf16.vlgmr.msra.gmra.mxu1 %vm11187_vm0, %v8865_v29  ;;  %v8869_v29 = vld [vmem:[%s11174_s1 + $0x20] sm:$0xff] }
  0xb8   : > { %1280 = vmatpush.bf16.msrb.mxu0 %v9625_v58  ;;  %1329 = vmatpush.bf16.msrb.mxu1 %v9628_v59 }
  0xb9   : > { %1582 = vmatpush.bf16.msrb.mxu2 %v9625_v58  ;;  %1631 = vmatpush.bf16.msrb.mxu3 %v9628_v59  ;;  %v7496_v58 = vor.u32 %v8927_v34, %v7493_v42  ;;  %v7405_v59 = vld [vmem:[#allocation2 + $0x28] sm:$0xf0]  ;;  %v8887_v34 = vld [vmem:[%s11174_s1 + $0x70] sm:$0xff] }
  0xba   : > { %7337 = vmatmul.msk.bf16.vlgmr.msra.gmra.mxu2 %vm11187_vm0, %v8881_v30  ;;  %7345 = vmatmul.msk.bf16.vlgmr.msra.gmra.mxu3 %vm11187_vm0, %v8881_v30  ;;  %v7408_v52 = vor.u32 %v8909_v43, %v7405_v59  ;;  %v8885_v30 = vld [vmem:[%s11174_s1 + $0x60] sm:$0xff] }
  0xbc   : > { %1281 = vmatpush.bf16.msrb.mxu0 %v7412_v39  ;;  %1330 = vmatpush.bf16.msrb.mxu1 %v7416_v40 }
  0xbd   : > { %1583 = vmatpush.bf16.msrb.mxu2 %v7492_v44  ;;  %1632 = vmatpush.bf16.msrb.mxu3 %v7496_v58 }
  0xc0   : > { %1282 = vmatpush.bf16.msrb.mxu0 %v7404_v51  ;;  %1331 = vmatpush.bf16.msrb.mxu1 %v7408_v52 }
  0xc1   : > { %1584 = vmatpush.bf16.msrb.mxu2 %v7484_v55  ;;  %1633 = vmatpush.bf16.msrb.mxu3 %v7488_v56  ;;  %v8898_v56 = vld [vmem:[%s11174_s1 + $0x88] sm:$0xff] }
  0xc4   : > { %1283 = vmatpush.bf16.msrb.mxu0 %v7396_v2  ;;  %1332 = vmatpush.bf16.msrb.mxu1 %v7400_v3 }
  0xc5   : > { %1585 = vmatpush.bf16.msrb.mxu2 %v7476_v4  ;;  %1634 = vmatpush.bf16.msrb.mxu3 %v7480_v5 }
  0xc7   : > { %7258 = vmatmul.msk.bf16.gmra.mxu0 %vm11187_vm0, %v8866_v18  ;;  %7266 = vmatmul.msk.bf16.gmra.mxu1 %vm11187_vm0, %v8866_v18 }
  0xc8   : > { %1284 = vmatpush.bf16.msrb.mxu0 %v7388_v14  ;;  %1333 = vmatpush.bf16.msrb.mxu1 %v7392_v15 }
  0xc9   : > { %1586 = vmatpush.bf16.msrb.mxu2 %v7468_v19  ;;  %1635 = vmatpush.bf16.msrb.mxu3 %v7472_v20  ;;  %v8899_v19 = vld [vmem:[%s11174_s1 + $0x90] sm:$0xff] }
  0xca   : > { %7338 = vmatmul.msk.bf16.gmra.mxu2 %vm11187_vm0, %v8882_v21  ;;  %7346 = vmatmul.msk.bf16.gmra.mxu3 %vm11187_vm0, %v8882_v21 }
  0xd7   : > { %7259 = vmatmul.msk.bf16.gmra.mxu0 %vm11187_vm0, %v8867_v22  ;;  %7267 = vmatmul.msk.bf16.gmra.mxu1 %vm11187_vm0, %v8867_v22 }
  0xda   : > { %7339 = vmatmul.msk.bf16.gmra.mxu2 %vm11187_vm0, %v8883_v24  ;;  %7347 = vmatmul.msk.bf16.gmra.mxu3 %vm11187_vm0, %v8883_v24 }
  0xe7   : > { %7260 = vmatmul.msk.bf16.gmra.mxu0 %vm11187_vm0, %v8868_v26  ;;  %7268 = vmatmul.msk.bf16.gmra.mxu1 %vm11187_vm0, %v8868_v26  ;;  %v8915_v26 = vld [vmem:[%s11174_s1 + $0xd0] sm:$0xff] }
  0xea   : > { %7340 = vmatmul.msk.bf16.gmra.mxu2 %vm11187_vm0, %v8884_v28  ;;  %7348 = vmatmul.msk.bf16.gmra.mxu3 %vm11187_vm0, %v8884_v28 }
  0xf7   : > { %7261 = vmatmul.msk.bf16.gmra.mxu0 %vm11187_vm0, %v8869_v29  ;;  %7269 = vmatmul.msk.bf16.gmra.mxu1 %vm11187_vm0, %v8869_v29 }
  0xfa   : > { %7341 = vmatmul.msk.bf16.gmra.mxu2 %vm11187_vm0, %v8885_v30  ;;  %7349 = vmatmul.msk.bf16.gmra.mxu3 %vm11187_vm0, %v8885_v30 }
 0x107   : > { %7262 = vmatmul.msk.bf16.gmra.mxu0 %vm11187_vm0, %v8870_v31  ;;  %7270 = vmatmul.msk.bf16.gmra.mxu1 %vm11187_vm0, %v8870_v31 }
 0x10a   : > { %7342 = vmatmul.msk.bf16.gmra.mxu2 %vm11187_vm0, %v8886_v32  ;;  %7350 = vmatmul.msk.bf16.gmra.mxu3 %vm11187_vm0, %v8886_v32 }
 0x117   : > { %7263 = vmatmul.msk.bf16.gmra.mxu0 %vm11187_vm0, %v8871_v33  ;;  %7271 = vmatmul.msk.bf16.gmra.mxu1 %vm11187_vm0, %v8871_v33 }
 0x11a   : > { %7343 = vmatmul.msk.bf16.gmra.mxu2 %vm11187_vm0, %v8887_v34  ;;  %7351 = vmatmul.msk.bf16.gmra.mxu3 %vm11187_vm0, %v8887_v34 }
 0x127   : > { %7264 = vmatmul.msk.bf16.gmra.mxu0 %vm11187_vm0, %v8872_v35  ;;  %7272 = vmatmul.msk.bf16.gmra.mxu1 %vm11187_vm0, %v8872_v35 }
 0x12a   : > { %7344 = vmatmul.msk.bf16.gmra.mxu2 %vm11187_vm0, %v8888_v36  ;;  %7352 = vmatmul.msk.bf16.gmra.mxu3 %vm11187_vm0, %v8888_v36 }
 0x134   : > { %v682_v39 = vpop.f32.mrf.mxu0  ;;  %v731_v40 = vpop.f32.mrf.mxu1 }
 0x135   : > { %v771_v42 = vmax.f32 %v682_v39, 0.0  ;;  %v772_v43 = vmax.f32 %v731_v40, 0.0 }
 0x137   : > { %v803_v44 = vpack.c.bf16 %v772_v43, %v771_v42  ;;  %7417 = vmatmul.msk.bf16.vlgmr.msrb.gmra.mxu0 %vm11187_vm0, %v8897_v38  ;;  %7425 = vmatmul.msk.bf16.vlgmr.msrb.gmra.mxu1 %vm11187_vm0, %v8897_v38 }
 0x139   : > { %819 = vst [vmem:[#allocation3] sm:$0xff] %v803_v44 }
 0x13a   : > { %7497 = vmatmul.msk.bf16.vlgmr.msrb.gmra.mxu2 %vm11187_vm0, %v8913_v41  ;;  %7505 = vmatmul.msk.bf16.vlgmr.msrb.gmra.mxu3 %vm11187_vm0, %v8913_v41 }
 0x13c   : > { %v684_v47 = vpop.f32.mrf.mxu0  ;;  %v733_v49 = vpop.f32.mrf.mxu1 }
 0x13d   : > { %v984_v58 = vpop.f32.mrf.mxu2  ;;  %v1033_v45 = vpop.f32.mrf.mxu3  ;;  %v773_v50 = vmax.f32 %v684_v47, 0.0  ;;  %v774_v51 = vmax.f32 %v733_v49, 0.0  ;;  %v8916_v49 = vld [vmem:[%s11174_s1 + $0xd8] sm:$0xff] }
 0x13e   : > { %v1073_v59 = vmax.f32 %v984_v58, 0.0  ;;  %v1074_v46 = vmax.f32 %v1033_v45, 0.0  ;;  %v8900_v58 = vld [vmem:[%s11174_s1 + $0x98] sm:$0xff] }
 0x13f   : > { %v804_v53 = vpack.c.bf16 %v774_v51, %v773_v50 }
 0x140   : > { %v1105_v52 = vpack.c.bf16 %v1074_v46, %v1073_v59 }
 0x141   : > { %820 = vst [vmem:[#allocation3 + $0x8] sm:$0xff] %v804_v53 }
 0x142   : > { %1121 = vst [vmem:[#allocation3 + $0x80] sm:$0xff] %v1105_v52 }
 0x144   : > { %v687_v61 = vpop.f32.mrf.mxu0  ;;  %v736_v63 = vpop.f32.mrf.mxu1 }
 0x145   : > { %v986_v54 = vpop.f32.mrf.mxu2  ;;  %v1035_v55 = vpop.f32.mrf.mxu3  ;;  %v775_v1 = vmax.f32 %v687_v61, 0.0  ;;  %v776_v2 = vmax.f32 %v736_v63, 0.0 }
 0x146   : > { %v1075_v57 = vmax.f32 %v986_v54, 0.0  ;;  %v1076_v60 = vmax.f32 %v1035_v55, 0.0 }
 0x147   : > { %v805_v4 = vpack.c.bf16 %v776_v2, %v775_v1  ;;  %7418 = vmatmul.msk.bf16.gmra.mxu0 %vm11187_vm0, %v8898_v56  ;;  %7426 = vmatmul.msk.bf16.gmra.mxu1 %vm11187_vm0, %v8898_v56 }
 0x148   : > { %v1106_v3 = vpack.c.bf16 %v1076_v60, %v1075_v57 }
 0x149   : > { %821 = vst [vmem:[#allocation3 + $0x10] sm:$0xff] %v805_v4 }
 0x14a   : > { %1122 = vst [vmem:[#allocation3 + $0x88] sm:$0xff] %v1106_v3  ;;  %7498 = vmatmul.msk.bf16.gmra.mxu2 %vm11187_vm0, %v8914_v0  ;;  %7506 = vmatmul.msk.bf16.gmra.mxu3 %vm11187_vm0, %v8914_v0 }
 0x14c   : > { %v689_v9 = vpop.f32.mrf.mxu0  ;;  %v738_v11 = vpop.f32.mrf.mxu1 }
 0x14d   : > { %v989_v5 = vpop.f32.mrf.mxu2  ;;  %v1038_v6 = vpop.f32.mrf.mxu3  ;;  %v777_v13 = vmax.f32 %v689_v9, 0.0  ;;  %v778_v14 = vmax.f32 %v738_v11, 0.0  ;;  %v8917_v11 = vld [vmem:[%s11174_s1 + $0xe0] sm:$0xff] }
 0x14e   : > { %v1077_v7 = vmax.f32 %v989_v5, 0.0  ;;  %v1078_v8 = vmax.f32 %v1038_v6, 0.0  ;;  %v8901_v5 = vld [vmem:[%s11174_s1 + $0xa0] sm:$0xff] }
 0x14f   : > { %v806_v16 = vpack.c.bf16 %v778_v14, %v777_v13 }
 0x150   : > { %v1107_v15 = vpack.c.bf16 %v1078_v8, %v1077_v7 }
 0x151   : > { %822 = vst [vmem:[#allocation3 + $0x18] sm:$0xff] %v806_v16 }
 0x152   : > { %1123 = vst [vmem:[#allocation3 + $0x90] sm:$0xff] %v1107_v15 }
 0x154   : > { %v692_v22 = vpop.f32.mrf.mxu0  ;;  %v741_v24 = vpop.f32.mrf.mxu1 }
 0x155   : > { %v991_v17 = vpop.f32.mrf.mxu2  ;;  %v1040_v18 = vpop.f32.mrf.mxu3  ;;  %v779_v28 = vmax.f32 %v692_v22, 0.0  ;;  %v780_v29 = vmax.f32 %v741_v24, 0.0 }
 0x156   : > { %v1079_v20 = vmax.f32 %v991_v17, 0.0  ;;  %v1080_v21 = vmax.f32 %v1040_v18, 0.0 }
 0x157   : > { %v807_v31 = vpack.c.bf16 %v780_v29, %v779_v28  ;;  %7419 = vmatmul.msk.bf16.gmra.mxu0 %vm11187_vm0, %v8899_v19  ;;  %7427 = vmatmul.msk.bf16.gmra.mxu1 %vm11187_vm0, %v8899_v19 }
 0x158   : > { %v1108_v30 = vpack.c.bf16 %v1080_v21, %v1079_v20 }
 0x159   : > { %823 = vst [vmem:[#allocation3 + $0x20] sm:$0xff] %v807_v31 }
 0x15a   : > { %1124 = vst [vmem:[#allocation3 + $0x98] sm:$0xff] %v1108_v30  ;;  %7499 = vmatmul.msk.bf16.gmra.mxu2 %vm11187_vm0, %v8915_v26  ;;  %7507 = vmatmul.msk.bf16.gmra.mxu3 %vm11187_vm0, %v8915_v26 }
 0x15c   : > { %v694_v36 = vpop.f32.mrf.mxu0  ;;  %v743_v38 = vpop.f32.mrf.mxu1 }
 0x15d   : > { %v994_v32 = vpop.f32.mrf.mxu2  ;;  %v1043_v33 = vpop.f32.mrf.mxu3  ;;  %v781_v39 = vmax.f32 %v694_v36, 0.0  ;;  %v782_v40 = vmax.f32 %v743_v38, 0.0  ;;  %v8918_v38 = vld [vmem:[%s11174_s1 + $0xe8] sm:$0xff] }
 0x15e   : > { %v1081_v34 = vmax.f32 %v994_v32, 0.0  ;;  %v1082_v35 = vmax.f32 %v1043_v33, 0.0  ;;  %v8902_v32 = vld [vmem:[%s11174_s1 + $0xa8] sm:$0xff] }
 0x15f   : > { %v808_v42 = vpack.c.bf16 %v782_v40, %v781_v39 }
 0x160   : > { %v1109_v41 = vpack.c.bf16 %v1082_v35, %v1081_v34 }
 0x161   : > { %824 = vst [vmem:[#allocation3 + $0x28] sm:$0xff] %v808_v42 }
 0x162   : > { %1125 = vst [vmem:[#allocation3 + $0xa0] sm:$0xff] %v1109_v41 }
 0x164   : > { %v697_v46 = vpop.f32.mrf.mxu0  ;;  %v746_v47 = vpop.f32.mrf.mxu1 }
 0x165   : > { %v996_v43 = vpop.f32.mrf.mxu2  ;;  %v1045_v44 = vpop.f32.mrf.mxu3  ;;  %v783_v50 = vmax.f32 %v697_v46, 0.0  ;;  %v784_v51 = vmax.f32 %v746_v47, 0.0 }
 0x166   : > { %v1083_v45 = vmax.f32 %v996_v43, 0.0  ;;  %v1084_v59 = vmax.f32 %v1045_v44, 0.0 }
 0x167   : > { %v809_v53 = vpack.c.bf16 %v784_v51, %v783_v50  ;;  %7420 = vmatmul.msk.bf16.gmra.mxu0 %vm11187_vm0, %v8900_v58  ;;  %7428 = vmatmul.msk.bf16.gmra.mxu1 %vm11187_vm0, %v8900_v58 }
 0x168   : > { %v1110_v52 = vpack.c.bf16 %v1084_v59, %v1083_v45 }
 0x169   : > { %825 = vst [vmem:[#allocation3 + $0x30] sm:$0xff] %v809_v53 }
 0x16a   : > { %1126 = vst [vmem:[#allocation3 + $0xa8] sm:$0xff] %v1110_v52  ;;  %7500 = vmatmul.msk.bf16.gmra.mxu2 %vm11187_vm0, %v8916_v49  ;;  %7508 = vmatmul.msk.bf16.gmra.mxu3 %vm11187_vm0, %v8916_v49 }
 0x16c   : > { %v699_v60 = vpop.f32.mrf.mxu0  ;;  %v748_v61 = vpop.f32.mrf.mxu1 }
 0x16d   : > { %v999_v54 = vpop.f32.mrf.mxu2  ;;  %v1048_v55 = vpop.f32.mrf.mxu3  ;;  %v785_v63 = vmax.f32 %v699_v60, 0.0  ;;  %v786_v0 = vmax.f32 %v748_v61, 0.0  ;;  %v8919_v61 = vld [vmem:[%s11174_s1 + $0xf0] sm:$0xff] }
 0x16e   : > { %v1085_v56 = vmax.f32 %v999_v54, 0.0  ;;  %v1086_v57 = vmax.f32 %v1048_v55, 0.0  ;;  %v8903_v54 = vld [vmem:[%s11174_s1 + $0xb0] sm:$0xff] }
 0x16f   : > { %v810_v2 = vpack.c.bf16 %v786_v0, %v785_v63 }
 0x170   : > { %v1111_v1 = vpack.c.bf16 %v1086_v57, %v1085_v56 }
 0x171   : > { %826 = vst [vmem:[#allocation3 + $0x38] sm:$0xff] %v810_v2 }
 0x172   : > { %1127 = vst [vmem:[#allocation3 + $0xb0] sm:$0xff] %v1111_v1 }
 0x174   : > { %v702_v8 = vpop.f32.mrf.mxu0  ;;  %v751_v9 = vpop.f32.mrf.mxu1 }
 0x175   : > { %v1001_v3 = vpop.f32.mrf.mxu2  ;;  %v1050_v4 = vpop.f32.mrf.mxu3  ;;  %v787_v13 = vmax.f32 %v702_v8, 0.0  ;;  %v788_v14 = vmax.f32 %v751_v9, 0.0 }
 0x176   : > { %v1087_v6 = vmax.f32 %v1001_v3, 0.0  ;;  %v1088_v7 = vmax.f32 %v1050_v4, 0.0 }
 0x177   : > { %v811_v16 = vpack.c.bf16 %v788_v14, %v787_v13  ;;  %7421 = vmatmul.msk.bf16.gmra.mxu0 %vm11187_vm0, %v8901_v5  ;;  %7429 = vmatmul.msk.bf16.gmra.mxu1 %vm11187_vm0, %v8901_v5 }
 0x178   : > { %v1112_v15 = vpack.c.bf16 %v1088_v7, %v1087_v6 }
 0x179   : > { %827 = vst [vmem:[#allocation3 + $0x40] sm:$0xff] %v811_v16 }
 0x17a   : > { %1128 = vst [vmem:[#allocation3 + $0xb8] sm:$0xff] %v1112_v15  ;;  %7501 = vmatmul.msk.bf16.gmra.mxu2 %vm11187_vm0, %v8917_v11  ;;  %7509 = vmatmul.msk.bf16.gmra.mxu3 %vm11187_vm0, %v8917_v11 }
 0x17c   : > { %v704_v21 = vpop.f32.mrf.mxu0  ;;  %v753_v22 = vpop.f32.mrf.mxu1 }
 0x17d   : > { %v1004_v17 = vpop.f32.mrf.mxu2  ;;  %v1053_v18 = vpop.f32.mrf.mxu3  ;;  %v789_v24 = vmax.f32 %v704_v21, 0.0  ;;  %v790_v26 = vmax.f32 %v753_v22, 0.0  ;;  %v8920_v22 = vld [vmem:[%s11174_s1 + $0xf8] sm:$0xff] }
 0x17e   : > { %v1089_v19 = vmax.f32 %v1004_v17, 0.0  ;;  %v1090_v20 = vmax.f32 %v1053_v18, 0.0  ;;  %v8904_v17 = vld [vmem:[%s11174_s1 + $0xb8] sm:$0xff] }
 0x17f   : > { %v812_v29 = vpack.c.bf16 %v790_v26, %v789_v24 }
 0x180   : > { %v1113_v28 = vpack.c.bf16 %v1090_v20, %v1089_v19 }
 0x181   : > { %828 = vst [vmem:[#allocation3 + $0x48] sm:$0xff] %v812_v29 }
 0x182   : > { %1129 = vst [vmem:[#allocation3 + $0xc0] sm:$0xff] %v1113_v28 }
 0x184   : > { %v707_v35 = vpop.f32.mrf.mxu0  ;;  %v756_v36 = vpop.f32.mrf.mxu1 }
 0x185   : > { %v1006_v30 = vpop.f32.mrf.mxu2  ;;  %v1055_v31 = vpop.f32.mrf.mxu3  ;;  %v791_v39 = vmax.f32 %v707_v35, 0.0  ;;  %v792_v40 = vmax.f32 %v756_v36, 0.0 }
 0x186   : > { %v1091_v33 = vmax.f32 %v1006_v30, 0.0  ;;  %v1092_v34 = vmax.f32 %v1055_v31, 0.0 }
 0x187   : > { %v813_v42 = vpack.c.bf16 %v792_v40, %v791_v39  ;;  %7422 = vmatmul.msk.bf16.gmra.mxu0 %vm11187_vm0, %v8902_v32  ;;  %7430 = vmatmul.msk.bf16.gmra.mxu1 %vm11187_vm0, %v8902_v32 }
 0x188   : > { %v1114_v41 = vpack.c.bf16 %v1092_v34, %v1091_v33 }
 0x189   : > { %829 = vst [vmem:[#allocation3 + $0x50] sm:$0xff] %v813_v42 }
 0x18a   : > { %1130 = vst [vmem:[#allocation3 + $0xc8] sm:$0xff] %v1114_v41  ;;  %7502 = vmatmul.msk.bf16.gmra.mxu2 %vm11187_vm0, %v8918_v38  ;;  %7510 = vmatmul.msk.bf16.gmra.mxu3 %vm11187_vm0, %v8918_v38 }
 0x18c   : > { %v709_v59 = vpop.f32.mrf.mxu0  ;;  %v758_v46 = vpop.f32.mrf.mxu1 }
 0x18d   : > { %v1009_v43 = vpop.f32.mrf.mxu2  ;;  %v1058_v44 = vpop.f32.mrf.mxu3  ;;  %v793_v47 = vmax.f32 %v709_v59, 0.0  ;;  %v794_v49 = vmax.f32 %v758_v46, 0.0 }
 0x18e   : > { %v1093_v58 = vmax.f32 %v1009_v43, 0.0  ;;  %v1094_v45 = vmax.f32 %v1058_v44, 0.0 }
 0x18f   : > { %v814_v51 = vpack.c.bf16 %v794_v49, %v793_v47 }
 0x190   : > { %v1115_v50 = vpack.c.bf16 %v1094_v45, %v1093_v58 }
 0x191   : > { %830 = vst [vmem:[#allocation3 + $0x58] sm:$0xff] %v814_v51 }
 0x192   : > { %1131 = vst [vmem:[#allocation3 + $0xd0] sm:$0xff] %v1115_v50 }
 0x194   : > { %v712_v57 = vpop.f32.mrf.mxu0  ;;  %v761_v60 = vpop.f32.mrf.mxu1 }
 0x195   : > { %v1011_v52 = vpop.f32.mrf.mxu2  ;;  %v1060_v53 = vpop.f32.mrf.mxu3  ;;  %v795_v63 = vmax.f32 %v712_v57, 0.0  ;;  %v796_v0 = vmax.f32 %v761_v60, 0.0 }
 0x196   : > { %v1095_v55 = vmax.f32 %v1011_v52, 0.0  ;;  %v1096_v56 = vmax.f32 %v1060_v53, 0.0 }
 0x197   : > { %v815_v2 = vpack.c.bf16 %v796_v0, %v795_v63  ;;  %7423 = vmatmul.msk.bf16.gmra.mxu0 %vm11187_vm0, %v8903_v54  ;;  %7431 = vmatmul.msk.bf16.gmra.mxu1 %vm11187_vm0, %v8903_v54 }
 0x198   : > { %v1116_v1 = vpack.c.bf16 %v1096_v56, %v1095_v55 }
 0x199   : > { %831 = vst [vmem:[#allocation3 + $0x60] sm:$0xff] %v815_v2 }
 0x19a   : > { %1132 = vst [vmem:[#allocation3 + $0xd8] sm:$0xff] %v1116_v1  ;;  %7503 = vmatmul.msk.bf16.gmra.mxu2 %vm11187_vm0, %v8919_v61  ;;  %7511 = vmatmul.msk.bf16.gmra.mxu3 %vm11187_vm0, %v8919_v61 }
 0x19c   : > { %v714_v7 = vpop.f32.mrf.mxu0  ;;  %v763_v8 = vpop.f32.mrf.mxu1 }
 0x19d   : > { %v1014_v3 = vpop.f32.mrf.mxu2  ;;  %v1063_v4 = vpop.f32.mrf.mxu3  ;;  %v797_v9 = vmax.f32 %v714_v7, 0.0  ;;  %v798_v11 = vmax.f32 %v763_v8, 0.0 }
 0x19e   : > { %v1097_v5 = vmax.f32 %v1014_v3, 0.0  ;;  %v1098_v6 = vmax.f32 %v1063_v4, 0.0  ;;  %v8956_v4 = vld [vmem:[#allocation3 + $0x54] sm:$0xf0] }
 0x19f   : > { %v816_v14 = vpack.c.bf16 %v798_v11, %v797_v9  ;;  %v7619_v9 = vld [vmem:[#allocation3 + $0x50] sm:$0xf] }
 0x1a0   : > { %v1117_v13 = vpack.c.bf16 %v1098_v6, %v1097_v5  ;;  %v7627_v63 = vld [vmem:[#allocation3 + $0x60] sm:$0xf]  ;;  %v7620_v11 = vor.u32 %v8956_v4, %v7619_v9 }
 0x1a1   : > { %832 = vst [vmem:[#allocation3 + $0x68] sm:$0xff] %v816_v14  ;;  %v8954_v14 = vld [vmem:[#allocation3 + $0x44] sm:$0xf0] }
 0x1a2   : > { %1133 = vst [vmem:[#allocation3 + $0xe0] sm:$0xff] %v1117_v13 }
 0x1a4   : > { %v717_v20 = vpop.f32.mrf.mxu0  ;;  %v766_v21 = vpop.f32.mrf.mxu1 }
 0x1a5   : > { %v1016_v15 = vpop.f32.mrf.mxu2  ;;  %v1065_v16 = vpop.f32.mrf.mxu3  ;;  %v799_v24 = vmax.f32 %v717_v20, 0.0  ;;  %v800_v26 = vmax.f32 %v766_v21, 0.0 }
 0x1a6   : > { %v1099_v18 = vmax.f32 %v1016_v15, 0.0  ;;  %v1100_v19 = vmax.f32 %v1065_v16, 0.0 }
 0x1a7   : > { %v817_v29 = vpack.c.bf16 %v800_v26, %v799_v24  ;;  %7424 = vmatmul.msk.bf16.gmra.mxu0 %vm11187_vm0, %v8904_v17  ;;  %7432 = vmatmul.msk.bf16.gmra.mxu1 %vm11187_vm0, %v8904_v17  ;;  %v7611_v24 = vld [vmem:[#allocation3 + $0x40] sm:$0xf] }
 0x1a8   : > { %v1118_v28 = vpack.c.bf16 %v1100_v19, %v1099_v18  ;;  %v8958_v53 = vld [vmem:[#allocation3 + $0x64] sm:$0xf0] }
 0x1a9   : > { %833 = vst [vmem:[#allocation3 + $0x70] sm:$0xff] %v817_v29  ;;  %v7628_v2 = vor.u32 %v8958_v53, %v7627_v63  ;;  %v7691_v17 = vld [vmem:[#allocation3 + $0xe0] sm:$0xf]  ;;  %v7612_v29 = vor.u32 %v8954_v14, %v7611_v24  ;;  %v8966_v63 = vld [vmem:[#allocation3 + $0xa4] sm:$0xf0] }
 0x1aa   : > { %1134 = vst [vmem:[#allocation3 + $0xe8] sm:$0xff] %v1118_v28  ;;  %7504 = vmatmul.msk.bf16.gmra.mxu2 %vm11187_vm0, %v8920_v22  ;;  %7512 = vmatmul.msk.bf16.gmra.mxu3 %vm11187_vm0, %v8920_v22  ;;  %vm11211_vm0 = vcmask 916480  }
 0x1ac   : > { %v719_v34 = vpop.f32.mrf.mxu0  ;;  %v768_v35 = vpop.f32.mrf.mxu1 }
 0x1ad   : > { %v1019_v30 = vpop.f32.mrf.mxu2  ;;  %v1068_v31 = vpop.f32.mrf.mxu3  ;;  %v801_v36 = vmax.f32 %v719_v34, 0.0  ;;  %v802_v38 = vmax.f32 %v768_v35, 0.0  ;;  %v7683_v34 = vld [vmem:[#allocation3 + $0xd0] sm:$0xf] }
 0x1ae   : > { %v1101_v32 = vmax.f32 %v1019_v30, 0.0  ;;  %v1102_v33 = vmax.f32 %v1068_v31, 0.0  ;;  %v8972_v30 = vld [vmem:[#allocation3 + $0xd4] sm:$0xf0] }
 0x1af   : > { %v818_v40 = vpack.c.bf16 %v802_v38, %v801_v36  ;;  %v7684_v35 = vor.u32 %v8972_v30, %v7683_v34  ;;  %v7603_v36 = vld [vmem:[#allocation3 + $0x30] sm:$0xf]  ;;  %v7621_v34 = vld [vmem:[#allocation3 + $0x58] sm:$0xf0] }
 0x1b0   : > { %v1119_v39 = vpack.c.bf16 %v1102_v33, %v1101_v32  ;;  %v7635_v50 = vld [vmem:[#allocation3 + $0x70] sm:$0xf]  ;;  %v8952_v32 = vld [vmem:[#allocation3 + $0x34] sm:$0xf0] }
 0x1b1   : > { %834 = vst [vmem:[#allocation3 + $0x78] sm:$0xff] %v818_v40  ;;  %v8974_v13 = vld [vmem:[#allocation3 + $0xe4] sm:$0xf0]  ;;  %v7604_v38 = vor.u32 %v8952_v32, %v7603_v36 }
 0x1b2   : > { %1135 = vst [vmem:[#allocation3 + $0xf0] sm:$0xff] %v1119_v39  ;;  %v7692_v22 = vor.u32 %v8974_v13, %v7691_v17  ;;  %v8970_v39 = vld [vmem:[#allocation3 + $0xc4] sm:$0xf0]  ;;  %v8964_v17 = vld [vmem:[#allocation3 + $0x94] sm:$0xf0] }
 0x1b3   : > { %v8950_v40 = vld [vmem:[#allocation3 + $0x24] sm:$0xf0] }
 0x1b4   : > { %v1286_v58 = vpop.f32.mrf.mxu0  ;;  %v1335_v45 = vpop.f32.mrf.mxu1 }
 0x1b5   : > { %v1021_v41 = vpop.f32.mrf.mxu2  ;;  %v1070_v42 = vpop.f32.mrf.mxu3  ;;  %v1375_v59 = vmax.f32 %v1286_v58, 0.0  ;;  %v1376_v46 = vmax.f32 %v1335_v45, 0.0 }
 0x1b6   : > { %v1103_v43 = vmax.f32 %v1021_v41, 0.0  ;;  %v1104_v44 = vmax.f32 %v1070_v42, 0.0 }
 0x1b7   : > { %v1407_v49 = vpack.c.bf16 %v1376_v46, %v1375_v59 }
 0x1b8   : > { %v1120_v47 = vpack.c.bf16 %v1104_v44, %v1103_v43  ;;  %v8960_v51 = vld [vmem:[#allocation3 + $0x74] sm:$0xf0]  ;;  %v7675_v43 = vld [vmem:[#allocation3 + $0xc0] sm:$0xf]  ;;  %v7637_v4 = vld [vmem:[#allocation3 + $0x78] sm:$0xf0] }
 0x1b9   : > { %1423 = vst [vmem:[#allocation3 + $0x100] sm:$0xff] %v1407_v49  ;;  %v7636_v52 = vor.u32 %v8960_v51, %v7635_v50  ;;  %v7699_v6 = vld [vmem:[#allocation3 + $0xf0] sm:$0xf]  ;;  %v7676_v46 = vor.u32 %v8970_v39, %v7675_v43 }
 0x1ba   : > { %1136 = vst [vmem:[#allocation3 + $0xf8] sm:$0xff] %v1120_v47  ;;  %v7595_v47 = vld [vmem:[#allocation3 + $0x20] sm:$0xf] }
 0x1bb   : > { %2237 = vmatpush.bf16.msra.mxu0 %v7636_v52  ;;  %v7596_v51 = vor.u32 %v8950_v40, %v7595_v47  ;;  %v8968_v52 = vld [vmem:[#allocation3 + $0xb4] sm:$0xf0] }
 0x1bc   : > { %v1288_v60 = vpop.f32.mrf.mxu0  ;;  %v1337_v61 = vpop.f32.mrf.mxu1 }
 0x1bd   : > { %v1588_v54 = vpop.f32.mrf.mxu2  ;;  %v1637_v55 = vpop.f32.mrf.mxu3  ;;  %v1377_v0 = vmax.f32 %v1288_v60, 0.0  ;;  %v1378_v1 = vmax.f32 %v1337_v61, 0.0  ;;  %v7587_v60 = vld [vmem:[#allocation3 + $0x10] sm:$0xf] }
 0x1be   : > { %v1677_v56 = vmax.f32 %v1588_v54, 0.0  ;;  %v1678_v57 = vmax.f32 %v1637_v55, 0.0  ;;  %v8948_v54 = vld [vmem:[#allocation3 + $0x14] sm:$0xf0] }
 0x1bf   : > { %v1408_v5 = vpack.c.bf16 %v1378_v1, %v1377_v0  ;;  %2238 = vmatpush.bf16.msra.mxu0 %v7628_v2  ;;  %v7588_v61 = vor.u32 %v8948_v54, %v7587_v60  ;;  %v8946_v0 = vld [vmem:[#allocation3 + $0x4] sm:$0xf0]  ;;  %v7685_v54 = vld [vmem:[#allocation3 + $0xd8] sm:$0xf0] }
 0x1c0   : > { %v1709_v3 = vpack.c.bf16 %v1678_v57, %v1677_v56  ;;  %v7667_v56 = vld [vmem:[#allocation3 + $0xb0] sm:$0xf] }
 0x1c1   : > { %v8976_v7 = vld [vmem:[#allocation3 + $0xf4] sm:$0xf0]  ;;  %1424 = vst [vmem:[#allocation3 + $0x108] sm:$0xff] %v1408_v5  ;;  %v7668_v57 = vor.u32 %v8968_v52, %v7667_v56  ;;  %v7701_v30 = vld [vmem:[#allocation3 + $0xf8] sm:$0xf0] }
 0x1c2   : > { %1725 = vst [vmem:[#allocation3 + $0x180] sm:$0xff] %v1709_v3  ;;  %v7700_v8 = vor.u32 %v8976_v7, %v7699_v6  ;;  %v7659_v3 = vld [vmem:[#allocation3 + $0xa0] sm:$0xf]  ;;  %v8953_v52 = vld [vmem:[#allocation3 + $0x44] sm:$0xf] }
 0x1c3   : > { %2239 = vmatpush.bf16.msra.mxu0 %v7620_v11  ;;  %v7660_v9 = vor.u32 %v8966_v63, %v7659_v3  ;;  %v7579_v11 = vld [vmem:[#allocation3] sm:$0xf] }
 0x1c4   : > { %2270 = vmatpush.bf16.msra.mxu1 %v7700_v8  ;;  %v1291_v20 = vpop.f32.mrf.mxu0  ;;  %v1340_v21 = vpop.f32.mrf.mxu1 }
 0x1c5   : > { %v1590_v15 = vpop.f32.mrf.mxu2  ;;  %v1639_v16 = vpop.f32.mrf.mxu3  ;;  %v1379_v26 = vmax.f32 %v1291_v20, 0.0  ;;  %v1380_v28 = vmax.f32 %v1340_v21, 0.0  ;;  %v7651_v21 = vld [vmem:[#allocation3 + $0x90] sm:$0xf] }
 0x1c6   : > { %v1679_v18 = vmax.f32 %v1590_v15, 0.0  ;;  %v1680_v19 = vmax.f32 %v1639_v16, 0.0  ;;  %v7580_v15 = vor.u32 %v8946_v0, %v7579_v11  ;;  %v8959_v16 = vld [vmem:[#allocation3 + $0x74] sm:$0xf]  ;;  %v7652_v24 = vor.u32 %v8964_v17, %v7651_v21  ;;  %v7597_v11 = vld [vmem:[#allocation3 + $0x28] sm:$0xf0] }
 0x1c7   : > { %v1409_v33 = vpack.c.bf16 %v1380_v28, %v1379_v26  ;;  %2240 = vmatpush.bf16.msra.mxu0 %v7612_v29  ;;  %v8957_v26 = vld [vmem:[#allocation3 + $0x64] sm:$0xf]  ;;  %v8962_v28 = vld [vmem:[#allocation3 + $0x84] sm:$0xf0]  ;;  %v7669_v17 = vld [vmem:[#allocation3 + $0xb8] sm:$0xf0] }
 0x1c8   : > { %v1710_v31 = vpack.c.bf16 %v1680_v19, %v1679_v18  ;;  %2271 = vmatpush.bf16.msra.mxu1 %v7692_v22  ;;  %v7640_v19 = vor.u32 %v8959_v16, %v7637_v4  ;;  %v7629_v22 = vld [vmem:[#allocation3 + $0x68] sm:$0xf0] }
 0x1c9   : > { %1425 = vst [vmem:[#allocation3 + $0x110] sm:$0xff] %v1409_v33  ;;  %v7632_v29 = vor.u32 %v8957_v26, %v7629_v22  ;;  %v7643_v33 = vld [vmem:[#allocation3 + $0x80] sm:$0xf] }
 0x1ca   : > { %1726 = vst [vmem:[#allocation3 + $0x188] sm:$0xff] %v1710_v31  ;;  %v7644_v40 = vor.u32 %v8962_v28, %v7643_v33  ;;  %v8967_v28 = vld [vmem:[#allocation3 + $0xb4] sm:$0xf] }
 0x1cb   : > { %2241 = vmatpush.bf16.msra.mxu0 %v7604_v38 }
 0x1cc   : > { %2272 = vmatpush.bf16.msra.mxu1 %v7684_v35  ;;  %v1293_v45 = vpop.f32.mrf.mxu0  ;;  %v1342_v59 = vpop.f32.mrf.mxu1 }
 0x1cd   : > { %v1593_v41 = vpop.f32.mrf.mxu2  ;;  %v1642_v42 = vpop.f32.mrf.mxu3  ;;  %v1381_v49 = vmax.f32 %v1293_v45, 0.0  ;;  %v1382_v50 = vmax.f32 %v1342_v59, 0.0 }
 0x1ce   : > { %v1681_v44 = vmax.f32 %v1593_v41, 0.0  ;;  %v1682_v58 = vmax.f32 %v1642_v42, 0.0  ;;  %v8975_v41 = vld [vmem:[#allocation3 + $0xf4] sm:$0xf] }
 0x1cf   : > { %v1410_v55 = vpack.c.bf16 %v1382_v50, %v1381_v49  ;;  %2242 = vmatpush.bf16.msra.mxu0 %v7596_v51  ;;  %v7613_v49 = vld [vmem:[#allocation3 + $0x48] sm:$0xf0]  ;;  %v8973_v50 = vld [vmem:[#allocation3 + $0xe4] sm:$0xf] }
 0x1d0   : > { %v1711_v53 = vpack.c.bf16 %v1682_v58, %v1681_v44  ;;  %2273 = vmatpush.bf16.msra.mxu1 %v7676_v46  ;;  %v7704_v44 = vor.u32 %v8975_v41, %v7701_v30  ;;  %v8955_v58 = vld [vmem:[#allocation3 + $0x54] sm:$0xf]  ;;  %v7693_v46 = vld [vmem:[#allocation3 + $0xe8] sm:$0xf0]  ;;  %v8945_v41 = vld [vmem:[#allocation3 + $0x4] sm:$0xf] }
 0x1d1   : > { %1426 = vst [vmem:[#allocation3 + $0x118] sm:$0xff] %v1410_v55  ;;  %v7624_v59 = vor.u32 %v8955_v58, %v7621_v34  ;;  %v7696_v51 = vor.u32 %v8973_v50, %v7693_v46 }
 0x1d2   : > { %1727 = vst [vmem:[#allocation3 + $0x190] sm:$0xff] %v1711_v53  ;;  %v7616_v53 = vor.u32 %v8953_v52, %v7613_v49  ;;  %v8963_v49 = vld [vmem:[#allocation3 + $0x94] sm:$0xf] }
 0x1d3   : > { %2243 = vmatpush.bf16.msra.mxu0 %v7588_v61 }
 0x1d4   : > { %2274 = vmatpush.bf16.msra.mxu1 %v7668_v57  ;;  %v1296_v7 = vpop.f32.mrf.mxu0  ;;  %v1345_v8 = vpop.f32.mrf.mxu1  ;;  %v7605_v57 = vld [vmem:[#allocation3 + $0x38] sm:$0xf0] }
 0x1d5   : > { %v1595_v1 = vpop.f32.mrf.mxu2  ;;  %v1644_v2 = vpop.f32.mrf.mxu3  ;;  %v1383_v13 = vmax.f32 %v1296_v7, 0.0  ;;  %v1384_v14 = vmax.f32 %v1345_v8, 0.0  ;;  %v7677_v8 = vld [vmem:[#allocation3 + $0xc8] sm:$0xf0] }
 0x1d6   : > { %v1683_v5 = vmax.f32 %v1595_v1, 0.0  ;;  %v1684_v6 = vmax.f32 %v1644_v2, 0.0  ;;  %v8971_v1 = vld [vmem:[#allocation3 + $0xd4] sm:$0xf] }
 0x1d7   : > { %v1411_v20 = vpack.c.bf16 %v1384_v14, %v1383_v13  ;;  %2244 = vmatpush.bf16.msra.mxu0 %v7580_v15  ;;  %v7688_v4 = vor.u32 %v8971_v1, %v7685_v54  ;;  %v8969_v13 = vld [vmem:[#allocation3 + $0xc4] sm:$0xf]  ;;  %v7645_v54 = vld [vmem:[#allocation3 + $0x88] sm:$0xf0] }
 0x1d8   : > { %v1712_v18 = vpack.c.bf16 %v1684_v6, %v1683_v5  ;;  %2275 = vmatpush.bf16.msra.mxu1 %v7660_v9  ;;  %v8951_v5 = vld [vmem:[#allocation3 + $0x34] sm:$0xf]  ;;  %v7680_v14 = vor.u32 %v8969_v13, %v7677_v8  ;;  %v8949_v15 = vld [vmem:[#allocation3 + $0x24] sm:$0xf] }
 0x1d9   : > { %1427 = vst [vmem:[#allocation3 + $0x120] sm:$0xff] %v1411_v20  ;;  %v7608_v7 = vor.u32 %v8951_v5, %v7605_v57  ;;  %v7600_v16 = vor.u32 %v8949_v15, %v7597_v11  ;;  %v7589_v20 = vld [vmem:[#allocation3 + $0x18] sm:$0xf0] }
 0x1da   : > { %1728 = vst [vmem:[#allocation3 + $0x198] sm:$0xff] %v1712_v18 }
 0x1db   : > { %2369 = vmatpush.bf16.msrb.mxu0 %v7640_v19 }
 0x1dc   : > { %2276 = vmatpush.bf16.msra.mxu1 %v7652_v24  ;;  %v1298_v38 = vpop.f32.mrf.mxu0  ;;  %v1347_v39 = vpop.f32.mrf.mxu1 }
 0x1dd   : > { %v1598_v31 = vpop.f32.mrf.mxu2  ;;  %v1647_v32 = vpop.f32.mrf.mxu3  ;;  %v1385_v42 = vmax.f32 %v1298_v38, 0.0  ;;  %v1386_v43 = vmax.f32 %v1347_v39, 0.0  ;;  %v7581_v38 = vld [vmem:[#allocation3 + $0x8] sm:$0xf0]  ;;  %v8965_v39 = vld [vmem:[#allocation3 + $0xa4] sm:$0xf] }
 0x1de   : > { %v1685_v35 = vmax.f32 %v1598_v31, 0.0  ;;  %v1686_v36 = vmax.f32 %v1647_v32, 0.0  ;;  %v7672_v31 = vor.u32 %v8967_v28, %v7669_v17  ;;  %v8947_v32 = vld [vmem:[#allocation3 + $0x14] sm:$0xf] }
 0x1df   : > { %2370 = vmatpush.bf16.msrb.mxu0 %v7632_v29  ;;  %v1412_v47 = vpack.c.bf16 %v1386_v43, %v1385_v42  ;;  %v7592_v34 = vor.u32 %v8947_v32, %v7589_v20  ;;  %v7584_v42 = vor.u32 %v8945_v41, %v7581_v38  ;;  %v7653_v43 = vld [vmem:[#allocation3 + $0x98] sm:$0xf0] }
 0x1e0   : > { %v1713_v45 = vpack.c.bf16 %v1686_v36, %v1685_v35  ;;  %2277 = vmatpush.bf16.msra.mxu1 %v7644_v40  ;;  %v7661_v35 = vld [vmem:[#allocation3 + $0xa8] sm:$0xf0]  ;;  %v7656_v52 = vor.u32 %v8963_v49, %v7653_v43 }
 0x1e1   : > { %1428 = vst [vmem:[#allocation3 + $0x128] sm:$0xff] %v1412_v47  ;;  %v7664_v40 = vor.u32 %v8965_v39, %v7661_v35 }
 0x1e2   : > { %1729 = vst [vmem:[#allocation3 + $0x1a0] sm:$0xff] %v1713_v45 }
 0x1e3   : > { %2371 = vmatpush.bf16.msrb.mxu0 %v7624_v59 }
 0x1e4   : > { %2402 = vmatpush.bf16.msrb.mxu1 %v7704_v44  ;;  %v1301_v63 = vpop.f32.mrf.mxu0  ;;  %v1350_v0 = vpop.f32.mrf.mxu1 }
 0x1e5   : > { %v1600_v55 = vpop.f32.mrf.mxu2  ;;  %v1649_v56 = vpop.f32.mrf.mxu3  ;;  %v1387_v2 = vmax.f32 %v1301_v63, 0.0  ;;  %v1388_v3 = vmax.f32 %v1350_v0, 0.0 }
 0x1e6   : > { %v1687_v60 = vmax.f32 %v1600_v55, 0.0  ;;  %v1688_v61 = vmax.f32 %v1649_v56, 0.0  ;;  %v8961_v56 = vld [vmem:[#allocation3 + $0x84] sm:$0xf] }
 0x1e7   : > { %2372 = vmatpush.bf16.msrb.mxu0 %v7616_v53  ;;  %v1413_v9 = vpack.c.bf16 %v1388_v3, %v1387_v2  ;;  %v7648_v57 = vor.u32 %v8961_v56, %v7645_v54 }
 0x1e8   : > { %2403 = vmatpush.bf16.msrb.mxu1 %v7696_v51  ;;  %v1714_v6 = vpack.c.bf16 %v1688_v61, %v1687_v60 }
 0x1e9   : > { %1429 = vst [vmem:[#allocation3 + $0x130] sm:$0xff] %v1413_v9 }
 0x1ea   : > { %1730 = vst [vmem:[#allocation3 + $0x1a8] sm:$0xff] %v1714_v6 }
 0x1eb   : > { %2373 = vmatpush.bf16.msrb.mxu0 %v7608_v7 }
 0x1ec   : > { %2404 = vmatpush.bf16.msrb.mxu1 %v7688_v4  ;;  %v1303_v24 = vpop.f32.mrf.mxu0  ;;  %v1352_v26 = vpop.f32.mrf.mxu1 }
 0x1ed   : > { %v1603_v18 = vpop.f32.mrf.mxu2  ;;  %v1652_v19 = vpop.f32.mrf.mxu3  ;;  %v1389_v29 = vmax.f32 %v1303_v24, 0.0  ;;  %v1390_v30 = vmax.f32 %v1352_v26, 0.0 }
 0x1ee   : > { %v1689_v21 = vmax.f32 %v1603_v18, 0.0  ;;  %v1690_v22 = vmax.f32 %v1652_v19, 0.0 }
 0x1ef   : > { %2374 = vmatpush.bf16.msrb.mxu0 %v7600_v16  ;;  %v1414_v36 = vpack.c.bf16 %v1390_v30, %v1389_v29 }
 0x1f0   : > { %2405 = vmatpush.bf16.msrb.mxu1 %v7680_v14  ;;  %v1715_v33 = vpack.c.bf16 %v1690_v22, %v1689_v21 }
 0x1f1   : > { %1430 = vst [vmem:[#allocation3 + $0x138] sm:$0xff] %v1414_v36 }
 0x1f2   : > { %1731 = vst [vmem:[#allocation3 + $0x1b0] sm:$0xff] %v1715_v33 }
 0x1f3   : > { %2375 = vmatpush.bf16.msrb.mxu0 %v7592_v34 }
 0x1f4   : > { %2406 = vmatpush.bf16.msrb.mxu1 %v7672_v31  ;;  %v1306_v46 = vpop.f32.mrf.mxu0  ;;  %v1355_v47 = vpop.f32.mrf.mxu1 }
 0x1f5   : > { %v1605_v44 = vpop.f32.mrf.mxu2  ;;  %v1654_v58 = vpop.f32.mrf.mxu3  ;;  %v1391_v50 = vmax.f32 %v1306_v46, 0.0  ;;  %v1392_v51 = vmax.f32 %v1355_v47, 0.0 }
 0x1f6   : > { %v1691_v45 = vmax.f32 %v1605_v44, 0.0  ;;  %v1692_v59 = vmax.f32 %v1654_v58, 0.0 }
 0x1f7   : > { %2376 = vmatpush.bf16.msrb.mxu0 %v7584_v42  ;;  %v1415_v55 = vpack.c.bf16 %v1392_v51, %v1391_v50 }
 0x1f8   : > { %2407 = vmatpush.bf16.msrb.mxu1 %v7664_v40  ;;  %v1716_v53 = vpack.c.bf16 %v1692_v59, %v1691_v45 }
 0x1f9   : > { %1431 = vst [vmem:[#allocation3 + $0x140] sm:$0xff] %v1415_v55 }
 0x1fa   : > { %1732 = vst [vmem:[#allocation3 + $0x1b8] sm:$0xff] %v1716_v53 }
 0x1fc   : > { %2408 = vmatpush.bf16.msrb.mxu1 %v7656_v52  ;;  %v1308_v1 = vpop.f32.mrf.mxu0  ;;  %v1357_v2 = vpop.f32.mrf.mxu1 }
 0x1fd   : > { %v1608_v60 = vpop.f32.mrf.mxu2  ;;  %v1657_v61 = vpop.f32.mrf.mxu3  ;;  %v1393_v3 = vmax.f32 %v1308_v1, 0.0  ;;  %v1394_v4 = vmax.f32 %v1357_v2, 0.0 }
 0x1fe   : > { %v1693_v63 = vmax.f32 %v1608_v60, 0.0  ;;  %v1694_v0 = vmax.f32 %v1657_v61, 0.0 }
 0x1ff   : > { %v1416_v6 = vpack.c.bf16 %v1394_v4, %v1393_v3 }
 0x200   : > { %2409 = vmatpush.bf16.msrb.mxu1 %v7648_v57  ;;  %v1717_v5 = vpack.c.bf16 %v1694_v0, %v1693_v63 }
 0x201   : > { %1432 = vst [vmem:[#allocation3 + $0x148] sm:$0xff] %v1416_v6 }
 0x202   : > { %1733 = vst [vmem:[#allocation3 + $0x1c0] sm:$0xff] %v1717_v5 }
 0x204   : > { %v1311_v13 = vpop.f32.mrf.mxu0  ;;  %v1360_v14 = vpop.f32.mrf.mxu1 }
 0x205   : > { %v1610_v7 = vpop.f32.mrf.mxu2  ;;  %v1659_v8 = vpop.f32.mrf.mxu3  ;;  %v1395_v15 = vmax.f32 %v1311_v13, 0.0  ;;  %v1396_v16 = vmax.f32 %v1360_v14, 0.0 }
 0x206   : > { %v1695_v9 = vmax.f32 %v1610_v7, 0.0  ;;  %v1696_v11 = vmax.f32 %v1659_v8, 0.0 }
 0x207   : > { %v1417_v18 = vpack.c.bf16 %v1396_v16, %v1395_v15 }
 0x208   : > { %v1718_v17 = vpack.c.bf16 %v1696_v11, %v1695_v9 }
 0x209   : > { %1433 = vst [vmem:[#allocation3 + $0x150] sm:$0xff] %v1417_v18 }
 0x20a   : > { %1734 = vst [vmem:[#allocation3 + $0x1c8] sm:$0xff] %v1718_v17 }
 0x20c   : > { %v1313_v24 = vpop.f32.mrf.mxu0  ;;  %v1362_v26 = vpop.f32.mrf.mxu1 }
 0x20d   : > { %v1613_v19 = vpop.f32.mrf.mxu2  ;;  %v1662_v20 = vpop.f32.mrf.mxu3  ;;  %v1397_v28 = vmax.f32 %v1313_v24, 0.0  ;;  %v1398_v29 = vmax.f32 %v1362_v26, 0.0  ;;  %v8931_v24 = vld [vmem:[%s11175_s2 + $0xc] sm:$0xf0]  ;;  %v8929_v26 = vld [vmem:[%s11175_s2 + $0x4] sm:$0xf] }
 0x20e   : > { %v1697_v21 = vmax.f32 %v1613_v19, 0.0  ;;  %v1698_v22 = vmax.f32 %v1662_v20, 0.0 }
 0x20f   : > { %v1418_v31 = vpack.c.bf16 %v1398_v29, %v1397_v28  ;;  %v7517_v29 = vld [vmem:[%s11175_s2 + $0x10] sm:$0xf0] }
 0x210   : > { %v1719_v30 = vpack.c.bf16 %v1698_v22, %v1697_v21  ;;  %v7515_v22 = vld [vmem:[%s11175_s2] sm:$0xf] }
 0x211   : > { %1434 = vst [vmem:[#allocation3 + $0x158] sm:$0xff] %v1418_v31  ;;  %v9845_v28 = vor.u32 %v8931_v24, %v7515_v22  ;;  %v9850_v31 = vor.u32 %v8929_v26, %v7517_v29  ;;  %v7779_v22 = vld [vmem:[#allocation3 + $0x190] sm:$0xf]  ;;  %v7547_v29 = vld [vmem:[%s11175_s2 + $0x40] sm:$0xf] }
 0x212   : > { %1735 = vst [vmem:[#allocation3 + $0x1d0] sm:$0xff] %v1719_v30 }
 0x213   : > { %2245 = vmatmul.bf16.vlgmr.msra.gmra.mxu0 %v9845_v28  ;;  %2278 = vmatmul.bf16.vlgmr.msra.gmra.mxu1 %v9850_v31 }
 0x214   : > { %v1316_v36 = vpop.f32.mrf.mxu0  ;;  %v1365_v38 = vpop.f32.mrf.mxu1 }
 0x215   : > { %v1615_v32 = vpop.f32.mrf.mxu2  ;;  %v1664_v33 = vpop.f32.mrf.mxu3  ;;  %v1399_v39 = vmax.f32 %v1316_v36, 0.0  ;;  %v1400_v40 = vmax.f32 %v1365_v38, 0.0  ;;  %v7747_v38 = vld [vmem:[#allocation3 + $0x150] sm:$0xf] }
 0x216   : > { %v1699_v34 = vmax.f32 %v1615_v32, 0.0  ;;  %v1700_v35 = vmax.f32 %v1664_v33, 0.0 }
 0x217   : > { %v1419_v42 = vpack.c.bf16 %v1400_v40, %v1399_v39 }
 0x218   : > { %v1720_v41 = vpack.c.bf16 %v1700_v35, %v1699_v34  ;;  %v8988_v33 = vld [vmem:[#allocation3 + $0x154] sm:$0xf0] }
 0x219   : > { %1435 = vst [vmem:[#allocation3 + $0x160] sm:$0xff] %v1419_v42  ;;  %v7748_v39 = vor.u32 %v8988_v33, %v7747_v38 }
 0x21a   : > { %1736 = vst [vmem:[#allocation3 + $0x1d8] sm:$0xff] %v1720_v41  ;;  %v8986_v41 = vld [vmem:[#allocation3 + $0x144] sm:$0xf0] }
 0x21c   : > { %v1318_v59 = vpop.f32.mrf.mxu0  ;;  %v1367_v46 = vpop.f32.mrf.mxu1 }
 0x21d   : > { %v1618_v43 = vpop.f32.mrf.mxu2  ;;  %v1667_v44 = vpop.f32.mrf.mxu3  ;;  %v1401_v47 = vmax.f32 %v1318_v59, 0.0  ;;  %v1402_v49 = vmax.f32 %v1367_v46, 0.0  ;;  %v8984_v59 = vld [vmem:[#allocation3 + $0x134] sm:$0xf0]  ;;  %v7811_v46 = vld [vmem:[#allocation3 + $0x1d0] sm:$0xf] }
 0x21e   : > { %v1701_v58 = vmax.f32 %v1618_v43, 0.0  ;;  %v1702_v45 = vmax.f32 %v1667_v44, 0.0  ;;  %v7739_v44 = vld [vmem:[#allocation3 + $0x140] sm:$0xf] }
 0x21f   : > { %v1420_v51 = vpack.c.bf16 %v1402_v49, %v1401_v47  ;;  %v7731_v47 = vld [vmem:[#allocation3 + $0x130] sm:$0xf] }
 0x220   : > { %v1721_v50 = vpack.c.bf16 %v1702_v45, %v1701_v58  ;;  %v7755_v30 = vld [vmem:[#allocation3 + $0x160] sm:$0xf]  ;;  %v7740_v58 = vor.u32 %v8986_v41, %v7739_v44  ;;  %v8930_v41 = vld [vmem:[%s11175_s2 + $0xc] sm:$0xf] }
 0x221   : > { %1436 = vst [vmem:[#allocation3 + $0x168] sm:$0xff] %v1420_v51  ;;  %v9004_v45 = vld [vmem:[#allocation3 + $0x1d4] sm:$0xf0]  ;;  %v8935_v51 = vld [vmem:[%s11175_s2 + $0x2c] sm:$0xf0] }
 0x222   : > { %1737 = vst [vmem:[#allocation3 + $0x1e0] sm:$0xff] %v1721_v50  ;;  %v7812_v49 = vor.u32 %v9004_v45, %v7811_v46  ;;  %v7531_v50 = vld [vmem:[%s11175_s2 + $0x20] sm:$0xf]  ;;  %v7771_v44 = vld [vmem:[#allocation3 + $0x180] sm:$0xf] }
 0x224   : > { %v1321_v56 = vpop.f32.mrf.mxu0  ;;  %v1370_v57 = vpop.f32.mrf.mxu1 }
 0x225   : > { %v1620_v52 = vpop.f32.mrf.mxu2  ;;  %v1669_v53 = vpop.f32.mrf.mxu3  ;;  %v1403_v60 = vmax.f32 %v1321_v56, 0.0  ;;  %v1404_v61 = vmax.f32 %v1370_v57, 0.0  ;;  %v7533_v56 = vld [vmem:[%s11175_s2 + $0x30] sm:$0xf0]  ;;  %v8982_v57 = vld [vmem:[#allocation3 + $0x124] sm:$0xf0] }
 0x226   : > { %v1703_v54 = vmax.f32 %v1620_v52, 0.0  ;;  %v1704_v55 = vmax.f32 %v1669_v53, 0.0  ;;  %v8933_v52 = vld [vmem:[%s11175_s2 + $0x24] sm:$0xf]  ;;  %v7732_v53 = vor.u32 %v8984_v59, %v7731_v47 }
 0x227   : > { %v1421_v0 = vpack.c.bf16 %v1404_v61, %v1403_v60  ;;  %v9868_v60 = vor.u32 %v8933_v52, %v7533_v56  ;;  %v7803_v61 = vld [vmem:[#allocation3 + $0x1c0] sm:$0xf]  ;;  %v7741_v52 = vld [vmem:[#allocation3 + $0x148] sm:$0xf0]  ;;  %v8985_v56 = vld [vmem:[#allocation3 + $0x144] sm:$0xf] }
 0x228   : > { %v1722_v63 = vpack.c.bf16 %v1704_v55, %v1703_v54  ;;  %v8990_v21 = vld [vmem:[#allocation3 + $0x164] sm:$0xf0]  ;;  %v9863_v55 = vor.u32 %v8935_v51, %v7531_v50  ;;  %v7757_v26 = vld [vmem:[#allocation3 + $0x168] sm:$0xf0] }
 0x229   : > { %1437 = vst [vmem:[#allocation3 + $0x170] sm:$0xff] %v1421_v0  ;;  %v7756_v32 = vor.u32 %v8990_v21, %v7755_v30  ;;  %v7819_v42 = vld [vmem:[#allocation3 + $0x1e0] sm:$0xf]  ;;  %v9002_v54 = vld [vmem:[#allocation3 + $0x1c4] sm:$0xf0]  ;;  %2283 = vmatmul.bf16.gmra.mxu1 %v9868_v60 }
 0x22a   : > { %1738 = vst [vmem:[#allocation3 + $0x1e8] sm:$0xff] %v1722_v63  ;;  %v7804_v63 = vor.u32 %v9002_v54, %v7803_v61  ;;  %v7723_v0 = vld [vmem:[#allocation3 + $0x120] sm:$0xf]  ;;  %2250 = vmatmul.bf16.gmra.mxu0 %v9863_v55  ;;  %v8939_v30 = vld [vmem:[%s11175_s2 + $0x4c] sm:$0xf0] }
 0x22b   : > { %v9892_v38 = vor.u32 %v8939_v30, %v7547_v29  ;;  %v7813_v61 = vld [vmem:[#allocation3 + $0x1d8] sm:$0xf0]  ;;  %v8999_v30 = vld [vmem:[#allocation3 + $0x1b4] sm:$0xf] }
 0x22c   : > { %v1323_v5 = vpop.f32.mrf.mxu0  ;;  %v1372_v6 = vpop.f32.mrf.mxu1  ;;  %v7717_v29 = vld [vmem:[#allocation3 + $0x118] sm:$0xf0] }
 0x22d   : > { %v1623_v1 = vpop.f32.mrf.mxu2  ;;  %v1672_v2 = vpop.f32.mrf.mxu3  ;;  %v1405_v7 = vmax.f32 %v1323_v5, 0.0  ;;  %v1406_v8 = vmax.f32 %v1372_v6, 0.0  ;;  %v7715_v6 = vld [vmem:[#allocation3 + $0x110] sm:$0xf] }
 0x22e   : > { %v1705_v3 = vmax.f32 %v1623_v1, 0.0  ;;  %v1706_v4 = vmax.f32 %v1672_v2, 0.0  ;;  %v7724_v1 = vor.u32 %v8982_v57, %v7723_v0  ;;  %v9000_v2 = vld [vmem:[#allocation3 + $0x1b4] sm:$0xf0]  ;;  %v7744_v57 = vor.u32 %v8985_v56, %v7741_v52  ;;  %v7539_v0 = vld [vmem:[%s11175_s2 + $0x28] sm:$0xf] }
 0x22f   : > { %v1422_v11 = vpack.c.bf16 %v1406_v8, %v1405_v7  ;;  %v8998_v8 = vld [vmem:[#allocation3 + $0x1a4] sm:$0xf0]  ;;  %v8993_v56 = vld [vmem:[#allocation3 + $0x184] sm:$0xf] }
 0x230   : > { %v1723_v9 = vpack.c.bf16 %v1706_v4, %v1705_v3  ;;  %v7763_v18 = vld [vmem:[#allocation3 + $0x170] sm:$0xf]  ;;  %v8980_v3 = vld [vmem:[#allocation3 + $0x114] sm:$0xf0] }
 0x231   : > { %1438 = vst [vmem:[#allocation3 + $0x178] sm:$0xff] %v1422_v11  ;;  %v9006_v40 = vld [vmem:[#allocation3 + $0x1e4] sm:$0xf0]  ;;  %v7795_v4 = vld [vmem:[#allocation3 + $0x1b0] sm:$0xf]  ;;  %v7716_v7 = vor.u32 %v8980_v3, %v7715_v6 }
 0x232   : > { %1739 = vst [vmem:[#allocation3 + $0x1f0] sm:$0xff] %v1723_v9  ;;  %v7820_v43 = vor.u32 %v9006_v40, %v7819_v42  ;;  %v7796_v5 = vor.u32 %v9000_v2, %v7795_v4  ;;  %v7787_v9 = vld [vmem:[#allocation3 + $0x1a0] sm:$0xf]  ;;  %v8978_v11 = vld [vmem:[#allocation3 + $0x104] sm:$0xf0] }
 0x233   : > { %v7525_v42 = vld [vmem:[%s11175_s2 + $0x18] sm:$0xf0]  ;;  %v7821_v51 = vld [vmem:[#allocation3 + $0x1e8] sm:$0xf0] }
 0x234   : > { %v9903_v47 = vor.u32 %v8930_v41, %v7525_v42  ;;  %v9003_v2 = vld [vmem:[#allocation3 + $0x1d4] sm:$0xf]  ;;  %v8977_v42 = vld [vmem:[#allocation3 + $0x104] sm:$0xf] }
 0x235   : > { %v1625_v13 = vpop.f32.mrf.mxu2  ;;  %v1674_v14 = vpop.f32.mrf.mxu3  ;;  %v7816_v3 = vor.u32 %v9003_v2, %v7813_v61  ;;  %v8983_v4 = vld [vmem:[#allocation3 + $0x134] sm:$0xf] }
 0x236   : > { %v1707_v15 = vmax.f32 %v1625_v13, 0.0  ;;  %v1708_v16 = vmax.f32 %v1674_v14, 0.0  ;;  %v7523_v14 = vld [vmem:[%s11175_s2 + $0x8] sm:$0xf] }
 0x238   : > { %v1724_v17 = vpack.c.bf16 %v1708_v16, %v1707_v15  ;;  %v8992_v19 = vld [vmem:[#allocation3 + $0x174] sm:$0xf0]  ;;  %v7765_v13 = vld [vmem:[#allocation3 + $0x178] sm:$0xf0]  ;;  %v8932_v15 = vld [vmem:[%s11175_s2 + $0x14] sm:$0xf0]  ;;  %v7788_v16 = vor.u32 %v8998_v8, %v7787_v9 }
 0x239   : > { %v7764_v20 = vor.u32 %v8992_v19, %v7763_v18  ;;  %v7827_v34 = vld [vmem:[#allocation3 + $0x1f0] sm:$0xf]  ;;  %v8991_v19 = vld [vmem:[#allocation3 + $0x174] sm:$0xf]  ;;  %v9878_v24 = vor.u32 %v8932_v15, %v7523_v14  ;;  %v7563_v8 = vld [vmem:[%s11175_s2 + $0x60] sm:$0xf] }
 0x23a   : > { %1740 = vst [vmem:[#allocation3 + $0x1f8] sm:$0xff] %v1724_v17  ;;  %v7707_v17 = vld [vmem:[#allocation3 + $0x100] sm:$0xf]  ;;  %v7768_v21 = vor.u32 %v8991_v19, %v7765_v13  ;;  %v9007_v59 = vld [vmem:[#allocation3 + $0x1f4] sm:$0xf]  ;;  %2255 = vmatmul.bf16.gmra.mxu0 %v9892_v38 }
 0x23b   : > { %2303 = vmatpush.bf16.msra.mxu2 %v7764_v20  ;;  %v7708_v18 = vor.u32 %v8978_v11, %v7707_v17  ;;  %v8996_v20 = vld [vmem:[#allocation3 + $0x194] sm:$0xf0]  ;;  %v8943_v9 = vld [vmem:[%s11175_s2 + $0x6c] sm:$0xf0]  ;;  %v7725_v11 = vld [vmem:[#allocation3 + $0x128] sm:$0xf0] }
 0x23c   : > { %v7780_v33 = vor.u32 %v8996_v20, %v7779_v22  ;;  %v8941_v13 = vld [vmem:[%s11175_s2 + $0x64] sm:$0xf]  ;;  %v7565_v14 = vld [vmem:[%s11175_s2 + $0x70] sm:$0xf0]  ;;  %v9001_v15 = vld [vmem:[#allocation3 + $0x1c4] sm:$0xf] }
 0x23d   : > { %v8981_v17 = vld [vmem:[#allocation3 + $0x124] sm:$0xf]  ;;  %v7797_v20 = vld [vmem:[#allocation3 + $0x1b8] sm:$0xf0]  ;;  %v7541_v22 = vld [vmem:[%s11175_s2 + $0x38] sm:$0xf0] }
 0x23e   : > { %v7728_v19 = vor.u32 %v8981_v17, %v7725_v11  ;;  %v1758_v11 = vld [vmem:[%s11175_s2 + $0x88] sm:$0xff]  ;;  %v2579_v17 = vld [vmem:[#allocation4 + $0x110] sm:$0xff] }
 0x23f   : > { %2304 = vmatpush.bf16.msra.mxu2 %v7756_v32  ;;  %v8937_v32 = vld [vmem:[%s11175_s2 + $0x44] sm:$0xf] }
 0x241   : > { %v9008_v35 = vld [vmem:[#allocation3 + $0x1f4] sm:$0xf0]  ;;  %v7829_v40 = vld [vmem:[#allocation3 + $0x1f8] sm:$0xf0] }
 0x242   : > { %v7828_v36 = vor.u32 %v9008_v35, %v7827_v34  ;;  %v7549_v34 = vld [vmem:[%s11175_s2 + $0x50] sm:$0xf0]  ;;  %v8989_v35 = vld [vmem:[#allocation3 + $0x164] sm:$0xf]  ;;  %v7832_v46 = vor.u32 %v9007_v59, %v7829_v40  ;;  %v7555_v59 = vld [vmem:[%s11175_s2 + $0x48] sm:$0xf] }
 0x243   : > { %2305 = vmatpush.bf16.msra.mxu2 %v7748_v39  ;;  %v7760_v39 = vor.u32 %v8989_v35, %v7757_v26  ;;  %v9937_v26 = vor.u32 %v8941_v13, %v7565_v14  ;;  %v8997_v40 = vld [vmem:[#allocation3 + $0x1a4] sm:$0xf]  ;;  %v1875_v13 = vunpack.c.l.b16 %v1758_v11 }
 0x244   : > { %2336 = vmatpush.bf16.msra.mxu3 %v7828_v36  ;;  %v8994_v36 = vld [vmem:[#allocation3 + $0x184] sm:$0xf0] }
 0x245   : > { %v7772_v45 = vor.u32 %v8994_v36, %v7771_v44  ;;  %v7789_v36 = vld [vmem:[#allocation3 + $0x1a8] sm:$0xf0]  ;;  %v1895_v14 = vpack.c.b16 %v1875_v13, %v1875_v13  ;;  %v2605_v13 = vld [vmem:[#allocation4 + $0x18] sm:$0xff] }
 0x246   : > { %v7792_v41 = vor.u32 %v8997_v40, %v7789_v36  ;;  %2613 = vrot.lane.b32.xlu0 %v2605_v13, %s9473_s17 }
 0x247   : > { %2306 = vmatpush.bf16.msra.mxu2 %v7740_v58  ;;  %v7749_v58 = vld [vmem:[#allocation3 + $0x158] sm:$0xf0] }
 0x248   : > { %2337 = vmatpush.bf16.msra.mxu3 %v7820_v43  ;;  %v9901_v43 = vor.u32 %v8937_v32, %v7549_v34  ;;  %v7800_v32 = vor.u32 %v8999_v30, %v7797_v20  ;;  %v8979_v34 = vld [vmem:[#allocation3 + $0x114] sm:$0xf] }
 0x249   : > { %v7720_v35 = vor.u32 %v8979_v34, %v7717_v29 }
 0x24a   : > { %2288 = vmatmul.bf16.gmra.mxu1 %v9901_v43 }
 0x24b   : > { %2307 = vmatpush.bf16.msra.mxu2 %v7732_v53  ;;  %v9005_v53 = vld [vmem:[#allocation3 + $0x1e4] sm:$0xf] }
 0x24c   : > { %2338 = vmatpush.bf16.msra.mxu3 %v7812_v49  ;;  %v8987_v49 = vld [vmem:[#allocation3 + $0x154] sm:$0xf]  ;;  %v7824_v54 = vor.u32 %v9005_v53, %v7821_v51  ;;  %v7773_v53 = vld [vmem:[#allocation3 + $0x188] sm:$0xf0] }
 0x24d   : > { %v7752_v50 = vor.u32 %v8987_v49, %v7749_v58  ;;  %v7781_v58 = vld [vmem:[#allocation3 + $0x198] sm:$0xf0]  ;;  %v8995_v49 = vld [vmem:[#allocation3 + $0x194] sm:$0xf] }
 0x24f   : > { %2308 = vmatpush.bf16.msra.mxu2 %v7724_v1  ;;  %v8936_v1 = vld [vmem:[%s11175_s2 + $0x34] sm:$0xf0] }
 0x250   : > { %2339 = vmatpush.bf16.msra.mxu3 %v7804_v63  ;;  %v7733_v63 = vld [vmem:[#allocation3 + $0x138] sm:$0xf0]  ;;  %v9914_v6 = vor.u32 %v8936_v1, %v7539_v0  ;;  %v7557_v0 = vld [vmem:[%s11175_s2 + $0x58] sm:$0xf0] }
 0x253   : > { %2309 = vmatpush.bf16.msra.mxu2 %v7716_v7  ;;  %v7805_v7 = vld [vmem:[#allocation3 + $0x1c8] sm:$0xf0] }
 0x254   : > { %2340 = vmatpush.bf16.msra.mxu3 %v7796_v5  ;;  %v7736_v5 = vor.u32 %v8983_v4, %v7733_v63  ;;  %v8938_v63 = vld [vmem:[%s11175_s2 + $0x4c] sm:$0xf]  ;;  %v8944_v4 = vld [vmem:[%s11175_s2 + $0x74] sm:$0xf0] }
 0x255   : > { %v7560_v2 = vor.u32 %v8938_v63, %v7557_v0 }
 0x257   : > { %2310 = vmatpush.bf16.msra.mxu2 %v7708_v18  ;;  %v9928_v18 = vor.u32 %v8943_v9, %v7563_v8  ;;  %v7573_v8 = vld [vmem:[%s11175_s2 + $0x78] sm:$0xf0] }
 0x258   : > { %2341 = vmatpush.bf16.msra.mxu3 %v7788_v16  ;;  %v7808_v16 = vor.u32 %v9001_v15, %v7805_v7  ;;  %v8942_v7 = vld [vmem:[%s11175_s2 + $0x6c] sm:$0xf]  ;;  %v1876_v15 = vunpack.c.h.b16 %v1758_v11 }
 0x259   : > { %2260 = vmatmul.bf16.gmra.mxu0 %v9928_v18  ;;  %v7576_v9 = vor.u32 %v8942_v7, %v7573_v8 }
 0x25a   : > { %2311 = vmatmul.bf16.vlgmr.msra.gmra.mxu2 %v9878_v24  ;;  %2293 = vmatmul.bf16.gmra.mxu1 %v9937_v26 }
 0x25b   : > { %2435 = vmatpush.bf16.msrb.mxu2 %v7768_v21  ;;  %v8934_v21 = vld [vmem:[%s11175_s2 + $0x2c] sm:$0xf] }
 0x25c   : > { %2342 = vmatpush.bf16.msra.mxu3 %v7780_v33  ;;  %v9939_v33 = vor.u32 %v8934_v21, %v7541_v22 }
 0x25f   : > { %2436 = vmatpush.bf16.msrb.mxu2 %v7760_v39  ;;  %v7709_v39 = vld [vmem:[#allocation3 + $0x108] sm:$0xf0] }
 0x260   : > { %2343 = vmatpush.bf16.msra.mxu3 %v7772_v45  ;;  %v7712_v44 = vor.u32 %v8977_v42, %v7709_v39  ;;  %v1757_v45 = vld [vmem:[%s11175_s2 + $0x80] sm:$0xff] }
 0x261   : > { %v1873_v51 = vunpack.c.l.b16 %v1757_v45 }
 0x263   : > { %2437 = vmatpush.bf16.msrb.mxu2 %v7752_v50  ;;  %2344 = vmatmul.bf16.vlgmr.msra.gmra.mxu3 %v9903_v47  ;;  %v7784_v50 = vor.u32 %v8995_v49, %v7781_v58  ;;  %v1893_v61 = vpack.c.b16 %v1873_v51, %v1873_v51 }
 0x264   : > { %2468 = vmatpush.bf16.msrb.mxu3 %v7832_v46  ;;  %v8940_v46 = vld [vmem:[%s11175_s2 + $0x54] sm:$0xf0] }
 0x265   : > { %v7556_v52 = vor.u32 %v8940_v46, %v7555_v59 }
 0x267   : > { %2438 = vmatpush.bf16.msrb.mxu2 %v7744_v57  ;;  %v7776_v57 = vor.u32 %v8993_v56, %v7773_v53 }
 0x268   : > { %2469 = vmatpush.bf16.msrb.mxu3 %v7824_v54  ;;  %v1874_v54 = vunpack.c.h.b16 %v1757_v45 }
 0x269   : > { %2265 = vmatmul.bf16.gmra.mxu0 %v1893_v61 }
 0x26a   : > { %2316 = vmatmul.bf16.gmra.mxu2 %v9914_v6  ;;  %v1894_v1 = vpack.c.b16 %v1874_v54, %v1874_v54 }
 0x26b   : > { %2439 = vmatpush.bf16.msrb.mxu2 %v7736_v5 }
 0x26c   : > { %2470 = vmatpush.bf16.msrb.mxu3 %v7816_v3  ;;  %2298 = vmatmul.bf16.gmra.mxu1 %v1894_v1  ;;  %v7571_v3 = vld [vmem:[%s11175_s2 + $0x68] sm:$0xf] }
 0x26d   : > { %v7572_v5 = vor.u32 %v8944_v4, %v7571_v3 }
 0x26f   : > { %2440 = vmatpush.bf16.msrb.mxu2 %v7728_v19 }
 0x270   : > { %2471 = vmatpush.bf16.msrb.mxu3 %v7808_v16  ;;  %v1896_v16 = vpack.c.b16 %v1876_v15, %v1876_v15 }
 0x273   : > { %2441 = vmatpush.bf16.msrb.mxu2 %v7720_v35  ;;  %2349 = vmatmul.bf16.gmra.mxu3 %v9939_v33 }
 0x274   : > { %2472 = vmatpush.bf16.msrb.mxu3 %v7800_v32 }
 0x277   : > { %2442 = vmatpush.bf16.msrb.mxu2 %v7712_v44 }
 0x278   : > { %2473 = vmatpush.bf16.msrb.mxu3 %v7792_v41 }
 0x279   : > { %2377 = vmatmul.bf16.vlgmr.msrb.gmra.mxu0 %v9845_v28  ;;  %v9981_v28 = vld [vmem:[#allocation4] sm:$0xff] }
 0x27a   : > { %2321 = vmatmul.bf16.gmra.mxu2 %v7556_v52  ;;  %2525 = vrot.lane.b32.xlu1 %v9981_v28, %s9477_s21 }
 0x27c   : > { %2474 = vmatpush.bf16.msrb.mxu3 %v7784_v50  ;;  %2410 = vmatmul.bf16.vlgmr.msrb.gmra.mxu1 %v9850_v31  ;;  %v2539_v31 = vld [vmem:[#allocation4 + $0x20] sm:$0xff] }
 0x280   : > { %2475 = vmatpush.bf16.msrb.mxu3 %v7776_v57 }
 0x282   : > { %2545 = vrot.lane.b32.xlu1 %v2539_v31, %s9478_s22 }
 0x283   : > { %2354 = vmatmul.bf16.gmra.mxu3 %v7560_v2 }
 0x289   : > { %2382 = vmatmul.bf16.gmra.mxu0 %v9863_v55 }
 0x28a   : > { %2326 = vmatmul.bf16.gmra.mxu2 %v7572_v5 }
 0x28c   : > { %2415 = vmatmul.bf16.gmra.mxu1 %v9868_v60 }
 0x290   : > { %v2246_v55 = vpop.f32.mrf.mxu0  ;;  %v2279_v60 = vpop.f32.mrf.mxu1 }
 0x291   : > { %v2280_v29 = vadd.f32 %v2279_v60, %v2246_v55 }
 0x293   : > { %2359 = vmatmul.bf16.gmra.mxu3 %v7576_v9 }
 0x299   : > { %2387 = vmatmul.bf16.gmra.mxu0 %v9892_v38  ;;  %v2645_v38 = vld [vmem:[#allocation4 + $0xd8] sm:$0xff] }
 0x29a   : > { %2331 = vmatmul.bf16.gmra.mxu2 %v1895_v14  ;;  %2653 = vrot.lane.b32.xlu2 %v2645_v38, %s9474_s18 }
 0x29c   : > { %2420 = vmatmul.bf16.gmra.mxu1 %v9901_v43  ;;  %v2248_v43 = vpop.f32.mrf.mxu0 }
 0x2a3   : > { %2364 = vmatmul.bf16.gmra.mxu3 %v1896_v16 }
 0x2a9   : > { %2392 = vmatmul.bf16.gmra.mxu0 %v9928_v18 }
 0x2aa   : > { %2443 = vmatmul.bf16.vlgmr.msrb.gmra.mxu2 %v9878_v24  ;;  %v2559_v24 = vld [vmem:[#allocation4 + $0x108] sm:$0xff] }
 0x2ab   : > { %2565 = vrot.lane.b32.xlu1 %v2559_v24, %s9476_s20 }
 0x2ac   : > { %2425 = vmatmul.bf16.gmra.mxu1 %v9937_v26 }
 0x2b3   : > { %2476 = vmatmul.bf16.vlgmr.msrb.gmra.mxu3 %v9903_v47  ;;  %v2281_v47 = vpop.f32.mrf.mxu1  ;;  %2585 = vrot.lane.b32.xlu1 %v2579_v17, %s9475_s19 }
 0x2b4   : > { %v2282_v40 = vadd.f32 %v2281_v47, %v2248_v43  ;;  %v2625_v43 = vld [vmem:[#allocation4 + $0x118] sm:$0xff] }
 0x2b5   : > { %2633 = vrot.lane.b32.xlu0 %v2625_v43, %s9471_s11 }
 0x2b9   : > { %2397 = vmatmul.bf16.gmra.mxu0 %v1893_v61 }
 0x2ba   : > { %2448 = vmatmul.bf16.gmra.mxu2 %v9914_v6  ;;  %v2251_v6 = vpop.f32.mrf.mxu0 }
 0x2bb   : > { %v2284_v19 = vpop.f32.mrf.mxu1 }
 0x2bc   : > { %2430 = vmatmul.bf16.gmra.mxu1 %v1894_v1  ;;  %v2285_v45 = vadd.f32 %v2284_v19, %v2251_v6 }
 0x2c2   : > { %v2253_v18 = vpop.f32.mrf.mxu0 }
 0x2c3   : > { %2481 = vmatmul.bf16.gmra.mxu3 %v9939_v33  ;;  %v2286_v20 = vpop.f32.mrf.mxu1 }
 0x2c4   : > { %v2287_v56 = vadd.f32 %v2286_v20, %v2253_v18 }
 0x2ca   : > { %2453 = vmatmul.bf16.gmra.mxu2 %v7556_v52  ;;  %v2256_v21 = vpop.f32.mrf.mxu0 }
 0x2cb   : > { %v2289_v22 = vpop.f32.mrf.mxu1 }
 0x2cc   : > { %v2290_v26 = vadd.f32 %v2289_v22, %v2256_v21 }
 0x2d2   : > { %v2258_v33 = vpop.f32.mrf.mxu0 }
 0x2d3   : > { %2486 = vmatmul.bf16.gmra.mxu3 %v7560_v2  ;;  %v2291_v34 = vpop.f32.mrf.mxu1 }
 0x2da   : > { %2458 = vmatmul.bf16.gmra.mxu2 %v7572_v5  ;;  %v2261_v41 = vpop.f32.mrf.mxu0 }
 0x2db   : > { %v2294_v44 = vpop.f32.mrf.mxu1 }
 0x2dc   : > { %v2295_v60 = vadd.f32 %v2294_v44, %v2261_v41 }
 0x2dd   : > { %v2312_v30 = vpop.f32.mrf.mxu2 }
 0x2de   : > { %v2313_v32 = vadd.f32 %v2312_v30, %v2280_v29 }
 0x2e2   : > { %v9996_v50 = vpop.f32.mrf.mxu0 }
 0x2e3   : > { %2491 = vmatmul.bf16.gmra.mxu3 %v7576_v9  ;;  %v9998_v51 = vpop.f32.mrf.mxu1 }
 0x2e5   : > { %v2314_v39 = vpop.f32.mrf.mxu2 }
 0x2e6   : > { %v2345_v35 = vpop.f32.mrf.mxu3  ;;  %v2315_v42 = vadd.f32 %v2314_v39, %v2282_v40 }
 0x2e7   : > { %v2346_v36 = vadd.f32 %v2345_v35, %v2313_v32 }
 0x2e9   : > { %2527 = vrot.lane.b32.xlu2 %v2346_v36, %s9477_s21 }
 0x2ea   : > { %2463 = vmatmul.bf16.gmra.mxu2 %v1895_v14  ;;  %v2266_v57 = vpop.f32.mrf.mxu0  ;;  %v2292_v14 = vadd.f32 %v2291_v34, %v2258_v33 }
 0x2eb   : > { %v2299_v63 = vpop.f32.mrf.mxu1 }
 0x2ec   : > { %v2300_v1 = vadd.f32 %v2299_v63, %v2266_v57 }
 0x2ed   : > { %v2317_v46 = vpop.f32.mrf.mxu2 }
 0x2ee   : > { %v2347_v58 = vpop.f32.mrf.mxu3  ;;  %v2318_v49 = vadd.f32 %v2317_v46, %v2285_v45 }
 0x2ef   : > { %v2348_v59 = vadd.f32 %v2347_v58, %v2315_v42 }
 0x2f1   : > { %2547 = vrot.lane.b32.xlu2 %v2348_v59, %s9478_s22 }
 0x2f2   : > { %v2268_v5 = vpop.f32.mrf.mxu0 }
 0x2f3   : > { %2496 = vmatmul.bf16.gmra.mxu3 %v1896_v16  ;;  %v2301_v7 = vpop.f32.mrf.mxu1 }
 0x2f5   : > { %v2319_v54 = vpop.f32.mrf.mxu2 }
 0x2f6   : > { %v2350_v52 = vpop.f32.mrf.mxu3  ;;  %v2320_v61 = vadd.f32 %v2319_v54, %v2287_v56 }
 0x2f7   : > { %v2351_v53 = vadd.f32 %v2350_v52, %v2318_v49 }
 0x2f9   : > { %2567 = vrot.lane.b32.xlu2 %v2351_v53, %s9476_s20 }
 0x2fa   : > { %v2378_v15 = vpop.f32.mrf.mxu0 }
 0x2fb   : > { %v2411_v31 = vpop.f32.mrf.mxu1 }
 0x2fc   : > { %v2412_v44 = vadd.f32 %v2411_v31, %v2378_v15 }
 0x2fd   : > { %v2322_v3 = vpop.f32.mrf.mxu2 }
 0x2fe   : > { %v2352_v0 = vpop.f32.mrf.mxu3  ;;  %v2323_v4 = vadd.f32 %v2322_v3, %v2290_v26 }
 0x2ff   : > { %v2353_v2 = vadd.f32 %v2352_v0, %v2320_v61 }
 0x301   : > { %2587 = vrot.lane.b32.xlu2 %v2353_v2, %s9475_s19 }
 0x302   : > { %v2380_v17 = vpop.f32.mrf.mxu0 }
 0x303   : > { %v2413_v6 = vpop.f32.mrf.mxu1 }
 0x304   : > { %v2414_v52 = vadd.f32 %v2413_v6, %v2380_v17 }
 0x305   : > { %v2324_v11 = vpop.f32.mrf.mxu2 }
 0x306   : > { %v2355_v8 = vpop.f32.mrf.mxu3  ;;  %v2325_v16 = vadd.f32 %v2324_v11, %v2292_v14 }
 0x307   : > { %v10002_v9 = vadd.f32 %v2355_v8, %v2323_v4 }
 0x30a   : > { %v2383_v21 = vpop.f32.mrf.mxu0 }
 0x30b   : > { %v2416_v22 = vpop.f32.mrf.mxu1 }
 0x30c   : > { %v2417_v61 = vadd.f32 %v2416_v22, %v2383_v21 }
 0x30d   : > { %v2327_v38 = vpop.f32.mrf.mxu2 }
 0x30e   : > { %v2357_v55 = vpop.f32.mrf.mxu3  ;;  %v2328_v47 = vadd.f32 %v2327_v38, %v2295_v60  ;;  %v2297_v60 = vadd.f32 %v9998_v51, %v9996_v50 }
 0x30f   : > { %v2358_v24 = vadd.f32 %v2357_v55, %v2325_v16 }
 0x311   : > { %2609 = vrot.lane.b32.xlu1 %v2358_v24, %s9473_s17 }
 0x312   : > { %v2385_v32 = vpop.f32.mrf.mxu0 }
 0x313   : > { %v2418_v33 = vpop.f32.mrf.mxu1 }
 0x314   : > { %v2419_v8 = vadd.f32 %v2418_v33, %v2385_v32 }
 0x315   : > { %v2329_v20 = vpop.f32.mrf.mxu2 }
 0x316   : > { %v2360_v19 = vpop.f32.mrf.mxu3  ;;  %v2330_v24 = vadd.f32 %v2329_v20, %v2297_v60 }
 0x317   : > { %v2361_v18 = vadd.f32 %v2360_v19, %v2328_v47 }
 0x319   : > { %2629 = vrot.lane.b32.xlu1 %v2361_v18, %s9471_s11 }
 0x31a   : > { %v2388_v39 = vpop.f32.mrf.mxu0 }
 0x31b   : > { %v2421_v40 = vpop.f32.mrf.mxu1 }
 0x31c   : > { %v2422_v42 = vadd.f32 %v2421_v40, %v2388_v39 }
 0x31d   : > { %v2332_v29 = vpop.f32.mrf.mxu2 }
 0x31e   : > { %v2362_v26 = vpop.f32.mrf.mxu3  ;;  %v2333_v30 = vadd.f32 %v2332_v29, %v2300_v1  ;;  %v2665_v29 = vld [vmem:[#allocation4 + $0xb0] sm:$0xff] }
 0x31f   : > { %v2363_v43 = vadd.f32 %v2362_v26, %v2330_v24 }
 0x322   : > { %v2390_v53 = vpop.f32.mrf.mxu0 }
 0x323   : > { %v2423_v56 = vpop.f32.mrf.mxu1 }
 0x324   : > { %v2424_v18 = vadd.f32 %v2423_v56, %v2390_v53  ;;  %v2614_v53 = vpop.permute.xlu0 %2613 }
 0x325   : > { %v2334_v36 = vpop.f32.mrf.mxu2 }
 0x326   : > { %v2365_v34 = vpop.f32.mrf.mxu3 }
 0x327   : > { %v10008_v35 = vadd.f32 %v2365_v34, %v2333_v30 }
 0x32a   : > { %v2393_v3 = vpop.f32.mrf.mxu0 }
 0x32b   : > { %v2426_v7 = vpop.f32.mrf.mxu1 }
 0x32c   : > { %v2427_v30 = vadd.f32 %v2426_v7, %v2393_v3  ;;  %v2634_v56 = vpop.permute.xlu0 %2633 }
 0x32d   : > { %v2444_v58 = vpop.f32.mrf.mxu2 }
 0x32e   : > { %v2367_v41 = vpop.f32.mrf.mxu3  ;;  %v2445_v45 = vadd.f32 %v2444_v58, %v2412_v44 }
 0x332   : > { %v2395_v31 = vpop.f32.mrf.mxu0 }
 0x333   : > { %v2428_v55 = vpop.f32.mrf.mxu1 }
 0x334   : > { %v2429_v39 = vadd.f32 %v2428_v55, %v2395_v31 }
 0x335   : > { %v2446_v49 = vpop.f32.mrf.mxu2 }
 0x336   : > { %v2477_v59 = vpop.f32.mrf.mxu3  ;;  %v2447_v54 = vadd.f32 %v2446_v49, %v2414_v52 }
 0x337   : > { %v2478_v46 = vadd.f32 %v2477_v59, %v2445_v45 }
 0x339   : > { %2529 = vrot.lane.b32.xlu0 %v2478_v46, %s9477_s21 }
 0x33a   : > { %v2398_v6 = vpop.f32.mrf.mxu0 }
 0x33b   : > { %v2431_v19 = vpop.f32.mrf.mxu1 }
 0x33c   : > { %v2432_v44 = vadd.f32 %v2431_v19, %v2398_v6 }
 0x33d   : > { %v2449_v0 = vpop.f32.mrf.mxu2 }
 0x33e   : > { %v2479_v57 = vpop.f32.mrf.mxu3  ;;  %v2450_v1 = vadd.f32 %v2449_v0, %v2417_v61  ;;  %v2526_v61 = vpop.permute.xlu1 %2525 }
 0x33f   : > { %v2480_v63 = vadd.f32 %v2479_v57, %v2447_v54  ;;  %v2654_v54 = vpop.permute.xlu2 %2653 }
 0x341   : > { %2549 = vrot.lane.b32.xlu0 %v2480_v63, %s9478_s22 }
 0x342   : > { %v2400_v50 = vpop.f32.mrf.mxu0 }
 0x343   : > { %v2433_v51 = vpop.f32.mrf.mxu1 }
 0x345   : > { %v2451_v5 = vpop.f32.mrf.mxu2 }
 0x346   : > { %v2482_v2 = vpop.f32.mrf.mxu3  ;;  %v2452_v11 = vadd.f32 %v2451_v5, %v2419_v8  ;;  %v10026_v5 = vld [vmem:[#allocation4 + $0x70] sm:$0xff] }
 0x347   : > { %v2483_v4 = vadd.f32 %v2482_v2, %v2450_v1  ;;  %v2528_v57 = vpop.permute.xlu2 %2527  ;;  %v2546_v1 = vpop.permute.xlu1 %2545 }
 0x349   : > { %2569 = vrot.lane.b32.xlu0 %v2483_v4, %s9476_s20 }
 0x34d   : > { %v2454_v15 = vpop.f32.mrf.mxu2 }
 0x34e   : > { %v2484_v13 = vpop.f32.mrf.mxu3  ;;  %v2455_v16 = vadd.f32 %v2454_v15, %v2422_v42 }
 0x34f   : > { %v2485_v14 = vadd.f32 %v2484_v13, %v2452_v11  ;;  %v2548_v0 = vpop.permute.xlu2 %2547  ;;  %v2566_v4 = vpop.permute.xlu1 %2565 }
 0x351   : > { %2589 = vrot.lane.b32.xlu0 %v2485_v14, %s9475_s19 }
 0x355   : > { %v2456_v17 = vpop.f32.mrf.mxu2 }
 0x356   : > { %v2487_v38 = vpop.f32.mrf.mxu3  ;;  %v2457_v21 = vadd.f32 %v2456_v17, %v2424_v18  ;;  %v2551_v18 = vsel %vm11189_vm1, %v2546_v1, %v2548_v0 }
 0x357   : > { %v10016_v47 = vadd.f32 %v2487_v38, %v2455_v16  ;;  %v2568_v3 = vpop.permute.xlu2 %2567  ;;  %v2586_v8 = vpop.permute.xlu1 %2585 }
 0x359   : > { %2649 = vrot.lane.b32.xlu0 %v2363_v43, %s9474_s18 }
 0x35d   : > { %v2459_v33 = vpop.f32.mrf.mxu2 }
 0x35e   : > { %v2489_v22 = vpop.f32.mrf.mxu3  ;;  %v2460_v20 = vadd.f32 %v2459_v33, %v2427_v30  ;;  %v2555_v30 = vsel %vm11188_vm11, %v2551_v18, 0.0  ;;  %vm11212_vm11 = vcmp.lt.s32.totalorder %v9583_v25, 15 }
 0x35f   : > { %v2490_v32 = vadd.f32 %v2489_v22, %v2457_v21  ;;  %v2588_v7 = vpop.permute.xlu2 %2587  ;;  %v2531_v22 = vsel %vm11190_vm12, %v2526_v61, %v2528_v57 }
 0x360   : > { %v2591_v33 = vsel %vm430_vm15, %v2586_v8, %v2588_v7 }
 0x361   : > { %2611 = vrot.lane.b32.xlu2 %v2490_v32, %s9473_s17  ;;  %2673 = vrot.lane.b32.xlu0 %v2665_v29, %s9472_s12  ;;  %v2571_v29 = vsel %vm11200_vm13, %v2566_v4, %v2568_v3 }
 0x365   : > { %v2461_v36 = vpop.f32.mrf.mxu2 }
 0x366   : > { %v2492_v26 = vpop.f32.mrf.mxu3  ;;  %v2462_v40 = vadd.f32 %v2461_v36, %v2429_v39  ;;  %v2595_v36 = vsel %vm350_vm8, %v2591_v33, 0.0 }
 0x367   : > { %v2493_v34 = vadd.f32 %v2492_v26, %v2460_v20  ;;  %v2535_v20 = vsel %vm9658_vm4, %v2531_v22, 0.0  ;;  %v2575_v26 = vsel %vm9634_vm14, %v2571_v29, 0.0 }
 0x369   : > { %2631 = vrot.lane.b32.xlu2 %v2493_v34, %s9471_s11  ;;  %v2557_v34 = vadd.f32 %v2555_v30, %v2535_v20 }
 0x36d   : > { %v2464_v58 = vpop.f32.mrf.mxu2 }
 0x36e   : > { %v2494_v41 = vpop.f32.mrf.mxu3  ;;  %v2465_v45 = vadd.f32 %v2464_v58, %v2432_v44 }
 0x36f   : > { %v2495_v42 = vadd.f32 %v2494_v41, %v2462_v40 }
 0x371   : > { %2651 = vrot.lane.b32.xlu1 %v2495_v42, %s9474_s18  ;;  %v2577_v42 = vadd.f32 %v2575_v26, %v2557_v34 }
 0x375   : > { %v2466_v49 = vpop.f32.mrf.mxu2 }
 0x376   : > { %v2497_v59 = vpop.f32.mrf.mxu3 }
 0x377   : > { %v2498_v46 = vadd.f32 %v2497_v59, %v2465_v45 }
 0x379   : > { %2669 = vrot.lane.b32.xlu1 %v10008_v35, %s9472_s12  ;;  %2671 = vrot.lane.b32.xlu2 %v2498_v46, %s9472_s12 }
 0x37e   : > { %v2499_v52 = vpop.f32.mrf.mxu3 }
 0x381   : > { %2841 = vrot.lane.b32.xlu2 %v10026_v5, %s9472_s12  ;;  %2801 = vrot.lane.b32.xlu1 %v10026_v5, %s9471_s11 }
 0x383   : > { %v2610_v16 = vpop.permute.xlu1 %2609 }
 0x389   : > { %2781 = vrot.lane.b32.xlu2 %v10026_v5, %s9473_s17 }
 0x38b   : > { %v2630_v32 = vpop.permute.xlu1 %2629 }
 0x3ab   : > { %v2530_v63 = vpop.permute.xlu0 %2529 }
 0x3ac   : > { %v2532_v14 = vsel %vm11190_vm12, %v2528_v57, %v2530_v63  ;;  %vm11214_vm12 = vmmov %vm11211_vm0 }
 0x3ad   : > { %v2536_v60 = vsel %vm351_vm6, %v2532_v14, 0.0 }
 0x3b3   : > { %v2550_v2 = vpop.permute.xlu0 %2549 }
 0x3b4   : > { %v2552_v31 = vsel %vm11189_vm1, %v2548_v0, %v2550_v2  ;;  %vm11213_vm1 = vcmp.lt.s32.totalorder %v9572_v12, 240 }
 0x3b5   : > { %v2558_v38 = vadd.f32 %v2552_v31, %v2536_v60 }
 0x3bb   : > { %v2570_v35 = vpop.permute.xlu0 %2569  ;;  %v2612_v11 = vpop.permute.xlu2 %2611 }
 0x3bc   : > { %v2572_v15 = vsel %vm11200_vm13, %v2568_v3, %v2570_v35  ;;  %v2616_v50 = vsel %vm11193_vm10, %v2612_v11, %v2614_v53  ;;  %v2615_v45 = vsel %vm11193_vm10, %v2610_v16, %v2612_v11 }
 0x3bd   : > { %v2576_v24 = vsel %vm397_vm2, %v2572_v15, 0.0  ;;  %v2620_v39 = vsel %vm397_vm2, %v2616_v50, 0.0  ;;  %v2619_v61 = vsel %vm11212_vm11, %v2615_v45, 0.0 }
 0x3be   : > { %v2578_v17 = vadd.f32 %v2576_v24, %v2558_v38 }
 0x3c3   : > { %v2590_v13 = vpop.permute.xlu0 %2589  ;;  %v2632_v6 = vpop.permute.xlu2 %2631 }
 0x3c4   : > { %v2592_v55 = vsel %vm430_vm15, %v2588_v7, %v2590_v13  ;;  %v2636_v58 = vsel %vm11192_vm7, %v2632_v6, %v2634_v56  ;;  %v2635_v52 = vsel %vm11192_vm7, %v2630_v32, %v2632_v6  ;;  %v9461_v7 = vld [vmem:[%s9551_s16 + $0x8] sm:$0xff] }
 0x3c5   : > { %v2596_v43 = vsel %vm351_vm6, %v2592_v55, 0.0  ;;  %v2640_v46 = vsel %vm9607_vm9, %v2636_v58, 0.0  ;;  %v2639_v2 = vsel %vm350_vm8, %v2635_v52, 0.0  ;;  %v9462_v55 = vld [vmem:[%s9551_s16] sm:$0xff] }
 0x3c6   : > { %v2598_v21 = vadd.f32 %v2596_v43, %v2578_v17 }
 0x3c8   : > { %v2602_v51 = vadd.f32 %v2598_v21, %v10016_v47  ;;  %v2597_v47 = vadd.f32 %v2595_v36, %v2577_v42 }
 0x3ca   : > { %v2622_v44 = vadd.f32 %v2620_v39, %v2602_v51  ;;  %v2601_v0 = vadd.f32 %v2597_v47, %v10002_v9 }
 0x3cb   : > { %v2650_v19 = vpop.permute.xlu0 %2649 }
 0x3cc   : > { %v2642_v53 = vadd.f32 %v2640_v46, %v2622_v44  ;;  %v2621_v3 = vadd.f32 %v2619_v61, %v2601_v0 }
 0x3ce   : > { %v2641_v35 = vadd.f32 %v2639_v2, %v2621_v3 }
 0x3d3   : > { %v2674_v40 = vpop.permute.xlu0 %2673  ;;  %v2672_v41 = vpop.permute.xlu2 %2671 }
 0x3d4   : > { %v2676_v59 = vsel %vm11191_vm3, %v2672_v41, %v2674_v40 }
 0x3d5   : > { %v2680_v63 = vsel %vm9591_vm5, %v2676_v59, 0.0 }
 0x3e3   : > { %v2652_v49 = vpop.permute.xlu1 %2651 }
 0x3e4   : > { %v2656_v57 = vsel %vm11211_vm0, %v2652_v49, %v2654_v54  ;;  %v2655_v54 = vsel %vm11214_vm12, %v2650_v19, %v2652_v49  ;;  %vm11215_vm0 = vmmov %vm11212_vm11 }
 0x3e5   : > { %v2660_v56 = vsel %vm11213_vm1, %v2656_v57, 0.0  ;;  %v2661_v13 = vadd.f32 %v2655_v54, %v2641_v35  ;;  %vm11216_vm1 = vmmov %vm11215_vm0 }
 0x3e6   : > { %v2662_v1 = vadd.f32 %v2660_v56, %v2642_v53  ;;  %vm11217_vm11 = vmmov %vm11214_vm12  ;;  %vm11218_vm12 = vcmp.lt.s32.totalorder %v9572_v12, 240 }
 0x3e8   : > { %v2682_v4 = vadd.f32 %v2680_v63, %v2662_v1 }
 0x3ea   : > { %v10078_v8 = vadd.f32 %v9461_v7, %v2682_v4 }
 0x3eb   : > { %v2670_v11 = vpop.permute.xlu1 %2669 }
 0x3ec   : > { %v2686_v14 = vmax.f32 %v10078_v8, 0.0  ;;  %v2675_v15 = vsel %vm11191_vm3, %v2670_v11, %v2672_v41 }
 0x3ed   : > { %v2679_v9 = vsel %vm11215_vm0, %v2675_v15, 0.0  ;;  %vm11219_vm0 = vmmov %vm11217_vm11 }
 0x3ee   : > { %v2681_v16 = vadd.f32 %v2679_v9, %v2661_v13  ;;  %v9311_v31 = vpack.i.bf16 %v10026_v5, %v2686_v14 }
 0x3f0   : > { %v10086_v60 = vadd.f32 %v9462_v55, %v2681_v16  ;;  %9312 = vrot.lane.b32.xlu2 %v9311_v31, %s9474_s18 }
 0x3f2   : > { %v2685_v24 = vmax.f32 %v10086_v60, 0.0 }
 0x3f3   : > { %v2802_v6 = vpop.permute.xlu1 %2801 }
 0x3f4   : > { %v2769_v38 = vpack.c.bf16 %v2686_v14, %v2685_v24  ;;  %v9301_v43 = vpack.i.bf16 %v2686_v14, %v2685_v24  ;;  %v9326_v17 = vpack.i.bf16 %v2685_v24, %v9981_v28  ;;  %v2842_v28 = vpop.permute.xlu2 %2841 }
 0x3f6   : > { %2770 = vst [vmem:[#allocation2 + $0x20] sm:$0xff] %v2769_v38  ;;  %9302 = vrot.lane.b32.xlu1 %v9301_v43, %s9472_s12  ;;  %9307 = vrot.lane.b32.xlu0 %v9301_v43, %s9471_s11 }
 0x3f8   : > { %9327 = vrot.lane.b32.xlu2 %v9326_v17, %s9475_s19 }
 0x3fc   : > { %v2782_v5 = vpop.permute.xlu2 %2781 }
 0x3fe   : > { %2817 = vrot.lane.b32.xlu0 %v2685_v24, %s9474_s18  ;;  %9317 = vrot.lane.b32.xlu1 %v9301_v43, %s9473_s17 }
 0x400   : > { %2699 = vrot.lane.b32.xlu2 %v2686_v14, %s9477_s21 }
 0x406   : > { %2739 = vrot.lane.b32.xlu1 %v2686_v14, %s9476_s20  ;;  %9322 = vrot.lane.b32.xlu0 %v9326_v17, %s9476_s20 }
 0x40e   : > { %2759 = vrot.lane.b32.xlu0 %v2686_v14, %s9475_s19  ;;  %9332 = vrot.lane.b32.xlu1 %v9326_v17, %s9477_s21 }
 0x416   : > { %9337 = vrot.lane.b32.xlu0 %v9326_v17, %s9478_s22  ;;  %2719 = vrot.lane.b32.xlu1 %v2686_v14, %s9478_s22 }
 0x44a   : > { %v9313_v19 = vpop.permute.xlu2 %9312 }
 0x44b   : > { %v9315_v18 = vunpack.i.h.bf16 %v9313_v19  ;;  %v9314_v21 = vunpack.i.l.bf16 %v9313_v19 }
 0x44d   : > { %v2824_v58 = vsel %vm11217_vm11, %v9314_v21, %v9315_v18  ;;  %vm11221_vm11 = vcmp.lt.s32.totalorder %v9583_v25, 15 }
 0x44e   : > { %v2828_v46 = vsel %vm11218_vm12, %v2824_v58, 0.0 }
 0x452   : > { %v9328_v7 = vpop.permute.xlu2 %9327 }
 0x453   : > { %v9330_v9 = vunpack.i.h.bf16 %v9328_v7  ;;  %v9329_v16 = vunpack.i.l.bf16 %v9328_v7 }
 0x468   : > { %v9303_v22 = vpop.permute.xlu1 %9302  ;;  %v9308_v29 = vpop.permute.xlu0 %9307 }
 0x469   : > { %v9305_v30 = vunpack.i.h.bf16 %v9303_v22  ;;  %v9304_v32 = vunpack.i.l.bf16 %v9303_v22  ;;  %v9310_v33 = vunpack.i.h.bf16 %v9308_v29  ;;  %v9309_v50 = vunpack.i.l.bf16 %v9308_v29 }
 0x46b   : > { %v2843_v51 = vsel %vm11191_vm3, %v9304_v32, %v9305_v30  ;;  %v2844_v20 = vsel %vm11191_vm3, %v9305_v30, %v2842_v28  ;;  %v2804_v26 = vsel %vm11192_vm7, %v9310_v33, %v2802_v6  ;;  %v2803_v34 = vsel %vm11192_vm7, %v9309_v50, %v9310_v33  ;;  %v7883_v50 = vld [vmem:[#allocation2 + $0x20] sm:$0xf] }
 0x46c   : > { %v2847_v36 = vsel %vm11216_vm1, %v2843_v51, 0.0  ;;  %v2848_v39 = vsel %vm9591_vm5, %v2844_v20, 0.0  ;;  %v2808_v40 = vsel %vm9607_vm9, %v2804_v26, 0.0  ;;  %v2807_v41 = vsel %vm350_vm8, %v2803_v34, 0.0  ;;  %v9021_v51 = vld [vmem:[#allocation2 + $0x24] sm:$0xf] }
 0x46d   : > { %v2849_v42 = vpack.c.bf16 %v2848_v39, %v2847_v36  ;;  %v2809_v44 = vpack.c.bf16 %v2808_v40, %v2807_v41  ;;  %vm11220_vm1 = vcmask 1043456   ;;  %v7963_v20 = vld [vmem:[#allocation2 + $0x20] sm:$0xf]  ;;  %v2761_v26 = vsel %vm430_vm15, %v9329_v16, %v9330_v9 }
 0x46e   : > { %vm11222_vm12 = vmmov %vm11220_vm1 }
 0x46f   : > { %2810 = vst [vmem:[#allocation2 + $0x30] sm:$0xff] %v2809_v44  ;;  %v2941_v47 = vunpack.c.l.b16 %v2849_v42  ;;  %v2942_v45 = vunpack.c.h.b16 %v2849_v42  ;;  %v9037_v44 = vld [vmem:[#allocation2 + $0x24] sm:$0xf] }
 0x470   : > { %v2818_v59 = vpop.permute.xlu0 %2817  ;;  %v9318_v49 = vpop.permute.xlu1 %9317 }
 0x471   : > { %v2823_v52 = vsel %vm11219_vm0, %v2818_v59, %v9314_v21  ;;  %v9320_v53 = vunpack.i.h.bf16 %v9318_v49  ;;  %v9319_v57 = vunpack.i.l.bf16 %v9318_v49  ;;  %v2951_v61 = vpack.c.b16 %v2941_v47, %v2941_v47 }
 0x472   : > { %v2829_v56 = vpack.c.bf16 %v2828_v46, %v2823_v52  ;;  %v2952_v63 = vpack.c.b16 %v2942_v45, %v2942_v45  ;;  %vm11223_vm0 = vcmask 138240  }
 0x473   : > { %v2783_v0 = vsel %vm11193_vm10, %v9319_v57, %v9320_v53  ;;  %v2784_v1 = vsel %vm11193_vm10, %v9320_v53, %v2782_v5  ;;  %v10122_v2 = vsel %vm11220_vm1, %v2951_v61, 0  ;;  %v2700_v53 = vpop.permute.xlu2 %2699  ;;  %v2765_v57 = vsel %vm350_vm8, %v2761_v26, 0.0  ;;  %vm11224_vm1 = vmmov %vm11223_vm0 }
 0x474   : > { %2830 = vst [vmem:[#allocation2 + $0x38] sm:$0xff] %v2829_v56  ;;  %v2787_v3 = vsel %vm11221_vm11, %v2783_v0, 0.0  ;;  %v2788_v4 = vsel %vm397_vm2, %v2784_v1, 0.0  ;;  %2994 = vmatpush.bf16.msra.mxu0 %v10122_v2  ;;  %v10130_v54 = vsel %vm11222_vm12, %v2952_v63, 0  ;;  %3296 = vmatpush.bf16.msra.mxu2 %v10122_v2  ;;  %vm11225_vm11 = vcmask 130048  }
 0x475   : > { %v2789_v35 = vpack.c.bf16 %v2788_v4, %v2787_v3  ;;  %3043 = vmatpush.bf16.msra.mxu1 %v10130_v54  ;;  %3345 = vmatpush.bf16.msra.mxu3 %v10130_v54  ;;  %vm11226_vm12 = vmmov %vm11225_vm11 }
 0x476   : > { %v7891_v31 = vld [vmem:[#allocation2 + $0x30] sm:$0xf]  ;;  %v9023_v55 = vld [vmem:[#allocation2 + $0x34] sm:$0xf] }
 0x477   : > { %2790 = vst [vmem:[#allocation2 + $0x28] sm:$0xff] %v2789_v35  ;;  %v7971_v24 = vld [vmem:[#allocation2 + $0x30] sm:$0xf]  ;;  %v9039_v22 = vld [vmem:[#allocation2 + $0x34] sm:$0xf] }
 0x478   : > { %v2740_v11 = vpop.permute.xlu1 %2739  ;;  %v9323_v13 = vpop.permute.xlu0 %9322 }
 0x479   : > { %v9325_v14 = vunpack.i.h.bf16 %v9323_v13  ;;  %v9324_v15 = vunpack.i.l.bf16 %v9323_v13 }
 0x47b   : > { %v2742_v38 = vsel %vm11200_vm13, %v9325_v14, %v2740_v11  ;;  %v2741_v43 = vsel %vm11200_vm13, %v9324_v15, %v9325_v14  ;;  %v9024_v17 = vld [vmem:[#allocation2 + $0x34] sm:$0xf0]  ;;  %v7893_v28 = vld [vmem:[#allocation2 + $0x38] sm:$0xf0] }
 0x47c   : > { %v9040_v5 = vld [vmem:[#allocation2 + $0x34] sm:$0xf0]  ;;  %v2746_v6 = vsel %vm397_vm2, %v2742_v38, 0.0  ;;  %v2745_v19 = vsel %vm9634_vm14, %v2741_v43, 0.0  ;;  %v7892_v18 = vor.u32 %v9024_v17, %v7891_v31  ;;  %v7896_v21 = vor.u32 %v9023_v55, %v7893_v28  ;;  %v7973_v29 = vld [vmem:[#allocation2 + $0x38] sm:$0xf0] }
 0x47d   : > { %v2747_v30 = vpack.c.bf16 %v2746_v6, %v2745_v19  ;;  %v7972_v32 = vor.u32 %v9040_v5, %v7971_v24  ;;  %v7976_v33 = vor.u32 %v9039_v22, %v7973_v29 }
 0x47e   : > { %2995 = vmatpush.bf16.msra.mxu0 %v7892_v18  ;;  %3044 = vmatpush.bf16.msra.mxu1 %v7896_v21  ;;  %v9022_v34 = vld [vmem:[#allocation2 + $0x24] sm:$0xf0]  ;;  %v7885_v36 = vld [vmem:[#allocation2 + $0x28] sm:$0xf0] }
 0x47f   : > { %v9038_v39 = vld [vmem:[#allocation2 + $0x24] sm:$0xf0]  ;;  %2748 = vst [vmem:[#allocation2 + $0x10] sm:$0xff] %v2747_v30  ;;  %3297 = vmatpush.bf16.msra.mxu2 %v7972_v32  ;;  %3346 = vmatpush.bf16.msra.mxu3 %v7976_v33  ;;  %v7884_v40 = vor.u32 %v9022_v34, %v7883_v50  ;;  %v7888_v41 = vor.u32 %v9021_v51, %v7885_v36  ;;  %v7965_v58 = vld [vmem:[#allocation2 + $0x28] sm:$0xf0] }
 0x480   : > { %v7964_v42 = vor.u32 %v9038_v39, %v7963_v20  ;;  %v2760_v47 = vpop.permute.xlu0 %2759  ;;  %v9333_v45 = vpop.permute.xlu1 %9332  ;;  %v7968_v59 = vor.u32 %v9037_v44, %v7965_v58  ;;  %v8053_v44 = vld [vmem:[#allocation2 + $0x38] sm:$0xf0]  ;;  %v9072_v58 = vld [vmem:[#allocation2 + $0x34] sm:$0xf0] }
 0x481   : > { %v2762_v46 = vsel %vm430_vm15, %v9330_v9, %v2760_v47  ;;  %v9335_v49 = vunpack.i.h.bf16 %v9333_v45  ;;  %v9334_v52 = vunpack.i.l.bf16 %v9333_v45  ;;  %v8133_v47 = vld [vmem:[#allocation2 + $0x38] sm:$0xf0]  ;;  %v8051_v45 = vld [vmem:[#allocation2 + $0x30] sm:$0xf] }
 0x482   : > { %v2766_v61 = vsel %vm351_vm6, %v2762_v46, 0.0  ;;  %2996 = vmatpush.bf16.msra.mxu0 %v7884_v40  ;;  %3045 = vmatpush.bf16.msra.mxu1 %v7888_v41  ;;  %v9009_v40 = vld [vmem:[%s11176_s3] sm:$0xff] }
 0x483   : > { %v2767_v56 = vpack.c.bf16 %v2766_v61, %v2765_v57  ;;  %v2701_v63 = vsel %vm11223_vm0, %v9334_v52, %v9335_v49  ;;  %v2702_v0 = vsel %vm11224_vm1, %v9335_v49, %v2700_v53  ;;  %3298 = vmatpush.bf16.msra.mxu2 %v7964_v42  ;;  %3347 = vmatpush.bf16.msra.mxu3 %v7968_v59  ;;  %vm11227_vm0 = vcmp.ge.s32.totalorder %v9569_v10, 16  ;;  %v9025_v41 = vld [vmem:[%s11176_s3 + $0x40] sm:$0xff]  ;;  %v9056_v42 = vld [vmem:[#allocation2 + $0x34] sm:$0xf0]  ;;  %v9055_v59 = vld [vmem:[#allocation2 + $0x34] sm:$0xf] }
 0x484   : > { %v2705_v1 = vsel %vm9658_vm4, %v2701_v63, 0.0  ;;  %v2706_v3 = vsel %vm351_vm6, %v2702_v0, 0.0  ;;  %vm11228_vm1 = vcmask 588800   ;;  %v8052_v46 = vor.u32 %v9056_v42, %v8051_v45  ;;  %v8131_v52 = vld [vmem:[#allocation2 + $0x30] sm:$0xf]  ;;  %v9013_v42 = vld [vmem:[%s11176_s3 + $0x20] sm:$0xff] }
 0x485   : > { %2768 = vst [vmem:[#allocation2 + $0x18] sm:$0xff] %v2767_v56  ;;  %v2707_v4 = vpack.c.bf16 %v2706_v3, %v2705_v1  ;;  %v8056_v49 = vor.u32 %v9055_v59, %v8053_v44  ;;  %v9071_v53 = vld [vmem:[#allocation2 + $0x34] sm:$0xf]  ;;  %v8132_v57 = vor.u32 %v9072_v58, %v8131_v52  ;;  %v9054_v56 = vld [vmem:[#allocation2 + $0x24] sm:$0xf0]  ;;  %v9029_v44 = vld [vmem:[%s11176_s3 + $0x60] sm:$0xff] }
 0x486   : > { %v7875_v9 = vld [vmem:[#allocation2 + $0x10] sm:$0xf]  ;;  %v9019_v16 = vld [vmem:[#allocation2 + $0x14] sm:$0xf]  ;;  %v8136_v61 = vor.u32 %v9071_v53, %v8133_v47  ;;  %v8125_v63 = vld [vmem:[#allocation2 + $0x28] sm:$0xf0] }
 0x487   : > { %2708 = vst [vmem:[#allocation2] sm:$0xff] %v2707_v4  ;;  %v7955_v31 = vld [vmem:[#allocation2 + $0x10] sm:$0xf]  ;;  %v9035_v6 = vld [vmem:[#allocation2 + $0x14] sm:$0xf]  ;;  %v9014_v58 = vld [vmem:[%s11176_s3 + $0x28] sm:$0xff] }
 0x488   : > { %v9338_v35 = vpop.permute.xlu0 %9337  ;;  %v2720_v13 = vpop.permute.xlu1 %2719  ;;  %v8043_v0 = vld [vmem:[#allocation2 + $0x20] sm:$0xf]  ;;  %v9053_v1 = vld [vmem:[#allocation2 + $0x24] sm:$0xf]  ;;  %v9030_v47 = vld [vmem:[%s11176_s3 + $0x68] sm:$0xff] }
 0x489   : > { %v9340_v7 = vunpack.i.h.bf16 %v9338_v35  ;;  %v9339_v11 = vunpack.i.l.bf16 %v9338_v35  ;;  %v8044_v3 = vor.u32 %v9054_v56, %v8043_v0  ;;  %v8123_v35 = vld [vmem:[#allocation2 + $0x20] sm:$0xf]  ;;  %v9015_v45 = vld [vmem:[%s11176_s3 + $0x30] sm:$0xff] }
 0x48a   : > { %v9031_v59 = vld [vmem:[%s11176_s3 + $0x70] sm:$0xff]  ;;  %v9041_v52 = vld [vmem:[%s11176_s3 + $0x80] sm:$0xff] }
 0x48b   : > { %v2721_v14 = vsel %vm11225_vm11, %v9339_v11, %v9340_v7  ;;  %v2722_v15 = vsel %vm11226_vm12, %v9340_v7, %v2720_v13  ;;  %vm11229_vm11 = vmmov %vm11228_vm1  ;;  %v9069_v7 = vld [vmem:[#allocation2 + $0x24] sm:$0xf] }
 0x48c   : > { %v2725_v55 = vsel %vm11227_vm0, %v2721_v14, 0.0  ;;  %v9020_v24 = vld [vmem:[#allocation2 + $0x14] sm:$0xf0]  ;;  %v7877_v38 = vld [vmem:[#allocation2 + $0x18] sm:$0xf0]  ;;  %vm11230_vm12 = vmmov %vm11228_vm1  ;;  %v8128_v13 = vor.u32 %v9069_v7, %v8125_v63 }
 0x48d   : > { %v2727_v43 = vpack.c.bf16 %v2722_v15, %v2725_v55  ;;  %v7876_v17 = vor.u32 %v9020_v24, %v7875_v9  ;;  %v7880_v28 = vor.u32 %v9019_v16, %v7877_v38  ;;  %v9036_v5 = vld [vmem:[#allocation2 + $0x14] sm:$0xf0]  ;;  %v7957_v19 = vld [vmem:[#allocation2 + $0x18] sm:$0xf0]  ;;  %vm11231_vm0 = vmmov %vm11228_vm1 }
 0x48e   : > { %v7956_v18 = vor.u32 %v9036_v5, %v7955_v31  ;;  %v7960_v21 = vor.u32 %v9035_v6, %v7957_v19  ;;  %v7867_v22 = vld [vmem:[#allocation2] sm:$0xf]  ;;  %v9017_v29 = vld [vmem:[#allocation2 + $0x4] sm:$0xf]  ;;  %v9052_v14 = vld [vmem:[#allocation2 + $0x14] sm:$0xf0] }
 0x48f   : > { %2728 = vst [vmem:[#allocation2 + $0x8] sm:$0xff] %v2727_v43  ;;  %2997 = vmatpush.bf16.msra.mxu0 %v7876_v17  ;;  %3046 = vmatpush.bf16.msra.mxu1 %v7880_v28  ;;  %v7947_v30 = vld [vmem:[#allocation2] sm:$0xf]  ;;  %v9033_v34 = vld [vmem:[#allocation2 + $0x4] sm:$0xf]  ;;  %vm11235_vm3 = vmmov %vm11231_vm0 }
 0x490   : > { %3299 = vmatpush.bf16.msra.mxu2 %v7956_v18  ;;  %3348 = vmatpush.bf16.msra.mxu3 %v7960_v21  ;;  %v8037_v15 = vld [vmem:[#allocation2 + $0x18] sm:$0xf0]  ;;  %v9068_v9 = vld [vmem:[#allocation2 + $0x14] sm:$0xf0]  ;;  %v8035_v31 = vld [vmem:[#allocation2 + $0x10] sm:$0xf] }
 0x491   : > { %v8117_v16 = vld [vmem:[#allocation2 + $0x18] sm:$0xf0]  ;;  %v9051_v55 = vld [vmem:[#allocation2 + $0x14] sm:$0xf]  ;;  %v8036_v24 = vor.u32 %v9052_v14, %v8035_v31  ;;  %v8115_v43 = vld [vmem:[#allocation2 + $0x10] sm:$0xf] }
 0x492   : > { %v8040_v38 = vor.u32 %v9051_v55, %v8037_v15  ;;  %v9067_v17 = vld [vmem:[#allocation2 + $0x14] sm:$0xf]  ;;  %v8116_v28 = vor.u32 %v9068_v9, %v8115_v43  ;;  %vm11236_vm7 = vmmov %vm11231_vm0  ;;  %v9058_v43 = vld [vmem:[%s11176_s3 + $0xc8] sm:$0xff] }
 0x493   : > { %v8120_v5 = vor.u32 %v9067_v17, %v8117_v16  ;;  %vm11237_vm10 = vmmov %vm11231_vm0  ;;  %v9042_v16 = vld [vmem:[%s11176_s3 + $0x88] sm:$0xff] }
 0x496   : > { %v9018_v32 = vld [vmem:[#allocation2 + $0x4] sm:$0xf0]  ;;  %v7869_v33 = vld [vmem:[#allocation2 + $0x8] sm:$0xf0] }
 0x497   : > { %v9034_v50 = vld [vmem:[#allocation2 + $0x4] sm:$0xf0]  ;;  %v7868_v51 = vor.u32 %v9018_v32, %v7867_v22  ;;  %v7872_v20 = vor.u32 %v9017_v29, %v7869_v33  ;;  %v7949_v36 = vld [vmem:[#allocation2 + $0x8] sm:$0xf0]  ;;  %v8027_v22 = vld [vmem:[#allocation2] sm:$0xf] }
 0x498   : > { %v7948_v26 = vor.u32 %v9034_v50, %v7947_v30  ;;  %v7952_v39 = vor.u32 %v9033_v34, %v7949_v36  ;;  %v9050_v6 = vld [vmem:[#allocation2 + $0x4] sm:$0xf0]  ;;  %v8029_v19 = vld [vmem:[#allocation2 + $0x8] sm:$0xf0]  ;;  %v9049_v29 = vld [vmem:[#allocation2 + $0x4] sm:$0xf] }
 0x499   : > { %2998 = vmatpush.bf16.msra.mxu0 %v7868_v51  ;;  %3047 = vmatpush.bf16.msra.mxu1 %v7872_v20  ;;  %v9066_v18 = vld [vmem:[#allocation2 + $0x4] sm:$0xf0]  ;;  %v8109_v21 = vld [vmem:[#allocation2 + $0x8] sm:$0xf0]  ;;  %v8028_v30 = vor.u32 %v9050_v6, %v8027_v22  ;;  %v8032_v32 = vor.u32 %v9049_v29, %v8029_v19  ;;  %v8107_v33 = vld [vmem:[#allocation2] sm:$0xf] }
 0x49a   : > { %3300 = vmatpush.bf16.msra.mxu2 %v7948_v26  ;;  %3349 = vmatpush.bf16.msra.mxu3 %v7952_v39  ;;  %v9065_v50 = vld [vmem:[#allocation2 + $0x4] sm:$0xf]  ;;  %v9010_v51 = vld [vmem:[%s11176_s3 + $0x8] sm:$0xff]  ;;  %v8108_v20 = vor.u32 %v9066_v18, %v8107_v33  ;;  %v9011_v36 = vld [vmem:[%s11176_s3 + $0x10] sm:$0xff] }
 0x49b   : > { %v8112_v26 = vor.u32 %v9065_v50, %v8109_v21  ;;  %v9026_v34 = vld [vmem:[%s11176_s3 + $0x48] sm:$0xff]  ;;  %v9027_v39 = vld [vmem:[%s11176_s3 + $0x50] sm:$0xff] }
 0x49c   : > { %7897 = vmatmul.msk.bf16.vlgmr.msra.gmra.mxu0 %vm11228_vm1, %v9009_v40  ;;  %7905 = vmatmul.msk.bf16.vlgmr.msra.gmra.mxu1 %vm11229_vm11, %v9009_v40  ;;  %vm11232_vm1 = vmmov %vm11231_vm0  ;;  %v9012_v40 = vld [vmem:[%s11176_s3 + $0x18] sm:$0xff] }
 0x49d   : > { %3598 = vmatpush.bf16.msrb.mxu0 %v10122_v2  ;;  %3647 = vmatpush.bf16.msrb.mxu1 %v10130_v54  ;;  %vm11233_vm11 = vmmov %vm11231_vm0 }
 0x49e   : > { %3900 = vmatpush.bf16.msrb.mxu2 %v10122_v2  ;;  %3949 = vmatpush.bf16.msrb.mxu3 %v10130_v54  ;;  %v8045_v2 = vld [vmem:[#allocation2 + $0x28] sm:$0xf0]  ;;  %v9070_v54 = vld [vmem:[#allocation2 + $0x24] sm:$0xf0] }
 0x49f   : > { %7977 = vmatmul.msk.bf16.vlgmr.msra.gmra.mxu2 %vm11230_vm12, %v9025_v41  ;;  %7985 = vmatmul.msk.bf16.vlgmr.msra.gmra.mxu3 %vm11231_vm0, %v9025_v41  ;;  %v8048_v4 = vor.u32 %v9053_v1, %v8045_v2  ;;  %v8124_v11 = vor.u32 %v9070_v54, %v8123_v35  ;;  %vm11234_vm12 = vmmov %vm11231_vm0  ;;  %v9028_v41 = vld [vmem:[%s11176_s3 + $0x58] sm:$0xff] }
 0x4a1   : > { %3599 = vmatpush.bf16.msrb.mxu0 %v8052_v46  ;;  %3648 = vmatpush.bf16.msrb.mxu1 %v8056_v49  ;;  %v9016_v46 = vld [vmem:[%s11176_s3 + $0x38] sm:$0xff] }
 0x4a2   : > { %3901 = vmatpush.bf16.msrb.mxu2 %v8132_v57  ;;  %3950 = vmatpush.bf16.msrb.mxu3 %v8136_v61  ;;  %v9032_v49 = vld [vmem:[%s11176_s3 + $0x78] sm:$0xff]  ;;  %v9057_v61 = vld [vmem:[%s11176_s3 + $0xc0] sm:$0xff] }
 0x4a5   : > { %3600 = vmatpush.bf16.msrb.mxu0 %v8044_v3  ;;  %3649 = vmatpush.bf16.msrb.mxu1 %v8048_v4 }
 0x4a6   : > { %3902 = vmatpush.bf16.msrb.mxu2 %v8124_v11  ;;  %3951 = vmatpush.bf16.msrb.mxu3 %v8128_v13 }
 0x4a9   : > { %3601 = vmatpush.bf16.msrb.mxu0 %v8036_v24  ;;  %3650 = vmatpush.bf16.msrb.mxu1 %v8040_v38 }
 0x4aa   : > { %3903 = vmatpush.bf16.msrb.mxu2 %v8116_v28  ;;  %3952 = vmatpush.bf16.msrb.mxu3 %v8120_v5 }
 0x4ac   : > { %7898 = vmatmul.msk.bf16.gmra.mxu0 %vm11232_vm1, %v9010_v51  ;;  %7906 = vmatmul.msk.bf16.gmra.mxu1 %vm11233_vm11, %v9010_v51  ;;  %vm11238_vm1 = vmmov %vm11231_vm0 }
 0x4ad   : > { %3602 = vmatpush.bf16.msrb.mxu0 %v8028_v30  ;;  %3651 = vmatpush.bf16.msrb.mxu1 %v8032_v32  ;;  %vm11239_vm11 = vmmov %vm11231_vm0 }
 0x4ae   : > { %3904 = vmatpush.bf16.msrb.mxu2 %v8108_v20  ;;  %3953 = vmatpush.bf16.msrb.mxu3 %v8112_v26 }
 0x4af   : > { %7978 = vmatmul.msk.bf16.gmra.mxu2 %vm11234_vm12, %v9026_v34  ;;  %7986 = vmatmul.msk.bf16.gmra.mxu3 %vm11231_vm0, %v9026_v34  ;;  %vm11240_vm12 = vmmov %vm11231_vm0  ;;  %v9043_v34 = vld [vmem:[%s11176_s3 + $0x90] sm:$0xff] }
 0x4bc   : > { %7899 = vmatmul.msk.bf16.gmra.mxu0 %vm11235_vm3, %v9011_v36  ;;  %7907 = vmatmul.msk.bf16.gmra.mxu1 %vm11236_vm7, %v9011_v36  ;;  %vm11241_vm3 = vmmov %vm11231_vm0 }
 0x4bd   : > { %vm11242_vm7 = vmmov %vm11231_vm0 }
 0x4bf   : > { %7979 = vmatmul.msk.bf16.gmra.mxu2 %vm11237_vm10, %v9027_v39  ;;  %7987 = vmatmul.msk.bf16.gmra.mxu3 %vm11238_vm1, %v9027_v39  ;;  %vm11243_vm10 = vmmov %vm11231_vm0 }
 0x4c0   : > { %vm11244_vm1 = vmmov %vm11231_vm0 }
 0x4cc   : > { %7900 = vmatmul.msk.bf16.gmra.mxu0 %vm11239_vm11, %v9012_v40  ;;  %7908 = vmatmul.msk.bf16.gmra.mxu1 %vm11240_vm12, %v9012_v40  ;;  %vm11245_vm11 = vmmov %vm11231_vm0 }
 0x4cd   : > { %vm11246_vm12 = vmmov %vm11231_vm0 }
 0x4cf   : > { %7980 = vmatmul.msk.bf16.gmra.mxu2 %vm11231_vm0, %v9028_v41  ;;  %7988 = vmatmul.msk.bf16.gmra.mxu3 %vm11241_vm3, %v9028_v41  ;;  %vm11247_vm3 = vmmov %vm11231_vm0 }
 0x4dc   : > { %7901 = vmatmul.msk.bf16.gmra.mxu0 %vm11242_vm7, %v9013_v42  ;;  %7909 = vmatmul.msk.bf16.gmra.mxu1 %vm11243_vm10, %v9013_v42  ;;  %vm11248_vm7 = vmmov %vm11231_vm0  ;;  %v9059_v42 = vld [vmem:[%s11176_s3 + $0xd0] sm:$0xff] }
 0x4dd   : > { %vm11249_vm10 = vmmov %vm11231_vm0 }
 0x4df   : > { %7981 = vmatmul.msk.bf16.gmra.mxu2 %vm11244_vm1, %v9029_v44  ;;  %7989 = vmatmul.msk.bf16.gmra.mxu3 %vm11245_vm11, %v9029_v44  ;;  %vm11250_vm1 = vmmov %vm11231_vm0 }
 0x4e0   : > { %vm11251_vm11 = vmmov %vm11231_vm0 }
 0x4ec   : > { %7902 = vmatmul.msk.bf16.gmra.mxu0 %vm11246_vm12, %v9014_v58  ;;  %7910 = vmatmul.msk.bf16.gmra.mxu1 %vm11231_vm0, %v9014_v58  ;;  %vm11252_vm12 = vmmov %vm11231_vm0 }
 0x4ef   : > { %7982 = vmatmul.msk.bf16.gmra.mxu2 %vm11247_vm3, %v9030_v47  ;;  %7990 = vmatmul.msk.bf16.gmra.mxu3 %vm11248_vm7, %v9030_v47  ;;  %vm11253_vm3 = vmmov %vm11231_vm0 }
 0x4f0   : > { %vm11254_vm7 = vmmov %vm11231_vm0 }
 0x4fc   : > { %7903 = vmatmul.msk.bf16.gmra.mxu0 %vm11249_vm10, %v9015_v45  ;;  %7911 = vmatmul.msk.bf16.gmra.mxu1 %vm11250_vm1, %v9015_v45  ;;  %vm11255_vm10 = vmmov %vm11231_vm0 }
 0x4fd   : > { %vm11256_vm1 = vmmov %vm11231_vm0 }
 0x4ff   : > { %7983 = vmatmul.msk.bf16.gmra.mxu2 %vm11251_vm11, %v9031_v59  ;;  %7991 = vmatmul.msk.bf16.gmra.mxu3 %vm11252_vm12, %v9031_v59  ;;  %vm11257_vm11 = vmmov %vm11231_vm0 }
 0x500   : > { %vm11258_vm12 = vmmov %vm11231_vm0 }
 0x50c   : > { %7904 = vmatmul.msk.bf16.gmra.mxu0 %vm11231_vm0, %v9016_v46  ;;  %7912 = vmatmul.msk.bf16.gmra.mxu1 %vm11253_vm3, %v9016_v46  ;;  %vm11259_vm3 = vmmov %vm11231_vm0 }
 0x50f   : > { %7984 = vmatmul.msk.bf16.gmra.mxu2 %vm11254_vm7, %v9032_v49  ;;  %7992 = vmatmul.msk.bf16.gmra.mxu3 %vm11255_vm10, %v9032_v49  ;;  %vm11260_vm7 = vmmov %vm11231_vm0 }
 0x510   : > { %vm11261_vm10 = vmmov %vm11231_vm0 }
 0x519   : > { %v3000_v53 = vpop.f32.mrf.mxu0  ;;  %v3049_v57 = vpop.f32.mrf.mxu1 }
 0x51a   : > { %v3089_v56 = vmax.f32 %v3000_v53, 0.0  ;;  %v3090_v2 = vmax.f32 %v3049_v57, 0.0 }
 0x51c   : > { %v3121_v54 = vpack.c.bf16 %v3090_v2, %v3089_v56  ;;  %8057 = vmatmul.msk.bf16.vlgmr.msrb.gmra.mxu0 %vm11256_vm1, %v9041_v52  ;;  %8065 = vmatmul.msk.bf16.vlgmr.msrb.gmra.mxu1 %vm11257_vm11, %v9041_v52  ;;  %vm11262_vm1 = vmmov %vm11231_vm0 }
 0x51d   : > { %vm11263_vm11 = vmmov %vm11231_vm0 }
 0x51e   : > { %3137 = vst [vmem:[#allocation3] sm:$0xff] %v3121_v54 }
 0x51f   : > { %8137 = vmatmul.msk.bf16.vlgmr.msrb.gmra.mxu2 %vm11258_vm12, %v9057_v61  ;;  %8145 = vmatmul.msk.bf16.vlgmr.msrb.gmra.mxu3 %vm11231_vm0, %v9057_v61  ;;  %vm11264_vm12 = vmmov %vm11231_vm0 }
 0x521   : > { %v3002_v4 = vpop.f32.mrf.mxu0  ;;  %v3051_v35 = vpop.f32.mrf.mxu1 }
 0x522   : > { %v3302_v63 = vpop.f32.mrf.mxu2  ;;  %v3351_v0 = vpop.f32.mrf.mxu3  ;;  %v3091_v7 = vmax.f32 %v3002_v4, 0.0  ;;  %v3092_v11 = vmax.f32 %v3051_v35, 0.0 }
 0x523   : > { %v3391_v1 = vmax.f32 %v3302_v63, 0.0  ;;  %v3392_v3 = vmax.f32 %v3351_v0, 0.0 }
 0x524   : > { %v3122_v14 = vpack.c.bf16 %v3092_v11, %v3091_v7  ;;  %v9060_v11 = vld [vmem:[%s11176_s3 + $0xd8] sm:$0xff] }
 0x525   : > { %v3423_v13 = vpack.c.bf16 %v3392_v3, %v3391_v1  ;;  %v9044_v1 = vld [vmem:[%s11176_s3 + $0x98] sm:$0xff] }
 0x526   : > { %3138 = vst [vmem:[#allocation3 + $0x8] sm:$0xff] %v3122_v14 }
 0x527   : > { %3439 = vst [vmem:[#allocation3 + $0x80] sm:$0xff] %v3423_v13 }
 0x529   : > { %v3005_v24 = vpop.f32.mrf.mxu0  ;;  %v3054_v38 = vpop.f32.mrf.mxu1 }
 0x52a   : > { %v3304_v15 = vpop.f32.mrf.mxu2  ;;  %v3353_v9 = vpop.f32.mrf.mxu3  ;;  %v3093_v17 = vmax.f32 %v3005_v24, 0.0  ;;  %v3094_v28 = vmax.f32 %v3054_v38, 0.0 }
 0x52b   : > { %v3393_v31 = vmax.f32 %v3304_v15, 0.0  ;;  %v3394_v55 = vmax.f32 %v3353_v9, 0.0 }
 0x52c   : > { %v3123_v6 = vpack.c.bf16 %v3094_v28, %v3093_v17  ;;  %8058 = vmatmul.msk.bf16.gmra.mxu0 %vm11259_vm3, %v9042_v16  ;;  %8066 = vmatmul.msk.bf16.gmra.mxu1 %vm11260_vm7, %v9042_v16  ;;  %vm11265_vm3 = vmmov %vm11231_vm0 }
 0x52d   : > { %v3424_v5 = vpack.c.bf16 %v3394_v55, %v3393_v31  ;;  %vm11266_vm7 = vmmov %vm11231_vm0 }
 0x52e   : > { %3139 = vst [vmem:[#allocation3 + $0x10] sm:$0xff] %v3123_v6 }
 0x52f   : > { %3440 = vst [vmem:[#allocation3 + $0x88] sm:$0xff] %v3424_v5  ;;  %8138 = vmatmul.msk.bf16.gmra.mxu2 %vm11261_vm10, %v9058_v43  ;;  %8146 = vmatmul.msk.bf16.gmra.mxu3 %vm11262_vm1, %v9058_v43  ;;  %vm11267_vm10 = vmmov %vm11231_vm0 }
 0x530   : > { %vm11268_vm1 = vmmov %vm11231_vm0 }
 0x531   : > { %v3007_v29 = vpop.f32.mrf.mxu0  ;;  %v3056_v30 = vpop.f32.mrf.mxu1 }
 0x532   : > { %v3307_v19 = vpop.f32.mrf.mxu2  ;;  %v3356_v18 = vpop.f32.mrf.mxu3  ;;  %v3095_v32 = vmax.f32 %v3007_v29, 0.0  ;;  %v3096_v33 = vmax.f32 %v3056_v30, 0.0 }
 0x533   : > { %v3395_v21 = vmax.f32 %v3307_v19, 0.0  ;;  %v3396_v22 = vmax.f32 %v3356_v18, 0.0 }
 0x534   : > { %v3124_v51 = vpack.c.bf16 %v3096_v33, %v3095_v32  ;;  %v9061_v33 = vld [vmem:[%s11176_s3 + $0xe0] sm:$0xff] }
 0x535   : > { %v3425_v50 = vpack.c.bf16 %v3396_v22, %v3395_v21  ;;  %v9045_v21 = vld [vmem:[%s11176_s3 + $0xa0] sm:$0xff] }
 0x536   : > { %3140 = vst [vmem:[#allocation3 + $0x18] sm:$0xff] %v3124_v51 }
 0x537   : > { %3441 = vst [vmem:[#allocation3 + $0x90] sm:$0xff] %v3425_v50 }
 0x539   : > { %v3010_v40 = vpop.f32.mrf.mxu0  ;;  %v3059_v41 = vpop.f32.mrf.mxu1 }
 0x53a   : > { %v3309_v20 = vpop.f32.mrf.mxu2  ;;  %v3358_v26 = vpop.f32.mrf.mxu3  ;;  %v3097_v44 = vmax.f32 %v3010_v40, 0.0  ;;  %v3098_v58 = vmax.f32 %v3059_v41, 0.0 }
 0x53b   : > { %v3397_v36 = vmax.f32 %v3309_v20, 0.0  ;;  %v3398_v39 = vmax.f32 %v3358_v26, 0.0 }
 0x53c   : > { %v3125_v45 = vpack.c.bf16 %v3098_v58, %v3097_v44  ;;  %8059 = vmatmul.msk.bf16.gmra.mxu0 %vm11263_vm11, %v9043_v34  ;;  %8067 = vmatmul.msk.bf16.gmra.mxu1 %vm11264_vm12, %v9043_v34  ;;  %vm11269_vm11 = vmmov %vm11231_vm0 }
 0x53d   : > { %v3426_v47 = vpack.c.bf16 %v3398_v39, %v3397_v36  ;;  %vm11270_vm12 = vmmov %vm11231_vm0 }
 0x53e   : > { %3141 = vst [vmem:[#allocation3 + $0x20] sm:$0xff] %v3125_v45 }
 0x53f   : > { %3442 = vst [vmem:[#allocation3 + $0x98] sm:$0xff] %v3426_v47  ;;  %8139 = vmatmul.msk.bf16.gmra.mxu2 %vm11231_vm0, %v9059_v42  ;;  %8147 = vmatmul.msk.bf16.gmra.mxu3 %vm11265_vm3, %v9059_v42  ;;  %vm11271_vm3 = vmmov %vm11231_vm0 }
 0x541   : > { %v3012_v53 = vpop.f32.mrf.mxu0  ;;  %v3061_v57 = vpop.f32.mrf.mxu1 }
 0x542   : > { %v3312_v59 = vpop.f32.mrf.mxu2  ;;  %v3361_v46 = vpop.f32.mrf.mxu3  ;;  %v3099_v61 = vmax.f32 %v3012_v53, 0.0  ;;  %v3100_v56 = vmax.f32 %v3061_v57, 0.0 }
 0x543   : > { %v3399_v49 = vmax.f32 %v3312_v59, 0.0  ;;  %v3400_v52 = vmax.f32 %v3361_v46, 0.0 }
 0x544   : > { %v3126_v54 = vpack.c.bf16 %v3100_v56, %v3099_v61  ;;  %v9062_v56 = vld [vmem:[%s11176_s3 + $0xe8] sm:$0xff] }
 0x545   : > { %v3427_v2 = vpack.c.bf16 %v3400_v52, %v3399_v49  ;;  %v9046_v49 = vld [vmem:[%s11176_s3 + $0xa8] sm:$0xff] }
 0x546   : > { %3142 = vst [vmem:[#allocation3 + $0x28] sm:$0xff] %v3126_v54 }
 0x547   : > { %3443 = vst [vmem:[#allocation3 + $0xa0] sm:$0xff] %v3427_v2 }
 0x549   : > { %v3015_v35 = vpop.f32.mrf.mxu0  ;;  %v3064_v7 = vpop.f32.mrf.mxu1 }
 0x54a   : > { %v3314_v63 = vpop.f32.mrf.mxu2  ;;  %v3363_v0 = vpop.f32.mrf.mxu3  ;;  %v3101_v13 = vmax.f32 %v3015_v35, 0.0  ;;  %v3102_v14 = vmax.f32 %v3064_v7, 0.0 }
 0x54b   : > { %v3401_v3 = vmax.f32 %v3314_v63, 0.0  ;;  %v3402_v4 = vmax.f32 %v3363_v0, 0.0 }
 0x54c   : > { %v3127_v9 = vpack.c.bf16 %v3102_v14, %v3101_v13  ;;  %8060 = vmatmul.msk.bf16.gmra.mxu0 %vm11266_vm7, %v9044_v1  ;;  %8068 = vmatmul.msk.bf16.gmra.mxu1 %vm11267_vm10, %v9044_v1  ;;  %vm11272_vm7 = vmmov %vm11231_vm0 }
 0x54d   : > { %v3428_v15 = vpack.c.bf16 %v3402_v4, %v3401_v3  ;;  %vm11273_vm10 = vmmov %vm11231_vm0 }
 0x54e   : > { %3143 = vst [vmem:[#allocation3 + $0x30] sm:$0xff] %v3127_v9 }
 0x54f   : > { %3444 = vst [vmem:[#allocation3 + $0xa8] sm:$0xff] %v3428_v15  ;;  %8140 = vmatmul.msk.bf16.gmra.mxu2 %vm11268_vm1, %v9060_v11  ;;  %8148 = vmatmul.msk.bf16.gmra.mxu3 %vm11269_vm11, %v9060_v11  ;;  %vm11274_vm1 = vmmov %vm11231_vm0 }
 0x550   : > { %vm11275_vm11 = vmmov %vm11231_vm0 }
 0x551   : > { %v3017_v38 = vpop.f32.mrf.mxu0  ;;  %v3066_v43 = vpop.f32.mrf.mxu1 }
 0x552   : > { %v3317_v16 = vpop.f32.mrf.mxu2  ;;  %v3366_v31 = vpop.f32.mrf.mxu3  ;;  %v3103_v17 = vmax.f32 %v3017_v38, 0.0  ;;  %v3104_v28 = vmax.f32 %v3066_v43, 0.0 }
 0x553   : > { %v3403_v55 = vmax.f32 %v3317_v16, 0.0  ;;  %v3404_v24 = vmax.f32 %v3366_v31, 0.0 }
 0x554   : > { %v3128_v6 = vpack.c.bf16 %v3104_v28, %v3103_v17  ;;  %v9063_v28 = vld [vmem:[%s11176_s3 + $0xf0] sm:$0xff] }
 0x555   : > { %v3429_v5 = vpack.c.bf16 %v3404_v24, %v3403_v55  ;;  %v9047_v55 = vld [vmem:[%s11176_s3 + $0xb0] sm:$0xff] }
 0x556   : > { %3144 = vst [vmem:[#allocation3 + $0x38] sm:$0xff] %v3128_v6 }
 0x557   : > { %3445 = vst [vmem:[#allocation3 + $0xb0] sm:$0xff] %v3429_v5 }
 0x559   : > { %v3020_v30 = vpop.f32.mrf.mxu0  ;;  %v3069_v32 = vpop.f32.mrf.mxu1 }
 0x55a   : > { %v3319_v19 = vpop.f32.mrf.mxu2  ;;  %v3368_v18 = vpop.f32.mrf.mxu3  ;;  %v3105_v50 = vmax.f32 %v3020_v30, 0.0  ;;  %v3106_v51 = vmax.f32 %v3069_v32, 0.0 }
 0x55b   : > { %v3405_v22 = vmax.f32 %v3319_v19, 0.0  ;;  %v3406_v29 = vmax.f32 %v3368_v18, 0.0 }
 0x55c   : > { %v3129_v26 = vpack.c.bf16 %v3106_v51, %v3105_v50  ;;  %8061 = vmatmul.msk.bf16.gmra.mxu0 %vm11270_vm12, %v9045_v21  ;;  %8069 = vmatmul.msk.bf16.gmra.mxu1 %vm11231_vm0, %v9045_v21  ;;  %vm11276_vm12 = vmmov %vm11231_vm0 }
 0x55d   : > { %v3430_v20 = vpack.c.bf16 %v3406_v29, %v3405_v22 }
 0x55e   : > { %3145 = vst [vmem:[#allocation3 + $0x40] sm:$0xff] %v3129_v26 }
 0x55f   : > { %3446 = vst [vmem:[#allocation3 + $0xb8] sm:$0xff] %v3430_v20  ;;  %8141 = vmatmul.msk.bf16.gmra.mxu2 %vm11271_vm3, %v9061_v33  ;;  %8149 = vmatmul.msk.bf16.gmra.mxu3 %vm11272_vm7, %v9061_v33  ;;  %vm11277_vm3 = vmmov %vm11231_vm0 }
 0x560   : > { %vm11278_vm7 = vmmov %vm11231_vm0 }
 0x561   : > { %v3022_v41 = vpop.f32.mrf.mxu0  ;;  %v3071_v42 = vpop.f32.mrf.mxu1 }
 0x562   : > { %v3322_v34 = vpop.f32.mrf.mxu2  ;;  %v3371_v36 = vpop.f32.mrf.mxu3  ;;  %v3107_v44 = vmax.f32 %v3022_v41, 0.0  ;;  %v3108_v58 = vmax.f32 %v3071_v42, 0.0 }
 0x563   : > { %v3407_v39 = vmax.f32 %v3322_v34, 0.0  ;;  %v3408_v40 = vmax.f32 %v3371_v36, 0.0 }
 0x564   : > { %v3130_v45 = vpack.c.bf16 %v3108_v58, %v3107_v44  ;;  %v9064_v58 = vld [vmem:[%s11176_s3 + $0xf8] sm:$0xff] }
 0x565   : > { %v3431_v47 = vpack.c.bf16 %v3408_v40, %v3407_v39  ;;  %v9048_v39 = vld [vmem:[%s11176_s3 + $0xb8] sm:$0xff] }
 0x566   : > { %3146 = vst [vmem:[#allocation3 + $0x48] sm:$0xff] %v3130_v45 }
 0x567   : > { %3447 = vst [vmem:[#allocation3 + $0xc0] sm:$0xff] %v3431_v47 }
 0x569   : > { %v3025_v57 = vpop.f32.mrf.mxu0  ;;  %v3074_v61 = vpop.f32.mrf.mxu1 }
 0x56a   : > { %v3324_v59 = vpop.f32.mrf.mxu2  ;;  %v3373_v46 = vpop.f32.mrf.mxu3  ;;  %v3109_v2 = vmax.f32 %v3025_v57, 0.0  ;;  %v3110_v54 = vmax.f32 %v3074_v61, 0.0 }
 0x56b   : > { %v3409_v52 = vmax.f32 %v3324_v59, 0.0  ;;  %v3410_v53 = vmax.f32 %v3373_v46, 0.0 }
 0x56c   : > { %v3131_v0 = vpack.c.bf16 %v3110_v54, %v3109_v2  ;;  %8062 = vmatmul.msk.bf16.gmra.mxu0 %vm11273_vm10, %v9046_v49  ;;  %8070 = vmatmul.msk.bf16.gmra.mxu1 %vm11274_vm1, %v9046_v49  ;;  %vm11279_vm10 = vmmov %vm11231_vm0 }
 0x56d   : > { %v3432_v63 = vpack.c.bf16 %v3410_v53, %v3409_v52  ;;  %vm11280_vm1 = vmmov %vm11231_vm0 }
 0x56e   : > { %3147 = vst [vmem:[#allocation3 + $0x50] sm:$0xff] %v3131_v0 }
 0x56f   : > { %3448 = vst [vmem:[#allocation3 + $0xc8] sm:$0xff] %v3432_v63  ;;  %8142 = vmatmul.msk.bf16.gmra.mxu2 %vm11275_vm11, %v9062_v56  ;;  %8150 = vmatmul.msk.bf16.gmra.mxu3 %vm11276_vm12, %v9062_v56  ;;  %vm11281_vm11 = vmmov %vm11231_vm0 }
 0x570   : > { %vm11282_vm12 = vmmov %vm11231_vm0 }
 0x571   : > { %v3027_v7 = vpop.f32.mrf.mxu0  ;;  %v3076_v11 = vpop.f32.mrf.mxu1 }
 0x572   : > { %v3327_v1 = vpop.f32.mrf.mxu2  ;;  %v3376_v3 = vpop.f32.mrf.mxu3  ;;  %v3111_v13 = vmax.f32 %v3027_v7, 0.0  ;;  %v3112_v14 = vmax.f32 %v3076_v11, 0.0 }
 0x573   : > { %v3411_v4 = vmax.f32 %v3327_v1, 0.0  ;;  %v3412_v35 = vmax.f32 %v3376_v3, 0.0 }
 0x574   : > { %v3132_v9 = vpack.c.bf16 %v3112_v14, %v3111_v13 }
 0x575   : > { %v3433_v15 = vpack.c.bf16 %v3412_v35, %v3411_v4 }
 0x576   : > { %3148 = vst [vmem:[#allocation3 + $0x58] sm:$0xff] %v3132_v9 }
 0x577   : > { %3449 = vst [vmem:[#allocation3 + $0xd0] sm:$0xff] %v3433_v15 }
 0x579   : > { %v3030_v43 = vpop.f32.mrf.mxu0  ;;  %v3079_v17 = vpop.f32.mrf.mxu1 }
 0x57a   : > { %v3329_v16 = vpop.f32.mrf.mxu2  ;;  %v3378_v31 = vpop.f32.mrf.mxu3  ;;  %v3113_v5 = vmax.f32 %v3030_v43, 0.0  ;;  %v3114_v6 = vmax.f32 %v3079_v17, 0.0 }
 0x57b   : > { %v3413_v24 = vmax.f32 %v3329_v16, 0.0  ;;  %v3414_v38 = vmax.f32 %v3378_v31, 0.0 }
 0x57c   : > { %v3133_v18 = vpack.c.bf16 %v3114_v6, %v3113_v5  ;;  %8063 = vmatmul.msk.bf16.gmra.mxu0 %vm11231_vm0, %v9047_v55  ;;  %8071 = vmatmul.msk.bf16.gmra.mxu1 %vm11277_vm3, %v9047_v55  ;;  %vm11283_vm3 = vcmask 138240  }
 0x57d   : > { %v3434_v19 = vpack.c.bf16 %v3414_v38, %v3413_v24 }
 0x57e   : > { %3149 = vst [vmem:[#allocation3 + $0x60] sm:$0xff] %v3133_v18 }
 0x57f   : > { %3450 = vst [vmem:[#allocation3 + $0xd8] sm:$0xff] %v3434_v19  ;;  %8143 = vmatmul.msk.bf16.gmra.mxu2 %vm11278_vm7, %v9063_v28  ;;  %8151 = vmatmul.msk.bf16.gmra.mxu3 %vm11279_vm10, %v9063_v28  ;;  %vm11284_vm7 = vcmask 130048   ;;  %vm11285_vm10 = vmmov %vm11283_vm3 }
 0x581   : > { %v3032_v32 = vpop.f32.mrf.mxu0  ;;  %v3081_v33 = vpop.f32.mrf.mxu1 }
 0x582   : > { %v3332_v21 = vpop.f32.mrf.mxu2  ;;  %v3381_v22 = vpop.f32.mrf.mxu3  ;;  %v3115_v50 = vmax.f32 %v3032_v32, 0.0  ;;  %v3116_v51 = vmax.f32 %v3081_v33, 0.0 }
 0x583   : > { %v3415_v29 = vmax.f32 %v3332_v21, 0.0  ;;  %v3416_v30 = vmax.f32 %v3381_v22, 0.0 }
 0x584   : > { %v3134_v26 = vpack.c.bf16 %v3116_v51, %v3115_v50 }
 0x585   : > { %v3435_v20 = vpack.c.bf16 %v3416_v30, %v3415_v29  ;;  %v8267_v19 = vld [vmem:[#allocation3 + $0x60] sm:$0xf]  ;;  %v9100_v30 = vld [vmem:[#allocation3 + $0x54] sm:$0xf0] }
 0x586   : > { %3150 = vst [vmem:[#allocation3 + $0x68] sm:$0xff] %v3134_v26 }
 0x587   : > { %3451 = vst [vmem:[#allocation3 + $0xe0] sm:$0xff] %v3435_v20  ;;  %v8259_v20 = vld [vmem:[#allocation3 + $0x50] sm:$0xf] }
 0x588   : > { %v8260_v26 = vor.u32 %v9100_v30, %v8259_v20 }
 0x589   : > { %v3035_v42 = vpop.f32.mrf.mxu0  ;;  %v3084_v44 = vpop.f32.mrf.mxu1 }
 0x58a   : > { %v3334_v34 = vpop.f32.mrf.mxu2  ;;  %v3383_v36 = vpop.f32.mrf.mxu3  ;;  %v3117_v47 = vmax.f32 %v3035_v42, 0.0  ;;  %v3118_v45 = vmax.f32 %v3084_v44, 0.0 }
 0x58b   : > { %v3417_v40 = vmax.f32 %v3334_v34, 0.0  ;;  %v3418_v41 = vmax.f32 %v3383_v36, 0.0  ;;  %v9098_v36 = vld [vmem:[#allocation3 + $0x44] sm:$0xf0] }
 0x58c   : > { %v3135_v46 = vpack.c.bf16 %v3118_v45, %v3117_v47  ;;  %8064 = vmatmul.msk.bf16.gmra.mxu0 %vm11280_vm1, %v9048_v39  ;;  %8072 = vmatmul.msk.bf16.gmra.mxu1 %vm11281_vm11, %v9048_v39  ;;  %vm11286_vm1 = vmmov %vm11284_vm7  ;;  %vm11287_vm11 = vcmp.ge.s32.totalorder %v9569_v10, 16 }
 0x58d   : > { %v3436_v59 = vpack.c.bf16 %v3418_v41, %v3417_v40  ;;  %v9102_v24 = vld [vmem:[#allocation3 + $0x64] sm:$0xf0] }
 0x58e   : > { %3151 = vst [vmem:[#allocation3 + $0x70] sm:$0xff] %v3135_v46  ;;  %v8268_v22 = vor.u32 %v9102_v24, %v8267_v19  ;;  %v8331_v41 = vld [vmem:[#allocation3 + $0xe0] sm:$0xf]  ;;  %v8227_v19 = vld [vmem:[#allocation3 + $0x10] sm:$0xf] }
 0x58f   : > { %3452 = vst [vmem:[#allocation3 + $0xe8] sm:$0xff] %v3436_v59  ;;  %8144 = vmatmul.msk.bf16.gmra.mxu2 %vm11282_vm12, %v9064_v58  ;;  %8152 = vmatmul.msk.bf16.gmra.mxu3 %vm11231_vm0, %v9064_v58  ;;  %v8251_v59 = vld [vmem:[#allocation3 + $0x40] sm:$0xf]  ;;  %vm11288_vm12 = vcmask 1039360  }
 0x590   : > { %vm11289_vm0 = vmmov %vm11288_vm12 }
 0x591   : > { %v3037_v61 = vpop.f32.mrf.mxu0  ;;  %v3086_v56 = vpop.f32.mrf.mxu1 }
 0x592   : > { %v3337_v49 = vpop.f32.mrf.mxu2  ;;  %v3386_v52 = vpop.f32.mrf.mxu3  ;;  %v3119_v2 = vmax.f32 %v3037_v61, 0.0  ;;  %v3120_v54 = vmax.f32 %v3086_v56, 0.0  ;;  %v9096_v61 = vld [vmem:[#allocation3 + $0x34] sm:$0xf0] }
 0x593   : > { %v3419_v53 = vmax.f32 %v3337_v49, 0.0  ;;  %v3420_v57 = vmax.f32 %v3386_v52, 0.0  ;;  %v8252_v52 = vor.u32 %v9098_v36, %v8251_v59  ;;  %v8219_v36 = vld [vmem:[#allocation3] sm:$0xf]  ;;  %v8291_v59 = vld [vmem:[#allocation3 + $0x90] sm:$0xf] }
 0x594   : > { %v3136_v0 = vpack.c.bf16 %v3120_v54, %v3119_v2  ;;  %v8323_v2 = vld [vmem:[#allocation3 + $0xd0] sm:$0xf] }
 0x595   : > { %v3437_v63 = vpack.c.bf16 %v3420_v57, %v3419_v53  ;;  %v8275_v16 = vld [vmem:[#allocation3 + $0x70] sm:$0xf]  ;;  %v9116_v53 = vld [vmem:[#allocation3 + $0xd4] sm:$0xf0] }
 0x596   : > { %3152 = vst [vmem:[#allocation3 + $0x78] sm:$0xff] %v3136_v0  ;;  %v9118_v34 = vld [vmem:[#allocation3 + $0xe4] sm:$0xf0]  ;;  %v8324_v54 = vor.u32 %v9116_v53, %v8323_v2 }
 0x597   : > { %3453 = vst [vmem:[#allocation3 + $0xf0] sm:$0xff] %v3437_v63  ;;  %v8332_v45 = vor.u32 %v9118_v34, %v8331_v41  ;;  %v8243_v63 = vld [vmem:[#allocation3 + $0x30] sm:$0xf]  ;;  %v9106_v53 = vld [vmem:[#allocation3 + $0x84] sm:$0xf0] }
 0x598   : > { %v8244_v0 = vor.u32 %v9096_v61, %v8243_v63  ;;  %v8261_v63 = vld [vmem:[#allocation3 + $0x58] sm:$0xf0] }
 0x599   : > { %v3604_v7 = vpop.f32.mrf.mxu0  ;;  %v3653_v11 = vpop.f32.mrf.mxu1 }
 0x59a   : > { %v3339_v1 = vpop.f32.mrf.mxu2  ;;  %v3388_v3 = vpop.f32.mrf.mxu3  ;;  %v3693_v13 = vmax.f32 %v3604_v7, 0.0  ;;  %v3694_v14 = vmax.f32 %v3653_v11, 0.0  ;;  %v8315_v7 = vld [vmem:[#allocation3 + $0xc0] sm:$0xf] }
 0x59b   : > { %v3421_v4 = vmax.f32 %v3339_v1, 0.0  ;;  %v3422_v35 = vmax.f32 %v3388_v3, 0.0  ;;  %v9114_v1 = vld [vmem:[#allocation3 + $0xc4] sm:$0xf0] }
 0x59c   : > { %v3725_v9 = vpack.c.bf16 %v3694_v14, %v3693_v13  ;;  %v9094_v3 = vld [vmem:[#allocation3 + $0x24] sm:$0xf0] }
 0x59d   : > { %v3438_v15 = vpack.c.bf16 %v3422_v35, %v3421_v4  ;;  %v9104_v31 = vld [vmem:[#allocation3 + $0x74] sm:$0xf0] }
 0x59e   : > { %3741 = vst [vmem:[#allocation3 + $0x100] sm:$0xff] %v3725_v9  ;;  %v8276_v55 = vor.u32 %v9104_v31, %v8275_v16  ;;  %v8339_v33 = vld [vmem:[#allocation3 + $0xf0] sm:$0xf]  ;;  %v8316_v9 = vor.u32 %v9114_v1, %v8315_v7  ;;  %v8235_v16 = vld [vmem:[#allocation3 + $0x20] sm:$0xf] }
 0x59f   : > { %3454 = vst [vmem:[#allocation3 + $0xf8] sm:$0xff] %v3438_v15  ;;  %v8236_v24 = vor.u32 %v9094_v3, %v8235_v16  ;;  %v9119_v7 = vld [vmem:[#allocation3 + $0xf4] sm:$0xf] }
 0x5a0   : > { %4555 = vmatpush.bf16.msra.mxu0 %v8276_v55 }
 0x5a1   : > { %v3606_v5 = vpop.f32.mrf.mxu0  ;;  %v3655_v6 = vpop.f32.mrf.mxu1 }
 0x5a2   : > { %v3906_v38 = vpop.f32.mrf.mxu2  ;;  %v3955_v43 = vpop.f32.mrf.mxu3  ;;  %v3695_v18 = vmax.f32 %v3606_v5, 0.0  ;;  %v3696_v21 = vmax.f32 %v3655_v6, 0.0  ;;  %v8307_v5 = vld [vmem:[#allocation3 + $0xb0] sm:$0xf] }
 0x5a3   : > { %v3995_v17 = vmax.f32 %v3906_v38, 0.0  ;;  %v3996_v28 = vmax.f32 %v3955_v43, 0.0  ;;  %v9112_v38 = vld [vmem:[#allocation3 + $0xb4] sm:$0xf0] }
 0x5a4   : > { %v3726_v32 = vpack.c.bf16 %v3696_v21, %v3695_v18  ;;  %4556 = vmatpush.bf16.msra.mxu0 %v8268_v22  ;;  %v8308_v6 = vor.u32 %v9112_v38, %v8307_v5  ;;  %v9110_v21 = vld [vmem:[#allocation3 + $0xa4] sm:$0xf0]  ;;  %v9117_v38 = vld [vmem:[#allocation3 + $0xe4] sm:$0xf]  ;;  %v8325_v5 = vld [vmem:[#allocation3 + $0xd8] sm:$0xf0] }
 0x5a5   : > { %v4027_v29 = vpack.c.bf16 %v3996_v28, %v3995_v17  ;;  %v9092_v17 = vld [vmem:[#allocation3 + $0x14] sm:$0xf0]  ;;  %v9090_v22 = vld [vmem:[#allocation3 + $0x4] sm:$0xf0] }
 0x5a6   : > { %v9120_v50 = vld [vmem:[#allocation3 + $0xf4] sm:$0xf0]  ;;  %3742 = vst [vmem:[#allocation3 + $0x108] sm:$0xff] %v3726_v32  ;;  %v8228_v18 = vor.u32 %v9092_v17, %v8227_v19  ;;  %v8299_v32 = vld [vmem:[#allocation3 + $0xa0] sm:$0xf]  ;;  %v8220_v41 = vor.u32 %v9090_v22, %v8219_v36 }
 0x5a7   : > { %4043 = vst [vmem:[#allocation3 + $0x180] sm:$0xff] %v4027_v29  ;;  %v8340_v51 = vor.u32 %v9120_v50, %v8339_v33  ;;  %v8277_v33 = vld [vmem:[#allocation3 + $0x78] sm:$0xf0]  ;;  %v8300_v34 = vor.u32 %v9110_v21, %v8299_v32  ;;  %v9097_v17 = vld [vmem:[#allocation3 + $0x44] sm:$0xf] }
 0x5a8   : > { %4557 = vmatpush.bf16.msra.mxu0 %v8260_v26  ;;  %v8341_v61 = vld [vmem:[#allocation3 + $0xf8] sm:$0xf0]  ;;  %v9115_v32 = vld [vmem:[#allocation3 + $0xd4] sm:$0xf]  ;;  %v8317_v36 = vld [vmem:[#allocation3 + $0xc8] sm:$0xf0] }
 0x5a9   : > { %4588 = vmatpush.bf16.msra.mxu1 %v8340_v51  ;;  %v3609_v58 = vpop.f32.mrf.mxu0  ;;  %v3658_v47 = vpop.f32.mrf.mxu1 }
 0x5aa   : > { %v3908_v39 = vpop.f32.mrf.mxu2  ;;  %v3957_v40 = vpop.f32.mrf.mxu3  ;;  %v3697_v46 = vmax.f32 %v3609_v58, 0.0  ;;  %v3698_v49 = vmax.f32 %v3658_v47, 0.0 }
 0x5ab   : > { %v3997_v42 = vmax.f32 %v3908_v39, 0.0  ;;  %v3998_v44 = vmax.f32 %v3957_v40, 0.0 }
 0x5ac   : > { %v3727_v56 = vpack.c.bf16 %v3698_v49, %v3697_v46  ;;  %4558 = vmatpush.bf16.msra.mxu0 %v8252_v52  ;;  %v8269_v46 = vld [vmem:[#allocation3 + $0x68] sm:$0xf0]  ;;  %v9101_v52 = vld [vmem:[#allocation3 + $0x64] sm:$0xf] }
 0x5ad   : > { %v4028_v57 = vpack.c.bf16 %v3998_v44, %v3997_v42  ;;  %4589 = vmatpush.bf16.msra.mxu1 %v8332_v45  ;;  %v9103_v42 = vld [vmem:[#allocation3 + $0x74] sm:$0xf]  ;;  %v9108_v44 = vld [vmem:[#allocation3 + $0x94] sm:$0xf0] }
 0x5ae   : > { %3743 = vst [vmem:[#allocation3 + $0x110] sm:$0xff] %v3727_v56  ;;  %v8280_v47 = vor.u32 %v9103_v42, %v8277_v33  ;;  %v8292_v49 = vor.u32 %v9108_v44, %v8291_v59  ;;  %v9093_v44 = vld [vmem:[#allocation3 + $0x24] sm:$0xf] }
 0x5af   : > { %4044 = vst [vmem:[#allocation3 + $0x188] sm:$0xff] %v4028_v57  ;;  %v8272_v57 = vor.u32 %v9101_v52, %v8269_v46  ;;  %v8229_v46 = vld [vmem:[#allocation3 + $0x18] sm:$0xf0] }
 0x5b0   : > { %4559 = vmatpush.bf16.msra.mxu0 %v8244_v0 }
 0x5b1   : > { %4590 = vmatpush.bf16.msra.mxu1 %v8324_v54  ;;  %v3611_v14 = vpop.f32.mrf.mxu0  ;;  %v3660_v15 = vpop.f32.mrf.mxu1  ;;  %v8283_v54 = vld [vmem:[#allocation3 + $0x80] sm:$0xf] }
 0x5b2   : > { %v3911_v4 = vpop.f32.mrf.mxu2  ;;  %v3960_v35 = vpop.f32.mrf.mxu3  ;;  %v3699_v31 = vmax.f32 %v3611_v14, 0.0  ;;  %v3700_v55 = vmax.f32 %v3660_v15, 0.0  ;;  %v8344_v14 = vor.u32 %v9119_v7, %v8341_v61  ;;  %v9099_v15 = vld [vmem:[#allocation3 + $0x54] sm:$0xf]  ;;  %v9109_v7 = vld [vmem:[#allocation3 + $0xa4] sm:$0xf] }
 0x5b3   : > { %v3999_v11 = vmax.f32 %v3911_v4, 0.0  ;;  %v4000_v13 = vmax.f32 %v3960_v35, 0.0  ;;  %v8284_v35 = vor.u32 %v9106_v53, %v8283_v54  ;;  %v8264_v16 = vor.u32 %v9099_v15, %v8261_v63  ;;  %v9111_v61 = vld [vmem:[#allocation3 + $0xb4] sm:$0xf]  ;;  %v8293_v15 = vld [vmem:[#allocation3 + $0x98] sm:$0xf0] }
 0x5b4   : > { %v3728_v28 = vpack.c.bf16 %v3700_v55, %v3699_v31  ;;  %4560 = vmatpush.bf16.msra.mxu0 %v8236_v24  ;;  %v8333_v31 = vld [vmem:[#allocation3 + $0xe8] sm:$0xf0]  ;;  %v9091_v63 = vld [vmem:[#allocation3 + $0x14] sm:$0xf] }
 0x5b5   : > { %v4029_v43 = vpack.c.bf16 %v4000_v13, %v3999_v11  ;;  %4591 = vmatpush.bf16.msra.mxu1 %v8316_v9  ;;  %v8253_v24 = vld [vmem:[#allocation3 + $0x48] sm:$0xf0] }
 0x5b6   : > { %3744 = vst [vmem:[#allocation3 + $0x118] sm:$0xff] %v3728_v28  ;;  %v8256_v28 = vor.u32 %v9097_v17, %v8253_v24 }
 0x5b7   : > { %4045 = vst [vmem:[#allocation3 + $0x190] sm:$0xff] %v4029_v43  ;;  %v8336_v43 = vor.u32 %v9117_v38, %v8333_v31 }
 0x5b8   : > { %4561 = vmatpush.bf16.msra.mxu0 %v8228_v18  ;;  %v8245_v18 = vld [vmem:[#allocation3 + $0x38] sm:$0xf0] }
 0x5b9   : > { %4592 = vmatpush.bf16.msra.mxu1 %v8308_v6  ;;  %v3614_v20 = vpop.f32.mrf.mxu0  ;;  %v3663_v26 = vpop.f32.mrf.mxu1 }
 0x5ba   : > { %v3913_v29 = vpop.f32.mrf.mxu2  ;;  %v3962_v30 = vpop.f32.mrf.mxu3  ;;  %v3701_v39 = vmax.f32 %v3614_v20, 0.0  ;;  %v3702_v40 = vmax.f32 %v3663_v26, 0.0  ;;  %v9095_v20 = vld [vmem:[#allocation3 + $0x34] sm:$0xf] }
 0x5bb   : > { %v4001_v50 = vmax.f32 %v3913_v29, 0.0  ;;  %v4002_v51 = vmax.f32 %v3962_v30, 0.0 }
 0x5bc   : > { %v3729_v45 = vpack.c.bf16 %v3702_v40, %v3701_v39  ;;  %4562 = vmatpush.bf16.msra.mxu0 %v8220_v41  ;;  %v8237_v40 = vld [vmem:[#allocation3 + $0x28] sm:$0xf0]  ;;  %v9113_v41 = vld [vmem:[#allocation3 + $0xc4] sm:$0xf] }
 0x5bd   : > { %v4030_v58 = vpack.c.bf16 %v4002_v51, %v4001_v50  ;;  %4593 = vmatpush.bf16.msra.mxu1 %v8300_v34  ;;  %v8328_v51 = vor.u32 %v9115_v32, %v8325_v5  ;;  %v8248_v34 = vor.u32 %v9095_v20, %v8245_v18  ;;  %v8320_v42 = vor.u32 %v9113_v41, %v8317_v36 }
 0x5be   : > { %3745 = vst [vmem:[#allocation3 + $0x120] sm:$0xff] %v3729_v45 }
 0x5bf   : > { %4046 = vst [vmem:[#allocation3 + $0x198] sm:$0xff] %v4030_v58  ;;  %v8240_v58 = vor.u32 %v9093_v44, %v8237_v40 }
 0x5c0   : > { %4687 = vmatpush.bf16.msrb.mxu0 %v8280_v47  ;;  %v8309_v47 = vld [vmem:[#allocation3 + $0xb8] sm:$0xf0] }
 0x5c1   : > { %4594 = vmatpush.bf16.msra.mxu1 %v8292_v49  ;;  %v3616_v3 = vpop.f32.mrf.mxu0  ;;  %v3665_v4 = vpop.f32.mrf.mxu1  ;;  %v8312_v54 = vor.u32 %v9111_v61, %v8309_v47 }
 0x5c2   : > { %v3916_v56 = vpop.f32.mrf.mxu2  ;;  %v3965_v2 = vpop.f32.mrf.mxu3  ;;  %v3703_v11 = vmax.f32 %v3616_v3, 0.0  ;;  %v3704_v13 = vmax.f32 %v3665_v4, 0.0  ;;  %v8301_v3 = vld [vmem:[#allocation3 + $0xa8] sm:$0xf0] }
 0x5c3   : > { %v4003_v0 = vmax.f32 %v3916_v56, 0.0  ;;  %v4004_v1 = vmax.f32 %v3965_v2, 0.0 }
 0x5c4   : > { %4688 = vmatpush.bf16.msrb.mxu0 %v8272_v57  ;;  %v3730_v55 = vpack.c.bf16 %v3704_v13, %v3703_v11  ;;  %v8304_v11 = vor.u32 %v9109_v7, %v8301_v3  ;;  %v9089_v13 = vld [vmem:[#allocation3 + $0x4] sm:$0xf] }
 0x5c5   : > { %v4031_v9 = vpack.c.bf16 %v4004_v1, %v4003_v0  ;;  %4595 = vmatpush.bf16.msra.mxu1 %v8284_v35  ;;  %v8232_v1 = vor.u32 %v9091_v63, %v8229_v46  ;;  %v8221_v35 = vld [vmem:[#allocation3 + $0x8] sm:$0xf0] }
 0x5c6   : > { %3746 = vst [vmem:[#allocation3 + $0x128] sm:$0xff] %v3730_v55 }
 0x5c7   : > { %4047 = vst [vmem:[#allocation3 + $0x1a0] sm:$0xff] %v4031_v9 }
 0x5c8   : > { %4689 = vmatpush.bf16.msrb.mxu0 %v8264_v16 }
 0x5c9   : > { %4720 = vmatpush.bf16.msrb.mxu1 %v8344_v14  ;;  %v3619_v29 = vpop.f32.mrf.mxu0  ;;  %v3668_v30 = vpop.f32.mrf.mxu1  ;;  %v8224_v14 = vor.u32 %v9089_v13, %v8221_v35 }
 0x5ca   : > { %v3918_v6 = vpop.f32.mrf.mxu2  ;;  %v3967_v19 = vpop.f32.mrf.mxu3  ;;  %v3705_v33 = vmax.f32 %v3619_v29, 0.0  ;;  %v3706_v50 = vmax.f32 %v3668_v30, 0.0 }
 0x5cb   : > { %v4005_v21 = vmax.f32 %v3918_v6, 0.0  ;;  %v4006_v22 = vmax.f32 %v3967_v19, 0.0  ;;  %v8285_v19 = vld [vmem:[#allocation3 + $0x88] sm:$0xf0] }
 0x5cc   : > { %4690 = vmatpush.bf16.msrb.mxu0 %v8256_v28  ;;  %v3731_v39 = vpack.c.bf16 %v3706_v50, %v3705_v33 }
 0x5cd   : > { %4721 = vmatpush.bf16.msrb.mxu1 %v8336_v43  ;;  %v4032_v26 = vpack.c.bf16 %v4006_v22, %v4005_v21  ;;  %v9107_v43 = vld [vmem:[#allocation3 + $0x94] sm:$0xf]  ;;  %v9105_v21 = vld [vmem:[#allocation3 + $0x84] sm:$0xf] }
 0x5ce   : > { %3747 = vst [vmem:[#allocation3 + $0x130] sm:$0xff] %v3731_v39  ;;  %v8296_v5 = vor.u32 %v9107_v43, %v8293_v15  ;;  %v8288_v22 = vor.u32 %v9105_v21, %v8285_v19 }
 0x5cf   : > { %4048 = vst [vmem:[#allocation3 + $0x1a8] sm:$0xff] %v4032_v26 }
 0x5d0   : > { %4691 = vmatpush.bf16.msrb.mxu0 %v8248_v34 }
 0x5d1   : > { %4722 = vmatpush.bf16.msrb.mxu1 %v8328_v51  ;;  %v3621_v53 = vpop.f32.mrf.mxu0  ;;  %v3670_v57 = vpop.f32.mrf.mxu1 }
 0x5d2   : > { %v3921_v45 = vpop.f32.mrf.mxu2  ;;  %v3970_v59 = vpop.f32.mrf.mxu3  ;;  %v3707_v56 = vmax.f32 %v3621_v53, 0.0  ;;  %v3708_v2 = vmax.f32 %v3670_v57, 0.0 }
 0x5d3   : > { %v4007_v49 = vmax.f32 %v3921_v45, 0.0  ;;  %v4008_v52 = vmax.f32 %v3970_v59, 0.0 }
 0x5d4   : > { %4692 = vmatpush.bf16.msrb.mxu0 %v8240_v58  ;;  %v3732_v4 = vpack.c.bf16 %v3708_v2, %v3707_v56 }
 0x5d5   : > { %4723 = vmatpush.bf16.msrb.mxu1 %v8320_v42  ;;  %v4033_v0 = vpack.c.bf16 %v4008_v52, %v4007_v49 }
 0x5d6   : > { %3748 = vst [vmem:[#allocation3 + $0x138] sm:$0xff] %v3732_v4 }
 0x5d7   : > { %4049 = vst [vmem:[#allocation3 + $0x1b0] sm:$0xff] %v4033_v0 }
 0x5d8   : > { %4693 = vmatpush.bf16.msrb.mxu0 %v8232_v1 }
 0x5d9   : > { %4724 = vmatpush.bf16.msrb.mxu1 %v8312_v54  ;;  %v3624_v24 = vpop.f32.mrf.mxu0  ;;  %v3673_v38 = vpop.f32.mrf.mxu1 }
 0x5da   : > { %v3923_v9 = vpop.f32.mrf.mxu2  ;;  %v3972_v16 = vpop.f32.mrf.mxu3  ;;  %v3709_v17 = vmax.f32 %v3624_v24, 0.0  ;;  %v3710_v28 = vmax.f32 %v3673_v38, 0.0 }
 0x5db   : > { %v4009_v31 = vmax.f32 %v3923_v9, 0.0  ;;  %v4010_v55 = vmax.f32 %v3972_v16, 0.0 }
 0x5dc   : > { %4694 = vmatpush.bf16.msrb.mxu0 %v8224_v14  ;;  %v3733_v18 = vpack.c.bf16 %v3710_v28, %v3709_v17 }
 0x5dd   : > { %4725 = vmatpush.bf16.msrb.mxu1 %v8304_v11  ;;  %v4034_v6 = vpack.c.bf16 %v4010_v55, %v4009_v31 }
 0x5de   : > { %3749 = vst [vmem:[#allocation3 + $0x140] sm:$0xff] %v3733_v18 }
 0x5df   : > { %4050 = vst [vmem:[#allocation3 + $0x1b8] sm:$0xff] %v4034_v6 }
 0x5e1   : > { %4726 = vmatpush.bf16.msrb.mxu1 %v8296_v5  ;;  %v3626_v50 = vpop.f32.mrf.mxu0  ;;  %v3675_v51 = vpop.f32.mrf.mxu1 }
 0x5e2   : > { %v3926_v29 = vpop.f32.mrf.mxu2  ;;  %v3975_v30 = vpop.f32.mrf.mxu3  ;;  %v3711_v20 = vmax.f32 %v3626_v50, 0.0  ;;  %v3712_v26 = vmax.f32 %v3675_v51, 0.0 }
 0x5e3   : > { %v4011_v32 = vmax.f32 %v3926_v29, 0.0  ;;  %v4012_v33 = vmax.f32 %v3975_v30, 0.0 }
 0x5e4   : > { %v3734_v36 = vpack.c.bf16 %v3712_v26, %v3711_v20 }
 0x5e5   : > { %4727 = vmatpush.bf16.msrb.mxu1 %v8288_v22  ;;  %v4035_v34 = vpack.c.bf16 %v4012_v33, %v4011_v32 }
 0x5e6   : > { %3750 = vst [vmem:[#allocation3 + $0x148] sm:$0xff] %v3734_v36 }
 0x5e7   : > { %4051 = vst [vmem:[#allocation3 + $0x1c0] sm:$0xff] %v4035_v34 }
 0x5e9   : > { %v3629_v44 = vpop.f32.mrf.mxu0  ;;  %v3678_v58 = vpop.f32.mrf.mxu1 }
 0x5ea   : > { %v3928_v39 = vpop.f32.mrf.mxu2  ;;  %v3977_v40 = vpop.f32.mrf.mxu3  ;;  %v3713_v47 = vmax.f32 %v3629_v44, 0.0  ;;  %v3714_v45 = vmax.f32 %v3678_v58, 0.0 }
 0x5eb   : > { %v4013_v41 = vmax.f32 %v3928_v39, 0.0  ;;  %v4014_v42 = vmax.f32 %v3977_v40, 0.0 }
 0x5ec   : > { %v3735_v46 = vpack.c.bf16 %v3714_v45, %v3713_v47 }
 0x5ed   : > { %v4036_v59 = vpack.c.bf16 %v4014_v42, %v4013_v41 }
 0x5ee   : > { %3751 = vst [vmem:[#allocation3 + $0x150] sm:$0xff] %v3735_v46 }
 0x5ef   : > { %4052 = vst [vmem:[#allocation3 + $0x1c8] sm:$0xff] %v4036_v59 }
 0x5f1   : > { %v3631_v61 = vpop.f32.mrf.mxu0  ;;  %v3680_v56 = vpop.f32.mrf.mxu1 }
 0x5f2   : > { %v3931_v49 = vpop.f32.mrf.mxu2  ;;  %v3980_v52 = vpop.f32.mrf.mxu3  ;;  %v3715_v2 = vmax.f32 %v3631_v61, 0.0  ;;  %v3716_v54 = vmax.f32 %v3680_v56, 0.0  ;;  %v8155_v56 = vld [vmem:[%s11177_s4] sm:$0xf] }
 0x5f3   : > { %v4015_v53 = vmax.f32 %v3931_v49, 0.0  ;;  %v4016_v57 = vmax.f32 %v3980_v52, 0.0 }
 0x5f4   : > { %v3736_v0 = vpack.c.bf16 %v3716_v54, %v3715_v2  ;;  %v9075_v2 = vld [vmem:[%s11177_s4 + $0xc] sm:$0xf0]  ;;  %v9073_v54 = vld [vmem:[%s11177_s4 + $0x4] sm:$0xf] }
 0x5f5   : > { %v4037_v63 = vpack.c.bf16 %v4016_v57, %v4015_v53 }
 0x5f6   : > { %3752 = vst [vmem:[#allocation3 + $0x158] sm:$0xff] %v3736_v0  ;;  %v8157_v0 = vld [vmem:[%s11177_s4 + $0x10] sm:$0xf0] }
 0x5f7   : > { %4053 = vst [vmem:[#allocation3 + $0x1d0] sm:$0xff] %v4037_v63  ;;  %v10330_v63 = vor.u32 %v9075_v2, %v8155_v56  ;;  %v9140_v56 = vld [vmem:[#allocation3 + $0x194] sm:$0xf0] }
 0x5f9   : > { %v3634_v7 = vpop.f32.mrf.mxu0  ;;  %v3683_v11 = vpop.f32.mrf.mxu1  ;;  %4563 = vmatmul.bf16.vlgmr.msra.gmra.mxu0 %v10330_v63 }
 0x5fa   : > { %v3933_v1 = vpop.f32.mrf.mxu2  ;;  %v3982_v3 = vpop.f32.mrf.mxu3  ;;  %v3717_v13 = vmax.f32 %v3634_v7, 0.0  ;;  %v3718_v14 = vmax.f32 %v3683_v11, 0.0 }
 0x5fb   : > { %v4017_v4 = vmax.f32 %v3933_v1, 0.0  ;;  %v4018_v35 = vmax.f32 %v3982_v3, 0.0  ;;  %v10335_v3 = vor.u32 %v9073_v54, %v8157_v0  ;;  %v8419_v54 = vld [vmem:[#allocation3 + $0x190] sm:$0xf] }
 0x5fc   : > { %v3737_v9 = vpack.c.bf16 %v3718_v14, %v3717_v13  ;;  %v8387_v14 = vld [vmem:[#allocation3 + $0x150] sm:$0xf] }
 0x5fd   : > { %v4038_v15 = vpack.c.bf16 %v4018_v35, %v4017_v4  ;;  %v9132_v35 = vld [vmem:[#allocation3 + $0x154] sm:$0xf0]  ;;  %4596 = vmatmul.bf16.vlgmr.msra.gmra.mxu1 %v10335_v3 }
 0x5fe   : > { %3753 = vst [vmem:[#allocation3 + $0x160] sm:$0xff] %v3737_v9 }
 0x5ff   : > { %4054 = vst [vmem:[#allocation3 + $0x1d8] sm:$0xff] %v4038_v15  ;;  %v8388_v15 = vor.u32 %v9132_v35, %v8387_v14  ;;  %v9083_v35 = vld [vmem:[%s11177_s4 + $0x4c] sm:$0xf0] }
 0x601   : > { %v3636_v38 = vpop.f32.mrf.mxu0  ;;  %v3685_v43 = vpop.f32.mrf.mxu1 }
 0x602   : > { %v3936_v16 = vpop.f32.mrf.mxu2  ;;  %v3985_v31 = vpop.f32.mrf.mxu3  ;;  %v3719_v17 = vmax.f32 %v3636_v38, 0.0  ;;  %v3720_v28 = vmax.f32 %v3685_v43, 0.0 }
 0x603   : > { %v4019_v55 = vmax.f32 %v3936_v16, 0.0  ;;  %v4020_v24 = vmax.f32 %v3985_v31, 0.0  ;;  %v9130_v16 = vld [vmem:[#allocation3 + $0x144] sm:$0xf0] }
 0x604   : > { %v3738_v6 = vpack.c.bf16 %v3720_v28, %v3719_v17  ;;  %v9128_v17 = vld [vmem:[#allocation3 + $0x134] sm:$0xf0]  ;;  %v8451_v28 = vld [vmem:[#allocation3 + $0x1d0] sm:$0xf] }
 0x605   : > { %v4039_v5 = vpack.c.bf16 %v4020_v24, %v4019_v55  ;;  %v8395_v1 = vld [vmem:[#allocation3 + $0x160] sm:$0xf]  ;;  %v9133_v14 = vld [vmem:[#allocation3 + $0x164] sm:$0xf] }
 0x606   : > { %3754 = vst [vmem:[#allocation3 + $0x168] sm:$0xff] %v3738_v6  ;;  %v8379_v24 = vld [vmem:[#allocation3 + $0x140] sm:$0xf]  ;;  %v9148_v43 = vld [vmem:[#allocation3 + $0x1d4] sm:$0xf0] }
 0x607   : > { %4055 = vst [vmem:[#allocation3 + $0x1e0] sm:$0xff] %v4039_v5  ;;  %v8380_v38 = vor.u32 %v9130_v16, %v8379_v24  ;;  %v8371_v5 = vld [vmem:[#allocation3 + $0x130] sm:$0xf]  ;;  %v8452_v6 = vor.u32 %v9148_v43, %v8451_v28  ;;  %v8165_v24 = vld [vmem:[%s11177_s4 + $0x18] sm:$0xf0] }
 0x608   : > { %v8411_v43 = vld [vmem:[#allocation3 + $0x180] sm:$0xf] }
 0x609   : > { %v3639_v29 = vpop.f32.mrf.mxu0  ;;  %v3688_v30 = vpop.f32.mrf.mxu1 }
 0x60a   : > { %v3938_v19 = vpop.f32.mrf.mxu2  ;;  %v3987_v18 = vpop.f32.mrf.mxu3  ;;  %v3721_v32 = vmax.f32 %v3639_v29, 0.0  ;;  %v3722_v33 = vmax.f32 %v3688_v30, 0.0  ;;  %v9146_v29 = vld [vmem:[#allocation3 + $0x1c4] sm:$0xf0] }
 0x60b   : > { %v4021_v21 = vmax.f32 %v3938_v19, 0.0  ;;  %v4022_v22 = vmax.f32 %v3987_v18, 0.0  ;;  %v8171_v19 = vld [vmem:[%s11177_s4 + $0x20] sm:$0xf]  ;;  %v9079_v18 = vld [vmem:[%s11177_s4 + $0x2c] sm:$0xf0] }
 0x60c   : > { %v3739_v51 = vpack.c.bf16 %v3722_v33, %v3721_v32  ;;  %v10348_v30 = vor.u32 %v9079_v18, %v8171_v19  ;;  %v8173_v32 = vld [vmem:[%s11177_s4 + $0x30] sm:$0xf0]  ;;  %v9126_v33 = vld [vmem:[#allocation3 + $0x124] sm:$0xf0]  ;;  %v9131_v18 = vld [vmem:[#allocation3 + $0x154] sm:$0xf] }
 0x60d   : > { %v4040_v50 = vpack.c.bf16 %v4022_v22, %v4021_v21  ;;  %v9134_v61 = vld [vmem:[#allocation3 + $0x164] sm:$0xf0]  ;;  %v9077_v21 = vld [vmem:[%s11177_s4 + $0x24] sm:$0xf]  ;;  %v8372_v22 = vor.u32 %v9128_v17, %v8371_v5 }
 0x60e   : > { %3755 = vst [vmem:[#allocation3 + $0x170] sm:$0xff] %v3739_v51  ;;  %v8396_v4 = vor.u32 %v9134_v61, %v8395_v1  ;;  %v8459_v31 = vld [vmem:[#allocation3 + $0x1e0] sm:$0xf]  ;;  %4568 = vmatmul.bf16.gmra.mxu0 %v10348_v30  ;;  %v8397_v1 = vld [vmem:[#allocation3 + $0x168] sm:$0xf0] }
 0x60f   : > { %4056 = vst [vmem:[#allocation3 + $0x1e8] sm:$0xff] %v4040_v50  ;;  %v10353_v50 = vor.u32 %v9077_v21, %v8173_v32  ;;  %v8443_v51 = vld [vmem:[#allocation3 + $0x1c0] sm:$0xf]  ;;  %v8400_v16 = vor.u32 %v9133_v14, %v8397_v1  ;;  %v8389_v17 = vld [vmem:[#allocation3 + $0x158] sm:$0xf0] }
 0x610   : > { %v8392_v21 = vor.u32 %v9131_v18, %v8389_v17  ;;  %v9149_v32 = vld [vmem:[#allocation3 + $0x1e4] sm:$0xf]  ;;  %v8195_v18 = vld [vmem:[%s11177_s4 + $0x48] sm:$0xf] }
 0x611   : > { %v3641_v39 = vpop.f32.mrf.mxu0  ;;  %v3690_v40 = vpop.f32.mrf.mxu1  ;;  %4601 = vmatmul.bf16.gmra.mxu1 %v10353_v50  ;;  %v9078_v1 = vld [vmem:[%s11177_s4 + $0x2c] sm:$0xf] }
 0x612   : > { %v3941_v20 = vpop.f32.mrf.mxu2  ;;  %v3990_v26 = vpop.f32.mrf.mxu3  ;;  %v3723_v41 = vmax.f32 %v3641_v39, 0.0  ;;  %v3724_v42 = vmax.f32 %v3690_v40, 0.0  ;;  %v9124_v39 = vld [vmem:[#allocation3 + $0x114] sm:$0xf0]  ;;  %v8435_v40 = vld [vmem:[#allocation3 + $0x1b0] sm:$0xf] }
 0x613   : > { %v4023_v34 = vmax.f32 %v3941_v20, 0.0  ;;  %v4024_v36 = vmax.f32 %v3990_v26, 0.0  ;;  %v8444_v20 = vor.u32 %v9146_v29, %v8443_v51  ;;  %v8363_v26 = vld [vmem:[#allocation3 + $0x120] sm:$0xf]  ;;  %v8381_v29 = vld [vmem:[#allocation3 + $0x148] sm:$0xf0] }
 0x614   : > { %v3740_v58 = vpack.c.bf16 %v3724_v42, %v3723_v41  ;;  %v8355_v42 = vld [vmem:[#allocation3 + $0x110] sm:$0xf]  ;;  %v9129_v51 = vld [vmem:[#allocation3 + $0x144] sm:$0xf] }
 0x615   : > { %v4041_v44 = vpack.c.bf16 %v4024_v36, %v4023_v34  ;;  %v8403_v52 = vld [vmem:[#allocation3 + $0x170] sm:$0xf]  ;;  %v8364_v34 = vor.u32 %v9126_v33, %v8363_v26  ;;  %v9144_v36 = vld [vmem:[#allocation3 + $0x1b4] sm:$0xf0]  ;;  %v9135_v61 = vld [vmem:[#allocation3 + $0x174] sm:$0xf] }
 0x616   : > { %3756 = vst [vmem:[#allocation3 + $0x178] sm:$0xff] %v3740_v58  ;;  %v9150_v9 = vld [vmem:[#allocation3 + $0x1e4] sm:$0xf0]  ;;  %v8436_v41 = vor.u32 %v9144_v36, %v8435_v40  ;;  %v8453_v26 = vld [vmem:[#allocation3 + $0x1d8] sm:$0xf0] }
 0x617   : > { %4057 = vst [vmem:[#allocation3 + $0x1f0] sm:$0xff] %v4041_v44  ;;  %v8460_v55 = vor.u32 %v9150_v9, %v8459_v31  ;;  %v8356_v44 = vor.u32 %v9124_v39, %v8355_v42  ;;  %v9142_v58 = vld [vmem:[#allocation3 + $0x1a4] sm:$0xf0]  ;;  %v8179_v36 = vld [vmem:[%s11177_s4 + $0x28] sm:$0xf] }
 0x618   : > { %v9080_v39 = vld [vmem:[%s11177_s4 + $0x34] sm:$0xf0]  ;;  %v9147_v40 = vld [vmem:[#allocation3 + $0x1d4] sm:$0xf]  ;;  %v9121_v17 = vld [vmem:[#allocation3 + $0x104] sm:$0xf] }
 0x619   : > { %v9127_v42 = vld [vmem:[#allocation3 + $0x134] sm:$0xf] }
 0x61a   : > { %v3943_v47 = vpop.f32.mrf.mxu2  ;;  %v3992_v45 = vpop.f32.mrf.mxu3 }
 0x61b   : > { %v4025_v59 = vmax.f32 %v3943_v47, 0.0  ;;  %v4026_v46 = vmax.f32 %v3992_v45, 0.0  ;;  %v8427_v47 = vld [vmem:[#allocation3 + $0x1a0] sm:$0xf]  ;;  %v9122_v45 = vld [vmem:[#allocation3 + $0x104] sm:$0xf0] }
 0x61d   : > { %v4042_v49 = vpack.c.bf16 %v4026_v46, %v4025_v59  ;;  %v9136_v53 = vld [vmem:[#allocation3 + $0x174] sm:$0xf0]  ;;  %v8405_v59 = vld [vmem:[#allocation3 + $0x178] sm:$0xf0]  ;;  %v8163_v46 = vld [vmem:[%s11177_s4 + $0x8] sm:$0xf] }
 0x61e   : > { %v8404_v57 = vor.u32 %v9136_v53, %v8403_v52  ;;  %v8467_v7 = vld [vmem:[#allocation3 + $0x1f0] sm:$0xf]  ;;  %v8428_v52 = vor.u32 %v9142_v58, %v8427_v47  ;;  %v8347_v53 = vld [vmem:[#allocation3 + $0x100] sm:$0xf]  ;;  %v8408_v2 = vor.u32 %v9135_v61, %v8405_v59  ;;  %v9151_v5 = vld [vmem:[#allocation3 + $0x1f4] sm:$0xf]  ;;  %v10399_v58 = vor.u32 %v9080_v39, %v8179_v36 }
 0x61f   : > { %4058 = vst [vmem:[#allocation3 + $0x1f8] sm:$0xff] %v4042_v49  ;;  %v9076_v49 = vld [vmem:[%s11177_s4 + $0x14] sm:$0xf0]  ;;  %v8445_v47 = vld [vmem:[#allocation3 + $0x1c8] sm:$0xf0] }
 0x620   : > { %4621 = vmatpush.bf16.msra.mxu2 %v8404_v57  ;;  %v8348_v57 = vor.u32 %v9122_v45, %v8347_v53  ;;  %v10363_v0 = vor.u32 %v9076_v49, %v8163_v46  ;;  %v8203_v45 = vld [vmem:[%s11177_s4 + $0x60] sm:$0xf]  ;;  %v9087_v59 = vld [vmem:[%s11177_s4 + $0x6c] sm:$0xf0]  ;;  %v8365_v46 = vld [vmem:[#allocation3 + $0x128] sm:$0xf0] }
 0x621   : > { %v9085_v49 = vld [vmem:[%s11177_s4 + $0x64] sm:$0xf]  ;;  %v9145_v53 = vld [vmem:[#allocation3 + $0x1c4] sm:$0xf] }
 0x622   : > { %v9125_v61 = vld [vmem:[#allocation3 + $0x124] sm:$0xf] }
 0x623   : > { %v9082_v39 = vld [vmem:[%s11177_s4 + $0x4c] sm:$0xf] }
 0x624   : > { %4622 = vmatpush.bf16.msra.mxu2 %v8396_v4  ;;  %v8187_v4 = vld [vmem:[%s11177_s4 + $0x40] sm:$0xf] }
 0x625   : > { %v10377_v9 = vor.u32 %v9083_v35, %v8187_v4  ;;  %v8181_v4 = vld [vmem:[%s11177_s4 + $0x38] sm:$0xf0] }
 0x626   : > { %v9152_v11 = vld [vmem:[#allocation3 + $0x1f4] sm:$0xf0]  ;;  %v8469_v31 = vld [vmem:[#allocation3 + $0x1f8] sm:$0xf0]  ;;  %v10424_v14 = vor.u32 %v9078_v1, %v8181_v4 }
 0x627   : > { %v8468_v13 = vor.u32 %v9152_v11, %v8467_v7  ;;  %v9081_v7 = vld [vmem:[%s11177_s4 + $0x44] sm:$0xf]  ;;  %v8420_v11 = vor.u32 %v9140_v56, %v8419_v54  ;;  %4573 = vmatmul.bf16.gmra.mxu0 %v10377_v9  ;;  %v10413_v56 = vor.u32 %v9087_v59, %v8203_v45  ;;  %v9086_v59 = vld [vmem:[%s11177_s4 + $0x6c] sm:$0xf] }
 0x628   : > { %4623 = vmatpush.bf16.msra.mxu2 %v8388_v15  ;;  %v9138_v15 = vld [vmem:[#allocation3 + $0x184] sm:$0xf0]  ;;  %v8437_v54 = vld [vmem:[#allocation3 + $0x1b8] sm:$0xf0] }
 0x629   : > { %4654 = vmatpush.bf16.msra.mxu3 %v8468_v13  ;;  %v8189_v13 = vld [vmem:[%s11177_s4 + $0x50] sm:$0xf0]  ;;  %v8412_v28 = vor.u32 %v9138_v15, %v8411_v43  ;;  %v9123_v15 = vld [vmem:[#allocation3 + $0x114] sm:$0xf] }
 0x62c   : > { %4624 = vmatpush.bf16.msra.mxu2 %v8380_v38  ;;  %v10386_v38 = vor.u32 %v9081_v7, %v8189_v13  ;;  %v8357_v7 = vld [vmem:[#allocation3 + $0x118] sm:$0xf0] }
 0x62d   : > { %4655 = vmatpush.bf16.msra.mxu3 %v8460_v55  ;;  %v9074_v55 = vld [vmem:[%s11177_s4 + $0xc] sm:$0xf] }
 0x62e   : > { %v10388_v19 = vor.u32 %v9074_v55, %v8165_v24  ;;  %4606 = vmatmul.bf16.gmra.mxu1 %v10386_v38  ;;  %v8349_v55 = vld [vmem:[#allocation3 + $0x108] sm:$0xf0]  ;;  %v9141_v24 = vld [vmem:[#allocation3 + $0x1a4] sm:$0xf] }
 0x630   : > { %4625 = vmatpush.bf16.msra.mxu2 %v8372_v22  ;;  %v8461_v22 = vld [vmem:[#allocation3 + $0x1e8] sm:$0xf0] }
 0x631   : > { %4656 = vmatpush.bf16.msra.mxu3 %v8452_v6  ;;  %v8472_v6 = vor.u32 %v9151_v5, %v8469_v31  ;;  %v8464_v33 = vor.u32 %v9149_v32, %v8461_v22  ;;  %v8429_v31 = vld [vmem:[#allocation3 + $0x1a8] sm:$0xf0]  ;;  %v8421_v5 = vld [vmem:[#allocation3 + $0x198] sm:$0xf0]  ;;  %v9139_v22 = vld [vmem:[#allocation3 + $0x194] sm:$0xf] }
 0x632   : > { %v8432_v43 = vor.u32 %v9141_v24, %v8429_v31 }
 0x634   : > { %4626 = vmatpush.bf16.msra.mxu2 %v8364_v34  ;;  %v8373_v34 = vld [vmem:[#allocation3 + $0x138] sm:$0xf0] }
 0x635   : > { %4657 = vmatpush.bf16.msra.mxu3 %v8444_v20  ;;  %v8384_v20 = vor.u32 %v9129_v51, %v8381_v29  ;;  %v8424_v29 = vor.u32 %v9139_v22, %v8421_v5  ;;  %v8413_v51 = vld [vmem:[#allocation3 + $0x188] sm:$0xf0] }
 0x637   : > { %4578 = vmatmul.bf16.gmra.mxu0 %v10413_v56 }
 0x638   : > { %4627 = vmatpush.bf16.msra.mxu2 %v8356_v44  ;;  %v8376_v44 = vor.u32 %v9127_v42, %v8373_v34 }
 0x639   : > { %4658 = vmatpush.bf16.msra.mxu3 %v8436_v41  ;;  %v8456_v41 = vor.u32 %v9147_v40, %v8453_v26  ;;  %v9137_v26 = vld [vmem:[#allocation3 + $0x184] sm:$0xf]  ;;  %v8197_v40 = vld [vmem:[%s11177_s4 + $0x58] sm:$0xf0] }
 0x63a   : > { %v8416_v34 = vor.u32 %v9137_v26, %v8413_v51  ;;  %v8200_v42 = vor.u32 %v9082_v39, %v8197_v40 }
 0x63c   : > { %4628 = vmatpush.bf16.msra.mxu2 %v8348_v57  ;;  %v8448_v57 = vor.u32 %v9145_v53, %v8445_v47  ;;  %v9088_v47 = vld [vmem:[%s11177_s4 + $0x74] sm:$0xf0] }
 0x63d   : > { %4659 = vmatpush.bf16.msra.mxu3 %v8428_v52  ;;  %v8205_v52 = vld [vmem:[%s11177_s4 + $0x70] sm:$0xf0] }
 0x63e   : > { %v10422_v35 = vor.u32 %v9085_v49, %v8205_v52  ;;  %v4076_v52 = vld [vmem:[%s11177_s4 + $0x88] sm:$0xff] }
 0x63f   : > { %4629 = vmatmul.bf16.vlgmr.msra.gmra.mxu2 %v10363_v0  ;;  %v4193_v53 = vunpack.c.l.b16 %v4076_v52 }
 0x640   : > { %4753 = vmatpush.bf16.msrb.mxu2 %v8408_v2  ;;  %v8368_v2 = vor.u32 %v9125_v61, %v8365_v46  ;;  %4611 = vmatmul.bf16.gmra.mxu1 %v10422_v35  ;;  %v8213_v46 = vld [vmem:[%s11177_s4 + $0x78] sm:$0xf0]  ;;  %v4194_v61 = vunpack.c.h.b16 %v4076_v52 }
 0x641   : > { %4660 = vmatpush.bf16.msra.mxu3 %v8420_v11  ;;  %v9143_v11 = vld [vmem:[#allocation3 + $0x1b4] sm:$0xf]  ;;  %v8216_v49 = vor.u32 %v9086_v59, %v8213_v46 }
 0x642   : > { %v8440_v13 = vor.u32 %v9143_v11, %v8437_v54 }
 0x644   : > { %4754 = vmatpush.bf16.msrb.mxu2 %v8400_v16  ;;  %v8360_v16 = vor.u32 %v9123_v15, %v8357_v7 }
 0x645   : > { %4661 = vmatpush.bf16.msra.mxu3 %v8412_v28  ;;  %v8352_v28 = vor.u32 %v9121_v17, %v8349_v55 }
 0x648   : > { %4755 = vmatpush.bf16.msrb.mxu2 %v8392_v21  ;;  %4662 = vmatmul.bf16.vlgmr.msra.gmra.mxu3 %v10388_v19  ;;  %v9084_v21 = vld [vmem:[%s11177_s4 + $0x54] sm:$0xf0] }
 0x649   : > { %4786 = vmatpush.bf16.msrb.mxu3 %v8472_v6  ;;  %v4075_v6 = vld [vmem:[%s11177_s4 + $0x80] sm:$0xff] }
 0x64a   : > { %v4191_v32 = vunpack.c.l.b16 %v4075_v6 }
 0x64c   : > { %4756 = vmatpush.bf16.msrb.mxu2 %v8384_v20  ;;  %v4192_v20 = vunpack.c.h.b16 %v4075_v6  ;;  %v4211_v36 = vpack.c.b16 %v4191_v32, %v4191_v32 }
 0x64d   : > { %4787 = vmatpush.bf16.msrb.mxu3 %v8464_v33  ;;  %v8196_v33 = vor.u32 %v9084_v21, %v8195_v18 }
 0x64e   : > { %4583 = vmatmul.bf16.gmra.mxu0 %v4211_v36 }
 0x64f   : > { %4634 = vmatmul.bf16.gmra.mxu2 %v10399_v58 }
 0x650   : > { %4757 = vmatpush.bf16.msrb.mxu2 %v8376_v44  ;;  %v8211_v44 = vld [vmem:[%s11177_s4 + $0x68] sm:$0xf] }
 0x651   : > { %4788 = vmatpush.bf16.msrb.mxu3 %v8456_v41  ;;  %v4212_v41 = vpack.c.b16 %v4192_v20, %v4192_v20  ;;  %v8212_v45 = vor.u32 %v9088_v47, %v8211_v44 }
 0x653   : > { %4616 = vmatmul.bf16.gmra.mxu1 %v4212_v41 }
 0x654   : > { %4758 = vmatpush.bf16.msrb.mxu2 %v8368_v2  ;;  %v4214_v2 = vpack.c.b16 %v4194_v61, %v4194_v61 }
 0x655   : > { %4789 = vmatpush.bf16.msrb.mxu3 %v8448_v57  ;;  %v4213_v57 = vpack.c.b16 %v4193_v53, %v4193_v53 }
 0x658   : > { %4759 = vmatpush.bf16.msrb.mxu2 %v8360_v16  ;;  %4667 = vmatmul.bf16.gmra.mxu3 %v10424_v14 }
 0x659   : > { %4790 = vmatpush.bf16.msrb.mxu3 %v8440_v13 }
 0x65c   : > { %4760 = vmatpush.bf16.msrb.mxu2 %v8352_v28 }
 0x65d   : > { %4791 = vmatpush.bf16.msrb.mxu3 %v8432_v43 }
 0x65e   : > { %4695 = vmatmul.bf16.vlgmr.msrb.gmra.mxu0 %v10330_v63  ;;  %v10467_v63 = vld [vmem:[#allocation4] sm:$0xff] }
 0x65f   : > { %4639 = vmatmul.bf16.gmra.mxu2 %v8196_v33  ;;  %4843 = vrot.lane.b32.xlu2 %v10467_v63, %s9477_s21 }
 0x661   : > { %4792 = vmatpush.bf16.msrb.mxu3 %v8424_v29 }
 0x663   : > { %4728 = vmatmul.bf16.vlgmr.msrb.gmra.mxu1 %v10335_v3  ;;  %v4857_v3 = vld [vmem:[#allocation4 + $0x20] sm:$0xff] }
 0x664   : > { %4863 = vrot.lane.b32.xlu1 %v4857_v3, %s9478_s22 }
 0x665   : > { %4793 = vmatpush.bf16.msrb.mxu3 %v8416_v34 }
 0x668   : > { %4672 = vmatmul.bf16.gmra.mxu3 %v8200_v42 }
 0x66e   : > { %4700 = vmatmul.bf16.gmra.mxu0 %v10348_v30 }
 0x66f   : > { %4644 = vmatmul.bf16.gmra.mxu2 %v8212_v45 }
 0x673   : > { %4733 = vmatmul.bf16.gmra.mxu1 %v10353_v50 }
 0x676   : > { %v4564_v30 = vpop.f32.mrf.mxu0 }
 0x678   : > { %4677 = vmatmul.bf16.gmra.mxu3 %v8216_v49 }
 0x67a   : > { %v4597_v50 = vpop.f32.mrf.mxu1 }
 0x67b   : > { %v4598_v11 = vadd.f32 %v4597_v50, %v4564_v30 }
 0x67e   : > { %4705 = vmatmul.bf16.gmra.mxu0 %v10377_v9  ;;  %v4566_v9 = vpop.f32.mrf.mxu0 }
 0x67f   : > { %4649 = vmatmul.bf16.gmra.mxu2 %v4213_v57 }
 0x683   : > { %4738 = vmatmul.bf16.gmra.mxu1 %v10386_v38  ;;  %v4599_v38 = vpop.f32.mrf.mxu1 }
 0x684   : > { %v4600_v43 = vadd.f32 %v4599_v38, %v4566_v9  ;;  %v4923_v9 = vld [vmem:[#allocation4 + $0x18] sm:$0xff] }
 0x685   : > { %4931 = vrot.lane.b32.xlu1 %v4923_v9, %s9473_s17 }
 0x688   : > { %4682 = vmatmul.bf16.gmra.mxu3 %v4214_v2 }
 0x68b   : > { %v4569_v54 = vpop.f32.mrf.mxu0 }
 0x68e   : > { %4710 = vmatmul.bf16.gmra.mxu0 %v10413_v56  ;;  %v4602_v1 = vpop.f32.mrf.mxu1 }
 0x68f   : > { %4761 = vmatmul.bf16.vlgmr.msrb.gmra.mxu2 %v10363_v0  ;;  %v4877_v0 = vld [vmem:[#allocation4 + $0x108] sm:$0xff]  ;;  %v4603_v18 = vadd.f32 %v4602_v1, %v4569_v54 }
 0x690   : > { %4883 = vrot.lane.b32.xlu2 %v4877_v0, %s9476_s20 }
 0x693   : > { %4743 = vmatmul.bf16.gmra.mxu1 %v10422_v35 }
 0x696   : > { %v4604_v56 = vpop.f32.mrf.mxu1 }
 0x698   : > { %4794 = vmatmul.bf16.vlgmr.msrb.gmra.mxu3 %v10388_v19  ;;  %v4897_v19 = vld [vmem:[#allocation4 + $0x110] sm:$0xff] }
 0x699   : > { %4903 = vrot.lane.b32.xlu2 %v4897_v19, %s9475_s19 }
 0x69e   : > { %4715 = vmatmul.bf16.gmra.mxu0 %v4211_v36 }
 0x69f   : > { %4766 = vmatmul.bf16.gmra.mxu2 %v10399_v58  ;;  %v4571_v58 = vpop.f32.mrf.mxu0 }
 0x6a0   : > { %v4605_v34 = vadd.f32 %v4604_v56, %v4571_v58 }
 0x6a3   : > { %4748 = vmatmul.bf16.gmra.mxu1 %v4212_v41 }
 0x6a7   : > { %v4574_v4 = vpop.f32.mrf.mxu0 }
 0x6a8   : > { %4799 = vmatmul.bf16.gmra.mxu3 %v10424_v14 }
 0x6ab   : > { %v4607_v35 = vpop.f32.mrf.mxu1 }
 0x6ac   : > { %v4608_v7 = vadd.f32 %v4607_v35, %v4574_v4  ;;  %v4943_v4 = vld [vmem:[#allocation4 + $0x118] sm:$0xff] }
 0x6ad   : > { %4951 = vrot.lane.b32.xlu1 %v4943_v4, %s9471_s11  ;;  %v4963_v4 = vld [vmem:[#allocation4 + $0xd8] sm:$0xff] }
 0x6af   : > { %4771 = vmatmul.bf16.gmra.mxu2 %v8196_v33  ;;  %v4576_v15 = vpop.f32.mrf.mxu0 }
 0x6b3   : > { %v4609_v16 = vpop.f32.mrf.mxu1 }
 0x6b4   : > { %v4610_v53 = vadd.f32 %v4609_v16, %v4576_v15 }
 0x6b7   : > { %v4579_v17 = vpop.f32.mrf.mxu0 }
 0x6b8   : > { %4804 = vmatmul.bf16.gmra.mxu3 %v8200_v42 }
 0x6bd   : > { %v4612_v5 = vpop.f32.mrf.mxu1 }
 0x6be   : > { %v4613_v30 = vadd.f32 %v4612_v5, %v4579_v17 }
 0x6bf   : > { %4776 = vmatmul.bf16.gmra.mxu2 %v8212_v45  ;;  %v4581_v32 = vpop.f32.mrf.mxu0 }
 0x6c2   : > { %v4630_v13 = vpop.f32.mrf.mxu2 }
 0x6c3   : > { %v4631_v14 = vadd.f32 %v4630_v13, %v4598_v11 }
 0x6c5   : > { %v4614_v33 = vpop.f32.mrf.mxu1 }
 0x6c6   : > { %v4615_v35 = vadd.f32 %v4614_v33, %v4581_v32 }
 0x6c8   : > { %4809 = vmatmul.bf16.gmra.mxu3 %v8216_v49 }
 0x6ca   : > { %v4632_v24 = vpop.f32.mrf.mxu2 }
 0x6cb   : > { %v4663_v31 = vpop.f32.mrf.mxu3  ;;  %v4633_v28 = vadd.f32 %v4632_v24, %v4600_v43  ;;  %v4584_v36 = vpop.f32.mrf.mxu0 }
 0x6cc   : > { %v4664_v55 = vadd.f32 %v4663_v31, %v4631_v14 }
 0x6ce   : > { %4845 = vrot.lane.b32.xlu0 %v4664_v55, %s9477_s21 }
 0x6cf   : > { %4781 = vmatmul.bf16.gmra.mxu2 %v4213_v57 }
 0x6d0   : > { %v4617_v40 = vpop.f32.mrf.mxu1 }
 0x6d1   : > { %v4618_v15 = vadd.f32 %v4617_v40, %v4584_v36 }
 0x6d2   : > { %v4635_v22 = vpop.f32.mrf.mxu2 }
 0x6d3   : > { %v4665_v6 = vpop.f32.mrf.mxu3  ;;  %v4636_v29 = vadd.f32 %v4635_v22, %v4603_v18  ;;  %v4586_v45 = vpop.f32.mrf.mxu0 }
 0x6d4   : > { %v4666_v21 = vadd.f32 %v4665_v6, %v4633_v28 }
 0x6d6   : > { %4865 = vrot.lane.b32.xlu2 %v4666_v21, %s9478_s22 }
 0x6d8   : > { %4814 = vmatmul.bf16.gmra.mxu3 %v4214_v2  ;;  %v4619_v59 = vpop.f32.mrf.mxu1 }
 0x6da   : > { %v4637_v26 = vpop.f32.mrf.mxu2 }
 0x6db   : > { %v4668_v51 = vpop.f32.mrf.mxu3  ;;  %v4638_v39 = vadd.f32 %v4637_v26, %v4605_v34  ;;  %v4696_v57 = vpop.f32.mrf.mxu0 }
 0x6dc   : > { %v4669_v20 = vadd.f32 %v4668_v51, %v4636_v29 }
 0x6de   : > { %4885 = vrot.lane.b32.xlu0 %v4669_v20, %s9476_s20 }
 0x6e0   : > { %v4729_v2 = vpop.f32.mrf.mxu1 }
 0x6e1   : > { %v4730_v29 = vadd.f32 %v4729_v2, %v4696_v57 }
 0x6e2   : > { %v4640_v44 = vpop.f32.mrf.mxu2 }
 0x6e3   : > { %v4670_v41 = vpop.f32.mrf.mxu3  ;;  %v4641_v47 = vadd.f32 %v4640_v44, %v4608_v7  ;;  %v4698_v19 = vpop.f32.mrf.mxu0 }
 0x6e4   : > { %v4671_v42 = vadd.f32 %v4670_v41, %v4638_v39 }
 0x6e6   : > { %4905 = vrot.lane.b32.xlu0 %v4671_v42, %s9475_s19 }
 0x6e8   : > { %v4731_v54 = vpop.f32.mrf.mxu1 }
 0x6e9   : > { %v4732_v39 = vadd.f32 %v4731_v54, %v4698_v19 }
 0x6ea   : > { %v4642_v52 = vpop.f32.mrf.mxu2 }
 0x6eb   : > { %v4673_v46 = vpop.f32.mrf.mxu3  ;;  %v4643_v61 = vadd.f32 %v4642_v52, %v4610_v53  ;;  %v4701_v7 = vpop.f32.mrf.mxu0 }
 0x6ec   : > { %v10482_v49 = vadd.f32 %v4673_v46, %v4641_v47 }
 0x6f0   : > { %v4734_v13 = vpop.f32.mrf.mxu1 }
 0x6f1   : > { %v4735_v47 = vadd.f32 %v4734_v13, %v4701_v7 }
 0x6f2   : > { %v4645_v0 = vpop.f32.mrf.mxu2 }
 0x6f3   : > { %v4675_v3 = vpop.f32.mrf.mxu3  ;;  %v4646_v38 = vadd.f32 %v4645_v0, %v4613_v30  ;;  %v4703_v24 = vpop.f32.mrf.mxu0 }
 0x6f4   : > { %v4676_v50 = vadd.f32 %v4675_v3, %v4643_v61 }
 0x6f6   : > { %4927 = vrot.lane.b32.xlu2 %v4676_v50, %s9473_s17 }
 0x6f8   : > { %v4736_v43 = vpop.f32.mrf.mxu1 }
 0x6f9   : > { %v4737_v3 = vadd.f32 %v4736_v43, %v4703_v24 }
 0x6fa   : > { %v4647_v56 = vpop.f32.mrf.mxu2 }
 0x6fb   : > { %v4678_v1 = vpop.f32.mrf.mxu3  ;;  %v4648_v11 = vadd.f32 %v4647_v56, %v4615_v35  ;;  %v4706_v6 = vpop.f32.mrf.mxu0 }
 0x6fc   : > { %v4679_v58 = vadd.f32 %v4678_v1, %v4646_v38 }
 0x6fe   : > { %4947 = vrot.lane.b32.xlu2 %v4679_v58, %s9471_s11 }
 0x700   : > { %v4739_v18 = vpop.f32.mrf.mxu1 }
 0x701   : > { %v4740_v22 = vadd.f32 %v4739_v18, %v4706_v6 }
 0x702   : > { %v4650_v31 = vpop.f32.mrf.mxu2 }
 0x703   : > { %v4680_v14 = vpop.f32.mrf.mxu3  ;;  %v4651_v55 = vadd.f32 %v4650_v31, %v4618_v15  ;;  %v4708_v51 = vpop.f32.mrf.mxu0  ;;  %v4983_v15 = vld [vmem:[#allocation4 + $0xb0] sm:$0xff] }
 0x704   : > { %v4681_v16 = vadd.f32 %v4680_v14, %v4648_v11 }
 0x706   : > { %4967 = vrot.lane.b32.xlu2 %v4681_v16, %s9474_s18 }
 0x708   : > { %v4741_v20 = vpop.f32.mrf.mxu1 }
 0x709   : > { %v4742_v11 = vadd.f32 %v4741_v20, %v4708_v51 }
 0x70a   : > { %v4652_v5 = vpop.f32.mrf.mxu2 }
 0x70b   : > { %v4683_v17 = vpop.f32.mrf.mxu3  ;;  %v4711_v40 = vpop.f32.mrf.mxu0 }
 0x70c   : > { %v4684_v28 = vadd.f32 %v4683_v17, %v4651_v55 }
 0x70e   : > { %4987 = vrot.lane.b32.xlu2 %v4684_v28, %s9472_s12 }
 0x710   : > { %v4744_v42 = vpop.f32.mrf.mxu1 }
 0x711   : > { %v4745_v16 = vadd.f32 %v4744_v42, %v4711_v40 }
 0x712   : > { %v4762_v32 = vpop.f32.mrf.mxu2 }
 0x713   : > { %v4685_v21 = vpop.f32.mrf.mxu3  ;;  %v4763_v33 = vadd.f32 %v4762_v32, %v4730_v29  ;;  %v4713_v52 = vpop.f32.mrf.mxu0 }
 0x716   : > { %5015 = vrot.lane.b32.xlu2 %v10467_v63, %s9479_s14 }
 0x718   : > { %v4746_v53 = vpop.f32.mrf.mxu1 }
 0x719   : > { %v4747_v5 = vadd.f32 %v4746_v53, %v4713_v52 }
 0x71a   : > { %v4764_v36 = vpop.f32.mrf.mxu2 }
 0x71b   : > { %v4795_v26 = vpop.f32.mrf.mxu3  ;;  %v4765_v41 = vadd.f32 %v4764_v36, %v4732_v39  ;;  %v4716_v30 = vpop.f32.mrf.mxu0 }
 0x71c   : > { %v4796_v34 = vadd.f32 %v4795_v26, %v4763_v33  ;;  %v4864_v36 = vpop.permute.xlu1 %4863 }
 0x71e   : > { %4847 = vrot.lane.b32.xlu0 %v4796_v34, %s9477_s21  ;;  %5030 = vrot.lane.b32.xlu2 %v10467_v63, %s9475_s19  ;;  %v4844_v34 = vpop.permute.xlu2 %4843 }
 0x720   : > { %v4749_v0 = vpop.f32.mrf.mxu1 }
 0x721   : > { %v4750_v21 = vadd.f32 %v4749_v0, %v4716_v30 }
 0x722   : > { %v4767_v59 = vpop.f32.mrf.mxu2 }
 0x723   : > { %v4797_v44 = vpop.f32.mrf.mxu3  ;;  %v4768_v46 = vadd.f32 %v4767_v59, %v4735_v47  ;;  %v4718_v1 = vpop.f32.mrf.mxu0 }
 0x724   : > { %v4798_v45 = vadd.f32 %v4797_v44, %v4765_v41  ;;  %v4932_v39 = vpop.permute.xlu1 %4931 }
 0x726   : > { %4867 = vrot.lane.b32.xlu1 %v4798_v45, %s9478_s22  ;;  %v4884_v40 = vpop.permute.xlu2 %4883 }
 0x728   : > { %v4751_v58 = vpop.f32.mrf.mxu1 }
 0x72a   : > { %v4769_v2 = vpop.f32.mrf.mxu2 }
 0x72b   : > { %v4800_v57 = vpop.f32.mrf.mxu3  ;;  %v4770_v50 = vadd.f32 %v4769_v2, %v4737_v3 }
 0x72c   : > { %v4801_v61 = vadd.f32 %v4800_v57, %v4768_v46  ;;  %v4952_v44 = vpop.permute.xlu1 %4951 }
 0x72e   : > { %4887 = vrot.lane.b32.xlu1 %v4801_v61, %s9476_s20  ;;  %v4904_v47 = vpop.permute.xlu2 %4903  ;;  %v10506_v61 = vld [vmem:[#allocation4 + $0x70] sm:$0xff] }
 0x732   : > { %v4772_v19 = vpop.f32.mrf.mxu2 }
 0x733   : > { %v4802_v9 = vpop.f32.mrf.mxu3  ;;  %v4773_v54 = vadd.f32 %v4772_v19, %v4740_v22 }
 0x734   : > { %v4803_v38 = vadd.f32 %v4802_v9, %v4770_v50 }
 0x736   : > { %4907 = vrot.lane.b32.xlu1 %v4803_v38, %s9475_s19  ;;  %v4866_v46 = vpop.permute.xlu2 %4865 }
 0x737   : > { %v4869_v0 = vsel %vm11284_vm7, %v4864_v36, %v4866_v46 }
 0x73a   : > { %v4774_v7 = vpop.f32.mrf.mxu2 }
 0x73b   : > { %v4805_v56 = vpop.f32.mrf.mxu3  ;;  %v4775_v13 = vadd.f32 %v4774_v7, %v4742_v11  ;;  %v4873_v7 = vsel %vm11287_vm11, %v4869_v0, 0.0 }
 0x73c   : > { %v10494_v35 = vadd.f32 %v4805_v56, %v4773_v54 }
 0x73e   : > { %4971 = vrot.lane.b32.xlu1 %v4963_v4, %s9474_s18 }
 0x740   : > { %v4846_v41 = vpop.permute.xlu0 %4845 }
 0x741   : > { %v4849_v50 = vsel %vm11283_vm3, %v4844_v34, %v4846_v41  ;;  %vm11290_vm3 = vcmask 924672  }
 0x742   : > { %v4777_v55 = vpop.f32.mrf.mxu2  ;;  %v4853_v54 = vsel %vm9658_vm4, %v4849_v50, 0.0  ;;  %vm11291_vm7 = vmmov %vm11290_vm3 }
 0x743   : > { %v4807_v14 = vpop.f32.mrf.mxu3  ;;  %v4778_v24 = vadd.f32 %v4777_v55, %v4745_v16 }
 0x744   : > { %v4808_v31 = vadd.f32 %v4807_v14, %v4775_v13 }
 0x746   : > { %4929 = vrot.lane.b32.xlu0 %v4808_v31, %s9473_s17  ;;  %4991 = vrot.lane.b32.xlu1 %v4983_v15, %s9472_s12  ;;  %v4875_v15 = vadd.f32 %v4873_v7, %v4853_v54 }
 0x74a   : > { %v4779_v28 = vpop.f32.mrf.mxu2 }
 0x74b   : > { %v4810_v43 = vpop.f32.mrf.mxu3  ;;  %v4780_v6 = vadd.f32 %v4779_v28, %v4747_v5 }
 0x74c   : > { %v4811_v17 = vadd.f32 %v4810_v43, %v4778_v24 }
 0x74e   : > { %4949 = vrot.lane.b32.xlu0 %v4811_v17, %s9471_s11  ;;  %5050 = vrot.lane.b32.xlu1 %v10506_v61, %s9473_s17 }
 0x750   : > { %v4886_v42 = vpop.permute.xlu0 %4885  ;;  %v4928_v53 = vpop.permute.xlu2 %4927 }
 0x751   : > { %v4889_v9 = vsel %vm11200_vm13, %v4884_v40, %v4886_v42 }
 0x752   : > { %v4782_v29 = vpop.f32.mrf.mxu2  ;;  %v4893_v11 = vsel %vm9634_vm14, %v4889_v9, 0.0 }
 0x753   : > { %v4812_v18 = vpop.f32.mrf.mxu3  ;;  %v4783_v32 = vadd.f32 %v4782_v29, %v4750_v21  ;;  %v4895_v43 = vadd.f32 %v4893_v11, %v4875_v15 }
 0x754   : > { %v4813_v22 = vadd.f32 %v4812_v18, %v4780_v6 }
 0x756   : > { %4969 = vrot.lane.b32.xlu0 %v4813_v22, %s9474_s18 }
 0x758   : > { %v4906_v45 = vpop.permute.xlu0 %4905  ;;  %v4948_v3 = vpop.permute.xlu2 %4947 }
 0x759   : > { %v4909_v56 = vsel %vm430_vm15, %v4904_v47, %v4906_v45 }
 0x75a   : > { %v4784_v20 = vpop.f32.mrf.mxu2  ;;  %v4913_v31 = vsel %vm350_vm8, %v4909_v56, 0.0 }
 0x75b   : > { %v4815_v33 = vpop.f32.mrf.mxu3  ;;  %v4915_v5 = vadd.f32 %v4913_v31, %v4895_v43 }
 0x75c   : > { %v4816_v51 = vadd.f32 %v4815_v33, %v4783_v32 }
 0x75d   : > { %v4919_v20 = vadd.f32 %v4915_v5, %v10482_v49 }
 0x75e   : > { %4989 = vrot.lane.b32.xlu0 %v4816_v51, %s9472_s12 }
 0x760   : > { %v4968_v28 = vpop.permute.xlu2 %4967 }
 0x763   : > { %v4817_v26 = vpop.f32.mrf.mxu3 }
 0x790   : > { %v4848_v52 = vpop.permute.xlu0 %4847 }
 0x791   : > { %v4850_v38 = vsel %vm11285_vm10, %v4846_v41, %v4848_v52  ;;  %vm11292_vm10 = vcmp.lt.s32.totalorder %v9583_v25, 15 }
 0x792   : > { %v4854_v13 = vsel %vm351_vm6, %v4850_v38, 0.0 }
 0x798   : > { %v4868_v59 = vpop.permute.xlu1 %4867 }
 0x799   : > { %v4870_v1 = vsel %vm11286_vm1, %v4866_v46, %v4868_v59  ;;  %vm11293_vm1 = vcmask 916480   ;;  %v4988_v59 = vpop.permute.xlu2 %4987 }
 0x79a   : > { %v4876_v16 = vadd.f32 %v4870_v1, %v4854_v13  ;;  %vm11294_vm11 = vmmov %vm11293_vm1 }
 0x7a0   : > { %v4888_v57 = vpop.permute.xlu1 %4887 }
 0x7a1   : > { %v4890_v19 = vsel %vm11200_vm13, %v4886_v42, %v4888_v57  ;;  %vm11305_vm13 = vcmp.lt.s32.totalorder %v9572_v12, 240 }
 0x7a2   : > { %v4894_v14 = vsel %vm397_vm2, %v4890_v19, 0.0 }
 0x7a3   : > { %v4896_v17 = vadd.f32 %v4894_v14, %v4876_v16 }
 0x7a8   : > { %v4908_v30 = vpop.permute.xlu1 %4907 }
 0x7a9   : > { %v4910_v4 = vsel %vm430_vm15, %v4906_v45, %v4908_v30 }
 0x7aa   : > { %v4914_v55 = vsel %vm351_vm6, %v4910_v4, 0.0 }
 0x7ab   : > { %v4916_v6 = vadd.f32 %v4914_v55, %v4896_v17 }
 0x7ad   : > { %v4920_v26 = vadd.f32 %v4916_v6, %v10494_v35 }
 0x7b0   : > { %v4972_v24 = vpop.permute.xlu1 %4971 }
 0x7b8   : > { %v4930_v2 = vpop.permute.xlu0 %4929  ;;  %v4992_v47 = vpop.permute.xlu1 %4991 }
 0x7b9   : > { %v4933_v18 = vsel %vm11288_vm12, %v4928_v53, %v4930_v2  ;;  %v4934_v21 = vsel %vm11289_vm0, %v4930_v2, %v4932_v39  ;;  %vm11295_vm12 = vcmp.lt.s32.totalorder %v9572_v12, 240  ;;  %vm11296_vm0 = vcmask 908288  }
 0x7ba   : > { %v4937_v33 = vsel %vm11292_vm10, %v4933_v18, 0.0  ;;  %v4938_v51 = vsel %vm397_vm2, %v4934_v21, 0.0 }
 0x7bb   : > { %v4939_v40 = vadd.f32 %v4937_v33, %v4919_v20  ;;  %v4940_v41 = vadd.f32 %v4938_v51, %v4920_v26 }
 0x7c0   : > { %v4950_v58 = vpop.permute.xlu0 %4949 }
 0x7c1   : > { %v4953_v29 = vsel %vm11290_vm3, %v4948_v3, %v4950_v58  ;;  %v4954_v32 = vsel %vm11291_vm7, %v4950_v58, %v4952_v44  ;;  %vm11297_vm3 = vmmov %vm11296_vm0 }
 0x7c2   : > { %v4957_v36 = vsel %vm350_vm8, %v4953_v29, 0.0  ;;  %v4958_v39 = vsel %vm9607_vm9, %v4954_v32, 0.0  ;;  %vm11298_vm7 = vmmov %vm11292_vm10  ;;  %vm11199_vm10 = vcmask 15360  }
 0x7c3   : > { %v4959_v45 = vadd.f32 %v4957_v36, %v4939_v40  ;;  %v4960_v49 = vadd.f32 %v4958_v39, %v4940_v41 }
 0x7c8   : > { %v4970_v22 = vpop.permute.xlu0 %4969 }
 0x7c9   : > { %v4974_v34 = vsel %vm11293_vm1, %v4970_v22, %v4972_v24  ;;  %v4973_v42 = vsel %vm11294_vm11, %v4968_v28, %v4970_v22  ;;  %vm11198_vm1 = vcmp.ge.s32.totalorder %v9583_v25, 2  ;;  %vm11197_vm11 = vcmp.ge.s32.totalorder %v9580_v23, 2 }
 0x7ca   : > { %v4978_v44 = vsel %vm11295_vm12, %v4974_v34, 0.0  ;;  %v4979_v46 = vadd.f32 %v4973_v42, %v4959_v45  ;;  %vm11299_vm12 = vcmask 1039360  }
 0x7cb   : > { %v4980_v52 = vadd.f32 %v4978_v44, %v4960_v49 }
 0x7d0   : > { %v4990_v35 = vpop.permute.xlu0 %4989 }
 0x7d1   : > { %v4993_v53 = vsel %vm11296_vm0, %v4988_v59, %v4990_v35  ;;  %v4994_v57 = vsel %vm11297_vm3, %v4990_v35, %v4992_v47  ;;  %vm11300_vm0 = vmmov %vm11299_vm12 }
 0x7d2   : > { %v4997_v2 = vsel %vm11298_vm7, %v4993_v53, 0.0  ;;  %v4998_v3 = vsel %vm9591_vm5, %v4994_v57, 0.0  ;;  %vm11301_vm3 = vmmov %vm11298_vm7  ;;  %vm11196_vm7 = vcmask 1031168  }
 0x7d3   : > { %v4999_v30 = vadd.f32 %v4997_v2, %v4979_v46  ;;  %v5000_v50 = vadd.f32 %v4998_v3, %v4980_v52 }
 0x7d5   : > { %v5001_v0 = vadd.f32 %v4999_v30, %v10086_v60  ;;  %v5002_v9 = vadd.f32 %v5000_v50, %v10078_v8  ;;  %v5016_v8 = vpop.permute.xlu2 %5015  ;;  %v5051_v60 = vpop.permute.xlu1 %5050 }
 0x7d7   : > { %v10558_v38 = vmax.f32 %v5001_v0, 0.0  ;;  %v10560_v19 = vmax.f32 %v5002_v9, 0.0 }
 0x7d9   : > { %5019 = vrot.lane.b32.xlu1 %v10560_v19, %s9479_s14  ;;  %5046 = vrot.lane.b32.xlu2 %v10558_v38, %s9473_s17 }
 0x7da   : > { %5017 = vrot.lane.b32.xlu0 %v10558_v38, %s9479_s14 }
 0x7dd   : > { %v5031_v1 = vpop.permute.xlu2 %5030 }
 0x7e1   : > { %5034 = vrot.lane.b32.xlu1 %v10560_v19, %s9475_s19  ;;  %5062 = vrot.lane.b32.xlu2 %v10558_v38, %s9480_s15 }
 0x7e2   : > { %5032 = vrot.lane.b32.xlu0 %v10558_v38, %s9475_s19 }
 0x7e9   : > { %5066 = vrot.lane.b32.xlu1 %v10506_v61, %s9480_s15  ;;  %5087 = vrot.lane.b32.xlu2 %v10467_v63, %s9481_s23 }
 0x7ea   : > { %5048 = vrot.lane.b32.xlu0 %v10560_v19, %s9473_s17 }
 0x7f1   : > { %5102 = vrot.lane.b32.xlu2 %v10467_v63, %s9478_s22 }
 0x7f2   : > { %5064 = vrot.lane.b32.xlu0 %v10560_v19, %s9480_s15 }
 0x7fa   : > { %5122 = vrot.lane.b32.xlu0 %v10506_v61, %s9474_s18 }
 0x833   : > { %v5047_v4 = vpop.permute.xlu2 %5046 }
 0x83b   : > { %v5063_v33 = vpop.permute.xlu2 %5062 }
 0x843   : > { %v5088_v44 = vpop.permute.xlu2 %5087 }
 0x84b   : > { %v5020_v58 = vpop.permute.xlu1 %5019  ;;  %v5103_v45 = vpop.permute.xlu2 %5102 }
 0x84c   : > { %v5018_v54 = vpop.permute.xlu0 %5017 }
 0x84d   : > { %v5022_v11 = vsel %vm11199_vm10, %v5016_v8, %v5018_v54  ;;  %v5023_v13 = vsel %vm11199_vm10, %v5018_v54, %v5020_v58  ;;  %vm11201_vm10 = vcmp.lt.s32.totalorder %v9572_v12, 224 }
 0x84e   : > { %v5026_v31 = vsel %vm11198_vm1, %v5022_v11, -inf  ;;  %v5027_v55 = vsel %vm11197_vm11, %v5023_v13, -inf  ;;  %vm11202_vm11 = vcmask 785408  }
 0x84f   : > { %v5028_v5 = vmax.f32 %v10558_v38, %v5026_v31  ;;  %v5029_v6 = vmax.f32 %v10560_v19, %v5027_v55 }
 0x853   : > { %v5035_v7 = vpop.permute.xlu1 %5034 }
 0x854   : > { %v5033_v56 = vpop.permute.xlu0 %5032 }
 0x855   : > { %v5036_v15 = vsel %vm430_vm15, %v5031_v1, %v5033_v56  ;;  %v5037_v16 = vsel %vm430_vm15, %v5033_v56, %v5035_v7 }
 0x856   : > { %v5040_v17 = vsel %vm350_vm8, %v5036_v15, -inf  ;;  %v5041_v28 = vsel %vm351_vm6, %v5037_v16, -inf }
 0x857   : > { %v5042_v29 = vmax.f32 %v5028_v5, %v5040_v17  ;;  %v5043_v32 = vmax.f32 %v5029_v6, %v5041_v28 }
 0x85b   : > { %v5067_v22 = vpop.permute.xlu1 %5066 }
 0x85c   : > { %v5049_v14 = vpop.permute.xlu0 %5048 }
 0x85d   : > { %v5052_v24 = vsel %vm11299_vm12, %v5047_v4, %v5049_v14  ;;  %v5053_v43 = vsel %vm11300_vm0, %v5049_v14, %v5051_v60  ;;  %vm11195_vm12 = vcmp.lt.s32.totalorder %v9583_v25, 14  ;;  %vm11194_vm0 = vcmp.lt.s32.totalorder %v9580_v23, 14 }
 0x85e   : > { %v5056_v18 = vsel %vm11301_vm3, %v5052_v24, -inf  ;;  %v5057_v21 = vsel %vm397_vm2, %v5053_v43, -inf  ;;  %vm5093_vm3 = vcmask 261120  }
 0x85f   : > { %v5058_v20 = vmax.f32 %v5042_v29, %v5056_v18  ;;  %v5059_v26 = vmax.f32 %v5043_v32, %v5057_v21 }
 0x864   : > { %v5065_v51 = vpop.permute.xlu0 %5064 }
 0x865   : > { %v5069_v34 = vsel %vm11196_vm7, %v5063_v33, %v5065_v51  ;;  %v5070_v36 = vsel %vm11196_vm7, %v5065_v51, %v5067_v22  ;;  %vm5082_vm7 = vcmp.ge.s32.totalorder %v9569_v10, 32 }
 0x866   : > { %v5073_v39 = vsel %vm11195_vm12, %v5069_v34, -inf  ;;  %v5074_v40 = vsel %vm11194_vm0, %v5070_v36, -inf  ;;  %vm11302_vm0 = vcmask 130048   ;;  %vm11303_vm12 = vcmask 916480  }
 0x867   : > { %v5075_v41 = vmax.f32 %v5058_v20, %v5073_v39  ;;  %v5076_v42 = vmax.f32 %v5059_v26, %v5074_v40  ;;  %vm11304_vm1 = vmmov %vm11302_vm0 }
 0x869   : > { %5120 = vrot.lane.b32.xlu2 %v5076_v42, %s9474_s18  ;;  %5091 = vrot.lane.b32.xlu1 %v5076_v42, %s9481_s23 }
 0x86a   : > { %5089 = vrot.lane.b32.xlu0 %v5075_v41, %s9481_s23 }
 0x86c   : > { %v5123_v47 = vpop.permute.xlu0 %5122 }
 0x871   : > { %5136 = vrot.lane.b32.xlu2 %v5076_v42, %s9482_s24  ;;  %5106 = vrot.lane.b32.xlu1 %v5076_v42, %s9478_s22 }
 0x872   : > { %5104 = vrot.lane.b32.xlu0 %v5075_v41, %s9478_s22 }
 0x879   : > { %5118 = vrot.lane.b32.xlu1 %v5075_v41, %s9474_s18  ;;  %5263 = vrot.lane.b32.xlu2 %v10506_v61, %s9471_s11 }
 0x87a   : > { %5138 = vrot.lane.b32.xlu0 %v10506_v61, %s9482_s24 }
 0x881   : > { %5134 = vrot.lane.b32.xlu1 %v5075_v41, %s9482_s24 }
 0x882   : > { %5303 = vrot.lane.b32.xlu0 %v10506_v61, %s9472_s12 }
 0x88a   : > { %5243 = vrot.lane.b32.xlu0 %v10506_v61, %s9473_s17 }
 0x8c3   : > { %v5121_v35 = vpop.permute.xlu2 %5120 }
 0x8c4   : > { %v5125_v3 = vsel %vm11303_vm12, %v5121_v35, %v5123_v47  ;;  %vm11306_vm12 = vcmp.ge.s32.totalorder %v9569_v10, 16 }
 0x8c5   : > { %v5129_v8 = vsel %vm11305_vm13, %v5125_v3, -inf  ;;  %vm11308_vm13 = vcmask 908288  }
 0x8cb   : > { %v5137_v60 = vpop.permute.xlu2 %5136 }
 0x8db   : > { %v5092_v49 = vpop.permute.xlu1 %5091 }
 0x8dc   : > { %v5090_v59 = vpop.permute.xlu0 %5089 }
 0x8dd   : > { %v5095_v52 = vsel %vm5093_vm3, %v5090_v59, %v5092_v49  ;;  %v5094_v30 = vsel %vm5093_vm3, %v5088_v44, %v5090_v59 }
 0x8de   : > { %v5101_v2 = vmax.f32 %v5076_v42, %v5095_v52  ;;  %v5098_v54 = vsel %vm5082_vm7, %v5094_v30, -inf }
 0x8df   : > { %v5100_v11 = vmax.f32 %v5075_v41, %v5098_v54 }
 0x8e3   : > { %v5107_v46 = vpop.permute.xlu1 %5106 }
 0x8e4   : > { %v5105_v53 = vpop.permute.xlu0 %5104 }
 0x8e5   : > { %v5109_v57 = vsel %vm11302_vm0, %v5105_v53, %v5107_v46  ;;  %v5108_v0 = vsel %vm11304_vm1, %v5103_v45, %v5105_v53  ;;  %vm11307_vm1 = vcmask 916480   ;;  %vm11309_vm0 = vmmov %vm11308_vm13 }
 0x8e6   : > { %v5115_v50 = vmax.f32 %v5101_v2, %v5109_v57  ;;  %v5112_v4 = vsel %vm11306_vm12, %v5108_v0, -inf  ;;  %vm11310_vm12 = vcmp.lt.s32.totalorder %v9583_v25, 15 }
 0x8e7   : > { %v5114_v15 = vmax.f32 %v5100_v11, %v5112_v4 }
 0x8e8   : > { %v5131_v58 = vmax.f32 %v5115_v50, %v5129_v8 }
 0x8eb   : > { %v5119_v9 = vpop.permute.xlu1 %5118 }
 0x8ec   : > { %v5139_v1 = vpop.permute.xlu0 %5138  ;;  %v5124_v14 = vsel %vm11307_vm1, %v5119_v9, %v5121_v35  ;;  %vm11311_vm1 = vcmask 1039360  }
 0x8ed   : > { %v5142_v56 = vsel %vm11202_vm11, %v5137_v60, %v5139_v1  ;;  %v5130_v31 = vmax.f32 %v5114_v15, %v5124_v14 }
 0x8ee   : > { %v5146_v7 = vsel %vm11201_vm10, %v5142_v56, -inf }
 0x8ef   : > { %v5148_v13 = vmax.f32 %v5131_v58, %v5146_v7 }
 0x8f1   : > { %5221 = vrot.lane.b32.xlu1 %v5148_v13, %s9475_s19  ;;  %5201 = vrot.lane.b32.xlu2 %v5148_v13, %s9476_s20  ;;  %v9341_v16 = vpack.i.bf16 %v10506_v61, %v5148_v13 }
 0x8f3   : > { %v5135_v55 = vpop.permute.xlu1 %5134  ;;  %9342 = vrot.lane.b32.xlu0 %v9341_v16, %s9474_s18 }
 0x8f4   : > { %v5141_v24 = vsel %vm11202_vm11, %v5135_v55, %v5137_v60  ;;  %v5304_v18 = vpop.permute.xlu0 %5303 }
 0x8f5   : > { %v5147_v43 = vmax.f32 %v5130_v31, %v5141_v24 }
 0x8f7   : > { %v5231_v17 = vpack.c.bf16 %v5148_v13, %v5147_v43  ;;  %v9351_v28 = vpack.i.bf16 %v5148_v13, %v5147_v43  ;;  %v9366_v5 = vpack.i.bf16 %v5147_v43, %v10467_v63  ;;  %v5264_v63 = vpop.permute.xlu2 %5263 }
 0x8f9   : > { %5232 = vst [vmem:[#allocation2 + $0x20] sm:$0xff] %v5231_v17  ;;  %9352 = vrot.lane.b32.xlu1 %v9351_v28, %s9471_s11  ;;  %9347 = vrot.lane.b32.xlu2 %v9351_v28, %s9472_s12 }
 0x8fb   : > { %9367 = vrot.lane.b32.xlu0 %v9366_v5, %s9475_s19 }
 0x8fc   : > { %v5244_v40 = vpop.permute.xlu0 %5243 }
 0x901   : > { %5279 = vrot.lane.b32.xlu1 %v5147_v43, %s9474_s18  ;;  %9357 = vrot.lane.b32.xlu2 %v9351_v28, %s9473_s17 }
 0x903   : > { %5161 = vrot.lane.b32.xlu0 %v5148_v13, %s9477_s21 }
 0x909   : > { %9362 = vrot.lane.b32.xlu1 %v9366_v5, %s9476_s20  ;;  %9372 = vrot.lane.b32.xlu2 %v9366_v5, %s9477_s21 }
 0x911   : > { %9377 = vrot.lane.b32.xlu1 %v9366_v5, %s9478_s22  ;;  %5181 = vrot.lane.b32.xlu2 %v5148_v13, %s9478_s22 }
 0x919   : > { %5447 = vrot.lane.b32.xlu2 %v10506_v61, %s9473_s17 }
 0x94b   : > { %v10667_v6 = vpop.permute.xlu2 %5201 }
 0x953   : > { %v9348_v21 = vpop.permute.xlu2 %9347 }
 0x954   : > { %v9350_v22 = vunpack.i.h.bf16 %v9348_v21  ;;  %v9349_v29 = vunpack.i.l.bf16 %v9348_v21 }
 0x956   : > { %v5305_v32 = vsel %vm11308_vm13, %v9349_v29, %v9350_v22  ;;  %v5306_v33 = vsel %vm11309_vm0, %v9350_v22, %v5304_v18  ;;  %vm11312_vm13 = vmmov %vm11311_vm1  ;;  %vm11313_vm0 = vcmask 1043456  }
 0x957   : > { %v5309_v51 = vsel %vm11310_vm12, %v5305_v32, 0.0  ;;  %v5310_v20 = vsel %vm9591_vm5, %v5306_v33, 0.0  ;;  %vm11314_vm10 = vmmov %vm11313_vm0  ;;  %v10705_v33 = vld [vmem:[#allocation4] sm:$0xff] }
 0x958   : > { %v5311_v26 = vpack.c.bf16 %v5310_v20, %v5309_v51  ;;  %5413 = vrot.lane.b32.xlu0 %v10705_v33, %s9479_s14 }
 0x95a   : > { %v5348_v34 = vunpack.c.l.b16 %v5311_v26  ;;  %v5349_v36 = vunpack.c.h.b16 %v5311_v26 }
 0x95b   : > { %v9358_v39 = vpop.permute.xlu2 %9357 }
 0x95c   : > { %v9360_v41 = vunpack.i.h.bf16 %v9358_v39  ;;  %v9359_v42 = vunpack.i.l.bf16 %v9358_v39  ;;  %v5358_v44 = vpack.c.b16 %v5348_v34, %v5348_v34  ;;  %v5359_v47 = vpack.c.b16 %v5349_v36, %v5349_v36 }
 0x95e   : > { %v5245_v45 = vsel %vm11311_vm1, %v9359_v42, %v9360_v41  ;;  %v5246_v49 = vsel %vm11312_vm13, %v9360_v41, %v5244_v40  ;;  %v5372_v59 = vsel %vm11313_vm0, %v5358_v44, 0  ;;  %v5375_v35 = vsel %vm11314_vm10, %v5359_v47, 0 }
 0x95f   : > { %v5249_v46 = vsel %vm11310_vm12, %v5245_v45, 0.0  ;;  %v5250_v52 = vsel %vm397_vm2, %v5246_v49, 0.0  ;;  %5380 = vmatpush.bf16.msra.mxu0 %v5372_v59  ;;  %5393 = vmatpush.bf16.msra.mxu1 %v5375_v35  ;;  %vm11315_vm10 = vcmask 924672   ;;  %vm11317_vm13 = vcmask 916480  }
 0x960   : > { %v5251_v53 = vpack.c.bf16 %v5250_v52, %v5249_v46  ;;  %vm11316_vm1 = vmmov %vm11315_vm10  ;;  %vm11319_vm12 = vcmp.lt.s32.totalorder %v9572_v12, 240  ;;  %5427 = vrot.lane.b32.xlu0 %v10705_v33, %s9475_s19 }
 0x961   : > { %vm11318_vm0 = vmmov %vm11317_vm13 }
 0x962   : > { %5252 = vst [vmem:[#allocation2 + $0x28] sm:$0xff] %v5251_v53  ;;  %v9157_v53 = vld [vmem:[#allocation2 + $0x24] sm:$0xf] }
 0x963   : > { %v5222_v57 = vpop.permute.xlu1 %5221  ;;  %v9373_v30 = vpop.permute.xlu2 %9372 }
 0x964   : > { %v9375_v4 = vunpack.i.h.bf16 %v9373_v30  ;;  %v9374_v13 = vunpack.i.l.bf16 %v9373_v30 }
 0x965   : > { %v9343_v2 = vpop.permute.xlu0 %9342 }
 0x966   : > { %v9345_v9 = vunpack.i.h.bf16 %v9343_v2  ;;  %v9344_v8 = vunpack.i.l.bf16 %v9343_v2 }
 0x968   : > { %v5286_v24 = vsel %vm11317_vm13, %v9344_v8, %v9345_v9  ;;  %vm11322_vm13 = vcmask 121856  }
 0x969   : > { %v5290_v5 = vsel %vm11319_vm12, %v5286_v24, 0.0  ;;  %v9158_v46 = vld [vmem:[#allocation2 + $0x24] sm:$0xf0]  ;;  %v8493_v52 = vld [vmem:[#allocation2 + $0x28] sm:$0xf0]  ;;  %vm11324_vm12 = vcmask 130048  }
 0x96a   : > { %v5313_v24 = vld [vmem:[%s11178_s5] sm:$0xf] }
 0x96b   : > { %v9353_v3 = vpop.permute.xlu1 %9352 }
 0x96c   : > { %v9355_v50 = vunpack.i.h.bf16 %v9353_v3  ;;  %v9354_v0 = vunpack.i.l.bf16 %v9353_v3  ;;  %v8496_v3 = vor.u32 %v9157_v53, %v8493_v52 }
 0x96d   : > { %v9368_v60 = vpop.permute.xlu0 %9367 }
 0x96e   : > { %v5266_v54 = vsel %vm11315_vm10, %v9355_v50, %v5264_v63  ;;  %v5265_v1 = vsel %vm11316_vm1, %v9354_v0, %v9355_v50  ;;  %v9370_v58 = vunpack.i.h.bf16 %v9368_v60  ;;  %v9369_v56 = vunpack.i.l.bf16 %v9368_v60  ;;  %v5182_v0 = vpop.permute.xlu2 %5181 }
 0x96f   : > { %v5270_v7 = vsel %vm9607_vm9, %v5266_v54, 0.0  ;;  %v5269_v11 = vsel %vm350_vm8, %v5265_v1, 0.0  ;;  %vm11320_vm10 = vcmask 138240  }
 0x970   : > { %v5271_v14 = vpack.c.bf16 %v5270_v7, %v5269_v11  ;;  %v5224_v15 = vsel %vm430_vm15, %v9370_v58, %v5222_v57  ;;  %v5223_v16 = vsel %vm430_vm15, %v9369_v56, %v9370_v58  ;;  %v5163_v63 = vsel %vm11320_vm10, %v9374_v13, %v9375_v4  ;;  %vm11321_vm1 = vmmov %vm11320_vm10 }
 0x971   : > { %v5228_v31 = vsel %vm351_vm6, %v5224_v15, 0.0  ;;  %v5227_v55 = vsel %vm350_vm8, %v5223_v16, 0.0  ;;  %v5167_v29 = vsel %vm9658_vm4, %v5163_v63, 0.0  ;;  %vm11325_vm10 = vmmov %vm11324_vm12 }
 0x972   : > { %5272 = vst [vmem:[#allocation2 + $0x30] sm:$0xff] %v5271_v14  ;;  %v5229_v43 = vpack.c.bf16 %v5228_v31, %v5227_v55 }
 0x973   : > { %v5280_v17 = vpop.permute.xlu1 %5279 }
 0x974   : > { %5230 = vst [vmem:[#allocation2 + $0x18] sm:$0xff] %v5229_v43  ;;  %v5285_v28 = vsel %vm11318_vm0, %v5280_v17, %v9344_v8  ;;  %vm11323_vm0 = vmmov %vm11322_vm13 }
 0x975   : > { %v5291_v18 = vpack.c.bf16 %v5290_v5, %v5285_v28  ;;  %v5162_v21 = vpop.permute.xlu0 %5161 }
 0x976   : > { %v5164_v22 = vsel %vm11321_vm1, %v9375_v4, %v5162_v21  ;;  %vm11326_vm1 = vcmp.ge.s32.totalorder %v9569_v10, 16  ;;  %v5448_v63 = vpop.permute.xlu2 %5447 }
 0x977   : > { %5292 = vst [vmem:[#allocation2 + $0x38] sm:$0xff] %v5291_v18  ;;  %v5168_v32 = vsel %vm351_vm6, %v5164_v22, 0.0 }
 0x978   : > { %v5169_v51 = vpack.c.bf16 %v5168_v32, %v5167_v29 }
 0x979   : > { %v8499_v36 = vld [vmem:[#allocation2 + $0x30] sm:$0xf]  ;;  %v9159_v42 = vld [vmem:[#allocation2 + $0x34] sm:$0xf] }
 0x97a   : > { %5170 = vst [vmem:[#allocation2] sm:$0xff] %v5169_v51 }
 0x97b   : > { %v9363_v20 = vpop.permute.xlu1 %9362  ;;  %v9156_v1 = vld [vmem:[#allocation2 + $0x14] sm:$0xf0]  ;;  %v8485_v4 = vld [vmem:[#allocation2 + $0x18] sm:$0xf0] }
 0x97c   : > { %v9365_v26 = vunpack.i.h.bf16 %v9363_v20  ;;  %v9364_v34 = vunpack.i.l.bf16 %v9363_v20 }
 0x97e   : > { %v5203_v39 = vsel %vm11322_vm13, %v9364_v34, %v9365_v26  ;;  %v5204_v40 = vsel %vm11323_vm0, %v9365_v26, %v10667_v6  ;;  %v9160_v41 = vld [vmem:[#allocation2 + $0x34] sm:$0xf0]  ;;  %v8501_v44 = vld [vmem:[#allocation2 + $0x38] sm:$0xf0]  ;;  %v8491_v6 = vld [vmem:[#allocation2 + $0x20] sm:$0xf] }
 0x97f   : > { %v5207_v47 = vsel %vm9634_vm14, %v5203_v39, 0.0  ;;  %v5208_v45 = vsel %vm397_vm2, %v5204_v40, 0.0  ;;  %v8500_v49 = vor.u32 %v9160_v41, %v8499_v36  ;;  %v8504_v59 = vor.u32 %v9159_v42, %v8501_v44 }
 0x980   : > { %v5209_v35 = vpack.c.bf16 %v5208_v45, %v5207_v47  ;;  %v8492_v2 = vor.u32 %v9158_v46, %v8491_v6  ;;  %vm11327_vm13 = vcmask 588800  }
 0x981   : > { %5381 = vmatpush.bf16.msra.mxu0 %v8500_v49  ;;  %5394 = vmatpush.bf16.msra.mxu1 %v8504_v59  ;;  %v8475_v13 = vld [vmem:[#allocation2] sm:$0xf]  ;;  %v9153_v15 = vld [vmem:[#allocation2 + $0x4] sm:$0xf]  ;;  %vm11328_vm0 = vmmov %vm11327_vm13 }
 0x982   : > { %5210 = vst [vmem:[#allocation2 + $0x10] sm:$0xff] %v5209_v35 }
 0x983   : > { %v9378_v57 = vpop.permute.xlu1 %9377 }
 0x984   : > { %v9380_v30 = vunpack.i.h.bf16 %v9378_v57  ;;  %v9379_v50 = vunpack.i.l.bf16 %v9378_v57 }
 0x985   : > { %5382 = vmatpush.bf16.msra.mxu0 %v8492_v2  ;;  %5395 = vmatpush.bf16.msra.mxu1 %v8496_v3 }
 0x986   : > { %v5183_v9 = vsel %vm11324_vm12, %v9379_v50, %v9380_v30  ;;  %v5184_v8 = vsel %vm11325_vm10, %v9380_v30, %v5182_v0  ;;  %vm11329_vm12 = vcmask 15360  }
 0x987   : > { %v5187_v60 = vsel %vm11326_vm1, %v5183_v9, 0.0  ;;  %vm11330_vm10 = vmmov %vm11329_vm12  ;;  %vm11331_vm1 = vcmp.ge.s32.totalorder %v9583_v25, 2 }
 0x988   : > { %v5189_v54 = vpack.c.bf16 %v5184_v8, %v5187_v60 }
 0x989   : > { %v8483_v58 = vld [vmem:[#allocation2 + $0x10] sm:$0xf]  ;;  %v9155_v56 = vld [vmem:[#allocation2 + $0x14] sm:$0xf] }
 0x98a   : > { %5190 = vst [vmem:[#allocation2 + $0x8] sm:$0xff] %v5189_v54  ;;  %v8484_v7 = vor.u32 %v9156_v1, %v8483_v58  ;;  %v8488_v11 = vor.u32 %v9155_v56, %v8485_v4 }
 0x98c   : > { %5383 = vmatpush.bf16.msra.mxu0 %v8484_v7  ;;  %5396 = vmatpush.bf16.msra.mxu1 %v8488_v11 }
 0x991   : > { %v9154_v14 = vld [vmem:[#allocation2 + $0x4] sm:$0xf0]  ;;  %v8477_v16 = vld [vmem:[#allocation2 + $0x8] sm:$0xf0] }
 0x992   : > { %v8476_v31 = vor.u32 %v9154_v14, %v8475_v13  ;;  %v8480_v55 = vor.u32 %v9153_v15, %v8477_v16 }
 0x994   : > { %5384 = vmatpush.bf16.msra.mxu0 %v8476_v31  ;;  %5397 = vmatpush.bf16.msra.mxu1 %v8480_v55 }
 0x997   : > { %8505 = vmatmul.msk.bf16.vlgmr.msra.gmra.mxu0 %vm11327_vm13, %v5313_v24  ;;  %8506 = vmatmul.msk.bf16.vlgmr.msra.gmra.mxu1 %vm11328_vm0, %v5313_v24  ;;  %vm11332_vm13 = vcmp.ge.s32.totalorder %v9580_v23, 2  ;;  %vm11333_vm0 = vcmask 1039360  }
 0x998   : > { %vm11334_vm11 = vmmov %vm11333_vm0 }
 0x9ca   : > { %v5414_v18 = vpop.permute.xlu0 %5413 }
 0x9d2   : > { %v5428_v29 = vpop.permute.xlu0 %5427 }
 0xa14   : > { %v10727_v43 = vpop.f32.mrf.mxu0  ;;  %v10729_v17 = vpop.f32.mrf.mxu1 }
 0xa15   : > { %5443 = vrot.lane.b32.xlu0 %v10727_v43, %s9473_s17  ;;  %5415 = vrot.lane.b32.xlu1 %v10727_v43, %s9479_s14 }
 0xa16   : > { %5417 = vrot.lane.b32.xlu2 %v10729_v17, %s9479_s14 }
 0xa1c   : > { %v5388_v28 = vpop.f32.mrf.mxu0  ;;  %v5401_v5 = vpop.f32.mrf.mxu1 }
 0xa1d   : > { %5457 = vrot.lane.b32.xlu0 %v10727_v43, %s9480_s15  ;;  %5429 = vrot.lane.b32.xlu1 %v10727_v43, %s9475_s19 }
 0xa1e   : > { %5431 = vrot.lane.b32.xlu2 %v10729_v17, %s9475_s19 }
 0xa25   : > { %5445 = vrot.lane.b32.xlu1 %v10729_v17, %s9473_s17  ;;  %5479 = vrot.lane.b32.xlu0 %v10705_v33, %s9481_s23 }
 0xa26   : > { %5461 = vrot.lane.b32.xlu2 %v10506_v61, %s9480_s15 }
 0xa2d   : > { %5459 = vrot.lane.b32.xlu1 %v10729_v17, %s9480_s15  ;;  %5493 = vrot.lane.b32.xlu0 %v10705_v33, %s9478_s22 }
 0xa35   : > { %5513 = vrot.lane.b32.xlu1 %v10506_v61, %s9474_s18 }
 0xa70   : > { %v5418_v22 = vpop.permute.xlu2 %5417 }
 0xa78   : > { %v5432_v51 = vpop.permute.xlu2 %5431 }
 0xa80   : > { %v5462_v6 = vpop.permute.xlu2 %5461 }
 0xa87   : > { %v5416_v21 = vpop.permute.xlu1 %5415  ;;  %v5444_v20 = vpop.permute.xlu0 %5443 }
 0xa88   : > { %v5419_v26 = vsel %vm11329_vm12, %v5414_v18, %v5416_v21  ;;  %v5420_v34 = vsel %vm11330_vm10, %v5416_v21, %v5418_v22  ;;  %vm11335_vm12 = vcmp.lt.s32.totalorder %v9583_v25, 15 }
 0xa89   : > { %v5423_v41 = vsel %vm11331_vm1, %v5419_v26, -inf  ;;  %v5424_v42 = vsel %vm11332_vm13, %v5420_v34, -inf  ;;  %vm11338_vm1 = vcmp.lt.s32.totalorder %v9583_v25, 14  ;;  %vm11339_vm13 = vcmp.lt.s32.totalorder %v9580_v23, 14 }
 0xa8a   : > { %v5425_v59 = vmax.f32 %v10727_v43, %v5423_v41  ;;  %v5426_v35 = vmax.f32 %v10729_v17, %v5424_v42 }
 0xa8f   : > { %v5430_v32 = vpop.permute.xlu1 %5429  ;;  %v5458_v2 = vpop.permute.xlu0 %5457 }
 0xa90   : > { %v5433_v39 = vsel %vm430_vm15, %v5428_v29, %v5430_v32  ;;  %v5434_v40 = vsel %vm430_vm15, %v5430_v32, %v5432_v51 }
 0xa91   : > { %v5437_v45 = vsel %vm350_vm8, %v5433_v39, -inf  ;;  %v5438_v49 = vsel %vm351_vm6, %v5434_v40, -inf }
 0xa92   : > { %v5439_v53 = vmax.f32 %v5425_v59, %v5437_v45  ;;  %v5440_v57 = vmax.f32 %v5426_v35, %v5438_v49 }
 0xa97   : > { %v5446_v36 = vpop.permute.xlu1 %5445  ;;  %v5480_v58 = vpop.permute.xlu0 %5479 }
 0xa98   : > { %v5449_v44 = vsel %vm11333_vm0, %v5444_v20, %v5446_v36  ;;  %v5450_v47 = vsel %vm11334_vm11, %v5446_v36, %v5448_v63  ;;  %vm11336_vm11 = vcmask 1031168   ;;  %vm11340_vm0 = vcmask 130048  }
 0xa99   : > { %v5453_v46 = vsel %vm11335_vm12, %v5449_v44, -inf  ;;  %v5454_v52 = vsel %vm397_vm2, %v5450_v47, -inf  ;;  %vm11337_vm10 = vmmov %vm11336_vm11 }
 0xa9a   : > { %v5455_v30 = vmax.f32 %v5439_v53, %v5453_v46  ;;  %v5456_v50 = vmax.f32 %v5440_v57, %v5454_v52  ;;  %vm11341_vm12 = vmmov %vm11340_vm0 }
 0xa9f   : > { %v5460_v3 = vpop.permute.xlu1 %5459  ;;  %v5494_v7 = vpop.permute.xlu0 %5493 }
 0xaa0   : > { %v5463_v0 = vsel %vm11336_vm11, %v5458_v2, %v5460_v3  ;;  %v5464_v9 = vsel %vm11337_vm10, %v5460_v3, %v5462_v6  ;;  %vm11342_vm11 = vcmp.ge.s32.totalorder %v9569_v10, 16  ;;  %vm11343_vm10 = vcmask 916480  }
 0xaa1   : > { %v5467_v8 = vsel %vm11338_vm1, %v5463_v0, -inf  ;;  %v5468_v60 = vsel %vm11339_vm13, %v5464_v9, -inf  ;;  %vm11344_vm1 = vmmov %vm11343_vm10 }
 0xaa2   : > { %v5469_v54 = vmax.f32 %v5455_v30, %v5467_v8  ;;  %v5470_v1 = vmax.f32 %v5456_v50, %v5468_v60 }
 0xaa4   : > { %5511 = vrot.lane.b32.xlu0 %v5470_v1, %s9474_s18  ;;  %5483 = vrot.lane.b32.xlu2 %v5470_v1, %s9481_s23 }
 0xaa5   : > { %5481 = vrot.lane.b32.xlu1 %v5469_v54, %s9481_s23 }
 0xaa7   : > { %v5514_v4 = vpop.permute.xlu1 %5513 }
 0xaac   : > { %5525 = vrot.lane.b32.xlu0 %v5470_v1, %s9482_s24  ;;  %5497 = vrot.lane.b32.xlu2 %v5470_v1, %s9478_s22 }
 0xaad   : > { %5495 = vrot.lane.b32.xlu1 %v5469_v54, %s9478_s22 }
 0xab4   : > { %5509 = vrot.lane.b32.xlu2 %v5469_v54, %s9474_s18  ;;  %5651 = vrot.lane.b32.xlu0 %v10506_v61, %s9471_s11 }
 0xab5   : > { %5527 = vrot.lane.b32.xlu1 %v10506_v61, %s9482_s24 }
 0xabc   : > { %5523 = vrot.lane.b32.xlu2 %v5469_v54, %s9482_s24 }
 0xabd   : > { %5691 = vrot.lane.b32.xlu1 %v10506_v61, %s9472_s12 }
 0xac5   : > { %5631 = vrot.lane.b32.xlu1 %v10506_v61, %s9473_s17 }
 0xafe   : > { %v5484_v56 = vpop.permute.xlu2 %5483 }
 0xb06   : > { %v5498_v11 = vpop.permute.xlu2 %5497 }
 0xb0e   : > { %v5510_v31 = vpop.permute.xlu2 %5509 }
 0xb16   : > { %v5512_v15 = vpop.permute.xlu0 %5511  ;;  %v5524_v39 = vpop.permute.xlu2 %5523 }
 0xb17   : > { %v5482_v13 = vpop.permute.xlu1 %5481  ;;  %v5516_v29 = vsel %vm11343_vm10, %v5512_v15, %v5514_v4  ;;  %v5515_v51 = vsel %vm11344_vm1, %v5510_v31, %v5512_v15  ;;  %vm11351_vm10 = vcmask 121856  }
 0xb18   : > { %v5485_v14 = vsel %vm5093_vm3, %v5480_v58, %v5482_v13  ;;  %v5486_v55 = vsel %vm5093_vm3, %v5482_v13, %v5484_v56  ;;  %vm11346_vm3 = vcmask 785408   ;;  %vm11352_vm1 = vmmov %vm11351_vm10 }
 0xb19   : > { %v5489_v16 = vsel %vm5082_vm7, %v5485_v14, -inf  ;;  %v5492_v21 = vmax.f32 %v5470_v1, %v5486_v55  ;;  %vm11345_vm7 = vcmp.lt.s32.totalorder %v9572_v12, 240  ;;  %vm11347_vm13 = vmmov %vm11346_vm3 }
 0xb1a   : > { %v5491_v28 = vmax.f32 %v5469_v54, %v5489_v16  ;;  %v5520_v34 = vsel %vm11345_vm7, %v5516_v29, -inf  ;;  %vm11353_vm7 = vcmask 916480  }
 0xb1e   : > { %v5526_v20 = vpop.permute.xlu0 %5525 }
 0xb1f   : > { %v5496_v24 = vpop.permute.xlu1 %5495  ;;  %v5529_v42 = vsel %vm11347_vm13, %v5524_v39, %v5526_v20  ;;  %vm11355_vm13 = vcmp.lt.s32.totalorder %v9572_v12, 240 }
 0xb20   : > { %v5499_v5 = vsel %vm11340_vm0, %v5494_v7, %v5496_v24  ;;  %v5500_v63 = vsel %vm11341_vm12, %v5496_v24, %v5498_v11  ;;  %vm11348_vm0 = vcmp.lt.s32.totalorder %v9572_v12, 224  ;;  %vm11349_vm12 = vcmask 924672  }
 0xb21   : > { %v5503_v18 = vsel %vm11342_vm11, %v5499_v5, -inf  ;;  %v5506_v32 = vmax.f32 %v5492_v21, %v5500_v63  ;;  %vm11350_vm11 = vmmov %vm11349_vm12 }
 0xb22   : > { %v5505_v22 = vmax.f32 %v5491_v28, %v5503_v18 }
 0xb23   : > { %v5522_v40 = vmax.f32 %v5506_v32, %v5520_v34 }
 0xb24   : > { %v5521_v26 = vmax.f32 %v5505_v22, %v5515_v51 }
 0xb26   : > { %v5535_v47 = vmax.f32 %v5521_v26, %v5529_v42  ;;  %v5652_v53 = vpop.permute.xlu0 %5651 }
 0xb27   : > { %v5528_v36 = vpop.permute.xlu1 %5527 }
 0xb28   : > { %v5530_v41 = vsel %vm11346_vm3, %v5526_v20, %v5528_v36  ;;  %v9406_v46 = vpack.i.bf16 %v5535_v47, %v10705_v33  ;;  %vm11354_vm3 = vmmov %vm11353_vm7 }
 0xb29   : > { %v5534_v44 = vsel %vm11348_vm0, %v5530_v41, -inf  ;;  %vm11356_vm0 = vcmask 908288  }
 0xb2a   : > { %v5536_v45 = vmax.f32 %v5522_v40, %v5534_v44 }
 0xb2c   : > { %v5619_v49 = vpack.c.bf16 %v5536_v45, %v5535_v47  ;;  %5609 = vrot.lane.b32.xlu2 %v5536_v45, %s9475_s19  ;;  %5589 = vrot.lane.b32.xlu0 %v5536_v45, %s9476_s20  ;;  %v9381_v59 = vpack.i.bf16 %v10506_v61, %v5536_v45  ;;  %v9391_v35 = vpack.i.bf16 %v5536_v45, %v5535_v47 }
 0xb2e   : > { %5620 = vst [vmem:[#allocation2 + $0x20] sm:$0xff] %v5619_v49  ;;  %9382 = vrot.lane.b32.xlu1 %v9381_v59, %s9474_s18 }
 0xb2f   : > { %v5692_v52 = vpop.permute.xlu1 %5691 }
 0xb34   : > { %9392 = vrot.lane.b32.xlu2 %v9391_v35, %s9471_s11  ;;  %9387 = vrot.lane.b32.xlu0 %v9391_v35, %s9472_s12 }
 0xb36   : > { %9407 = vrot.lane.b32.xlu1 %v9406_v46, %s9475_s19 }
 0xb37   : > { %v5632_v60 = vpop.permute.xlu1 %5631 }
 0xb3c   : > { %5667 = vrot.lane.b32.xlu2 %v5535_v47, %s9474_s18  ;;  %9397 = vrot.lane.b32.xlu0 %v9391_v35, %s9473_s17 }
 0xb3e   : > { %5549 = vrot.lane.b32.xlu1 %v5536_v45, %s9477_s21 }
 0xb44   : > { %9402 = vrot.lane.b32.xlu2 %v9406_v46, %s9476_s20  ;;  %9412 = vrot.lane.b32.xlu0 %v9406_v46, %s9477_s21 }
 0xb4c   : > { %9417 = vrot.lane.b32.xlu2 %v9406_v46, %s9478_s22  ;;  %5569 = vrot.lane.b32.xlu0 %v5536_v45, %s9478_s22 }
 0xb86   : > { %v5610_v61 = vpop.permute.xlu2 %5609 }
 0xb8e   : > { %v9393_v6 = vpop.permute.xlu2 %9392 }
 0xb8f   : > { %v9395_v57 = vunpack.i.h.bf16 %v9393_v6  ;;  %v9394_v2 = vunpack.i.l.bf16 %v9393_v6  ;;  %v10856_v6 = vld [vmem:[#allocation4 + $0x70] sm:$0xff] }
 0xb90   : > { %5949 = vrot.lane.b32.xlu2 %v10856_v6, %s9472_s12  ;;  %5909 = vrot.lane.b32.xlu1 %v10856_v6, %s9471_s11 }
 0xb91   : > { %v5653_v3 = vsel %vm11349_vm12, %v9394_v2, %v9395_v57  ;;  %v5654_v30 = vsel %vm11350_vm11, %v9395_v57, %v5652_v53  ;;  %vm11357_vm12 = vmmov %vm11356_vm0  ;;  %vm11358_vm11 = vcmp.lt.s32.totalorder %v9583_v25, 15 }
 0xb92   : > { %v5657_v50 = vsel %vm350_vm8, %v5653_v3, 0.0  ;;  %v5658_v0 = vsel %vm9607_vm9, %v5654_v30, 0.0 }
 0xb93   : > { %v5659_v9 = vpack.c.bf16 %v5658_v0, %v5657_v50 }
 0xb95   : > { %5660 = vst [vmem:[#allocation2 + $0x30] sm:$0xff] %v5659_v9 }
 0xb96   : > { %v5668_v8 = vpop.permute.xlu2 %5667 }
 0xb98   : > { %5889 = vrot.lane.b32.xlu2 %v10856_v6, %s9473_s17 }
 0xb9e   : > { %v9403_v54 = vpop.permute.xlu2 %9402  ;;  %v5590_v1 = vpop.permute.xlu0 %5589 }
 0xb9f   : > { %v9405_v58 = vunpack.i.h.bf16 %v9403_v54  ;;  %v9404_v56 = vunpack.i.l.bf16 %v9403_v54  ;;  %v9167_v54 = vld [vmem:[#allocation2 + $0x34] sm:$0xf] }
 0xba0   : > { %v9383_v4 = vpop.permute.xlu1 %9382 }
 0xba1   : > { %v5591_v7 = vsel %vm11351_vm10, %v9404_v56, %v9405_v58  ;;  %v5592_v11 = vsel %vm11352_vm1, %v9405_v58, %v5590_v1  ;;  %v9385_v13 = vunpack.i.h.bf16 %v9383_v4  ;;  %v9384_v14 = vunpack.i.l.bf16 %v9383_v4 }
 0xba2   : > { %v5595_v15 = vsel %vm9634_vm14, %v5591_v7, 0.0  ;;  %v5596_v16 = vsel %vm397_vm2, %v5592_v11, 0.0  ;;  %vm11359_vm10 = vcmask 1039360  }
 0xba3   : > { %v5597_v31 = vpack.c.bf16 %v5596_v16, %v5595_v15  ;;  %v5673_v55 = vsel %vm11353_vm7, %v5668_v8, %v9384_v14  ;;  %v5674_v24 = vsel %vm11354_vm3, %v9384_v14, %v9385_v13  ;;  %vm11360_vm1 = vmmov %vm11359_vm10  ;;  %vm11361_vm7 = vcmask 1043456   ;;  %v8533_v8 = vld [vmem:[#allocation2 + $0x30] sm:$0xf] }
 0xba4   : > { %v5678_v28 = vsel %vm11355_vm13, %v5674_v24, 0.0  ;;  %vm11362_vm3 = vmmov %vm11361_vm7 }
 0xba5   : > { %5598 = vst [vmem:[#allocation2 + $0x10] sm:$0xff] %v5597_v31  ;;  %v5679_v5 = vpack.c.bf16 %v5678_v28, %v5673_v55  ;;  %vm11363_vm13 = vmmov %vm11358_vm11  ;;  %v8525_v28 = vld [vmem:[#allocation2 + $0x20] sm:$0xf] }
 0xba6   : > { %v9388_v63 = vpop.permute.xlu0 %9387 }
 0xba7   : > { %5680 = vst [vmem:[#allocation2 + $0x38] sm:$0xff] %v5679_v5  ;;  %v9390_v18 = vunpack.i.h.bf16 %v9388_v63  ;;  %v9389_v21 = vunpack.i.l.bf16 %v9388_v63 }
 0xba8   : > { %v9408_v22 = vpop.permute.xlu1 %9407 }
 0xba9   : > { %v5693_v29 = vsel %vm11356_vm0, %v9389_v21, %v9390_v18  ;;  %v5694_v32 = vsel %vm11357_vm12, %v9390_v18, %v5692_v52  ;;  %v9410_v51 = vunpack.i.h.bf16 %v9408_v22  ;;  %v9409_v20 = vunpack.i.l.bf16 %v9408_v22  ;;  %v9165_v18 = vld [vmem:[#allocation2 + $0x24] sm:$0xf] }
 0xbaa   : > { %v5697_v26 = vsel %vm11358_vm11, %v5693_v29, 0.0  ;;  %v5698_v34 = vsel %vm9591_vm5, %v5694_v32, 0.0  ;;  %vm11364_vm0 = vcmask 138240   ;;  %vm11366_vm11 = vcmask 130048  }
 0xbab   : > { %v5699_v36 = vpack.c.bf16 %v5698_v34, %v5697_v26  ;;  %v5612_v39 = vsel %vm430_vm15, %v9410_v51, %v5610_v61  ;;  %v5611_v40 = vsel %vm430_vm15, %v9409_v20, %v9410_v51  ;;  %vm11365_vm12 = vmmov %vm11364_vm0 }
 0xbac   : > { %v5616_v41 = vsel %vm351_vm6, %v5612_v39, 0.0  ;;  %v5615_v42 = vsel %vm350_vm8, %v5611_v40, 0.0  ;;  %v8517_v39 = vld [vmem:[#allocation2 + $0x10] sm:$0xf]  ;;  %v9163_v40 = vld [vmem:[#allocation2 + $0x14] sm:$0xf] }
 0xbad   : > { %v5617_v44 = vpack.c.bf16 %v5616_v41, %v5615_v42  ;;  %v5736_v47 = vunpack.c.l.b16 %v5699_v36  ;;  %v5737_v45 = vunpack.c.h.b16 %v5699_v36 }
 0xbae   : > { %v9398_v49 = vpop.permute.xlu0 %9397  ;;  %v9168_v3 = vld [vmem:[#allocation2 + $0x34] sm:$0xf0]  ;;  %v8535_v30 = vld [vmem:[#allocation2 + $0x38] sm:$0xf0] }
 0xbaf   : > { %5618 = vst [vmem:[#allocation2 + $0x18] sm:$0xff] %v5617_v44  ;;  %v9400_v59 = vunpack.i.h.bf16 %v9398_v49  ;;  %v9399_v35 = vunpack.i.l.bf16 %v9398_v49  ;;  %v5746_v46 = vpack.c.b16 %v5736_v47, %v5736_v47  ;;  %v5747_v52 = vpack.c.b16 %v5737_v45, %v5737_v45 }
 0xbb0   : > { %v8534_v1 = vor.u32 %v9168_v3, %v8533_v8  ;;  %v8538_v58 = vor.u32 %v9167_v54, %v8535_v30  ;;  %v5550_v14 = vpop.permute.xlu1 %5549 }
 0xbb1   : > { %v5633_v61 = vsel %vm11359_vm10, %v9399_v35, %v9400_v59  ;;  %v5634_v53 = vsel %vm11360_vm1, %v9400_v59, %v5632_v60  ;;  %v5760_v57 = vsel %vm11361_vm7, %v5746_v46, 0  ;;  %v5763_v2 = vsel %vm11362_vm3, %v5747_v52, 0  ;;  %v9418_v60 = vpop.permute.xlu2 %9417  ;;  %vm11368_vm1 = vmmov %vm11366_vm11  ;;  %v5701_v46 = vld [vmem:[%s11179_s6] sm:$0xf] }
 0xbb2   : > { %v5637_v50 = vsel %vm11363_vm13, %v5633_v61, 0.0  ;;  %v5638_v0 = vsel %vm397_vm2, %v5634_v53, 0.0  ;;  %5768 = vmatpush.bf16.msra.mxu2 %v5760_v57  ;;  %5781 = vmatpush.bf16.msra.mxu3 %v5763_v2  ;;  %v9420_v11 = vunpack.i.h.bf16 %v9418_v60  ;;  %v9419_v13 = vunpack.i.l.bf16 %v9418_v60 }
 0xbb3   : > { %v5639_v9 = vpack.c.bf16 %v5638_v0, %v5637_v50  ;;  %vm11367_vm10 = vcmp.ge.s32.totalorder %v9569_v10, 16  ;;  %vm11369_vm7 = vcmask 588800   ;;  %v5403_v52 = vadd.f32 %v10727_v43, %v10558_v38 }
 0xbb4   : > { %v5571_v5 = vsel %vm11366_vm11, %v9419_v13, %v9420_v11  ;;  %vm11370_vm3 = vmmov %vm11369_vm7  ;;  %v5404_v61 = vadd.f32 %v10729_v17, %v10560_v19  ;;  %vm11371_vm13 = vcmask 908288   ;;  %vm11374_vm11 = vcmask 924672  }
 0xbb5   : > { %5640 = vst [vmem:[#allocation2 + $0x28] sm:$0xff] %v5639_v9  ;;  %v5575_v26 = vsel %vm11367_vm10, %v5571_v5, 0.0  ;;  %vm11375_vm10 = vmmov %vm11374_vm11 }
 0xbb6   : > { %v9413_v56 = vpop.permute.xlu0 %9412  ;;  %5769 = vmatpush.bf16.msra.mxu2 %v8534_v1  ;;  %5782 = vmatpush.bf16.msra.mxu3 %v8538_v58  ;;  %v9164_v51 = vld [vmem:[#allocation2 + $0x14] sm:$0xf0]  ;;  %v8519_v20 = vld [vmem:[#allocation2 + $0x18] sm:$0xf0] }
 0xbb7   : > { %v9415_v4 = vunpack.i.h.bf16 %v9413_v56  ;;  %v9414_v7 = vunpack.i.l.bf16 %v9413_v56  ;;  %v8518_v41 = vor.u32 %v9164_v51, %v8517_v39  ;;  %v8522_v42 = vor.u32 %v9163_v40, %v8519_v20 }
 0xbb9   : > { %v5551_v15 = vsel %vm11364_vm0, %v9414_v7, %v9415_v4  ;;  %v5552_v16 = vsel %vm11365_vm12, %v9415_v4, %v5550_v14  ;;  %vm11372_vm0 = vmmov %vm11371_vm13  ;;  %vm11373_vm12 = vcmp.lt.s32.totalorder %v9583_v25, 15 }
 0xbba   : > { %v5555_v31 = vsel %vm9658_vm4, %v5551_v15, 0.0  ;;  %v5556_v55 = vsel %vm351_vm6, %v5552_v16, 0.0 }
 0xbbb   : > { %v5557_v24 = vpack.c.bf16 %v5556_v55, %v5555_v31 }
 0xbbc   : > { %v9166_v63 = vld [vmem:[#allocation2 + $0x24] sm:$0xf0]  ;;  %v8527_v21 = vld [vmem:[#allocation2 + $0x28] sm:$0xf0] }
 0xbbd   : > { %5558 = vst [vmem:[#allocation2] sm:$0xff] %v5557_v24  ;;  %v8526_v22 = vor.u32 %v9166_v63, %v8525_v28  ;;  %v8530_v29 = vor.u32 %v9165_v18, %v8527_v21 }
 0xbbe   : > { %v5570_v32 = vpop.permute.xlu0 %5569 }
 0xbbf   : > { %v5572_v34 = vsel %vm11368_vm1, %v9420_v11, %v5570_v32  ;;  %5770 = vmatpush.bf16.msra.mxu2 %v8526_v22  ;;  %5783 = vmatpush.bf16.msra.mxu3 %v8530_v29  ;;  %vm11376_vm1 = vcmask 916480  }
 0xbc0   : > { %v5577_v36 = vpack.c.bf16 %v5572_v34, %v5575_v26 }
 0xbc2   : > { %5578 = vst [vmem:[#allocation2 + $0x8] sm:$0xff] %v5577_v36 }
 0xbc3   : > { %5771 = vmatpush.bf16.msra.mxu2 %v8518_v41  ;;  %5784 = vmatpush.bf16.msra.mxu3 %v8522_v42 }
 0xbc4   : > { %v8509_v44 = vld [vmem:[#allocation2] sm:$0xf]  ;;  %v9161_v45 = vld [vmem:[#allocation2 + $0x4] sm:$0xf] }
 0xbc9   : > { %v9162_v47 = vld [vmem:[#allocation2 + $0x4] sm:$0xf0]  ;;  %v8511_v49 = vld [vmem:[#allocation2 + $0x8] sm:$0xf0] }
 0xbca   : > { %v8510_v59 = vor.u32 %v9162_v47, %v8509_v44  ;;  %v8514_v35 = vor.u32 %v9161_v45, %v8511_v49 }
 0xbcc   : > { %5772 = vmatpush.bf16.msra.mxu2 %v8510_v59  ;;  %5785 = vmatpush.bf16.msra.mxu3 %v8514_v35 }
 0xbcf   : > { %8539 = vmatmul.msk.bf16.vlgmr.msra.gmra.mxu2 %vm11369_vm7, %v5701_v46  ;;  %8540 = vmatmul.msk.bf16.vlgmr.msra.gmra.mxu3 %vm11370_vm3, %v5701_v46  ;;  %vm11377_vm7 = vcmp.lt.s32.totalorder %v9572_v12, 240  ;;  %vm11378_vm3 = vmmov %vm11376_vm1 }
 0xc52   : > { %v5774_v53 = vpop.f32.mrf.mxu2  ;;  %v5787_v57 = vpop.f32.mrf.mxu3 }
 0xc53   : > { %v10891_v2 = vadd.f32 %v5774_v53, %v5403_v52  ;;  %v10893_v3 = vadd.f32 %v5787_v57, %v5404_v61 }
 0xc55   : > { %v5793_v30 = vmax.f32 %v10891_v2, 0.0  ;;  %v5794_v50 = vmax.f32 %v10893_v3, 0.0 }
 0xc57   : > { %v5877_v0 = vpack.c.bf16 %v5794_v50, %v5793_v30  ;;  %v9431_v9 = vpack.i.bf16 %v10856_v6, %v5794_v50  ;;  %v9421_v8 = vpack.i.bf16 %v5794_v50, %v5793_v30  ;;  %v9446_v43 = vpack.i.bf16 %v5793_v30, %v10705_v33  ;;  %v5950_v33 = vpop.permute.xlu2 %5949  ;;  %v5910_v6 = vpop.permute.xlu1 %5909 }
 0xc59   : > { %5878 = vst [vmem:[#allocation2 + $0x20] sm:$0xff] %v5877_v0  ;;  %9432 = vrot.lane.b32.xlu2 %v9431_v9, %s9474_s18  ;;  %9422 = vrot.lane.b32.xlu1 %v9421_v8, %s9472_s12 }
 0xc5a   : > { %v5776_v38 = vpop.f32.mrf.mxu2  ;;  %v5789_v19 = vpop.f32.mrf.mxu3  ;;  %9427 = vrot.lane.b32.xlu0 %v9421_v8, %s9471_s11 }
 0xc5f   : > { %v5890_v17 = vpop.permute.xlu2 %5889 }
 0xc61   : > { %9437 = vrot.lane.b32.xlu1 %v9421_v8, %s9473_s17  ;;  %9447 = vrot.lane.b32.xlu2 %v9446_v43, %s9475_s19 }
 0xc62   : > { %5925 = vrot.lane.b32.xlu0 %v5793_v30, %s9474_s18 }
 0xc69   : > { %5847 = vrot.lane.b32.xlu1 %v5794_v50, %s9476_s20  ;;  %5807 = vrot.lane.b32.xlu2 %v5794_v50, %s9477_s21 }
 0xc6a   : > { %9442 = vrot.lane.b32.xlu0 %v9446_v43, %s9476_s20 }
 0xc71   : > { %9452 = vrot.lane.b32.xlu1 %v9446_v43, %s9477_s21 }
 0xc72   : > { %5867 = vrot.lane.b32.xlu0 %v5794_v50, %s9475_s19 }
 0xc79   : > { %5827 = vrot.lane.b32.xlu1 %v5794_v50, %s9478_s22 }
 0xc7a   : > { %9457 = vrot.lane.b32.xlu0 %v9446_v43, %s9478_s22 }
 0xcb3   : > { %v9433_v54 = vpop.permute.xlu2 %9432 }
 0xcb4   : > { %v9435_v11 = vunpack.i.h.bf16 %v9433_v54  ;;  %v9434_v13 = vunpack.i.l.bf16 %v9433_v54  ;;  %v9181_v54 = vld [vmem:[#allocation2 + $0x24] sm:$0xf] }
 0xcb6   : > { %v5932_v21 = vsel %vm11376_vm1, %v9434_v13, %v9435_v11  ;;  %vm11384_vm1 = vcmask 121856  }
 0xcb7   : > { %v5936_v39 = vsel %vm11377_vm7, %v5932_v21, 0.0  ;;  %vm11385_vm7 = vmmov %vm11384_vm1 }
 0xcbb   : > { %v9448_v46 = vpop.permute.xlu2 %9447 }
 0xcbc   : > { %v9450_v9 = vunpack.i.h.bf16 %v9448_v46  ;;  %v9449_v8 = vunpack.i.l.bf16 %v9448_v46 }
 0xccb   : > { %v9423_v1 = vpop.permute.xlu1 %9422 }
 0xccc   : > { %v9425_v58 = vunpack.i.h.bf16 %v9423_v1  ;;  %v9424_v60 = vunpack.i.l.bf16 %v9423_v1  ;;  %v9428_v56 = vpop.permute.xlu0 %9427 }
 0xccd   : > { %v9430_v4 = vunpack.i.h.bf16 %v9428_v56  ;;  %v9429_v7 = vunpack.i.l.bf16 %v9428_v56 }
 0xcce   : > { %v5952_v14 = vsel %vm11371_vm13, %v9425_v58, %v5950_v33  ;;  %v5951_v15 = vsel %vm11372_vm0, %v9424_v60, %v9425_v58  ;;  %vm11379_vm13 = vcmask 1039360  }
 0xccf   : > { %v5956_v16 = vsel %vm9591_vm5, %v5952_v14, 0.0  ;;  %v5955_v31 = vsel %vm11373_vm12, %v5951_v15, 0.0  ;;  %v5912_v55 = vsel %vm11374_vm11, %v9430_v4, %v5910_v6  ;;  %v5911_v24 = vsel %vm11375_vm10, %v9429_v7, %v9430_v4  ;;  %vm11380_vm0 = vmmov %vm11379_vm13  ;;  %v8591_v6 = vld [vmem:[#allocation2 + $0x20] sm:$0xf] }
 0xcd0   : > { %v5957_v28 = vpack.c.bf16 %v5956_v16, %v5955_v31  ;;  %v5916_v5 = vsel %vm9607_vm9, %v5912_v55, 0.0  ;;  %v5915_v63 = vsel %vm350_vm8, %v5911_v24, 0.0  ;;  %vm11381_vm12 = vcmask 1043456  }
 0xcd1   : > { %v5917_v18 = vpack.c.bf16 %v5916_v5, %v5915_v63  ;;  %vm11382_vm11 = vcmp.lt.s32.totalorder %v9583_v25, 15  ;;  %vm11383_vm10 = vmmov %vm11381_vm12  ;;  %v9197_v5 = vld [vmem:[#allocation2 + $0x24] sm:$0xf] }
 0xcd2   : > { %v6049_v22 = vunpack.c.l.b16 %v5957_v28  ;;  %v6050_v29 = vunpack.c.h.b16 %v5957_v28  ;;  %v8671_v28 = vld [vmem:[#allocation2 + $0x20] sm:$0xf] }
 0xcd3   : > { %5918 = vst [vmem:[#allocation2 + $0x30] sm:$0xff] %v5917_v18  ;;  %v9438_v32 = vpop.permute.xlu1 %9437  ;;  %v5869_v18 = vsel %vm430_vm15, %v9449_v8, %v9450_v9 }
 0xcd4   : > { %v5926_v51 = vpop.permute.xlu0 %5925  ;;  %v9440_v20 = vunpack.i.h.bf16 %v9438_v32  ;;  %v9439_v26 = vunpack.i.l.bf16 %v9438_v32  ;;  %v6059_v34 = vpack.c.b16 %v6049_v22, %v6049_v22  ;;  %v6060_v36 = vpack.c.b16 %v6050_v29, %v6050_v29 }
 0xcd5   : > { %v5931_v40 = vsel %vm11378_vm3, %v5926_v51, %v9434_v13  ;;  %vm11386_vm3 = vcmask 138240  }
 0xcd6   : > { %v5937_v41 = vpack.c.bf16 %v5936_v39, %v5931_v40  ;;  %v5892_v42 = vsel %vm11379_vm13, %v9440_v20, %v5890_v17  ;;  %v5891_v44 = vsel %vm11380_vm0, %v9439_v26, %v9440_v20  ;;  %v6094_v47 = vsel %vm11381_vm12, %v6059_v34, 0  ;;  %v5808_v26 = vpop.permute.xlu2 %5807  ;;  %vm11387_vm13 = vmmov %vm11386_vm3 }
 0xcd7   : > { %v5896_v45 = vsel %vm397_vm2, %v5892_v42, 0.0  ;;  %v5895_v49 = vsel %vm11382_vm11, %v5891_v44, 0.0  ;;  %6102 = vmatpush.bf16.msrb.mxu0 %v6094_v47  ;;  %v6097_v59 = vsel %vm11383_vm10, %v6060_v36, 0  ;;  %6404 = vmatpush.bf16.msrb.mxu2 %v6094_v47  ;;  %v5873_v36 = vsel %vm350_vm8, %v5869_v18, 0.0  ;;  %v9187_v18 = vld [vmem:[%s11180_s7 + $0x50] sm:$0xff] }
 0xcd8   : > { %5938 = vst [vmem:[#allocation2 + $0x38] sm:$0xff] %v5937_v41  ;;  %v5897_v35 = vpack.c.bf16 %v5896_v45, %v5895_v49  ;;  %6151 = vmatpush.bf16.msrb.mxu1 %v6097_v59  ;;  %6453 = vmatpush.bf16.msrb.mxu3 %v6097_v59  ;;  %vm11388_vm0 = vcmask 130048   ;;  %vm11390_vm11 = vcmp.ge.s32.totalorder %v9569_v10, 16  ;;  %vm11391_vm10 = vcmask 588800  }
 0xcd9   : > { %vm11389_vm12 = vmmov %vm11388_vm0 }
 0xcda   : > { %5898 = vst [vmem:[#allocation2 + $0x28] sm:$0xff] %v5897_v35  ;;  %v8599_v30 = vld [vmem:[#allocation2 + $0x30] sm:$0xf]  ;;  %v9183_v50 = vld [vmem:[#allocation2 + $0x34] sm:$0xf] }
 0xcdb   : > { %v5848_v52 = vpop.permute.xlu1 %5847  ;;  %v8679_v0 = vld [vmem:[#allocation2 + $0x30] sm:$0xf]  ;;  %v9199_v4 = vld [vmem:[#allocation2 + $0x34] sm:$0xf] }
 0xcdc   : > { %v9443_v61 = vpop.permute.xlu0 %9442 }
 0xcdd   : > { %v9445_v53 = vunpack.i.h.bf16 %v9443_v61  ;;  %v9444_v57 = vunpack.i.l.bf16 %v9443_v61 }
 0xcdf   : > { %v5850_v38 = vsel %vm11384_vm1, %v9445_v53, %v5848_v52  ;;  %v5849_v19 = vsel %vm11385_vm7, %v9444_v57, %v9445_v53  ;;  %v9184_v43 = vld [vmem:[#allocation2 + $0x34] sm:$0xf0]  ;;  %v8601_v33 = vld [vmem:[#allocation2 + $0x38] sm:$0xf0]  ;;  %vm11392_vm1 = vmmov %vm11391_vm10 }
 0xce0   : > { %v9200_v17 = vld [vmem:[#allocation2 + $0x34] sm:$0xf0]  ;;  %v5854_v1 = vsel %vm397_vm2, %v5850_v38, 0.0  ;;  %v5853_v58 = vsel %vm9634_vm14, %v5849_v19, 0.0  ;;  %v8600_v60 = vor.u32 %v9184_v43, %v8599_v30  ;;  %v8604_v56 = vor.u32 %v9183_v50, %v8601_v33  ;;  %v8681_v7 = vld [vmem:[#allocation2 + $0x38] sm:$0xf0]  ;;  %vm11393_vm7 = vmmov %vm11392_vm1 }
 0xce1   : > { %v5855_v11 = vpack.c.bf16 %v5854_v1, %v5853_v58  ;;  %v8680_v13 = vor.u32 %v9200_v17, %v8679_v0  ;;  %v8684_v14 = vor.u32 %v9199_v4, %v8681_v7  ;;  %v9182_v15 = vld [vmem:[#allocation2 + $0x24] sm:$0xf0]  ;;  %v8593_v16 = vld [vmem:[#allocation2 + $0x28] sm:$0xf0] }
 0xce2   : > { %v9198_v31 = vld [vmem:[#allocation2 + $0x24] sm:$0xf0]  ;;  %6103 = vmatpush.bf16.msrb.mxu0 %v8600_v60  ;;  %6152 = vmatpush.bf16.msrb.mxu1 %v8604_v56  ;;  %v8592_v55 = vor.u32 %v9182_v15, %v8591_v6  ;;  %v8596_v24 = vor.u32 %v9181_v54, %v8593_v16  ;;  %v8673_v63 = vld [vmem:[#allocation2 + $0x28] sm:$0xf0] }
 0xce3   : > { %5856 = vst [vmem:[#allocation2 + $0x10] sm:$0xff] %v5855_v11  ;;  %6405 = vmatpush.bf16.msrb.mxu2 %v8680_v13  ;;  %6454 = vmatpush.bf16.msrb.mxu3 %v8684_v14  ;;  %v9453_v21 = vpop.permute.xlu1 %9452  ;;  %v8672_v22 = vor.u32 %v9198_v31, %v8671_v28  ;;  %v8676_v29 = vor.u32 %v9197_v5, %v8673_v63  ;;  %v9170_v28 = vld [vmem:[%s11180_s7 + $0x8] sm:$0xff]  ;;  %v9171_v63 = vld [vmem:[%s11180_s7 + $0x10] sm:$0xff] }
 0xce4   : > { %v5868_v32 = vpop.permute.xlu0 %5867  ;;  %v9455_v51 = vunpack.i.h.bf16 %v9453_v21  ;;  %v9454_v20 = vunpack.i.l.bf16 %v9453_v21  ;;  %v9186_v5 = vld [vmem:[%s11180_s7 + $0x48] sm:$0xff]  ;;  %v9172_v21 = vld [vmem:[%s11180_s7 + $0x18] sm:$0xff] }
 0xce5   : > { %v5870_v34 = vsel %vm430_vm15, %v9450_v9, %v5868_v32  ;;  %v9189_v32 = vld [vmem:[%s11180_s7 + $0x60] sm:$0xff] }
 0xce6   : > { %v5874_v39 = vsel %vm351_vm6, %v5870_v34, 0.0  ;;  %v5810_v40 = vsel %vm11386_vm3, %v9455_v51, %v5808_v26  ;;  %v5809_v41 = vsel %vm11387_vm13, %v9454_v20, %v9455_v51  ;;  %6104 = vmatpush.bf16.msrb.mxu0 %v8592_v55  ;;  %6153 = vmatpush.bf16.msrb.mxu1 %v8596_v24  ;;  %v9169_v55 = vld [vmem:[%s11180_s7] sm:$0xff]  ;;  %vm11394_vm3 = vmmov %vm11392_vm1  ;;  %v9174_v51 = vld [vmem:[%s11180_s7 + $0x28] sm:$0xff] }
 0xce7   : > { %v5875_v42 = vpack.c.bf16 %v5874_v39, %v5873_v36  ;;  %v5814_v44 = vsel %vm351_vm6, %v5810_v40, 0.0  ;;  %v5813_v47 = vsel %vm9658_vm4, %v5809_v41, 0.0  ;;  %6406 = vmatpush.bf16.msrb.mxu2 %v8672_v22  ;;  %6455 = vmatpush.bf16.msrb.mxu3 %v8676_v29  ;;  %v9185_v24 = vld [vmem:[%s11180_s7 + $0x40] sm:$0xff]  ;;  %vm11395_vm13 = vmmov %vm11392_vm1  ;;  %v9188_v22 = vld [vmem:[%s11180_s7 + $0x58] sm:$0xff] }
 0xce8   : > { %v5815_v45 = vpack.c.bf16 %v5814_v44, %v5813_v47  ;;  %v9173_v29 = vld [vmem:[%s11180_s7 + $0x20] sm:$0xff]  ;;  %v9190_v20 = vld [vmem:[%s11180_s7 + $0x68] sm:$0xff]  ;;  %v9175_v26 = vld [vmem:[%s11180_s7 + $0x30] sm:$0xff] }
 0xce9   : > { %5876 = vst [vmem:[#allocation2 + $0x18] sm:$0xff] %v5875_v42  ;;  %v9191_v34 = vld [vmem:[%s11180_s7 + $0x70] sm:$0xff]  ;;  %v9176_v36 = vld [vmem:[%s11180_s7 + $0x38] sm:$0xff] }
 0xcea   : > { %5816 = vst [vmem:[#allocation2] sm:$0xff] %v5815_v45  ;;  %v8583_v53 = vld [vmem:[#allocation2 + $0x10] sm:$0xf]  ;;  %v9179_v57 = vld [vmem:[#allocation2 + $0x14] sm:$0xf]  ;;  %v9192_v39 = vld [vmem:[%s11180_s7 + $0x78] sm:$0xff] }
 0xceb   : > { %v5828_v46 = vpop.permute.xlu1 %5827  ;;  %v8663_v30 = vld [vmem:[#allocation2 + $0x10] sm:$0xf]  ;;  %v9195_v33 = vld [vmem:[#allocation2 + $0x14] sm:$0xf] }
 0xcec   : > { %v9458_v49 = vpop.permute.xlu0 %9457 }
 0xced   : > { %v9460_v59 = vunpack.i.h.bf16 %v9458_v49  ;;  %v9459_v35 = vunpack.i.l.bf16 %v9458_v49 }
 0xcef   : > { %v5829_v52 = vsel %vm11388_vm0, %v9459_v35, %v9460_v59  ;;  %v5830_v61 = vsel %vm11389_vm12, %v9460_v59, %v5828_v46  ;;  %vm11396_vm0 = vmmov %vm11392_vm1 }
 0xcf0   : > { %v5833_v50 = vsel %vm11390_vm11, %v5829_v52, 0.0  ;;  %v9180_v0 = vld [vmem:[#allocation2 + $0x14] sm:$0xf0]  ;;  %v8585_v9 = vld [vmem:[#allocation2 + $0x18] sm:$0xf0]  ;;  %vm11397_vm12 = vmmov %vm11396_vm0 }
 0xcf1   : > { %v5835_v8 = vpack.c.bf16 %v5830_v61, %v5833_v50  ;;  %v8584_v38 = vor.u32 %v9180_v0, %v8583_v53  ;;  %v8588_v19 = vor.u32 %v9179_v57, %v8585_v9  ;;  %v9196_v43 = vld [vmem:[#allocation2 + $0x14] sm:$0xf0]  ;;  %v8665_v17 = vld [vmem:[#allocation2 + $0x18] sm:$0xf0]  ;;  %v8575_v1 = vld [vmem:[#allocation2] sm:$0xf] }
 0xcf2   : > { %v8664_v6 = vor.u32 %v9196_v43, %v8663_v30  ;;  %v8668_v54 = vor.u32 %v9195_v33, %v8665_v17  ;;  %v9177_v58 = vld [vmem:[#allocation2 + $0x4] sm:$0xf]  ;;  %v8655_v60 = vld [vmem:[#allocation2] sm:$0xf]  ;;  %vm11398_vm11 = vmmov %vm11396_vm0 }
 0xcf3   : > { %5836 = vst [vmem:[#allocation2 + $0x8] sm:$0xff] %v5835_v8  ;;  %6105 = vmatpush.bf16.msrb.mxu0 %v8584_v38  ;;  %6154 = vmatpush.bf16.msrb.mxu1 %v8588_v19  ;;  %v9193_v15 = vld [vmem:[#allocation2 + $0x4] sm:$0xf] }
 0xcf4   : > { %6407 = vmatpush.bf16.msrb.mxu2 %v8664_v6  ;;  %6456 = vmatpush.bf16.msrb.mxu3 %v8668_v54 }
 0xcfa   : > { %v9178_v56 = vld [vmem:[#allocation2 + $0x4] sm:$0xf0]  ;;  %v8577_v4 = vld [vmem:[#allocation2 + $0x8] sm:$0xf0] }
 0xcfb   : > { %v9194_v7 = vld [vmem:[#allocation2 + $0x4] sm:$0xf0]  ;;  %v8576_v11 = vor.u32 %v9178_v56, %v8575_v1  ;;  %v8580_v13 = vor.u32 %v9177_v58, %v8577_v4  ;;  %v8657_v16 = vld [vmem:[#allocation2 + $0x8] sm:$0xf0] }
 0xcfc   : > { %v8656_v14 = vor.u32 %v9194_v7, %v8655_v60  ;;  %v8660_v31 = vor.u32 %v9193_v15, %v8657_v16 }
 0xcfd   : > { %6106 = vmatpush.bf16.msrb.mxu0 %v8576_v11  ;;  %6155 = vmatpush.bf16.msrb.mxu1 %v8580_v13 }
 0xcfe   : > { %6408 = vmatpush.bf16.msrb.mxu2 %v8656_v14  ;;  %6457 = vmatpush.bf16.msrb.mxu3 %v8660_v31 }
 0xd00   : > { %8605 = vmatmul.msk.bf16.vlgmr.msrb.gmra.mxu0 %vm11391_vm10, %v9169_v55  ;;  %8613 = vmatmul.msk.bf16.vlgmr.msrb.gmra.mxu1 %vm11392_vm1, %v9169_v55  ;;  %vm11399_vm10 = vmmov %vm11396_vm0 }
 0xd01   : > { %8685 = vmatmul.msk.bf16.vlgmr.msrb.gmra.mxu2 %vm11393_vm7, %v9185_v24  ;;  %8693 = vmatmul.msk.bf16.vlgmr.msrb.gmra.mxu3 %vm11394_vm3, %v9185_v24  ;;  %vm11400_vm1 = vmmov %vm11396_vm0 }
 0xd02   : > { %vm11401_vm7 = vmmov %vm11396_vm0 }
 0xd03   : > { %vm11402_vm3 = vmmov %vm11396_vm0 }
 0xd10   : > { %8606 = vmatmul.msk.bf16.gmra.mxu0 %vm11395_vm13, %v9170_v28  ;;  %8614 = vmatmul.msk.bf16.gmra.mxu1 %vm11396_vm0, %v9170_v28  ;;  %vm11403_vm13 = vmmov %vm11396_vm0 }
 0xd11   : > { %8686 = vmatmul.msk.bf16.gmra.mxu2 %vm11397_vm12, %v9186_v5  ;;  %8694 = vmatmul.msk.bf16.gmra.mxu3 %vm11398_vm11, %v9186_v5  ;;  %vm11404_vm12 = vmmov %vm11396_vm0 }
 0xd12   : > { %vm11405_vm11 = vmmov %vm11396_vm0 }
 0xd20   : > { %8607 = vmatmul.msk.bf16.gmra.mxu0 %vm11399_vm10, %v9171_v63  ;;  %8615 = vmatmul.msk.bf16.gmra.mxu1 %vm11400_vm1, %v9171_v63  ;;  %vm11406_vm10 = vmmov %vm11396_vm0 }
 0xd21   : > { %8687 = vmatmul.msk.bf16.gmra.mxu2 %vm11401_vm7, %v9187_v18  ;;  %8695 = vmatmul.msk.bf16.gmra.mxu3 %vm11402_vm3, %v9187_v18  ;;  %vm11407_vm1 = vmmov %vm11396_vm0 }
 0xd22   : > { %vm11408_vm7 = vmmov %vm11396_vm0 }
 0xd23   : > { %vm11409_vm3 = vmmov %vm11396_vm0 }
 0xd30   : > { %8608 = vmatmul.msk.bf16.gmra.mxu0 %vm11403_vm13, %v9172_v21  ;;  %8616 = vmatmul.msk.bf16.gmra.mxu1 %vm11396_vm0, %v9172_v21  ;;  %vm11410_vm13 = vmmov %vm11396_vm0 }
 0xd31   : > { %8688 = vmatmul.msk.bf16.gmra.mxu2 %vm11404_vm12, %v9188_v22  ;;  %8696 = vmatmul.msk.bf16.gmra.mxu3 %vm11405_vm11, %v9188_v22  ;;  %vm11411_vm12 = vmmov %vm11396_vm0 }
 0xd32   : > { %vm11412_vm11 = vmmov %vm11396_vm0 }
 0xd40   : > { %8609 = vmatmul.msk.bf16.gmra.mxu0 %vm11406_vm10, %v9173_v29  ;;  %8617 = vmatmul.msk.bf16.gmra.mxu1 %vm11407_vm1, %v9173_v29  ;;  %vm11413_vm10 = vmmov %vm11396_vm0 }
 0xd41   : > { %8689 = vmatmul.msk.bf16.gmra.mxu2 %vm11408_vm7, %v9189_v32  ;;  %8697 = vmatmul.msk.bf16.gmra.mxu3 %vm11409_vm3, %v9189_v32  ;;  %vm11414_vm1 = vmmov %vm11396_vm0 }
 0xd42   : > { %vm11415_vm7 = vmmov %vm11396_vm0 }
 0xd43   : > { %vm11416_vm3 = vmmov %vm11396_vm0 }
 0xd50   : > { %8610 = vmatmul.msk.bf16.gmra.mxu0 %vm11410_vm13, %v9174_v51  ;;  %8618 = vmatmul.msk.bf16.gmra.mxu1 %vm11396_vm0, %v9174_v51  ;;  %vm11417_vm13 = vmmov %vm11396_vm0 }
 0xd51   : > { %8690 = vmatmul.msk.bf16.gmra.mxu2 %vm11411_vm12, %v9190_v20  ;;  %8698 = vmatmul.msk.bf16.gmra.mxu3 %vm11412_vm11, %v9190_v20  ;;  %vm11418_vm12 = vmmov %vm11396_vm0 }
 0xd52   : > { %vm11419_vm11 = vmmov %vm11396_vm0 }
 0xd60   : > { %8611 = vmatmul.msk.bf16.gmra.mxu0 %vm11413_vm10, %v9175_v26  ;;  %8619 = vmatmul.msk.bf16.gmra.mxu1 %vm11414_vm1, %v9175_v26  ;;  %vm11420_vm10 = vcmask 130048   ;;  %vm11421_vm1 = vcmask 138240  }
 0xd61   : > { %8691 = vmatmul.msk.bf16.gmra.mxu2 %vm11415_vm7, %v9191_v34  ;;  %8699 = vmatmul.msk.bf16.gmra.mxu3 %vm11416_vm3, %v9191_v34  ;;  %vm11422_vm7 = vmmov %vm11421_vm1  ;;  %vm11423_vm3 = vcmask 121856  }
 0xd70   : > { %8612 = vmatmul.msk.bf16.gmra.mxu0 %vm11417_vm13, %v9176_v36  ;;  %8620 = vmatmul.msk.bf16.gmra.mxu1 %vm11396_vm0, %v9176_v36  ;;  %vm11424_vm13 = vmmov %vm11423_vm3  ;;  %vm11425_vm0 = vcmp.ge.s32.totalorder %v9569_v10, 16 }
 0xd71   : > { %8692 = vmatmul.msk.bf16.gmra.mxu2 %vm11418_vm12, %v9192_v39  ;;  %8700 = vmatmul.msk.bf16.gmra.mxu3 %vm11419_vm11, %v9192_v39  ;;  %vm11426_vm12 = vmmov %vm11420_vm10 }
 0xd7d   : > { %v6108_v40 = vpop.f32.mrf.mxu0  ;;  %v6157_v41 = vpop.f32.mrf.mxu1 }
 0xd7e   : > { %v6197_v42 = vmax.f32 %v6108_v40, 0.0  ;;  %v6198_v44 = vmax.f32 %v6157_v41, 0.0 }
 0xd80   : > { %v6229_v47 = vpack.c.bf16 %v6198_v44, %v6197_v42 }
 0xd82   : > { %6245 = vst [vmem:[#allocation3] sm:$0xff] %v6229_v47 }
 0xd84   : > { %v6410_v45 = vpop.f32.mrf.mxu2  ;;  %v6459_v49 = vpop.f32.mrf.mxu3 }
 0xd85   : > { %v6499_v59 = vmax.f32 %v6410_v45, 0.0  ;;  %v6500_v35 = vmax.f32 %v6459_v49, 0.0  ;;  %v6110_v46 = vpop.f32.mrf.mxu0  ;;  %v6159_v52 = vpop.f32.mrf.mxu1 }
 0xd86   : > { %v6199_v61 = vmax.f32 %v6110_v46, 0.0  ;;  %v6200_v53 = vmax.f32 %v6159_v52, 0.0 }
 0xd87   : > { %v6531_v57 = vpack.c.bf16 %v6500_v35, %v6499_v59 }
 0xd88   : > { %v6230_v30 = vpack.c.bf16 %v6200_v53, %v6199_v61 }
 0xd89   : > { %6547 = vst [vmem:[#allocation3 + $0x80] sm:$0xff] %v6531_v57 }
 0xd8a   : > { %6246 = vst [vmem:[#allocation3 + $0x8] sm:$0xff] %v6230_v30 }
 0xd8c   : > { %v6412_v50 = vpop.f32.mrf.mxu2  ;;  %v6461_v0 = vpop.f32.mrf.mxu3 }
 0xd8d   : > { %v6501_v9 = vmax.f32 %v6412_v50, 0.0  ;;  %v6502_v8 = vmax.f32 %v6461_v0, 0.0  ;;  %v6113_v38 = vpop.f32.mrf.mxu0  ;;  %v6162_v19 = vpop.f32.mrf.mxu1 }
 0xd8e   : > { %v6201_v43 = vmax.f32 %v6113_v38, 0.0  ;;  %v6202_v33 = vmax.f32 %v6162_v19, 0.0 }
 0xd8f   : > { %v6532_v17 = vpack.c.bf16 %v6502_v8, %v6501_v9 }
 0xd90   : > { %v6231_v6 = vpack.c.bf16 %v6202_v33, %v6201_v43 }
 0xd91   : > { %6548 = vst [vmem:[#allocation3 + $0x88] sm:$0xff] %v6532_v17 }
 0xd92   : > { %6247 = vst [vmem:[#allocation3 + $0x10] sm:$0xff] %v6231_v6 }
 0xd94   : > { %v6415_v54 = vpop.f32.mrf.mxu2  ;;  %v6464_v1 = vpop.f32.mrf.mxu3 }
 0xd95   : > { %v6503_v58 = vmax.f32 %v6415_v54, 0.0  ;;  %v6504_v60 = vmax.f32 %v6464_v1, 0.0  ;;  %v6115_v56 = vpop.f32.mrf.mxu0  ;;  %v6164_v4 = vpop.f32.mrf.mxu1 }
 0xd96   : > { %v6203_v7 = vmax.f32 %v6115_v56, 0.0  ;;  %v6204_v11 = vmax.f32 %v6164_v4, 0.0 }
 0xd97   : > { %v6533_v13 = vpack.c.bf16 %v6504_v60, %v6503_v58 }
 0xd98   : > { %v6232_v14 = vpack.c.bf16 %v6204_v11, %v6203_v7 }
 0xd99   : > { %6549 = vst [vmem:[#allocation3 + $0x90] sm:$0xff] %v6533_v13 }
 0xd9a   : > { %6248 = vst [vmem:[#allocation3 + $0x18] sm:$0xff] %v6232_v14 }
 0xd9c   : > { %v6417_v15 = vpop.f32.mrf.mxu2  ;;  %v6466_v16 = vpop.f32.mrf.mxu3 }
 0xd9d   : > { %v6505_v31 = vmax.f32 %v6417_v15, 0.0  ;;  %v6506_v55 = vmax.f32 %v6466_v16, 0.0  ;;  %v6118_v24 = vpop.f32.mrf.mxu0  ;;  %v6167_v28 = vpop.f32.mrf.mxu1 }
 0xd9e   : > { %v6205_v5 = vmax.f32 %v6118_v24, 0.0  ;;  %v6206_v63 = vmax.f32 %v6167_v28, 0.0 }
 0xd9f   : > { %v6534_v18 = vpack.c.bf16 %v6506_v55, %v6505_v31 }
 0xda0   : > { %v6233_v21 = vpack.c.bf16 %v6206_v63, %v6205_v5 }
 0xda1   : > { %6550 = vst [vmem:[#allocation3 + $0x98] sm:$0xff] %v6534_v18 }
 0xda2   : > { %6249 = vst [vmem:[#allocation3 + $0x20] sm:$0xff] %v6233_v21 }
 0xda4   : > { %v6420_v22 = vpop.f32.mrf.mxu2  ;;  %v6469_v29 = vpop.f32.mrf.mxu3 }
 0xda5   : > { %v6507_v32 = vmax.f32 %v6420_v22, 0.0  ;;  %v6508_v51 = vmax.f32 %v6469_v29, 0.0  ;;  %v6120_v20 = vpop.f32.mrf.mxu0  ;;  %v6169_v26 = vpop.f32.mrf.mxu1 }
 0xda6   : > { %v6207_v34 = vmax.f32 %v6120_v20, 0.0  ;;  %v6208_v36 = vmax.f32 %v6169_v26, 0.0 }
 0xda7   : > { %v6535_v39 = vpack.c.bf16 %v6508_v51, %v6507_v32 }
 0xda8   : > { %v6234_v40 = vpack.c.bf16 %v6208_v36, %v6207_v34 }
 0xda9   : > { %6551 = vst [vmem:[#allocation3 + $0xa0] sm:$0xff] %v6535_v39 }
 0xdaa   : > { %6250 = vst [vmem:[#allocation3 + $0x28] sm:$0xff] %v6234_v40 }
 0xdac   : > { %v6422_v41 = vpop.f32.mrf.mxu2  ;;  %v6471_v42 = vpop.f32.mrf.mxu3 }
 0xdad   : > { %v6509_v44 = vmax.f32 %v6422_v41, 0.0  ;;  %v6510_v47 = vmax.f32 %v6471_v42, 0.0  ;;  %v6123_v45 = vpop.f32.mrf.mxu0  ;;  %v6172_v49 = vpop.f32.mrf.mxu1 }
 0xdae   : > { %v6209_v59 = vmax.f32 %v6123_v45, 0.0  ;;  %v6210_v35 = vmax.f32 %v6172_v49, 0.0 }
 0xdaf   : > { %v6536_v46 = vpack.c.bf16 %v6510_v47, %v6509_v44 }
 0xdb0   : > { %v6235_v52 = vpack.c.bf16 %v6210_v35, %v6209_v59 }
 0xdb1   : > { %6552 = vst [vmem:[#allocation3 + $0xa8] sm:$0xff] %v6536_v46 }
 0xdb2   : > { %6251 = vst [vmem:[#allocation3 + $0x30] sm:$0xff] %v6235_v52 }
 0xdb4   : > { %v6425_v61 = vpop.f32.mrf.mxu2  ;;  %v6474_v53 = vpop.f32.mrf.mxu3 }
 0xdb5   : > { %v6511_v57 = vmax.f32 %v6425_v61, 0.0  ;;  %v6512_v30 = vmax.f32 %v6474_v53, 0.0  ;;  %v6125_v50 = vpop.f32.mrf.mxu0  ;;  %v6174_v0 = vpop.f32.mrf.mxu1 }
 0xdb6   : > { %v6211_v9 = vmax.f32 %v6125_v50, 0.0  ;;  %v6212_v8 = vmax.f32 %v6174_v0, 0.0 }
 0xdb7   : > { %v6537_v38 = vpack.c.bf16 %v6512_v30, %v6511_v57 }
 0xdb8   : > { %v6236_v19 = vpack.c.bf16 %v6212_v8, %v6211_v9 }
 0xdb9   : > { %6553 = vst [vmem:[#allocation3 + $0xb0] sm:$0xff] %v6537_v38 }
 0xdba   : > { %6252 = vst [vmem:[#allocation3 + $0x38] sm:$0xff] %v6236_v19 }
 0xdbc   : > { %v6427_v43 = vpop.f32.mrf.mxu2  ;;  %v6476_v33 = vpop.f32.mrf.mxu3 }
 0xdbd   : > { %v6513_v17 = vmax.f32 %v6427_v43, 0.0  ;;  %v6514_v6 = vmax.f32 %v6476_v33, 0.0  ;;  %v6128_v54 = vpop.f32.mrf.mxu0  ;;  %v6177_v1 = vpop.f32.mrf.mxu1 }
 0xdbe   : > { %v6213_v58 = vmax.f32 %v6128_v54, 0.0  ;;  %v6214_v60 = vmax.f32 %v6177_v1, 0.0 }
 0xdbf   : > { %v6538_v56 = vpack.c.bf16 %v6514_v6, %v6513_v17 }
 0xdc0   : > { %v6237_v4 = vpack.c.bf16 %v6214_v60, %v6213_v58 }
 0xdc1   : > { %6554 = vst [vmem:[#allocation3 + $0xb8] sm:$0xff] %v6538_v56 }
 0xdc2   : > { %6253 = vst [vmem:[#allocation3 + $0x40] sm:$0xff] %v6237_v4 }
 0xdc4   : > { %v6430_v7 = vpop.f32.mrf.mxu2  ;;  %v6479_v11 = vpop.f32.mrf.mxu3 }
 0xdc5   : > { %v6515_v13 = vmax.f32 %v6430_v7, 0.0  ;;  %v6516_v14 = vmax.f32 %v6479_v11, 0.0  ;;  %v6130_v15 = vpop.f32.mrf.mxu0  ;;  %v6179_v16 = vpop.f32.mrf.mxu1 }
 0xdc6   : > { %v6215_v31 = vmax.f32 %v6130_v15, 0.0  ;;  %v6216_v55 = vmax.f32 %v6179_v16, 0.0 }
 0xdc7   : > { %v6539_v24 = vpack.c.bf16 %v6516_v14, %v6515_v13 }
 0xdc8   : > { %v6238_v28 = vpack.c.bf16 %v6216_v55, %v6215_v31 }
 0xdc9   : > { %6555 = vst [vmem:[#allocation3 + $0xc0] sm:$0xff] %v6539_v24 }
 0xdca   : > { %6254 = vst [vmem:[#allocation3 + $0x48] sm:$0xff] %v6238_v28 }
 0xdcc   : > { %v6432_v5 = vpop.f32.mrf.mxu2  ;;  %v6481_v63 = vpop.f32.mrf.mxu3 }
 0xdcd   : > { %v6517_v18 = vmax.f32 %v6432_v5, 0.0  ;;  %v6518_v21 = vmax.f32 %v6481_v63, 0.0  ;;  %v6133_v22 = vpop.f32.mrf.mxu0  ;;  %v6182_v29 = vpop.f32.mrf.mxu1 }
 0xdce   : > { %v6217_v32 = vmax.f32 %v6133_v22, 0.0  ;;  %v6218_v51 = vmax.f32 %v6182_v29, 0.0 }
 0xdcf   : > { %v6540_v20 = vpack.c.bf16 %v6518_v21, %v6517_v18 }
 0xdd0   : > { %v6239_v26 = vpack.c.bf16 %v6218_v51, %v6217_v32 }
 0xdd1   : > { %6556 = vst [vmem:[#allocation3 + $0xc8] sm:$0xff] %v6540_v20 }
 0xdd2   : > { %6255 = vst [vmem:[#allocation3 + $0x50] sm:$0xff] %v6239_v26 }
 0xdd4   : > { %v6435_v34 = vpop.f32.mrf.mxu2  ;;  %v6484_v36 = vpop.f32.mrf.mxu3 }
 0xdd5   : > { %v6519_v39 = vmax.f32 %v6435_v34, 0.0  ;;  %v6520_v40 = vmax.f32 %v6484_v36, 0.0  ;;  %v6135_v41 = vpop.f32.mrf.mxu0  ;;  %v6184_v42 = vpop.f32.mrf.mxu1 }
 0xdd6   : > { %v6219_v44 = vmax.f32 %v6135_v41, 0.0  ;;  %v6220_v47 = vmax.f32 %v6184_v42, 0.0 }
 0xdd7   : > { %v6541_v45 = vpack.c.bf16 %v6520_v40, %v6519_v39 }
 0xdd8   : > { %v6240_v49 = vpack.c.bf16 %v6220_v47, %v6219_v44 }
 0xdd9   : > { %6557 = vst [vmem:[#allocation3 + $0xd0] sm:$0xff] %v6541_v45 }
 0xdda   : > { %6256 = vst [vmem:[#allocation3 + $0x58] sm:$0xff] %v6240_v49 }
 0xddc   : > { %v6437_v59 = vpop.f32.mrf.mxu2  ;;  %v6486_v35 = vpop.f32.mrf.mxu3 }
 0xddd   : > { %v6521_v46 = vmax.f32 %v6437_v59, 0.0  ;;  %v6522_v52 = vmax.f32 %v6486_v35, 0.0  ;;  %v6138_v61 = vpop.f32.mrf.mxu0  ;;  %v6187_v53 = vpop.f32.mrf.mxu1 }
 0xdde   : > { %v6221_v57 = vmax.f32 %v6138_v61, 0.0  ;;  %v6222_v30 = vmax.f32 %v6187_v53, 0.0 }
 0xddf   : > { %v6542_v50 = vpack.c.bf16 %v6522_v52, %v6521_v46 }
 0xde0   : > { %v6241_v0 = vpack.c.bf16 %v6222_v30, %v6221_v57 }
 0xde1   : > { %6558 = vst [vmem:[#allocation3 + $0xd8] sm:$0xff] %v6542_v50  ;;  %v9220_v61 = vld [vmem:[#allocation3 + $0x54] sm:$0xf0]  ;;  %v8777_v53 = vld [vmem:[#allocation3 + $0x58] sm:$0xf0] }
 0xde2   : > { %6257 = vst [vmem:[#allocation3 + $0x60] sm:$0xff] %v6241_v0 }
 0xde4   : > { %v6440_v9 = vpop.f32.mrf.mxu2  ;;  %v6489_v8 = vpop.f32.mrf.mxu3 }
 0xde5   : > { %v6523_v38 = vmax.f32 %v6440_v9, 0.0  ;;  %v6524_v19 = vmax.f32 %v6489_v8, 0.0  ;;  %v6140_v43 = vpop.f32.mrf.mxu0  ;;  %v6189_v33 = vpop.f32.mrf.mxu1  ;;  %v8775_v8 = vld [vmem:[#allocation3 + $0x50] sm:$0xf] }
 0xde6   : > { %v6223_v17 = vmax.f32 %v6140_v43, 0.0  ;;  %v6224_v6 = vmax.f32 %v6189_v33, 0.0 }
 0xde7   : > { %v6543_v54 = vpack.c.bf16 %v6524_v19, %v6523_v38  ;;  %v9219_v38 = vld [vmem:[#allocation3 + $0x54] sm:$0xf]  ;;  %v8776_v19 = vor.u32 %v9220_v61, %v8775_v8  ;;  %v9210_v8 = vld [vmem:[#allocation3 + $0x4] sm:$0xf0] }
 0xde8   : > { %v6242_v1 = vpack.c.bf16 %v6224_v6, %v6223_v17  ;;  %v8780_v43 = vor.u32 %v9219_v38, %v8777_v53  ;;  %v9218_v6 = vld [vmem:[#allocation3 + $0x44] sm:$0xf0]  ;;  %v8743_v53 = vld [vmem:[#allocation3 + $0x10] sm:$0xf]  ;;  %v8737_v38 = vld [vmem:[#allocation3 + $0x8] sm:$0xf0] }
 0xde9   : > { %6559 = vst [vmem:[#allocation3 + $0xe0] sm:$0xff] %v6543_v54  ;;  %v8783_v49 = vld [vmem:[#allocation3 + $0x60] sm:$0xf]  ;;  %v9221_v59 = vld [vmem:[#allocation3 + $0x64] sm:$0xf] }
 0xdea   : > { %6258 = vst [vmem:[#allocation3 + $0x68] sm:$0xff] %v6242_v1  ;;  %v8769_v54 = vld [vmem:[#allocation3 + $0x48] sm:$0xf0] }
 0xdec   : > { %v6442_v58 = vpop.f32.mrf.mxu2  ;;  %v6491_v60 = vpop.f32.mrf.mxu3 }
 0xded   : > { %v6525_v56 = vmax.f32 %v6442_v58, 0.0  ;;  %v6526_v4 = vmax.f32 %v6491_v60, 0.0  ;;  %v6143_v7 = vpop.f32.mrf.mxu0  ;;  %v6192_v11 = vpop.f32.mrf.mxu1 }
 0xdee   : > { %v6225_v13 = vmax.f32 %v6143_v7, 0.0  ;;  %v6226_v14 = vmax.f32 %v6192_v11, 0.0  ;;  %v9217_v7 = vld [vmem:[#allocation3 + $0x44] sm:$0xf] }
 0xdef   : > { %v6544_v15 = vpack.c.bf16 %v6526_v4, %v6525_v56  ;;  %v8767_v4 = vld [vmem:[#allocation3 + $0x40] sm:$0xf] }
 0xdf0   : > { %v6243_v16 = vpack.c.bf16 %v6226_v14, %v6225_v13  ;;  %v8847_v1 = vld [vmem:[#allocation3 + $0xe0] sm:$0xf]  ;;  %v9237_v58 = vld [vmem:[#allocation3 + $0xe4] sm:$0xf]  ;;  %v8768_v11 = vor.u32 %v9218_v6, %v8767_v4  ;;  %v8772_v13 = vor.u32 %v9217_v7, %v8769_v54  ;;  %v9236_v14 = vld [vmem:[#allocation3 + $0xd4] sm:$0xf0] }
 0xdf1   : > { %6560 = vst [vmem:[#allocation3 + $0xe8] sm:$0xff] %v6544_v15  ;;  %v9222_v47 = vld [vmem:[#allocation3 + $0x64] sm:$0xf0]  ;;  %v8785_v45 = vld [vmem:[#allocation3 + $0x68] sm:$0xf0] }
 0xdf2   : > { %6259 = vst [vmem:[#allocation3 + $0x70] sm:$0xff] %v6243_v16  ;;  %v8784_v35 = vor.u32 %v9222_v47, %v8783_v49  ;;  %v8788_v46 = vor.u32 %v9221_v59, %v8785_v45  ;;  %v8841_v15 = vld [vmem:[#allocation3 + $0xd8] sm:$0xf0]  ;;  %v9216_v16 = vld [vmem:[#allocation3 + $0x34] sm:$0xf0] }
 0xdf3   : > { %v9232_v47 = vld [vmem:[#allocation3 + $0xb4] sm:$0xf0]  ;;  %v8825_v45 = vld [vmem:[#allocation3 + $0xb8] sm:$0xf0]  ;;  %v9209_v54 = vld [vmem:[#allocation3 + $0x4] sm:$0xf] }
 0xdf4   : > { %v6445_v31 = vpop.f32.mrf.mxu2  ;;  %v6494_v55 = vpop.f32.mrf.mxu3  ;;  %v9212_v49 = vld [vmem:[#allocation3 + $0x14] sm:$0xf0]  ;;  %v8745_v59 = vld [vmem:[#allocation3 + $0x18] sm:$0xf0] }
 0xdf5   : > { %v6527_v24 = vmax.f32 %v6445_v31, 0.0  ;;  %v6528_v28 = vmax.f32 %v6494_v55, 0.0  ;;  %v6145_v5 = vpop.f32.mrf.mxu0  ;;  %v6194_v63 = vpop.f32.mrf.mxu1  ;;  %v8761_v31 = vld [vmem:[#allocation3 + $0x38] sm:$0xf0]  ;;  %v8839_v55 = vld [vmem:[#allocation3 + $0xd0] sm:$0xf] }
 0xdf6   : > { %v6227_v18 = vmax.f32 %v6145_v5, 0.0  ;;  %v6228_v21 = vmax.f32 %v6194_v63, 0.0  ;;  %v8759_v63 = vld [vmem:[#allocation3 + $0x30] sm:$0xf]  ;;  %v9228_v4 = vld [vmem:[#allocation3 + $0x94] sm:$0xf0] }
 0xdf7   : > { %v6545_v22 = vpack.c.bf16 %v6528_v28, %v6527_v24  ;;  %v9235_v24 = vld [vmem:[#allocation3 + $0xd4] sm:$0xf]  ;;  %v8840_v28 = vor.u32 %v9236_v14, %v8839_v55  ;;  %v8809_v7 = vld [vmem:[#allocation3 + $0x98] sm:$0xf0]  ;;  %v8801_v55 = vld [vmem:[#allocation3 + $0x88] sm:$0xf0] }
 0xdf8   : > { %v6244_v29 = vpack.c.bf16 %v6228_v21, %v6227_v18  ;;  %v9238_v33 = vld [vmem:[#allocation3 + $0xe4] sm:$0xf0]  ;;  %v8849_v17 = vld [vmem:[#allocation3 + $0xe8] sm:$0xf0]  ;;  %v8844_v5 = vor.u32 %v9235_v24, %v8841_v15  ;;  %v9215_v18 = vld [vmem:[#allocation3 + $0x34] sm:$0xf]  ;;  %v8760_v21 = vor.u32 %v9216_v16, %v8759_v63 }
 0xdf9   : > { %6561 = vst [vmem:[#allocation3 + $0xf0] sm:$0xff] %v6545_v22  ;;  %v8791_v36 = vld [vmem:[#allocation3 + $0x70] sm:$0xf]  ;;  %v9223_v39 = vld [vmem:[#allocation3 + $0x74] sm:$0xf]  ;;  %v8848_v60 = vor.u32 %v9238_v33, %v8847_v1  ;;  %v8852_v56 = vor.u32 %v9237_v58, %v8849_v17  ;;  %v8764_v22 = vor.u32 %v9215_v18, %v8761_v31 }
 0xdfa   : > { %6260 = vst [vmem:[#allocation3 + $0x78] sm:$0xff] %v6244_v29  ;;  %v9234_v29 = vld [vmem:[#allocation3 + $0xc4] sm:$0xf0]  ;;  %v8735_v33 = vld [vmem:[#allocation3] sm:$0xf] }
 0xdfb   : > { %v8703_v1 = vld [vmem:[%s11181_s8] sm:$0xf]  ;;  %v9202_v58 = vld [vmem:[%s11181_s8 + $0x4] sm:$0xf0]  ;;  %v9226_v31 = vld [vmem:[#allocation3 + $0x84] sm:$0xf0] }
 0xdfc   : > { %v6447_v32 = vpop.f32.mrf.mxu2  ;;  %v6496_v51 = vpop.f32.mrf.mxu3  ;;  %v8704_v14 = vor.u32 %v9202_v58, %v8703_v1  ;;  %v9201_v24 = vld [vmem:[%s11181_s8 + $0x4] sm:$0xf]  ;;  %v9225_v63 = vld [vmem:[#allocation3 + $0x84] sm:$0xf]  ;;  %v7021_v1 = vld [vmem:[#allocation4 + $0x110] sm:$0xff] }
 0xdfd   : > { %v6529_v20 = vmax.f32 %v6447_v32, 0.0  ;;  %v6530_v26 = vmax.f32 %v6496_v51, 0.0  ;;  %v8833_v32 = vld [vmem:[#allocation3 + $0xc8] sm:$0xf0]  ;;  %v9214_v51 = vld [vmem:[#allocation3 + $0x24] sm:$0xf0] }
 0xdff   : > { %v6546_v34 = vpack.c.bf16 %v6530_v26, %v6529_v20  ;;  %v8753_v20 = vld [vmem:[#allocation3 + $0x28] sm:$0xf0]  ;;  %v8831_v26 = vld [vmem:[#allocation3 + $0xc0] sm:$0xf] }
 0xe00   : > { %v8855_v52 = vld [vmem:[#allocation3 + $0xf0] sm:$0xf]  ;;  %v9239_v30 = vld [vmem:[#allocation3 + $0xf4] sm:$0xf] }
 0xe01   : > { %6562 = vst [vmem:[#allocation3 + $0xf8] sm:$0xff] %v6546_v34  ;;  %v9224_v40 = vld [vmem:[#allocation3 + $0x74] sm:$0xf0]  ;;  %v8793_v41 = vld [vmem:[#allocation3 + $0x78] sm:$0xf0] }
 0xe02   : > { %v8792_v42 = vor.u32 %v9224_v40, %v8791_v36  ;;  %v8796_v44 = vor.u32 %v9223_v39, %v8793_v41  ;;  %v9233_v34 = vld [vmem:[#allocation3 + $0xc4] sm:$0xf]  ;;  %v8832_v36 = vor.u32 %v9234_v29, %v8831_v26  ;;  %v8751_v40 = vld [vmem:[#allocation3 + $0x20] sm:$0xf]  ;;  %v8711_v29 = vld [vmem:[%s11181_s8 + $0x10] sm:$0xf] }
 0xe03   : > { %v8836_v39 = vor.u32 %v9233_v34, %v8833_v32  ;;  %v9213_v41 = vld [vmem:[#allocation3 + $0x24] sm:$0xf]  ;;  %v9204_v32 = vld [vmem:[%s11181_s8 + $0x14] sm:$0xf0]  ;;  %v8713_v26 = vld [vmem:[%s11181_s8 + $0x18] sm:$0xf0] }
 0xe04   : > { %6811 = vmatpush.bf16.msra.mxu0 %v8792_v42  ;;  %6877 = vmatpush.bf16.msra.mxu2 %v8796_v44  ;;  %v8752_v42 = vor.u32 %v9214_v51, %v8751_v40  ;;  %v8756_v44 = vor.u32 %v9213_v41, %v8753_v20  ;;  %v8712_v51 = vor.u32 %v9204_v32, %v8711_v29  ;;  %v9203_v20 = vld [vmem:[%s11181_s8 + $0x14] sm:$0xf]  ;;  %v9205_v41 = vld [vmem:[%s11181_s8 + $0x24] sm:$0xf] }
 0xe05   : > { %v8716_v34 = vor.u32 %v9203_v20, %v8713_v26 }
 0xe08   : > { %6812 = vmatpush.bf16.msra.mxu0 %v8784_v35  ;;  %6878 = vmatpush.bf16.msra.mxu2 %v8788_v46  ;;  %v9240_v57 = vld [vmem:[#allocation3 + $0xf4] sm:$0xf0]  ;;  %v8857_v50 = vld [vmem:[#allocation3 + $0xf8] sm:$0xf0]  ;;  %v8823_v35 = vld [vmem:[#allocation3 + $0xb0] sm:$0xf] }
 0xe09   : > { %v8856_v0 = vor.u32 %v9240_v57, %v8855_v52  ;;  %v8860_v9 = vor.u32 %v9239_v30, %v8857_v50  ;;  %v9231_v46 = vld [vmem:[#allocation3 + $0xb4] sm:$0xf]  ;;  %v8824_v52 = vor.u32 %v9232_v47, %v8823_v35  ;;  %v8744_v30 = vor.u32 %v9212_v49, %v8743_v53  ;;  %v8727_v47 = vld [vmem:[%s11181_s8 + $0x30] sm:$0xf] }
 0xe0a   : > { %v8828_v61 = vor.u32 %v9231_v46, %v8825_v45  ;;  %v9211_v57 = vld [vmem:[#allocation3 + $0x14] sm:$0xf]  ;;  %v9208_v45 = vld [vmem:[%s11181_s8 + $0x34] sm:$0xf0] }
 0xe0b   : > { %6844 = vmatpush.bf16.msra.mxu1 %v8856_v0  ;;  %6910 = vmatpush.bf16.msra.mxu3 %v8860_v9  ;;  %v8748_v50 = vor.u32 %v9211_v57, %v8745_v59  ;;  %v9230_v0 = vld [vmem:[#allocation3 + $0xa4] sm:$0xf0]  ;;  %v8817_v9 = vld [vmem:[#allocation3 + $0xa8] sm:$0xf0]  ;;  %v8728_v49 = vor.u32 %v9208_v45, %v8727_v47  ;;  %v8729_v35 = vld [vmem:[%s11181_s8 + $0x38] sm:$0xf0] }
 0xe0c   : > { %6813 = vmatpush.bf16.msra.mxu0 %v8776_v19  ;;  %6879 = vmatpush.bf16.msra.mxu2 %v8780_v43  ;;  %v8815_v19 = vld [vmem:[#allocation3 + $0xa0] sm:$0xf]  ;;  %v9229_v43 = vld [vmem:[#allocation3 + $0xa4] sm:$0xf]  ;;  %v9207_v59 = vld [vmem:[%s11181_s8 + $0x34] sm:$0xf] }
 0xe0d   : > { %v8816_v17 = vor.u32 %v9230_v0, %v8815_v19  ;;  %v8820_v6 = vor.u32 %v9229_v43, %v8817_v9  ;;  %v8732_v46 = vor.u32 %v9207_v59, %v8729_v35  ;;  %v7087_v0 = vld [vmem:[#allocation4 + $0xd8] sm:$0xff]  ;;  %v7001_v43 = vld [vmem:[#allocation4 + $0x108] sm:$0xff] }
 0xe0e   : > { %7095 = vrot.lane.b32.xlu0 %v7087_v0, %s9474_s18  ;;  %v7067_v9 = vld [vmem:[#allocation4 + $0x118] sm:$0xff] }
 0xe0f   : > { %6845 = vmatpush.bf16.msra.mxu1 %v8848_v60  ;;  %6911 = vmatpush.bf16.msra.mxu3 %v8852_v56  ;;  %v8736_v60 = vor.u32 %v9210_v8, %v8735_v33  ;;  %v8740_v56 = vor.u32 %v9209_v54, %v8737_v38  ;;  %v6961_v8 = vld [vmem:[#allocation4] sm:$0xff] }
 0xe10   : > { %6814 = vmatpush.bf16.msra.mxu0 %v8768_v11  ;;  %6880 = vmatpush.bf16.msra.mxu2 %v8772_v13  ;;  %v8807_v11 = vld [vmem:[#allocation3 + $0x90] sm:$0xf]  ;;  %v9227_v13 = vld [vmem:[#allocation3 + $0x94] sm:$0xf]  ;;  %v6981_v38 = vld [vmem:[#allocation4 + $0x20] sm:$0xff] }
 0xe11   : > { %v8808_v15 = vor.u32 %v9228_v4, %v8807_v11  ;;  %v8812_v16 = vor.u32 %v9227_v13, %v8809_v7  ;;  %6967 = vrot.lane.b32.xlu2 %v6961_v8, %s9477_s21  ;;  %v7107_v8 = vld [vmem:[#allocation4 + $0xb0] sm:$0xff] }
 0xe13   : > { %6846 = vmatpush.bf16.msra.mxu1 %v8840_v28  ;;  %6912 = vmatpush.bf16.msra.mxu3 %v8844_v5  ;;  %v8705_v28 = vld [vmem:[%s11181_s8 + $0x8] sm:$0xf0]  ;;  %v8799_v5 = vld [vmem:[#allocation3 + $0x80] sm:$0xf] }
 0xe14   : > { %6815 = vmatpush.bf16.msra.mxu0 %v8760_v21  ;;  %6881 = vmatpush.bf16.msra.mxu2 %v8764_v22  ;;  %v8800_v18 = vor.u32 %v9226_v31, %v8799_v5  ;;  %v8804_v21 = vor.u32 %v9225_v63, %v8801_v55  ;;  %v8708_v22 = vor.u32 %v9201_v24, %v8705_v28 }
 0xe17   : > { %6847 = vmatpush.bf16.msra.mxu1 %v8832_v36  ;;  %6913 = vmatpush.bf16.msra.mxu3 %v8836_v39  ;;  %v8719_v36 = vld [vmem:[%s11181_s8 + $0x20] sm:$0xf]  ;;  %v9206_v39 = vld [vmem:[%s11181_s8 + $0x24] sm:$0xf0] }
 0xe18   : > { %6816 = vmatpush.bf16.msra.mxu0 %v8752_v42  ;;  %6882 = vmatpush.bf16.msra.mxu2 %v8756_v44  ;;  %v8720_v40 = vor.u32 %v9206_v39, %v8719_v36  ;;  %v8721_v42 = vld [vmem:[%s11181_s8 + $0x28] sm:$0xf0] }
 0xe19   : > { %v8724_v44 = vor.u32 %v9205_v41, %v8721_v42  ;;  %6987 = vrot.lane.b32.xlu2 %v6981_v38, %s9478_s22 }
 0xe1b   : > { %6848 = vmatpush.bf16.msra.mxu1 %v8824_v52  ;;  %6914 = vmatpush.bf16.msra.mxu3 %v8828_v61  ;;  %v6571_v52 = vld [vmem:[%s11181_s8 + $0x40] sm:$0xff] }
 0xe1c   : > { %6817 = vmatpush.bf16.msra.mxu0 %v8744_v30  ;;  %6883 = vmatpush.bf16.msra.mxu2 %v8748_v50  ;;  %v6629_v61 = vunpack.c.l.b16 %v6571_v52  ;;  %v6630_v57 = vunpack.c.h.b16 %v6571_v52  ;;  %v7047_v50 = vld [vmem:[#allocation4 + $0x18] sm:$0xff] }
 0xe1d   : > { %7055 = vrot.lane.b32.xlu1 %v7047_v50, %s9473_s17 }
 0xe1e   : > { %v6639_v53 = vpack.c.b16 %v6629_v61, %v6629_v61  ;;  %v6640_v30 = vpack.c.b16 %v6630_v57, %v6630_v57 }
 0xe1f   : > { %6849 = vmatpush.bf16.msra.mxu1 %v8816_v17  ;;  %6915 = vmatpush.bf16.msra.mxu3 %v8820_v6 }
 0xe20   : > { %6818 = vmatpush.bf16.msra.mxu0 %v8736_v60  ;;  %6884 = vmatpush.bf16.msra.mxu2 %v8740_v56 }
 0xe21   : > { %7007 = vrot.lane.b32.xlu2 %v7001_v43, %s9476_s20 }
 0xe23   : > { %6850 = vmatpush.bf16.msra.mxu1 %v8808_v15  ;;  %6916 = vmatpush.bf16.msra.mxu3 %v8812_v16 }
 0xe24   : > { %6819 = vmatmul.bf16.vlgmr.msra.gmra.mxu0 %v8704_v14  ;;  %6885 = vmatmul.bf16.vlgmr.msra.gmra.mxu2 %v8704_v14 }
 0xe25   : > { %7075 = vrot.lane.b32.xlu1 %v7067_v9, %s9471_s11 }
 0xe27   : > { %6851 = vmatpush.bf16.msra.mxu1 %v8800_v18  ;;  %6917 = vmatpush.bf16.msra.mxu3 %v8804_v21 }
 0xe29   : > { %7027 = vrot.lane.b32.xlu2 %v7021_v1, %s9475_s19 }
 0xe2a   : > { %6852 = vmatmul.bf16.vlgmr.msra.gmra.mxu1 %v8708_v22  ;;  %6918 = vmatmul.bf16.vlgmr.msra.gmra.mxu3 %v8708_v22 }
 0xe34   : > { %6824 = vmatmul.bf16.gmra.mxu0 %v8712_v51  ;;  %6890 = vmatmul.bf16.gmra.mxu2 %v8712_v51 }
 0xe3a   : > { %6857 = vmatmul.bf16.gmra.mxu1 %v8716_v34  ;;  %6923 = vmatmul.bf16.gmra.mxu3 %v8716_v34 }
 0xe44   : > { %6895 = vmatmul.bf16.gmra.mxu2 %v8720_v40  ;;  %6829 = vmatmul.bf16.gmra.mxu0 %v8720_v40 }
 0xe4a   : > { %6928 = vmatmul.bf16.gmra.mxu3 %v8724_v44  ;;  %6862 = vmatmul.bf16.gmra.mxu1 %v8724_v44 }
 0xe54   : > { %6900 = vmatmul.bf16.gmra.mxu2 %v8728_v49  ;;  %6834 = vmatmul.bf16.gmra.mxu0 %v8728_v49 }
 0xe5a   : > { %6933 = vmatmul.bf16.gmra.mxu3 %v8732_v46  ;;  %6867 = vmatmul.bf16.gmra.mxu1 %v8732_v46 }
 0xe64   : > { %6905 = vmatmul.bf16.gmra.mxu2 %v6639_v53  ;;  %6839 = vmatmul.bf16.gmra.mxu0 %v6639_v53 }
 0xe6a   : > { %6938 = vmatmul.bf16.gmra.mxu3 %v6640_v30  ;;  %6872 = vmatmul.bf16.gmra.mxu1 %v6640_v30 }
 0xea1   : > { %v6820_v19 = vpop.f32.mrf.mxu0 }
 0xea7   : > { %v6853_v33 = vpop.f32.mrf.mxu1  ;;  %v6886_v17 = vpop.f32.mrf.mxu2 }
 0xea8   : > { %v6854_v6 = vadd.f32 %v6853_v33, %v6820_v19 }
 0xea9   : > { %v6822_v54 = vpop.f32.mrf.mxu0 }
 0xeaa   : > { %6969 = vrot.lane.b32.xlu0 %v6854_v6, %s9477_s21 }
 0xead   : > { %v6919_v58 = vpop.f32.mrf.mxu3 }
 0xeae   : > { %v6920_v60 = vadd.f32 %v6919_v58, %v6886_v17  ;;  %v7056_v58 = vpop.permute.xlu1 %7055 }
 0xeaf   : > { %v6855_v56 = vpop.f32.mrf.mxu1  ;;  %v6888_v4 = vpop.f32.mrf.mxu2 }
 0xeb0   : > { %v6856_v7 = vadd.f32 %v6855_v56, %v6822_v54  ;;  %6971 = vrot.lane.b32.xlu1 %v6920_v60, %s9477_s21  ;;  %v7096_v60 = vpop.permute.xlu0 %7095  ;;  %v6968_v56 = vpop.permute.xlu2 %6967 }
 0xeb1   : > { %v6825_v11 = vpop.f32.mrf.mxu0 }
 0xeb2   : > { %6989 = vrot.lane.b32.xlu0 %v6856_v7, %s9478_s22 }
 0xeb5   : > { %v6921_v13 = vpop.f32.mrf.mxu3 }
 0xeb6   : > { %v6922_v14 = vadd.f32 %v6921_v13, %v6888_v4  ;;  %v7076_v4 = vpop.permute.xlu1 %7075 }
 0xeb7   : > { %v6858_v15 = vpop.f32.mrf.mxu1  ;;  %v6891_v16 = vpop.f32.mrf.mxu2 }
 0xeb8   : > { %v6859_v31 = vadd.f32 %v6858_v15, %v6825_v11  ;;  %6991 = vrot.lane.b32.xlu1 %v6922_v14, %s9478_s22  ;;  %v6988_v11 = vpop.permute.xlu2 %6987 }
 0xeb9   : > { %v6827_v55 = vpop.f32.mrf.mxu0 }
 0xeba   : > { %7009 = vrot.lane.b32.xlu0 %v6859_v31, %s9476_s20 }
 0xebd   : > { %v6924_v24 = vpop.f32.mrf.mxu3 }
 0xebe   : > { %v6925_v28 = vadd.f32 %v6924_v24, %v6891_v16 }
 0xebf   : > { %v6860_v5 = vpop.f32.mrf.mxu1  ;;  %v6893_v63 = vpop.f32.mrf.mxu2 }
 0xec0   : > { %v6861_v18 = vadd.f32 %v6860_v5, %v6827_v55  ;;  %7011 = vrot.lane.b32.xlu1 %v6925_v28, %s9476_s20  ;;  %v7008_v15 = vpop.permute.xlu2 %7007 }
 0xec1   : > { %v6830_v21 = vpop.f32.mrf.mxu0 }
 0xec2   : > { %7029 = vrot.lane.b32.xlu0 %v6861_v18, %s9475_s19 }
 0xec5   : > { %v6926_v22 = vpop.f32.mrf.mxu3 }
 0xec6   : > { %v6927_v29 = vadd.f32 %v6926_v22, %v6893_v63 }
 0xec7   : > { %v6863_v32 = vpop.f32.mrf.mxu1  ;;  %v6896_v51 = vpop.f32.mrf.mxu2 }
 0xec8   : > { %v11103_v20 = vadd.f32 %v6863_v32, %v6830_v21  ;;  %7031 = vrot.lane.b32.xlu1 %v6927_v29, %s9475_s19  ;;  %v7028_v55 = vpop.permute.xlu2 %7027 }
 0xec9   : > { %v6832_v26 = vpop.f32.mrf.mxu0 }
 0xecd   : > { %v6929_v34 = vpop.f32.mrf.mxu3 }
 0xece   : > { %v11106_v36 = vadd.f32 %v6929_v34, %v6896_v51 }
 0xecf   : > { %v6865_v39 = vpop.f32.mrf.mxu1  ;;  %v6898_v40 = vpop.f32.mrf.mxu2 }
 0xed0   : > { %v6866_v41 = vadd.f32 %v6865_v39, %v6832_v26 }
 0xed1   : > { %v6835_v42 = vpop.f32.mrf.mxu0 }
 0xed2   : > { %7051 = vrot.lane.b32.xlu2 %v6866_v41, %s9473_s17 }
 0xed5   : > { %v6931_v44 = vpop.f32.mrf.mxu3 }
 0xed6   : > { %v6932_v47 = vadd.f32 %v6931_v44, %v6898_v40 }
 0xed7   : > { %v6868_v45 = vpop.f32.mrf.mxu1  ;;  %v6901_v49 = vpop.f32.mrf.mxu2 }
 0xed8   : > { %v6869_v59 = vadd.f32 %v6868_v45, %v6835_v42  ;;  %7053 = vrot.lane.b32.xlu0 %v6932_v47, %s9473_s17  ;;  %s332_s17 = scalar_lea.vmem %s11182_s9, %s8863_s13 }
 0xed9   : > { %v6837_v35 = vpop.f32.mrf.mxu0 }
 0xeda   : > { %7071 = vrot.lane.b32.xlu2 %v6869_v59, %s9471_s11 }
 0xedd   : > { %v6934_v46 = vpop.f32.mrf.mxu3 }
 0xede   : > { %v6935_v52 = vadd.f32 %v6934_v46, %v6901_v49 }
 0xedf   : > { %v6870_v61 = vpop.f32.mrf.mxu1  ;;  %v6903_v53 = vpop.f32.mrf.mxu2 }
 0xee0   : > { %v6871_v57 = vadd.f32 %v6870_v61, %v6837_v35  ;;  %7073 = vrot.lane.b32.xlu0 %v6935_v52, %s9471_s11 }
 0xee1   : > { %v6840_v30 = vpop.f32.mrf.mxu0 }
 0xee2   : > { %7091 = vrot.lane.b32.xlu1 %v6871_v57, %s9474_s18 }
 0xee5   : > { %v6936_v50 = vpop.f32.mrf.mxu3 }
 0xee6   : > { %v6937_v0 = vadd.f32 %v6936_v50, %v6903_v53 }
 0xee7   : > { %v6906_v9 = vpop.f32.mrf.mxu2  ;;  %v6873_v38 = vpop.f32.mrf.mxu1 }
 0xee8   : > { %7093 = vrot.lane.b32.xlu2 %v6937_v0, %s9474_s18  ;;  %v6874_v19 = vadd.f32 %v6873_v38, %v6840_v30 }
 0xee9   : > { %v6842_v43 = vpop.f32.mrf.mxu0 }
 0xeea   : > { %7115 = vrot.lane.b32.xlu1 %v7107_v8, %s9472_s12 }
 0xeed   : > { %v6939_v33 = vpop.f32.mrf.mxu3 }
 0xeee   : > { %v6940_v17 = vadd.f32 %v6939_v33, %v6906_v9 }
 0xeef   : > { %v6908_v6 = vpop.f32.mrf.mxu2  ;;  %v6875_v54 = vpop.f32.mrf.mxu1 }
 0xef0   : > { %7113 = vrot.lane.b32.xlu0 %v6940_v17, %s9472_s12  ;;  %7111 = vrot.lane.b32.xlu2 %v6874_v19, %s9472_s12 }
 0xef5   : > { %v6941_v1 = vpop.f32.mrf.mxu3 }
 0xf1c   : > { %v6970_v7 = vpop.permute.xlu0 %6969 }
 0xf1d   : > { %v6973_v29 = vsel %vm11421_vm1, %v6968_v56, %v6970_v7 }
 0xf1e   : > { %v6977_v42 = vsel %vm9658_vm4, %v6973_v29, 0.0  ;;  %vm11427_vm4 = vcmask 1039360  }
 0xf22   : > { %v6972_v13 = vpop.permute.xlu1 %6971 }
 0xf23   : > { %v6974_v32 = vsel %vm11422_vm7, %v6970_v7, %v6972_v13 }
 0xf24   : > { %v6990_v14 = vpop.permute.xlu0 %6989  ;;  %v6978_v44 = vsel %vm351_vm6, %v6974_v32, 0.0 }
 0xf25   : > { %v6993_v18 = vsel %vm11420_vm10, %v6988_v11, %v6990_v14  ;;  %vm11431_vm10 = vcmp.lt.s32.totalorder %v9583_v25, 15 }
 0xf26   : > { %v6997_v34 = vsel %vm11425_vm0, %v6993_v18, 0.0  ;;  %vm11437_vm7 = vmmov %vm11431_vm10 }
 0xf27   : > { %v6999_v10 = vadd.f32 %v6997_v34, %v6977_v42 }
 0xf2a   : > { %v6992_v16 = vpop.permute.xlu1 %6991 }
 0xf2b   : > { %v6994_v39 = vsel %vm11426_vm12, %v6990_v14, %v6992_v16 }
 0xf2c   : > { %v7010_v31 = vpop.permute.xlu0 %7009  ;;  %v7052_v5 = vpop.permute.xlu2 %7051  ;;  %v7000_v49 = vadd.f32 %v6994_v39, %v6978_v44 }
 0xf2d   : > { %v7013_v51 = vsel %vm11423_vm3, %v7008_v15, %v7010_v31 }
 0xf2e   : > { %v7017_v47 = vsel %vm9634_vm14, %v7013_v51, 0.0  ;;  %vm11429_vm14 = vcmask 924672  }
 0xf2f   : > { %v7019_v46 = vadd.f32 %v7017_v47, %v6999_v10  ;;  %vm11430_vm11 = vmmov %vm11429_vm14 }
 0xf32   : > { %v7012_v24 = vpop.permute.xlu1 %7011 }
 0xf33   : > { %v7014_v26 = vsel %vm11424_vm13, %v7010_v31, %v7012_v24 }
 0xf34   : > { %v7030_v28 = vpop.permute.xlu0 %7029  ;;  %v7072_v22 = vpop.permute.xlu2 %7071  ;;  %v7018_v45 = vsel %vm397_vm2, %v7014_v26, 0.0 }
 0xf35   : > { %v7033_v40 = vsel %vm430_vm15, %v7028_v55, %v7030_v28  ;;  %v7020_v48 = vadd.f32 %v7018_v45, %v7000_v49 }
 0xf36   : > { %v7037_v59 = vsel %vm350_vm8, %v7033_v40, 0.0 }
 0xf37   : > { %v7039_v61 = vadd.f32 %v7037_v59, %v7019_v46 }
 0xf39   : > { %v7043_v19 = vadd.f32 %v7039_v61, %v11103_v20 }
 0xf3a   : > { %v7032_v21 = vpop.permute.xlu1 %7031 }
 0xf3b   : > { %v7034_v41 = vsel %vm430_vm15, %v7030_v28, %v7032_v21  ;;  %vm11428_vm15 = vmmov %vm11427_vm4 }
 0xf3c   : > { %v7038_v35 = vsel %vm351_vm6, %v7034_v41, 0.0  ;;  %vm11432_vm6 = vcmask 916480  }
 0xf3d   : > { %v7040_v53 = vadd.f32 %v7038_v35, %v7020_v48  ;;  %vm11433_vm1 = vmmov %vm11432_vm6 }
 0xf3f   : > { %v7044_v43 = vadd.f32 %v7040_v53, %v11106_v36 }
 0xf42   : > { %v7094_v30 = vpop.permute.xlu2 %7093 }
 0xf43   : > { %v7098_v56 = vsel %vm11432_vm6, %v7094_v30, %v7096_v60 }
 0xf4a   : > { %v7054_v63 = vpop.permute.xlu0 %7053  ;;  %v7112_v7 = vpop.permute.xlu2 %7111 }
 0xf4b   : > { %v7057_v57 = vsel %vm11427_vm4, %v7052_v5, %v7054_v63  ;;  %v7058_v62 = vsel %vm11428_vm15, %v7054_v63, %v7056_v58 }
 0xf4c   : > { %v7061_v8 = vsel %vm11431_vm10, %v7057_v57, 0.0  ;;  %v7062_v38 = vsel %vm397_vm2, %v7058_v62, 0.0  ;;  %vm11434_vm2 = vcmp.lt.s32.totalorder %v9572_v12, 240 }
 0xf4d   : > { %v7063_v6 = vadd.f32 %v7061_v8, %v7043_v19  ;;  %v7064_v54 = vadd.f32 %v7062_v38, %v7044_v43  ;;  %v7102_v20 = vsel %vm11434_vm2, %v7098_v56, 0.0 }
 0xf52   : > { %v7074_v52 = vpop.permute.xlu0 %7073 }
 0xf53   : > { %v7077_v0 = vsel %vm11429_vm14, %v7072_v22, %v7074_v52  ;;  %v7078_v9 = vsel %vm11430_vm11, %v7074_v52, %v7076_v4 }
 0xf54   : > { %v7092_v50 = vpop.permute.xlu1 %7091  ;;  %v7081_v33 = vsel %vm350_vm8, %v7077_v0, 0.0  ;;  %v7082_v17 = vsel %vm9607_vm9, %v7078_v9, 0.0  ;;  %vm11435_vm8 = vcmask 908288  }
 0xf55   : > { %v7083_v1 = vadd.f32 %v7081_v33, %v7063_v6  ;;  %v7084_v58 = vadd.f32 %v7082_v17, %v7064_v54  ;;  %v7097_v23 = vsel %vm11433_vm1, %v7092_v50, %v7094_v30  ;;  %vm11436_vm9 = vmmov %vm11435_vm8 }
 0xf57   : > { %v7104_v11 = vadd.f32 %v7102_v20, %v7084_v58  ;;  %v7103_v13 = vadd.f32 %v7097_v23, %v7083_v1 }
 0xf5c   : > { %v7116_v4 = vpop.permute.xlu1 %7115 }
 0xf62   : > { %v7114_v36 = vpop.permute.xlu0 %7113 }
 0xf63   : > { %v7117_v37 = vsel %vm11435_vm8, %v7112_v7, %v7114_v36  ;;  %v7118_v14 = vsel %vm11436_vm9, %v7114_v36, %v7116_v4 }
 0xf64   : > { %v7121_v15 = vsel %vm11437_vm7, %v7117_v37, 0.0  ;;  %v7122_v60 = vsel %vm9591_vm5, %v7118_v14, 0.0 }
 0xf65   : > { %v7123_v16 = vadd.f32 %v7121_v15, %v7103_v13  ;;  %v7124_v31 = vadd.f32 %v7122_v60, %v7104_v11 }
 0xf67   : > { %v7125_v12 = vadd.f32 %v7123_v16, %v10891_v2  ;;  %v7126_v55 = vadd.f32 %v7124_v31, %v10893_v3 }
 0xf69   : > { %7127 = vst [vmem:[%s332_s17] sm:$0xff] %v7125_v12 }
 0xf6a   : > { %7128 = vst [vmem:[%s332_s17 + $0x8] sm:$0xff] %v7126_v55 }
 0xf6b PF: > { %s19_s30 = sadd.s32 1, %s9469_s30  }
 0xf6c   : > { %p16_p4 = scmp.ge.s32.totalorder %s19_s30, 4  }
 0xf6e   :  { %18 = sbr.rel (!%p16_p4) target bundleno = 1 (0x1), region = 86 }

</bundles_post_ra>
